<compile_context>
chip_gen: v6e
topology: v6e:2x2x1
jax: 0.10.0
libtpu: 0.0.40
codegen_flags: <defaults>
</compile_context>

<pallas_src>
import jax
import jax.numpy as jnp
from jax.experimental import pallas as pl
from jax.experimental.pallas import tpu as pltpu

DIMS = [403, 403, 403, 403, 403, 300, 200, 100, 50, 25, 1]
NUM_LAYERS = len(DIMS) - 1          # 10 linear layers
BN_EPS = 1e-5
TM_MAX = 512                        # max batch-tile rows per grid step


def _round_up(x, m):
    return (x + m - 1) // m * m


def _cdiv(a, b):
    return (a + b - 1) // b


# Per-boundary lane-padded feature widths (multiples of 128):
# [512, 512, 512, 512, 512, 384, 256, 128, 128, 128, 128]
P = [max(128, _round_up(d, 128)) for d in DIMS]
BIAS_W = max(P[1:])                 # 512: lane width of the packed bias slab


def pdnet_kernel(x_ref, *refs):
    """Whole 10-layer forward pass for one batch tile.

    x_ref              (tm, P[0])        bf16 activations (streamed)
    refs[0 : NL]       w_refs (P[l], P[l+1])  bf16, BN-folded, transposed (resident)
    refs[NL]           b_ref  (NL, BIAS_W)    f32 packed biases, row l = layer l
    refs[NL+1]         o_ref  (tm, P[-1]=128) f32 (col 0 = sigmoid output)
    """
    w_refs = refs[:NUM_LAYERS]
    b_ref = refs[NUM_LAYERS]
    o_ref = refs[NUM_LAYERS + 1]

    h = x_ref[...]                                          # (tm, 512) bf16
    for l in range(NUM_LAYERS):                             # static unroll
        b = b_ref[l:l + 1, :P[l + 1]]                       # (1, P[l+1]) f32
        y = jnp.dot(h, w_refs[l][...],
                    preferred_element_type=jnp.float32) + b  # f32 accumulator
        if l < 7:        # Linear + BN + ReLU (+ Dropout = identity in eval)
            h = jnp.maximum(y, 0.0).astype(jnp.bfloat16)     # relu in f32, store bf16
        elif l < 9:      # Linear + BN + ReLU6 (+ Dropout = identity in eval)
            h = jnp.clip(y, 0.0, 6.0).astype(jnp.bfloat16)
        else:            # final Linear(25,1) + Sigmoid (128-lane slab, f32)
            o_ref[...] = jax.nn.sigmoid(y)


def fold_bn_into_linear(w, b, gamma, beta, mean, var, eps=BN_EPS):
    """Fold eval-mode BatchNorm1d(1) (scalar stats) into the preceding Linear."""
    scale = gamma / jnp.sqrt(var + eps)
    return scale * w, scale * (b - mean) + beta


def make_params(key):
    """Deterministic PyTorch-default init, BN-folded, padded, transposed.

    Returns:
      ws     : tuple of per-layer weights, ws[l] shape (P[l], P[l+1]) bf16.
      b_slab : (NUM_LAYERS, BIAS_W) f32, row l holds layer-l bias in its first
               DIMS[l+1] lanes.  Padded rows/cols are zero (contribute nothing).
    """
    ws = []
    b_slab = jnp.zeros((NUM_LAYERS, BIAS_W), jnp.float32)
    for l in range(NUM_LAYERS):
        fan_in, fan_out = DIMS[l], DIMS[l + 1]
        key, kw, kb = jax.random.split(key, 3)
        bound = 1.0 / (fan_in ** 0.5)
        w = jax.random.uniform(kw, (fan_out, fan_in), jnp.float32, -bound, bound)
        b = jax.random.uniform(kb, (fan_out,), jnp.float32, -bound, bound)
        if l < NUM_LAYERS - 1:          # every layer except the last has a BN
            w, b = fold_bn_into_linear(w, b, gamma=1.0, beta=0.0, mean=0.0, var=1.0)
        wp = jnp.zeros((P[l], P[l + 1]), jnp.float32).at[:fan_in, :fan_out].set(w.T)
        ws.append(wp.astype(jnp.bfloat16))   # bf16 weights, f32 MXU accumulation
        b_slab = b_slab.at[l, :fan_out].set(b)
    return tuple(ws), b_slab


def _min_grid_steps():
    """>=2 grid steps lets the 'parallel' batch axis shard across v7x's 2 TCs."""
    try:
        kind = jax.devices()[0].device_kind.lower()
    except Exception:
        return 1
    return 2 if ("v7" in kind or "7x" in kind) else 1


def _tile_rows(n, min_steps):
    """Balanced batch tile: minimizes padded rows, caps at TM_MAX, 16-aligned."""
    steps = max(_cdiv(n, TM_MAX), min_steps)
    return min(TM_MAX, _round_up(_cdiv(n, steps), 16))


def _pallas_forward(xp, ws, b_slab, tm, grid, single_buffer_resident):
    # Weights / bias slab have constant index_maps -> fetched once, VMEM-resident.
    resident_kw = (
        dict(pipeline_mode=pl.Buffered(1)) if single_buffer_resident else {})
    in_specs = [pl.BlockSpec((tm, P[0]), lambda i: (i, 0))]        # streamed bf16 x
    in_specs += [pl.BlockSpec((P[l], P[l + 1]), lambda i: (0, 0), **resident_kw)
                 for l in range(NUM_LAYERS)]
    in_specs += [pl.BlockSpec((NUM_LAYERS, BIAS_W), lambda i: (0, 0), **resident_kw)]

    NP = grid * tm
    w_elems = sum(P[l] * P[l + 1] for l in range(NUM_LAYERS))
    cost = pl.CostEstimate(
        flops=2 * NP * w_elems,
        transcendentals=NP * P[-1],                      # sigmoid lanes
        bytes_accessed=(NP * P[0] * 2                    # bf16 input
                        + w_elems * 2                    # bf16 weights
                        + NUM_LAYERS * BIAS_W * 4        # f32 bias slab
                        + NP * P[-1] * 4),               # f32 output slab
    )
    return pl.pallas_call(
        pdnet_kernel,
        out_shape=jax.ShapeDtypeStruct((NP, P[-1]), jnp.float32),
        grid=(grid,),
        in_specs=in_specs,
        out_specs=pl.BlockSpec((tm, P[-1]), lambda i: (i, 0)),
        compiler_params=pltpu.CompilerParams(
            dimension_semantics=("parallel",),           # megacore on v7x
            vmem_limit_bytes=32 * 1024 * 1024,           # actual footprint < 8 MiB
        ),
        cost_estimate=cost,
    )(xp, *ws, b_slab)


def pdnetwork_long(x, ws, b_slab):
    """x: (N, 1, 403) float32  ->  (N, 1, 1) float32 (matches PyTorch shapes)."""
    N = x.shape[0]
    x2 = x.reshape(N, DIMS[0]).astype(jnp.float32)

    tm = _tile_rows(N, _min_grid_steps())
    grid = _cdiv(N, tm)
    NP = grid * tm
    # Stream activations in bf16: halves the only per-tile streaming DMA.
    xp = jnp.pad(x2, ((0, NP - N), (0, P[0] - DIMS[0]))).astype(jnp.bfloat16)

    try:
        out = _pallas_forward(xp, ws, b_slab, tm, grid, True)
    except Exception:
        # pipeline_mode=pl.Buffered(1) not supported by this jax version; the
        # default double-buffered resident weights still fit comfortably in VMEM.
        out = _pallas_forward(xp, ws, b_slab, tm, grid, False)

    return out[:N, :1].reshape(N, 1, 1)


def reference_forward(x, ws, b_slab):
    """Pure-JAX reference with identical math (bf16 streams, f32 accumulate)."""
    N = x.shape[0]
    h = jnp.pad(x.reshape(N, DIMS[0]).astype(jnp.float32),
                ((0, 0), (0, P[0] - DIMS[0]))).astype(jnp.bfloat16)
    for l in range(NUM_LAYERS):
        y = jnp.dot(h, ws[l], preferred_element_type=jnp.float32) \
            + b_slab[l:l + 1, :P[l + 1]]
        if l < 7:
            h = jnp.maximum(y, 0.0).astype(jnp.bfloat16)
        elif l < 9:
            h = jnp.clip(y, 0.0, 6.0).astype(jnp.bfloat16)
        else:
            h = jax.nn.sigmoid(y)
    return h[:, :1].reshape(N, 1, 1)


if __name__ == "__main__":
    key = jax.random.PRNGKey(0)
    k1, k2, k3, k_par = jax.random.split(key, 4)

    ws, b_slab = make_params(k_par)

    # (N=8)   single tiny tile; (N=300) balanced single/dual tile (<=20 pad rows);
    # (N=640) exercises the multi-step batch grid on every chip.
    for k_in, n in ((k1, 8), (k2, 300), (k3, 640)):
        x = jax.random.normal(k_in, (n, 1, 403), dtype=jnp.float32)
        out = jax.block_until_ready(pdnetwork_long(x, ws, b_slab))
        ref = reference_forward(x, ws, b_slab)
        assert out.shape == (n, 1, 1), out.shape
        assert jnp.allclose(out, ref, atol=2e-3, rtol=2e-3), (
            n, float(jnp.max(jnp.abs(out - ref))))

    print("KERNEL_OK")
</pallas_src>

<mosaic_0001>
module attributes {stable_mosaic.version = 11 : i64} {
  func.func @pdnet_kernel(%arg0: i32, %arg1: memref<16x512xbf16, #tpu.memory_space<vmem>>, %arg2: memref<512x512xbf16, #tpu.memory_space<vmem>>, %arg3: memref<512x512xbf16, #tpu.memory_space<vmem>>, %arg4: memref<512x512xbf16, #tpu.memory_space<vmem>>, %arg5: memref<512x512xbf16, #tpu.memory_space<vmem>>, %arg6: memref<512x384xbf16, #tpu.memory_space<vmem>>, %arg7: memref<384x256xbf16, #tpu.memory_space<vmem>>, %arg8: memref<256x128xbf16, #tpu.memory_space<vmem>>, %arg9: memref<128x128xbf16, #tpu.memory_space<vmem>>, %arg10: memref<128x128xbf16, #tpu.memory_space<vmem>>, %arg11: memref<128x128xbf16, #tpu.memory_space<vmem>>, %arg12: memref<10x512xf32, #tpu.memory_space<vmem>>, %arg13: memref<16x128xf32, #tpu.memory_space<vmem>>) attributes {dimension_semantics = [#tpu.dimension_semantics<parallel>], iteration_bounds = array<i64: 1>, scalar_prefetch = 0 : i64, scratch_operands = 0 : i64, tpu.core_type = #tpu.core_type<tc>, window_params = [{transform_indices = @transform_0, window_bounds = array<i64: 16, 512>}, {pipeline_mode = #tpu.pipeline_mode<synchronous>, transform_indices = @transform_1, window_bounds = array<i64: 512, 512>}, {pipeline_mode = #tpu.pipeline_mode<synchronous>, transform_indices = @transform_2, window_bounds = array<i64: 512, 512>}, {pipeline_mode = #tpu.pipeline_mode<synchronous>, transform_indices = @transform_3, window_bounds = array<i64: 512, 512>}, {pipeline_mode = #tpu.pipeline_mode<synchronous>, transform_indices = @transform_4, window_bounds = array<i64: 512, 512>}, {pipeline_mode = #tpu.pipeline_mode<synchronous>, transform_indices = @transform_5, window_bounds = array<i64: 512, 384>}, {pipeline_mode = #tpu.pipeline_mode<synchronous>, transform_indices = @transform_6, window_bounds = array<i64: 384, 256>}, {pipeline_mode = #tpu.pipeline_mode<synchronous>, transform_indices = @transform_7, window_bounds = array<i64: 256, 128>}, {pipeline_mode = #tpu.pipeline_mode<synchronous>, transform_indices = @transform_8, window_bounds = array<i64: 128, 128>}, {pipeline_mode = #tpu.pipeline_mode<synchronous>, transform_indices = @transform_9, window_bounds = array<i64: 128, 128>}, {pipeline_mode = #tpu.pipeline_mode<synchronous>, transform_indices = @transform_10, window_bounds = array<i64: 128, 128>}, {pipeline_mode = #tpu.pipeline_mode<synchronous>, transform_indices = @transform_11, window_bounds = array<i64: 10, 512>}, {transform_indices = @transform_12, window_bounds = array<i64: 16, 128>}]} {
    %c0 = arith.constant 0 : index
    %c0_0 = arith.constant 0 : index
    %0 = vector.load %arg1[%c0, %c0_0] : memref<16x512xbf16, #tpu.memory_space<vmem>>, vector<16x512xbf16>
    %c0_1 = arith.constant 0 : index
    %c0_2 = arith.constant 0 : index
    %1 = vector.load %arg12[%c0_1, %c0_2] : memref<10x512xf32, #tpu.memory_space<vmem>>, vector<1x512xf32>
    %c0_3 = arith.constant 0 : index
    %c0_4 = arith.constant 0 : index
    %2 = vector.load %arg2[%c0_3, %c0_4] : memref<512x512xbf16, #tpu.memory_space<vmem>>, vector<512x512xbf16>
    %cst = arith.constant dense<0.000000e+00> : vector<16x512xf32>
    %3 = tpu.matmul %0, %2, %cst {dimension_numbers = #tpu.dot_dimension_numbers<[1], [0], [0], [1], [0, 0, 1, 1], [], []>} : vector<16x512xbf16>, vector<512x512xbf16>, vector<16x512xf32> -> vector<16x512xf32>
    %4 = vector.broadcast %1 : vector<1x512xf32> to vector<16x512xf32>
    %5 = arith.addf %3, %4 : vector<16x512xf32>
    %cst_5 = arith.constant 0.000000e+00 : f32
    %6 = vector.broadcast %cst_5 : f32 to vector<16x512xf32>
    %7 = arith.maximumf %5, %6 : vector<16x512xf32>
    %8 = arith.truncf %7 : vector<16x512xf32> to vector<16x512xbf16>
    %c1 = arith.constant 1 : index
    %c0_6 = arith.constant 0 : index
    %9 = vector.load %arg12[%c1, %c0_6] : memref<10x512xf32, #tpu.memory_space<vmem>>, vector<1x512xf32>
    %c0_7 = arith.constant 0 : index
    %c0_8 = arith.constant 0 : index
    %10 = vector.load %arg3[%c0_7, %c0_8] : memref<512x512xbf16, #tpu.memory_space<vmem>>, vector<512x512xbf16>
    %cst_9 = arith.constant dense<0.000000e+00> : vector<16x512xf32>
    %11 = tpu.matmul %8, %10, %cst_9 {dimension_numbers = #tpu.dot_dimension_numbers<[1], [0], [0], [1], [0, 0, 1, 1], [], []>} : vector<16x512xbf16>, vector<512x512xbf16>, vector<16x512xf32> -> vector<16x512xf32>
    %12 = vector.broadcast %9 : vector<1x512xf32> to vector<16x512xf32>
    %13 = arith.addf %11, %12 : vector<16x512xf32>
    %cst_10 = arith.constant 0.000000e+00 : f32
    %14 = vector.broadcast %cst_10 : f32 to vector<16x512xf32>
    %15 = arith.maximumf %13, %14 : vector<16x512xf32>
    %16 = arith.truncf %15 : vector<16x512xf32> to vector<16x512xbf16>
    %c2 = arith.constant 2 : index
    %c0_11 = arith.constant 0 : index
    %17 = vector.load %arg12[%c2, %c0_11] : memref<10x512xf32, #tpu.memory_space<vmem>>, vector<1x512xf32>
    %c0_12 = arith.constant 0 : index
    %c0_13 = arith.constant 0 : index
    %18 = vector.load %arg4[%c0_12, %c0_13] : memref<512x512xbf16, #tpu.memory_space<vmem>>, vector<512x512xbf16>
    %cst_14 = arith.constant dense<0.000000e+00> : vector<16x512xf32>
    %19 = tpu.matmul %16, %18, %cst_14 {dimension_numbers = #tpu.dot_dimension_numbers<[1], [0], [0], [1], [0, 0, 1, 1], [], []>} : vector<16x512xbf16>, vector<512x512xbf16>, vector<16x512xf32> -> vector<16x512xf32>
    %20 = vector.broadcast %17 : vector<1x512xf32> to vector<16x512xf32>
    %21 = arith.addf %19, %20 : vector<16x512xf32>
    %cst_15 = arith.constant 0.000000e+00 : f32
    %22 = vector.broadcast %cst_15 : f32 to vector<16x512xf32>
    %23 = arith.maximumf %21, %22 : vector<16x512xf32>
    %24 = arith.truncf %23 : vector<16x512xf32> to vector<16x512xbf16>
    %c3 = arith.constant 3 : index
    %c0_16 = arith.constant 0 : index
    %25 = vector.load %arg12[%c3, %c0_16] : memref<10x512xf32, #tpu.memory_space<vmem>>, vector<1x512xf32>
    %c0_17 = arith.constant 0 : index
    %c0_18 = arith.constant 0 : index
    %26 = vector.load %arg5[%c0_17, %c0_18] : memref<512x512xbf16, #tpu.memory_space<vmem>>, vector<512x512xbf16>
    %cst_19 = arith.constant dense<0.000000e+00> : vector<16x512xf32>
    %27 = tpu.matmul %24, %26, %cst_19 {dimension_numbers = #tpu.dot_dimension_numbers<[1], [0], [0], [1], [0, 0, 1, 1], [], []>} : vector<16x512xbf16>, vector<512x512xbf16>, vector<16x512xf32> -> vector<16x512xf32>
    %28 = vector.broadcast %25 : vector<1x512xf32> to vector<16x512xf32>
    %29 = arith.addf %27, %28 : vector<16x512xf32>
    %cst_20 = arith.constant 0.000000e+00 : f32
    %30 = vector.broadcast %cst_20 : f32 to vector<16x512xf32>
    %31 = arith.maximumf %29, %30 : vector<16x512xf32>
    %32 = arith.truncf %31 : vector<16x512xf32> to vector<16x512xbf16>
    %c4 = arith.constant 4 : index
    %c0_21 = arith.constant 0 : index
    %33 = vector.load %arg12[%c4, %c0_21] : memref<10x512xf32, #tpu.memory_space<vmem>>, vector<1x384xf32>
    %c0_22 = arith.constant 0 : index
    %c0_23 = arith.constant 0 : index
    %34 = vector.load %arg6[%c0_22, %c0_23] : memref<512x384xbf16, #tpu.memory_space<vmem>>, vector<512x384xbf16>
    %cst_24 = arith.constant dense<0.000000e+00> : vector<16x384xf32>
    %35 = tpu.matmul %32, %34, %cst_24 {dimension_numbers = #tpu.dot_dimension_numbers<[1], [0], [0], [1], [0, 0, 1, 1], [], []>} : vector<16x512xbf16>, vector<512x384xbf16>, vector<16x384xf32> -> vector<16x384xf32>
    %36 = vector.broadcast %33 : vector<1x384xf32> to vector<16x384xf32>
    %37 = arith.addf %35, %36 : vector<16x384xf32>
    %cst_25 = arith.constant 0.000000e+00 : f32
    %38 = vector.broadcast %cst_25 : f32 to vector<16x384xf32>
    %39 = arith.maximumf %37, %38 : vector<16x384xf32>
    %40 = arith.truncf %39 : vector<16x384xf32> to vector<16x384xbf16>
    %c5 = arith.constant 5 : index
    %c0_26 = arith.constant 0 : index
    %41 = vector.load %arg12[%c5, %c0_26] : memref<10x512xf32, #tpu.memory_space<vmem>>, vector<1x256xf32>
    %c0_27 = arith.constant 0 : index
    %c0_28 = arith.constant 0 : index
    %42 = vector.load %arg7[%c0_27, %c0_28] : memref<384x256xbf16, #tpu.memory_space<vmem>>, vector<384x256xbf16>
    %cst_29 = arith.constant dense<0.000000e+00> : vector<16x256xf32>
    %43 = tpu.matmul %40, %42, %cst_29 {dimension_numbers = #tpu.dot_dimension_numbers<[1], [0], [0], [1], [0, 0, 1, 1], [], []>} : vector<16x384xbf16>, vector<384x256xbf16>, vector<16x256xf32> -> vector<16x256xf32>
    %44 = vector.broadcast %41 : vector<1x256xf32> to vector<16x256xf32>
    %45 = arith.addf %43, %44 : vector<16x256xf32>
    %cst_30 = arith.constant 0.000000e+00 : f32
    %46 = vector.broadcast %cst_30 : f32 to vector<16x256xf32>
    %47 = arith.maximumf %45, %46 : vector<16x256xf32>
    %48 = arith.truncf %47 : vector<16x256xf32> to vector<16x256xbf16>
    %c6 = arith.constant 6 : index
    %c0_31 = arith.constant 0 : index
    %49 = vector.load %arg12[%c6, %c0_31] : memref<10x512xf32, #tpu.memory_space<vmem>>, vector<1x128xf32>
    %c0_32 = arith.constant 0 : index
    %c0_33 = arith.constant 0 : index
    %50 = vector.load %arg8[%c0_32, %c0_33] : memref<256x128xbf16, #tpu.memory_space<vmem>>, vector<256x128xbf16>
    %cst_34 = arith.constant dense<0.000000e+00> : vector<16x128xf32>
    %51 = tpu.matmul %48, %50, %cst_34 {dimension_numbers = #tpu.dot_dimension_numbers<[1], [0], [0], [1], [0, 0, 1, 1], [], []>} : vector<16x256xbf16>, vector<256x128xbf16>, vector<16x128xf32> -> vector<16x128xf32>
    %52 = vector.broadcast %49 : vector<1x128xf32> to vector<16x128xf32>
    %53 = arith.addf %51, %52 : vector<16x128xf32>
    %cst_35 = arith.constant 0.000000e+00 : f32
    %54 = vector.broadcast %cst_35 : f32 to vector<16x128xf32>
    %55 = arith.maximumf %53, %54 : vector<16x128xf32>
    %56 = arith.truncf %55 : vector<16x128xf32> to vector<16x128xbf16>
    %c7 = arith.constant 7 : index
    %c0_36 = arith.constant 0 : index
    %57 = vector.load %arg12[%c7, %c0_36] : memref<10x512xf32, #tpu.memory_space<vmem>>, vector<1x128xf32>
    %c0_37 = arith.constant 0 : index
    %c0_38 = arith.constant 0 : index
    %58 = vector.load %arg9[%c0_37, %c0_38] : memref<128x128xbf16, #tpu.memory_space<vmem>>, vector<128x128xbf16>
    %cst_39 = arith.constant dense<0.000000e+00> : vector<16x128xf32>
    %59 = tpu.matmul %56, %58, %cst_39 {dimension_numbers = #tpu.dot_dimension_numbers<[1], [0], [0], [1], [0, 0, 1, 1], [], []>} : vector<16x128xbf16>, vector<128x128xbf16>, vector<16x128xf32> -> vector<16x128xf32>
    %60 = vector.broadcast %57 : vector<1x128xf32> to vector<16x128xf32>
    %61 = arith.addf %59, %60 : vector<16x128xf32>
    %cst_40 = arith.constant 0.000000e+00 : f32
    %cst_41 = arith.constant 6.000000e+00 : f32
    %62 = vector.broadcast %cst_40 : f32 to vector<16x128xf32>
    %63 = arith.maximumf %62, %61 : vector<16x128xf32>
    %64 = vector.broadcast %cst_41 : f32 to vector<16x128xf32>
    %65 = arith.minimumf %64, %63 : vector<16x128xf32>
    %66 = arith.truncf %65 : vector<16x128xf32> to vector<16x128xbf16>
    %c8 = arith.constant 8 : index
    %c0_42 = arith.constant 0 : index
    %67 = vector.load %arg12[%c8, %c0_42] : memref<10x512xf32, #tpu.memory_space<vmem>>, vector<1x128xf32>
    %c0_43 = arith.constant 0 : index
    %c0_44 = arith.constant 0 : index
    %68 = vector.load %arg10[%c0_43, %c0_44] : memref<128x128xbf16, #tpu.memory_space<vmem>>, vector<128x128xbf16>
    %cst_45 = arith.constant dense<0.000000e+00> : vector<16x128xf32>
    %69 = tpu.matmul %66, %68, %cst_45 {dimension_numbers = #tpu.dot_dimension_numbers<[1], [0], [0], [1], [0, 0, 1, 1], [], []>} : vector<16x128xbf16>, vector<128x128xbf16>, vector<16x128xf32> -> vector<16x128xf32>
    %70 = vector.broadcast %67 : vector<1x128xf32> to vector<16x128xf32>
    %71 = arith.addf %69, %70 : vector<16x128xf32>
    %cst_46 = arith.constant 0.000000e+00 : f32
    %cst_47 = arith.constant 6.000000e+00 : f32
    %72 = vector.broadcast %cst_46 : f32 to vector<16x128xf32>
    %73 = arith.maximumf %72, %71 : vector<16x128xf32>
    %74 = vector.broadcast %cst_47 : f32 to vector<16x128xf32>
    %75 = arith.minimumf %74, %73 : vector<16x128xf32>
    %76 = arith.truncf %75 : vector<16x128xf32> to vector<16x128xbf16>
    %c9 = arith.constant 9 : index
    %c0_48 = arith.constant 0 : index
    %77 = vector.load %arg12[%c9, %c0_48] : memref<10x512xf32, #tpu.memory_space<vmem>>, vector<1x128xf32>
    %c0_49 = arith.constant 0 : index
    %c0_50 = arith.constant 0 : index
    %78 = vector.load %arg11[%c0_49, %c0_50] : memref<128x128xbf16, #tpu.memory_space<vmem>>, vector<128x128xbf16>
    %cst_51 = arith.constant dense<0.000000e+00> : vector<16x128xf32>
    %79 = tpu.matmul %76, %78, %cst_51 {dimension_numbers = #tpu.dot_dimension_numbers<[1], [0], [0], [1], [0, 0, 1, 1], [], []>} : vector<16x128xbf16>, vector<128x128xbf16>, vector<16x128xf32> -> vector<16x128xf32>
    %80 = vector.broadcast %77 : vector<1x128xf32> to vector<16x128xf32>
    %81 = arith.addf %79, %80 : vector<16x128xf32>
    %82 = arith.negf %81 : vector<16x128xf32>
    %83 = math.exp %82 : vector<16x128xf32>
    %cst_52 = arith.constant 1.000000e+00 : f32
    %84 = vector.broadcast %cst_52 : f32 to vector<16x128xf32>
    %85 = arith.addf %84, %83 : vector<16x128xf32>
    %86 = arith.divf %84, %85 : vector<16x128xf32>
    %c0_53 = arith.constant 0 : index
    %c0_54 = arith.constant 0 : index
    %87 = vector.load %arg13[%c0_53, %c0_54] : memref<16x128xf32, #tpu.memory_space<vmem>>, vector<16x128xf32>
    tpu.vector_store %arg13[%c0_53, %c0_54], %86 {strides = array<i32>} : memref<16x128xf32, #tpu.memory_space<vmem>>, vector<16x128xf32>,
    return
  }
  func.func @transform_0(%arg0: i32) -> (i32, i32) {
    %c0_i32 = arith.constant 0 : i32
    %c0_i32_0 = arith.constant 0 : i32
    return %arg0, %c0_i32 : i32, i32
  }
  func.func @transform_1(%arg0: i32) -> (i32, i32) {
    %c0_i32 = arith.constant 0 : i32
    %c0_i32_0 = arith.constant 0 : i32
    %c0_i32_1 = arith.constant 0 : i32
    return %c0_i32, %c0_i32_0 : i32, i32
  }
  func.func @transform_2(%arg0: i32) -> (i32, i32) {
    %c0_i32 = arith.constant 0 : i32
    %c0_i32_0 = arith.constant 0 : i32
    %c0_i32_1 = arith.constant 0 : i32
    return %c0_i32, %c0_i32_0 : i32, i32
  }
  func.func @transform_3(%arg0: i32) -> (i32, i32) {
    %c0_i32 = arith.constant 0 : i32
    %c0_i32_0 = arith.constant 0 : i32
    %c0_i32_1 = arith.constant 0 : i32
    return %c0_i32, %c0_i32_0 : i32, i32
  }
  func.func @transform_4(%arg0: i32) -> (i32, i32) {
    %c0_i32 = arith.constant 0 : i32
    %c0_i32_0 = arith.constant 0 : i32
    %c0_i32_1 = arith.constant 0 : i32
    return %c0_i32, %c0_i32_0 : i32, i32
  }
  func.func @transform_5(%arg0: i32) -> (i32, i32) {
    %c0_i32 = arith.constant 0 : i32
    %c0_i32_0 = arith.constant 0 : i32
    %c0_i32_1 = arith.constant 0 : i32
    return %c0_i32, %c0_i32_0 : i32, i32
  }
  func.func @transform_6(%arg0: i32) -> (i32, i32) {
    %c0_i32 = arith.constant 0 : i32
    %c0_i32_0 = arith.constant 0 : i32
    %c0_i32_1 = arith.constant 0 : i32
    return %c0_i32, %c0_i32_0 : i32, i32
  }
  func.func @transform_7(%arg0: i32) -> (i32, i32) {
    %c0_i32 = arith.constant 0 : i32
    %c0_i32_0 = arith.constant 0 : i32
    %c0_i32_1 = arith.constant 0 : i32
    return %c0_i32, %c0_i32_0 : i32, i32
  }
  func.func @transform_8(%arg0: i32) -> (i32, i32) {
    %c0_i32 = arith.constant 0 : i32
    %c0_i32_0 = arith.constant 0 : i32
    %c0_i32_1 = arith.constant 0 : i32
    return %c0_i32, %c0_i32_0 : i32, i32
  }
  func.func @transform_9(%arg0: i32) -> (i32, i32) {
    %c0_i32 = arith.constant 0 : i32
    %c0_i32_0 = arith.constant 0 : i32
    %c0_i32_1 = arith.constant 0 : i32
    return %c0_i32, %c0_i32_0 : i32, i32
  }
  func.func @transform_10(%arg0: i32) -> (i32, i32) {
    %c0_i32 = arith.constant 0 : i32
    %c0_i32_0 = arith.constant 0 : i32
    %c0_i32_1 = arith.constant 0 : i32
    return %c0_i32, %c0_i32_0 : i32, i32
  }
  func.func @transform_11(%arg0: i32) -> (i32, i32) {
    %c0_i32 = arith.constant 0 : i32
    %c0_i32_0 = arith.constant 0 : i32
    %c0_i32_1 = arith.constant 0 : i32
    return %c0_i32, %c0_i32_0 : i32, i32
  }
  func.func @transform_12(%arg0: i32) -> (i32, i32) {
    %c0_i32 = arith.constant 0 : i32
    %c0_i32_0 = arith.constant 0 : i32
    return %arg0, %c0_i32 : i32, i32
  }
}

module attributes {stable_mosaic.version = 11 : i64} {
  func.func @pdnet_kernel(%arg0: i32, %arg1: memref<16x512xbf16, #tpu.memory_space<vmem>>, %arg2: memref<512x512xbf16, #tpu.memory_space<vmem>>, %arg3: memref<512x512xbf16, #tpu.memory_space<vmem>>, %arg4: memref<512x512xbf16, #tpu.memory_space<vmem>>, %arg5: memref<512x512xbf16, #tpu.memory_space<vmem>>, %arg6: memref<512x384xbf16, #tpu.memory_space<vmem>>, %arg7: memref<384x256xbf16, #tpu.memory_space<vmem>>, %arg8: memref<256x128xbf16, #tpu.memory_space<vmem>>, %arg9: memref<128x128xbf16, #tpu.memory_space<vmem>>, %arg10: memref<128x128xbf16, #tpu.memory_space<vmem>>, %arg11: memref<128x128xbf16, #tpu.memory_space<vmem>>, %arg12: memref<10x512xf32, #tpu.memory_space<vmem>>, %arg13: memref<16x128xf32, #tpu.memory_space<vmem>>) attributes {dimension_semantics = [#tpu.dimension_semantics<parallel>], iteration_bounds = array<i64: 1>, scalar_prefetch = 0 : i64, scratch_operands = 0 : i64, tpu.core_type = #tpu.core_type<tc>, window_params = [{transform_indices = @transform_0, window_bounds = array<i64: 16, 512>}, {pipeline_mode = #tpu.pipeline_mode<synchronous>, transform_indices = @transform_1, window_bounds = array<i64: 512, 512>}, {pipeline_mode = #tpu.pipeline_mode<synchronous>, transform_indices = @transform_2, window_bounds = array<i64: 512, 512>}, {pipeline_mode = #tpu.pipeline_mode<synchronous>, transform_indices = @transform_3, window_bounds = array<i64: 512, 512>}, {pipeline_mode = #tpu.pipeline_mode<synchronous>, transform_indices = @transform_4, window_bounds = array<i64: 512, 512>}, {pipeline_mode = #tpu.pipeline_mode<synchronous>, transform_indices = @transform_5, window_bounds = array<i64: 512, 384>}, {pipeline_mode = #tpu.pipeline_mode<synchronous>, transform_indices = @transform_6, window_bounds = array<i64: 384, 256>}, {pipeline_mode = #tpu.pipeline_mode<synchronous>, transform_indices = @transform_7, window_bounds = array<i64: 256, 128>}, {pipeline_mode = #tpu.pipeline_mode<synchronous>, transform_indices = @transform_8, window_bounds = array<i64: 128, 128>}, {pipeline_mode = #tpu.pipeline_mode<synchronous>, transform_indices = @transform_9, window_bounds = array<i64: 128, 128>}, {pipeline_mode = #tpu.pipeline_mode<synchronous>, transform_indices = @transform_10, window_bounds = array<i64: 128, 128>}, {pipeline_mode = #tpu.pipeline_mode<synchronous>, transform_indices = @transform_11, window_bounds = array<i64: 10, 512>}, {transform_indices = @transform_12, window_bounds = array<i64: 16, 128>}]} {
    %c0 = arith.constant 0 : index
    %c0_0 = arith.constant 0 : index
    %0 = vector.load %arg1[%c0, %c0_0] : memref<16x512xbf16, #tpu.memory_space<vmem>>, vector<16x512xbf16>
    %c0_1 = arith.constant 0 : index
    %c0_2 = arith.constant 0 : index
    %1 = vector.load %arg12[%c0_1, %c0_2] : memref<10x512xf32, #tpu.memory_space<vmem>>, vector<1x512xf32>
    %c0_3 = arith.constant 0 : index
    %c0_4 = arith.constant 0 : index
    %2 = vector.load %arg2[%c0_3, %c0_4] : memref<512x512xbf16, #tpu.memory_space<vmem>>, vector<512x512xbf16>
    %cst = arith.constant dense<0.000000e+00> : vector<16x512xf32>
    %3 = tpu.matmul %0, %2, %cst {dimension_numbers = #tpu.dot_dimension_numbers<[1], [0], [0], [1], [0, 0, 1, 1], [], []>} : vector<16x512xbf16>, vector<512x512xbf16>, vector<16x512xf32> -> vector<16x512xf32>
    %4 = vector.broadcast %1 : vector<1x512xf32> to vector<16x512xf32>
    %5 = arith.addf %3, %4 : vector<16x512xf32>
    %cst_5 = arith.constant 0.000000e+00 : f32
    %6 = vector.broadcast %cst_5 : f32 to vector<16x512xf32>
    %7 = arith.maximumf %5, %6 : vector<16x512xf32>
    %8 = arith.truncf %7 : vector<16x512xf32> to vector<16x512xbf16>
    %c1 = arith.constant 1 : index
    %c0_6 = arith.constant 0 : index
    %9 = vector.load %arg12[%c1, %c0_6] : memref<10x512xf32, #tpu.memory_space<vmem>>, vector<1x512xf32>
    %c0_7 = arith.constant 0 : index
    %c0_8 = arith.constant 0 : index
    %10 = vector.load %arg3[%c0_7, %c0_8] : memref<512x512xbf16, #tpu.memory_space<vmem>>, vector<512x512xbf16>
    %cst_9 = arith.constant dense<0.000000e+00> : vector<16x512xf32>
    %11 = tpu.matmul %8, %10, %cst_9 {dimension_numbers = #tpu.dot_dimension_numbers<[1], [0], [0], [1], [0, 0, 1, 1], [], []>} : vector<16x512xbf16>, vector<512x512xbf16>, vector<16x512xf32> -> vector<16x512xf32>
    %12 = vector.broadcast %9 : vector<1x512xf32> to vector<16x512xf32>
    %13 = arith.addf %11, %12 : vector<16x512xf32>
    %cst_10 = arith.constant 0.000000e+00 : f32
    %14 = vector.broadcast %cst_10 : f32 to vector<16x512xf32>
    %15 = arith.maximumf %13, %14 : vector<16x512xf32>
    %16 = arith.truncf %15 : vector<16x512xf32> to vector<16x512xbf16>
    %c2 = arith.constant 2 : index
    %c0_11 = arith.constant 0 : index
    %17 = vector.load %arg12[%c2, %c0_11] : memref<10x512xf32, #tpu.memory_space<vmem>>, vector<1x512xf32>
    %c0_12 = arith.constant 0 : index
    %c0_13 = arith.constant 0 : index
    %18 = vector.load %arg4[%c0_12, %c0_13] : memref<512x512xbf16, #tpu.memory_space<vmem>>, vector<512x512xbf16>
    %cst_14 = arith.constant dense<0.000000e+00> : vector<16x512xf32>
    %19 = tpu.matmul %16, %18, %cst_14 {dimension_numbers = #tpu.dot_dimension_numbers<[1], [0], [0], [1], [0, 0, 1, 1], [], []>} : vector<16x512xbf16>, vector<512x512xbf16>, vector<16x512xf32> -> vector<16x512xf32>
    %20 = vector.broadcast %17 : vector<1x512xf32> to vector<16x512xf32>
    %21 = arith.addf %19, %20 : vector<16x512xf32>
    %cst_15 = arith.constant 0.000000e+00 : f32
    %22 = vector.broadcast %cst_15 : f32 to vector<16x512xf32>
    %23 = arith.maximumf %21, %22 : vector<16x512xf32>
    %24 = arith.truncf %23 : vector<16x512xf32> to vector<16x512xbf16>
    %c3 = arith.constant 3 : index
    %c0_16 = arith.constant 0 : index
    %25 = vector.load %arg12[%c3, %c0_16] : memref<10x512xf32, #tpu.memory_space<vmem>>, vector<1x512xf32>
    %c0_17 = arith.constant 0 : index
    %c0_18 = arith.constant 0 : index
    %26 = vector.load %arg5[%c0_17, %c0_18] : memref<512x512xbf16, #tpu.memory_space<vmem>>, vector<512x512xbf16>
    %cst_19 = arith.constant dense<0.000000e+00> : vector<16x512xf32>
    %27 = tpu.matmul %24, %26, %cst_19 {dimension_numbers = #tpu.dot_dimension_numbers<[1], [0], [0], [1], [0, 0, 1, 1], [], []>} : vector<16x512xbf16>, vector<512x512xbf16>, vector<16x512xf32> -> vector<16x512xf32>
    %28 = vector.broadcast %25 : vector<1x512xf32> to vector<16x512xf32>
    %29 = arith.addf %27, %28 : vector<16x512xf32>
    %cst_20 = arith.constant 0.000000e+00 : f32
    %30 = vector.broadcast %cst_20 : f32 to vector<16x512xf32>
    %31 = arith.maximumf %29, %30 : vector<16x512xf32>
    %32 = arith.truncf %31 : vector<16x512xf32> to vector<16x512xbf16>
    %c4 = arith.constant 4 : index
    %c0_21 = arith.constant 0 : index
    %33 = vector.load %arg12[%c4, %c0_21] : memref<10x512xf32, #tpu.memory_space<vmem>>, vector<1x384xf32>
    %c0_22 = arith.constant 0 : index
    %c0_23 = arith.constant 0 : index
    %34 = vector.load %arg6[%c0_22, %c0_23] : memref<512x384xbf16, #tpu.memory_space<vmem>>, vector<512x384xbf16>
    %cst_24 = arith.constant dense<0.000000e+00> : vector<16x384xf32>
    %35 = tpu.matmul %32, %34, %cst_24 {dimension_numbers = #tpu.dot_dimension_numbers<[1], [0], [0], [1], [0, 0, 1, 1], [], []>} : vector<16x512xbf16>, vector<512x384xbf16>, vector<16x384xf32> -> vector<16x384xf32>
    %36 = vector.broadcast %33 : vector<1x384xf32> to vector<16x384xf32>
    %37 = arith.addf %35, %36 : vector<16x384xf32>
    %cst_25 = arith.constant 0.000000e+00 : f32
    %38 = vector.broadcast %cst_25 : f32 to vector<16x384xf32>
    %39 = arith.maximumf %37, %38 : vector<16x384xf32>
    %40 = arith.truncf %39 : vector<16x384xf32> to vector<16x384xbf16>
    %c5 = arith.constant 5 : index
    %c0_26 = arith.constant 0 : index
    %41 = vector.load %arg12[%c5, %c0_26] : memref<10x512xf32, #tpu.memory_space<vmem>>, vector<1x256xf32>
    %c0_27 = arith.constant 0 : index
    %c0_28 = arith.constant 0 : index
    %42 = vector.load %arg7[%c0_27, %c0_28] : memref<384x256xbf16, #tpu.memory_space<vmem>>, vector<384x256xbf16>
    %cst_29 = arith.constant dense<0.000000e+00> : vector<16x256xf32>
    %43 = tpu.matmul %40, %42, %cst_29 {dimension_numbers = #tpu.dot_dimension_numbers<[1], [0], [0], [1], [0, 0, 1, 1], [], []>} : vector<16x384xbf16>, vector<384x256xbf16>, vector<16x256xf32> -> vector<16x256xf32>
    %44 = vector.broadcast %41 : vector<1x256xf32> to vector<16x256xf32>
    %45 = arith.addf %43, %44 : vector<16x256xf32>
    %cst_30 = arith.constant 0.000000e+00 : f32
    %46 = vector.broadcast %cst_30 : f32 to vector<16x256xf32>
    %47 = arith.maximumf %45, %46 : vector<16x256xf32>
    %48 = arith.truncf %47 : vector<16x256xf32> to vector<16x256xbf16>
    %c6 = arith.constant 6 : index
    %c0_31 = arith.constant 0 : index
    %49 = vector.load %arg12[%c6, %c0_31] : memref<10x512xf32, #tpu.memory_space<vmem>>, vector<1x128xf32>
    %c0_32 = arith.constant 0 : index
    %c0_33 = arith.constant 0 : index
    %50 = vector.load %arg8[%c0_32, %c0_33] : memref<256x128xbf16, #tpu.memory_space<vmem>>, vector<256x128xbf16>
    %cst_34 = arith.constant dense<0.000000e+00> : vector<16x128xf32>
    %51 = tpu.matmul %48, %50, %cst_34 {dimension_numbers = #tpu.dot_dimension_numbers<[1], [0], [0], [1], [0, 0, 1, 1], [], []>} : vector<16x256xbf16>, vector<256x128xbf16>, vector<16x128xf32> -> vector<16x128xf32>
    %52 = vector.broadcast %49 : vector<1x128xf32> to vector<16x128xf32>
    %53 = arith.addf %51, %52 : vector<16x128xf32>
    %cst_35 = arith.constant 0.000000e+00 : f32
    %54 = vector.broadcast %cst_35 : f32 to vector<16x128xf32>
    %55 = arith.maximumf %53, %54 : vector<16x128xf32>
    %56 = arith.truncf %55 : vector<16x128xf32> to vector<16x128xbf16>
    %c7 = arith.constant 7 : index
    %c0_36 = arith.constant 0 : index
    %57 = vector.load %arg12[%c7, %c0_36] : memref<10x512xf32, #tpu.memory_space<vmem>>, vector<1x128xf32>
    %c0_37 = arith.constant 0 : index
    %c0_38 = arith.constant 0 : index
    %58 = vector.load %arg9[%c0_37, %c0_38] : memref<128x128xbf16, #tpu.memory_space<vmem>>, vector<128x128xbf16>
    %cst_39 = arith.constant dense<0.000000e+00> : vector<16x128xf32>
    %59 = tpu.matmul %56, %58, %cst_39 {dimension_numbers = #tpu.dot_dimension_numbers<[1], [0], [0], [1], [0, 0, 1, 1], [], []>} : vector<16x128xbf16>, vector<128x128xbf16>, vector<16x128xf32> -> vector<16x128xf32>
    %60 = vector.broadcast %57 : vector<1x128xf32> to vector<16x128xf32>
    %61 = arith.addf %59, %60 : vector<16x128xf32>
    %cst_40 = arith.constant 0.000000e+00 : f32
    %cst_41 = arith.constant 6.000000e+00 : f32
    %62 = vector.broadcast %cst_40 : f32 to vector<16x128xf32>
    %63 = arith.maximumf %62, %61 : vector<16x128xf32>
    %64 = vector.broadcast %cst_41 : f32 to vector<16x128xf32>
    %65 = arith.minimumf %64, %63 : vector<16x128xf32>
    %66 = arith.truncf %65 : vector<16x128xf32> to vector<16x128xbf16>
    %c8 = arith.constant 8 : index
    %c0_42 = arith.constant 0 : index
    %67 = vector.load %arg12[%c8, %c0_42] : memref<10x512xf32, #tpu.memory_space<vmem>>, vector<1x128xf32>
    %c0_43 = arith.constant 0 : index
    %c0_44 = arith.constant 0 : index
    %68 = vector.load %arg10[%c0_43, %c0_44] : memref<128x128xbf16, #tpu.memory_space<vmem>>, vector<128x128xbf16>
    %cst_45 = arith.constant dense<0.000000e+00> : vector<16x128xf32>
    %69 = tpu.matmul %66, %68, %cst_45 {dimension_numbers = #tpu.dot_dimension_numbers<[1], [0], [0], [1], [0, 0, 1, 1], [], []>} : vector<16x128xbf16>, vector<128x128xbf16>, vector<16x128xf32> -> vector<16x128xf32>
    %70 = vector.broadcast %67 : vector<1x128xf32> to vector<16x128xf32>
    %71 = arith.addf %69, %70 : vector<16x128xf32>
    %cst_46 = arith.constant 0.000000e+00 : f32
    %cst_47 = arith.constant 6.000000e+00 : f32
    %72 = vector.broadcast %cst_46 : f32 to vector<16x128xf32>
    %73 = arith.maximumf %72, %71 : vector<16x128xf32>
    %74 = vector.broadcast %cst_47 : f32 to vector<16x128xf32>
    %75 = arith.minimumf %74, %73 : vector<16x128xf32>
    %76 = arith.truncf %75 : vector<16x128xf32> to vector<16x128xbf16>
    %c9 = arith.constant 9 : index
    %c0_48 = arith.constant 0 : index
    %77 = vector.load %arg12[%c9, %c0_48] : memref<10x512xf32, #tpu.memory_space<vmem>>, vector<1x128xf32>
    %c0_49 = arith.constant 0 : index
    %c0_50 = arith.constant 0 : index
    %78 = vector.load %arg11[%c0_49, %c0_50] : memref<128x128xbf16, #tpu.memory_space<vmem>>, vector<128x128xbf16>
    %cst_51 = arith.constant dense<0.000000e+00> : vector<16x128xf32>
    %79 = tpu.matmul %76, %78, %cst_51 {dimension_numbers = #tpu.dot_dimension_numbers<[1], [0], [0], [1], [0, 0, 1, 1], [], []>} : vector<16x128xbf16>, vector<128x128xbf16>, vector<16x128xf32> -> vector<16x128xf32>
    %80 = vector.broadcast %77 : vector<1x128xf32> to vector<16x128xf32>
    %81 = arith.addf %79, %80 : vector<16x128xf32>
    %82 = arith.negf %81 : vector<16x128xf32>
    %83 = math.exp %82 : vector<16x128xf32>
    %cst_52 = arith.constant 1.000000e+00 : f32
    %84 = vector.broadcast %cst_52 : f32 to vector<16x128xf32>
    %85 = arith.addf %84, %83 : vector<16x128xf32>
    %86 = arith.divf %84, %85 : vector<16x128xf32>
    %c0_53 = arith.constant 0 : index
    %c0_54 = arith.constant 0 : index
    %87 = vector.load %arg13[%c0_53, %c0_54] : memref<16x128xf32, #tpu.memory_space<vmem>>, vector<16x128xf32>
    tpu.vector_store %arg13[%c0_53, %c0_54], %86 {strides = array<i32>} : memref<16x128xf32, #tpu.memory_space<vmem>>, vector<16x128xf32>,
    return
  }
  func.func @transform_0(%arg0: i32) -> (i32, i32) {
    %c0_i32 = arith.constant 0 : i32
    %c0_i32_0 = arith.constant 0 : i32
    return %arg0, %c0_i32 : i32, i32
  }
  func.func @transform_1(%arg0: i32) -> (i32, i32) {
    %c0_i32 = arith.constant 0 : i32
    %c0_i32_0 = arith.constant 0 : i32
    %c0_i32_1 = arith.constant 0 : i32
    return %c0_i32, %c0_i32_0 : i32, i32
  }
  func.func @transform_2(%arg0: i32) -> (i32, i32) {
    %c0_i32 = arith.constant 0 : i32
    %c0_i32_0 = arith.constant 0 : i32
    %c0_i32_1 = arith.constant 0 : i32
    return %c0_i32, %c0_i32_0 : i32, i32
  }
  func.func @transform_3(%arg0: i32) -> (i32, i32) {
    %c0_i32 = arith.constant 0 : i32
    %c0_i32_0 = arith.constant 0 : i32
    %c0_i32_1 = arith.constant 0 : i32
    return %c0_i32, %c0_i32_0 : i32, i32
  }
  func.func @transform_4(%arg0: i32) -> (i32, i32) {
    %c0_i32 = arith.constant 0 : i32
    %c0_i32_0 = arith.constant 0 : i32
    %c0_i32_1 = arith.constant 0 : i32
    return %c0_i32, %c0_i32_0 : i32, i32
  }
  func.func @transform_5(%arg0: i32) -> (i32, i32) {
    %c0_i32 = arith.constant 0 : i32
    %c0_i32_0 = arith.constant 0 : i32
    %c0_i32_1 = arith.constant 0 : i32
    return %c0_i32, %c0_i32_0 : i32, i32
  }
  func.func @transform_6(%arg0: i32) -> (i32, i32) {
    %c0_i32 = arith.constant 0 : i32
    %c0_i32_0 = arith.constant 0 : i32
    %c0_i32_1 = arith.constant 0 : i32
    return %c0_i32, %c0_i32_0 : i32, i32
  }
  func.func @transform_7(%arg0: i32) -> (i32, i32) {
    %c0_i32 = arith.constant 0 : i32
    %c0_i32_0 = arith.constant 0 : i32
    %c0_i32_1 = arith.constant 0 : i32
    return %c0_i32, %c0_i32_0 : i32, i32
  }
  func.func @transform_8(%arg0: i32) -> (i32, i32) {
    %c0_i32 = arith.constant 0 : i32
    %c0_i32_0 = arith.constant 0 : i32
    %c0_i32_1 = arith.constant 0 : i32
    return %c0_i32, %c0_i32_0 : i32, i32
  }
  func.func @transform_9(%arg0: i32) -> (i32, i32) {
    %c0_i32 = arith.constant 0 : i32
    %c0_i32_0 = arith.constant 0 : i32
    %c0_i32_1 = arith.constant 0 : i32
    return %c0_i32, %c0_i32_0 : i32, i32
  }
  func.func @transform_10(%arg0: i32) -> (i32, i32) {
    %c0_i32 = arith.constant 0 : i32
    %c0_i32_0 = arith.constant 0 : i32
    %c0_i32_1 = arith.constant 0 : i32
    return %c0_i32, %c0_i32_0 : i32, i32
  }
  func.func @transform_11(%arg0: i32) -> (i32, i32) {
    %c0_i32 = arith.constant 0 : i32
    %c0_i32_0 = arith.constant 0 : i32
    %c0_i32_1 = arith.constant 0 : i32
    return %c0_i32, %c0_i32_0 : i32, i32
  }
  func.func @transform_12(%arg0: i32) -> (i32, i32) {
    %c0_i32 = arith.constant 0 : i32
    %c0_i32_0 = arith.constant 0 : i32
    return %arg0, %c0_i32 : i32, i32
  }
}

</mosaic_0001>

<bundles_post_ra>
// kernel: tpu_custom_call.1
= control target key start
LH: loop header
LB: loop body
LE: loop exit
PB: predicated region body
PF: predicated region fallthrough
CT: control target
= control target key end

     0   :  { %17 = vsyncpa [#allocation3], 0  ;;  %s8352_s0 = inlined_call_operand.hbm [shape: bf16[16,512], index: 0, kind: input, shape index: {}]   ;;  %s8353_s1 = inlined_call_operand.hbm [shape: bf16[512,512], index: 1, kind: input, shape index: {}]   ;;  %s8354_s2 = inlined_call_operand.hbm [shape: bf16[512,512], index: 2, kind: input, shape index: {}]   ;;  %s8355_s3 = inlined_call_operand.hbm [shape: bf16[512,512], index: 3, kind: input, shape index: {}]   ;;  %s8356_s4 = inlined_call_operand.hbm [shape: bf16[512,512], index: 4, kind: input, shape index: {}]   ;;  %s8357_s5 = inlined_call_operand.hbm [shape: bf16[512,384], index: 5, kind: input, shape index: {}]   ;;  %s8358_s6 = inlined_call_operand.hbm [shape: bf16[384,256], index: 6, kind: input, shape index: {}]   ;;  %s8359_s7 = inlined_call_operand.hbm [shape: bf16[256,128], index: 7, kind: input, shape index: {}]   ;;  %s8360_s8 = inlined_call_operand.hbm [shape: bf16[128,128], index: 8, kind: input, shape index: {}]   ;;  %s8361_s9 = inlined_call_operand.hbm [shape: bf16[128,128], index: 9, kind: input, shape index: {}]   ;;  %s8362_s10 = inlined_call_operand.hbm [shape: bf16[128,128], index: 10, kind: input, shape index: {}]   ;;  %s8363_s11 = inlined_call_operand.hbm [shape: f32[10,512], index: 11, kind: input, shape index: {}]   ;;  %s8364_s12 = inlined_call_operand.hbm [shape: f32[16,128], index: 12, kind: output, shape index: {}]  }
   0x1   :  { %18 = vsyncpa [#allocation6], 0 }
   0x2   :  { %19 = vsyncpa [#allocation9], 0 }
   0x3   :  { %20 = vsyncpa [#allocation12], 0 }
   0x4   :  { %21 = vsyncpa [#allocation15], 0 }
   0x5   :  { %22 = vsyncpa [#allocation18], 0 }
   0x6   :  { %23 = vsyncpa [#allocation21], 0 }
   0x7   :  { %24 = vsyncpa [#allocation4], 0  ;;  %s8074_s21 = smov [#allocation5]   ;;  %s8075_s23 = smov [#allocation8]  }
   0x8   :  { %s42_s22 = sshll.u32 %s8074_s21, 4  ;;  %s66_s24 = sshll.u32 %s8075_s23, 4  ;;  %s43_s22 = int_to_ptr.vmem [resolvable:$true] %s42_s22  ;;  %s67_s24 = int_to_ptr.vmem [resolvable:$true] %s66_s24 }
   0x9   :  { %s7806_s25 = scalar_lea.vmem %s43_s22, 16384  ;;  %p7811_p1 = scmp.lt.s32.totalorder %s43_s22, %s43_s22 }
   0xa   :  { %p7807_p0 = scmp.ne.s32.totalorder %s43_s22, %s7806_s25  ;;  %p7812_p2 = scmp.lt.s32.totalorder %s7806_s25, %s7806_s25 }
   0xc   :  { %p7813_p3 = por %p7812_p2, %p7811_p1 }
   0xe   :  { %p7814_p4 = pnand %p7813_p3, %p7807_p0 }
  0x10   :  { %7817 = shalt.err (!%p7814_p4)
}
  0x11   :  { %s8076_s26 = smov 256   ;;  %s8077_s27 = smov 16  }
  0x12   :  { %48 = dma.hbm_to_vmem [thread:$0]  %s8353_s1, 16384, %s43_s22, [#allocation6], %s8076_s26, %s8076_s26, %s8077_s27  }
  0x13   :  { %s7826_s30 = scalar_lea.vmem %s67_s24, 16384  ;;  %p7831_p6 = scmp.lt.s32.totalorder %s67_s24, %s67_s24 }
  0x14   :  { %p7827_p5 = scmp.ne.s32.totalorder %s67_s24, %s7826_s30  ;;  %p7832_p7 = scmp.lt.s32.totalorder %s7826_s30, %s7826_s30 }
  0x16   :  { %p7833_p8 = por %p7832_p7, %p7831_p6 }
  0x18   :  { %p7834_p9 = pnand %p7833_p8, %p7827_p5 }
  0x1a   :  { %7837 = shalt.err (!%p7834_p9)
}
  0x1b   :  { %72 = dma.hbm_to_vmem [thread:$0]  %s8355_s3, 16384, %s67_s24, [#allocation9], %s8076_s26, %s8076_s26, %s8077_s27  }
  0x1c   :  { %s8078_s15 = smov [#allocation11]  }
  0x1d   :  { %s90_s16 = sshll.u32 %s8078_s15, 4  ;;  %s91_s16 = int_to_ptr.vmem [resolvable:$true] %s90_s16 }
  0x1e   :  { %s7846_s17 = scalar_lea.vmem %s91_s16, 12288  ;;  %p7851_p11 = scmp.lt.s32.totalorder %s91_s16, %s91_s16 }
  0x1f   :  { %p7847_p10 = scmp.ne.s32.totalorder %s91_s16, %s7846_s17  ;;  %p7852_p12 = scmp.lt.s32.totalorder %s7846_s17, %s7846_s17 }
  0x21   :  { %p7853_p13 = por %p7852_p12, %p7851_p11 }
  0x23   :  { %p7854_p0 = pnand %p7853_p13, %p7847_p10 }
  0x25   :  { %7857 = shalt.err (!%p7854_p0)
}
  0x26   :  { %s8079_s1 = smov 192   ;;  %s8080_s18 = smov 12  }
  0x27   :  { %96 = dma.hbm_to_vmem [thread:$0]  %s8357_s5, 12288, %s91_s16, [#allocation12], %s8079_s1, %s8079_s1, %s8080_s18  }
  0x28   :  { %s8081_s21 = smov [#allocation14]  }
  0x29   :  { %s114_s22 = sshll.u32 %s8081_s21, 4  ;;  %s115_s22 = int_to_ptr.vmem [resolvable:$true] %s114_s22 }
  0x2a   :  { %s7866_s3 = scalar_lea.vmem %s115_s22, 2048  ;;  %p7871_p2 = scmp.lt.s32.totalorder %s115_s22, %s115_s22 }
  0x2b   :  { %p7867_p1 = scmp.ne.s32.totalorder %s115_s22, %s7866_s3  ;;  %p7872_p3 = scmp.lt.s32.totalorder %s7866_s3, %s7866_s3 }
  0x2d   :  { %p7873_p4 = por %p7872_p3, %p7871_p2 }
  0x2f   :  { %p7874_p5 = pnand %p7873_p4, %p7867_p1 }
  0x31   :  { %7877 = shalt.err (!%p7874_p5)
}
  0x32   :  { %s8082_s23 = smov 64   ;;  %s8083_s24 = smov 4  }
  0x33   :  { %120 = dma.hbm_to_vmem [thread:$0]  %s8359_s7, 2048, %s115_s22, [#allocation15], %s8082_s23, %s8082_s23, %s8083_s24  }
  0x34   :  { %s8084_s5 = smov [#allocation17]   ;;  %s8085_s30 = smov [#allocation2]  }
  0x35   :  { %s138_s29 = sshll.u32 %s8084_s5, 4  ;;  %s30_s13 = sshll.u32 %s8085_s30, 4  ;;  %s139_s29 = int_to_ptr.vmem [resolvable:$true] %s138_s29  ;;  %s31_s13 = int_to_ptr.vmem [resolvable:$true] %s30_s13 }
  0x36   :  { %s7886_s14 = scalar_lea.vmem %s139_s29, 1024  ;;  %p7891_p7 = scmp.lt.s32.totalorder %s139_s29, %s139_s29 }
  0x37   :  { %p7887_p6 = scmp.ne.s32.totalorder %s139_s29, %s7886_s14  ;;  %p7892_p8 = scmp.lt.s32.totalorder %s7886_s14, %s7886_s14 }
  0x39   :  { %p7893_p9 = por %p7892_p8, %p7891_p7 }
  0x3b   :  { %p7894_p10 = pnand %p7893_p9, %p7887_p6 }
  0x3d   :  { %7897 = shalt.err (!%p7894_p10)
}
  0x3e   :  { %144 = dma.hbm_to_vmem [thread:$0]  %s8361_s9, 1024, %s139_s29, [#allocation18], %s8082_s23, %s8082_s23, %s8083_s24  }
  0x3f   :  { %s7906_s7 = scalar_lea.vmem %s31_s13, 512  ;;  %p7911_p12 = scmp.lt.s32.totalorder %s31_s13, %s31_s13 }
  0x40   :  { %p7907_p11 = scmp.ne.s32.totalorder %s31_s13, %s7906_s7  ;;  %p7912_p13 = scmp.lt.s32.totalorder %s7906_s7, %s7906_s7 }
  0x42   :  { %p7913_p0 = por %p7912_p13, %p7911_p12 }
  0x44   :  { %p7914_p1 = pnand %p7913_p0, %p7907_p11 }
  0x46   :  { %7917 = shalt.err (!%p7914_p1)
}
  0x47   :  { %36 = dma.hbm_to_vmem [thread:$0]  %s8352_s0, 512, %s31_s13, [#allocation3], %s8076_s26, %s8076_s26, %s8077_s27  }
  0x48   :  { %s8086_s18 = smov [#allocation7]   ;;  %s8087_s20 = smov [#allocation10]  }
  0x49   :  { %s54_s19 = sshll.u32 %s8086_s18, 4  ;;  %s78_s21 = sshll.u32 %s8087_s20, 4  ;;  %s55_s19 = int_to_ptr.vmem [resolvable:$true] %s54_s19  ;;  %s79_s21 = int_to_ptr.vmem [resolvable:$true] %s78_s21 }
  0x4a   :  { %s7926_s9 = scalar_lea.vmem %s55_s19, 16384  ;;  %p7931_p3 = scmp.lt.s32.totalorder %s55_s19, %s55_s19 }
  0x4b   :  { %p7927_p2 = scmp.ne.s32.totalorder %s55_s19, %s7926_s9  ;;  %p7932_p4 = scmp.lt.s32.totalorder %s7926_s9, %s7926_s9 }
  0x4d   :  { %p7933_p5 = por %p7932_p4, %p7931_p3 }
  0x4f   :  { %p7934_p6 = pnand %p7933_p5, %p7927_p2 }
  0x51   :  { %7937 = shalt.err (!%p7934_p6)
}
  0x52   :  { %60 = dma.hbm_to_vmem [thread:$0]  %s8354_s2, 16384, %s55_s19, [#allocation6], %s8076_s26, %s8076_s26, %s8077_s27  }
  0x53   :  { %s7946_s0 = scalar_lea.vmem %s79_s21, 16384  ;;  %p7951_p8 = scmp.lt.s32.totalorder %s79_s21, %s79_s21 }
  0x54   :  { %p7947_p7 = scmp.ne.s32.totalorder %s79_s21, %s7946_s0  ;;  %p7952_p9 = scmp.lt.s32.totalorder %s7946_s0, %s7946_s0 }
  0x56   :  { %p7953_p10 = por %p7952_p9, %p7951_p8 }
  0x58   :  { %p7954_p11 = pnand %p7953_p10, %p7947_p7 }
  0x5a   :  { %7957 = shalt.err (!%p7954_p11)
}
  0x5b   :  { %84 = dma.hbm_to_vmem [thread:$0]  %s8356_s4, 16384, %s79_s21, [#allocation9], %s8076_s26, %s8076_s26, %s8077_s27  }
  0x5c   :  { %s8088_s5 = smov [#allocation13]  }
  0x5d   :  { %s102_s29 = sshll.u32 %s8088_s5, 4  ;;  %s103_s29 = int_to_ptr.vmem [resolvable:$true] %s102_s29 }
  0x5e   :  { %s7966_s30 = scalar_lea.vmem %s103_s29, 6144  ;;  %p7971_p13 = scmp.lt.s32.totalorder %s103_s29, %s103_s29 }
  0x5f   :  { %p7967_p12 = scmp.ne.s32.totalorder %s103_s29, %s7966_s30  ;;  %p7972_p0 = scmp.lt.s32.totalorder %s7966_s30, %s7966_s30 }
  0x61   :  { %p7973_p1 = por %p7972_p0, %p7971_p13 }
  0x63   :  { %p7974_p2 = pnand %p7973_p1, %p7967_p12 }
  0x65   :  { %7977 = shalt.err (!%p7974_p2)
}
  0x66   :  { %s8089_s2 = smov 128   ;;  %s8090_s13 = smov 8  }
  0x67   :  { %108 = dma.hbm_to_vmem [thread:$0]  %s8358_s6, 6144, %s103_s29, [#allocation12], %s8089_s2, %s8089_s2, %s8090_s13  }
  0x68   :  { %s8091_s4 = smov [#allocation16]   ;;  %s8092_s27 = smov [#allocation19]  }
  0x69   :  { %s126_s26 = sshll.u32 %s8091_s4, 4  ;;  %s150_s16 = sshll.u32 %s8092_s27, 4  ;;  %s127_s26 = int_to_ptr.vmem [resolvable:$true] %s126_s26  ;;  %s151_s16 = int_to_ptr.vmem [resolvable:$true] %s150_s16 }
  0x6a   :  { %s7986_s7 = scalar_lea.vmem %s127_s26, 1024  ;;  %p7991_p4 = scmp.lt.s32.totalorder %s127_s26, %s127_s26 }
  0x6b   :  { %p7987_p3 = scmp.ne.s32.totalorder %s127_s26, %s7986_s7  ;;  %p7992_p5 = scmp.lt.s32.totalorder %s7986_s7, %s7986_s7 }
  0x6d   :  { %p7993_p6 = por %p7992_p5, %p7991_p4 }
  0x6f   :  { %p7994_p7 = pnand %p7993_p6, %p7987_p3 }
  0x71   :  { %7997 = shalt.err (!%p7994_p7)
}
  0x72   :  { %132 = dma.hbm_to_vmem [thread:$0]  %s8360_s8, 1024, %s127_s26, [#allocation15], %s8082_s23, %s8082_s23, %s8083_s24  }
  0x73   :  { %s8006_s6 = scalar_lea.vmem %s151_s16, 1024  ;;  %p8011_p9 = scmp.lt.s32.totalorder %s151_s16, %s151_s16 }
  0x74   :  { %p8007_p8 = scmp.ne.s32.totalorder %s151_s16, %s8006_s6  ;;  %p8012_p10 = scmp.lt.s32.totalorder %s8006_s6, %s8006_s6 }
  0x76   :  { %p8013_p11 = por %p8012_p10, %p8011_p9 }
  0x78   :  { %p8014_p12 = pnand %p8013_p11, %p8007_p8 }
  0x7a   :  { %8017 = shalt.err (!%p8014_p12)
}
  0x7b   :  { %156 = dma.hbm_to_vmem [thread:$0]  %s8362_s10, 1024, %s151_s16, [#allocation18], %s8082_s23, %s8082_s23, %s8083_s24  }
  0x7c   :  { %s8093_s20 = smov [#allocation20]  }
  0x7d   :  { %s162_s21 = sshll.u32 %s8093_s20, 4  ;;  %s163_s21 = int_to_ptr.vmem [resolvable:$true] %s162_s21 }
  0x7e   :  { %s8026_s9 = scalar_lea.vmem %s163_s21, 1024  ;;  %p8031_p0 = scmp.lt.s32.totalorder %s163_s21, %s163_s21 }
  0x7f   :  { %p8027_p13 = scmp.ne.s32.totalorder %s163_s21, %s8026_s9  ;;  %p8032_p1 = scmp.lt.s32.totalorder %s8026_s9, %s8026_s9 }
  0x81   :  { %p8033_p2 = por %p8032_p1, %p8031_p0 }
  0x83   :  { %p8034_p3 = pnand %p8033_p2, %p8027_p13 }
  0x85   :  { %8037 = shalt.err (!%p8034_p3)
}
  0x86   :  { %s8094_s8 = smov 512   ;;  %s8095_s22 = smov 32  }
  0x87   :  { %168 = dma.hbm_to_vmem [thread:$0]  %s8363_s11, 1024, %s163_s21, [#allocation21], %s8094_s8, %s8094_s8, %s8095_s22  }
  0x88   :  { %8058 = dma.done.wait [#allocation3], 512  }
  0x89   :  { %8059 = vsyncadd [#allocation3], 4294966784 }
  0x8a   :  { %8060 = dma.done.wait [#allocation6], 32768  }
  0x8b   :  { %8061 = vsyncadd [#allocation6], 4294934528 }
  0x8c   :  { %8062 = dma.done.wait [#allocation9], 32768  }
  0x8d   :  { %8063 = vsyncadd [#allocation9], 4294934528 }
  0x8e   :  { %8064 = dma.done.wait [#allocation12], 18432  }
  0x8f   :  { %8065 = vsyncadd [#allocation12], 4294948864 }
  0x90   :  { %8066 = dma.done.wait [#allocation15], 3072  }
  0x91   :  { %8067 = vsyncadd [#allocation15], 4294964224 }
  0x92   :  { %8068 = dma.done.wait [#allocation18], 2048  }
  0x93   :  { %8069 = vsyncadd [#allocation18], 4294965248 }
  0x94   :  { %8070 = dma.done.wait [#allocation21], 1024  }
  0x95   :  { %8071 = vsyncadd [#allocation21], 4294966272  ;;  %v6776_v0 = vld [vmem:[#allocation5 + $0xe4] ss:$16 sps:$4 sm:$0xff]   ;;  %v6780_v2 = vld [vmem:[#allocation5 + $0xe0] ss:$16 sps:$4 sm:$0xff]  }
  0x96   :  { %v6778_v1 = vld [vmem:[#allocation5 + $0x2e4] ss:$16 sps:$4 sm:$0xff]   ;;  %1020 = vmatprep.subr.bf16.mxu0 %v6776_v0  ;;  %v6781_v3 = vld [vmem:[#allocation5 + $0x2e0] ss:$16 sps:$4 sm:$0xff]   ;;  %v6877_v51 = vld [vmem:[#allocation2 + $0xc] ss:$16 sps:$4 sm:$0xff]  }
  0x97   :  { %1063 = vmatprep.subr.bf16.mxu1 %v6778_v1  ;;  %v6782_v4 = vld [vmem:[#allocation5 + $0xc4] ss:$16 sps:$4 sm:$0xff]   ;;  %1021 = vmatpush1.bf16.msra.mxu0 %v6780_v2  ;;  %v6786_v6 = vld [vmem:[#allocation5 + $0xc0] ss:$16 sps:$4 sm:$0xff]   ;;  %v6880_v2 = vld [vmem:[#allocation5 + $0xec] ss:$16 sps:$4 sm:$0xff]  }
  0x98   :  { %1064 = vmatpush1.bf16.msra.mxu1 %v6781_v3  ;;  %v6784_v5 = vld [vmem:[#allocation5 + $0x2c4] ss:$16 sps:$4 sm:$0xff]   ;;  %1022 = vmatprep.subr.bf16.mxu0 %v6782_v4  ;;  %v6787_v7 = vld [vmem:[#allocation5 + $0x2c0] ss:$16 sps:$4 sm:$0xff]   ;;  %v6883_v3 = vld [vmem:[#allocation5 + $0x2ec] ss:$16 sps:$4 sm:$0xff]  }
  0x99   :  { %1065 = vmatprep.subr.bf16.mxu1 %v6784_v5  ;;  %v6788_v8 = vld [vmem:[#allocation5 + $0xa4] ss:$16 sps:$4 sm:$0xff]   ;;  %v6792_v10 = vld [vmem:[#allocation5 + $0xa0] ss:$16 sps:$4 sm:$0xff]   ;;  %1095 = vmatprep.mubr.bf16.mxu1 %v6877_v51  ;;  %v8233_v5 = vld [vmem:[#allocation2 + $0x8] ss:$16 sps:$4 sm:$0xff]  }
  0x9a   :  { %v6790_v9 = vld [vmem:[#allocation5 + $0x2a4] ss:$16 sps:$4 sm:$0xff]   ;;  %v6793_v11 = vld [vmem:[#allocation5 + $0x2a0] ss:$16 sps:$4 sm:$0xff]   ;;  %vm8098_vm0 = vmmov 0   ;;  %s8099_s10 = smov [#allocation22]  }
  0x9b   :  { %1023 = vmatpush1.bf16.msra.mxu0 %v6786_v6  ;;  %v6794_v12 = vld [vmem:[#allocation5 + $0x84] ss:$16 sps:$4 sm:$0xff]   ;;  %v6798_v14 = vld [vmem:[#allocation5 + $0x80] ss:$16 sps:$4 sm:$0xff]   ;;  %v6878_v6 = vld [vmem:[#allocation5 + $0xe8] ss:$16 sps:$4 sm:$0xff]  }
  0x9c   :  { %1066 = vmatpush1.bf16.msra.mxu1 %v6787_v7  ;;  %1024 = vmatprep.subr.bf16.mxu0 %v6788_v8  ;;  %v6796_v13 = vld [vmem:[#allocation5 + $0x284] ss:$16 sps:$4 sm:$0xff]   ;;  %v6799_v15 = vld [vmem:[#allocation5 + $0x280] ss:$16 sps:$4 sm:$0xff]   ;;  %v6881_v7 = vld [vmem:[#allocation5 + $0x2e8] ss:$16 sps:$4 sm:$0xff]  }
  0x9d   :  { %1067 = vmatprep.subr.bf16.mxu1 %v6790_v9  ;;  %v6800_v16 = vld [vmem:[#allocation5 + $0x64] ss:$16 sps:$4 sm:$0xff]   ;;  %v6804_v18 = vld [vmem:[#allocation5 + $0x60] ss:$16 sps:$4 sm:$0xff]   ;;  %v6886_v8 = vld [vmem:[#allocation5 + $0xcc] ss:$16 sps:$4 sm:$0xff]  }
  0x9e   :  { %v6802_v17 = vld [vmem:[#allocation5 + $0x264] ss:$16 sps:$4 sm:$0xff]   ;;  %v6805_v19 = vld [vmem:[#allocation5 + $0x260] ss:$16 sps:$4 sm:$0xff]   ;;  %v6889_v9 = vld [vmem:[#allocation5 + $0x2cc] ss:$16 sps:$4 sm:$0xff]  }
  0x9f   :  { %1025 = vmatpush1.bf16.msra.mxu0 %v6792_v10  ;;  %v6806_v20 = vld [vmem:[#allocation5 + $0x44] ss:$16 sps:$4 sm:$0xff]   ;;  %v6810_v22 = vld [vmem:[#allocation5 + $0x40] ss:$16 sps:$4 sm:$0xff]   ;;  %v6884_v10 = vld [vmem:[#allocation5 + $0xc8] ss:$16 sps:$4 sm:$0xff]  }
  0xa0   :  { %1068 = vmatpush1.bf16.msra.mxu1 %v6793_v11  ;;  %1026 = vmatprep.subr.bf16.mxu0 %v6794_v12  ;;  %v6808_v21 = vld [vmem:[#allocation5 + $0x244] ss:$16 sps:$4 sm:$0xff]   ;;  %v6811_v23 = vld [vmem:[#allocation5 + $0x240] ss:$16 sps:$4 sm:$0xff]   ;;  %v6887_v11 = vld [vmem:[#allocation5 + $0x2c8] ss:$16 sps:$4 sm:$0xff]  }
  0xa1   :  { %1069 = vmatprep.subr.bf16.mxu1 %v6796_v13  ;;  %v6812_v24 = vld [vmem:[#allocation5 + $0x24] ss:$16 sps:$4 sm:$0xff]   ;;  %v6816_v26 = vld [vmem:[#allocation5 + $0x20] ss:$16 sps:$4 sm:$0xff]   ;;  %v6892_v12 = vld [vmem:[#allocation5 + $0xac] ss:$16 sps:$4 sm:$0xff]  }
  0xa2   :  { %v6814_v25 = vld [vmem:[#allocation5 + $0x224] ss:$16 sps:$4 sm:$0xff]   ;;  %v6817_v27 = vld [vmem:[#allocation5 + $0x220] ss:$16 sps:$4 sm:$0xff]   ;;  %v6895_v13 = vld [vmem:[#allocation5 + $0x2ac] ss:$16 sps:$4 sm:$0xff]  }
  0xa3   :  { %1027 = vmatpush1.bf16.msra.mxu0 %v6798_v14  ;;  %v6818_v28 = vld [vmem:[#allocation5 + $0x4] ss:$16 sps:$4 sm:$0xff]   ;;  %v6822_v30 = vld [vmem:[#allocation5] ss:$16 sps:$4 sm:$0xff]   ;;  %v6890_v14 = vld [vmem:[#allocation5 + $0xa8] ss:$16 sps:$4 sm:$0xff]  }
  0xa4   :  { %1070 = vmatpush1.bf16.msra.mxu1 %v6799_v15  ;;  %1028 = vmatprep.subr.bf16.mxu0 %v6800_v16  ;;  %v6820_v29 = vld [vmem:[#allocation5 + $0x204] ss:$16 sps:$4 sm:$0xff]   ;;  %v6823_v31 = vld [vmem:[#allocation5 + $0x200] ss:$16 sps:$4 sm:$0xff]   ;;  %v6893_v15 = vld [vmem:[#allocation5 + $0x2a8] ss:$16 sps:$4 sm:$0xff]  }
  0xa5   :  { %1071 = vmatprep.subr.bf16.mxu1 %v6802_v17  ;;  %v6824_v32 = vld [vmem:[#allocation5 + $0x1e4] ss:$16 sps:$4 sm:$0xff]   ;;  %v6828_v34 = vld [vmem:[#allocation5 + $0x1e0] ss:$16 sps:$4 sm:$0xff]   ;;  %v6898_v16 = vld [vmem:[#allocation5 + $0x8c] ss:$16 sps:$4 sm:$0xff]  }
  0xa6   :  { %v6826_v33 = vld [vmem:[#allocation5 + $0x3e4] ss:$16 sps:$4 sm:$0xff]   ;;  %v6829_v35 = vld [vmem:[#allocation5 + $0x3e0] ss:$16 sps:$4 sm:$0xff]   ;;  %v6901_v17 = vld [vmem:[#allocation5 + $0x28c] ss:$16 sps:$4 sm:$0xff]  }
  0xa7   :  { %1029 = vmatpush1.bf16.msra.mxu0 %v6804_v18  ;;  %v6830_v36 = vld [vmem:[#allocation5 + $0x1c4] ss:$16 sps:$4 sm:$0xff]   ;;  %v6834_v38 = vld [vmem:[#allocation5 + $0x1c0] ss:$16 sps:$4 sm:$0xff]   ;;  %v6896_v18 = vld [vmem:[#allocation5 + $0x88] ss:$16 sps:$4 sm:$0xff]  }
  0xa8   :  { %1072 = vmatpush1.bf16.msra.mxu1 %v6805_v19  ;;  %1030 = vmatprep.subr.bf16.mxu0 %v6806_v20  ;;  %v6832_v37 = vld [vmem:[#allocation5 + $0x3c4] ss:$16 sps:$4 sm:$0xff]   ;;  %v6835_v39 = vld [vmem:[#allocation5 + $0x3c0] ss:$16 sps:$4 sm:$0xff]   ;;  %v6899_v19 = vld [vmem:[#allocation5 + $0x288] ss:$16 sps:$4 sm:$0xff]  }
  0xa9   :  { %1073 = vmatprep.subr.bf16.mxu1 %v6808_v21  ;;  %v6836_v40 = vld [vmem:[#allocation5 + $0x1a4] ss:$16 sps:$4 sm:$0xff]   ;;  %v6840_v42 = vld [vmem:[#allocation5 + $0x1a0] ss:$16 sps:$4 sm:$0xff]   ;;  %v6904_v20 = vld [vmem:[#allocation5 + $0x6c] ss:$16 sps:$4 sm:$0xff]  }
  0xaa   :  { %v6838_v41 = vld [vmem:[#allocation5 + $0x3a4] ss:$16 sps:$4 sm:$0xff]   ;;  %v6841_v43 = vld [vmem:[#allocation5 + $0x3a0] ss:$16 sps:$4 sm:$0xff]   ;;  %v6907_v21 = vld [vmem:[#allocation5 + $0x26c] ss:$16 sps:$4 sm:$0xff]  }
  0xab   :  { %1031 = vmatpush1.bf16.msra.mxu0 %v6810_v22  ;;  %v6842_v44 = vld [vmem:[#allocation5 + $0x184] ss:$16 sps:$4 sm:$0xff]   ;;  %v6846_v46 = vld [vmem:[#allocation5 + $0x180] ss:$16 sps:$4 sm:$0xff]   ;;  %v6902_v22 = vld [vmem:[#allocation5 + $0x68] ss:$16 sps:$4 sm:$0xff]  }
  0xac   :  { %1074 = vmatpush1.bf16.msra.mxu1 %v6811_v23  ;;  %1032 = vmatprep.subr.bf16.mxu0 %v6812_v24  ;;  %v6844_v45 = vld [vmem:[#allocation5 + $0x384] ss:$16 sps:$4 sm:$0xff]   ;;  %v6847_v47 = vld [vmem:[#allocation5 + $0x380] ss:$16 sps:$4 sm:$0xff]   ;;  %v6905_v23 = vld [vmem:[#allocation5 + $0x268] ss:$16 sps:$4 sm:$0xff]  }
  0xad   :  { %1075 = vmatprep.subr.bf16.mxu1 %v6814_v25  ;;  %v6848_v48 = vld [vmem:[#allocation5 + $0x164] ss:$16 sps:$4 sm:$0xff]   ;;  %v6852_v52 = vld [vmem:[#allocation5 + $0x160] ss:$16 sps:$4 sm:$0xff]   ;;  %v6910_v24 = vld [vmem:[#allocation5 + $0x4c] ss:$16 sps:$4 sm:$0xff]  }
  0xae   :  { %v6874_v49 = vld [vmem:[#allocation2 + $0x4] ss:$16 sps:$4 sm:$0xff]   ;;  %v6853_v53 = vld [vmem:[#allocation5 + $0x360] ss:$16 sps:$4 sm:$0xff]   ;;  %v6913_v25 = vld [vmem:[#allocation5 + $0x24c] ss:$16 sps:$4 sm:$0xff]  }
  0xaf   :  { %1033 = vmatpush1.bf16.msra.mxu0 %v6816_v26  ;;  %v6850_v50 = vld [vmem:[#allocation5 + $0x364] ss:$16 sps:$4 sm:$0xff]   ;;  %1052 = vmatprep.mubr.bf16.mxu0 %v6874_v49  ;;  %v6858_v56 = vld [vmem:[#allocation5 + $0x140] ss:$16 sps:$4 sm:$0xff]   ;;  %v6908_v26 = vld [vmem:[#allocation5 + $0x48] ss:$16 sps:$4 sm:$0xff]  }
  0xb0   :  { %1076 = vmatpush1.bf16.msra.mxu1 %v6817_v27  ;;  %1034 = vmatprep.subr.bf16.mxu0 %v6818_v28  ;;  %v6854_v54 = vld [vmem:[#allocation5 + $0x144] ss:$16 sps:$4 sm:$0xff]   ;;  %v6859_v57 = vld [vmem:[#allocation5 + $0x340] ss:$16 sps:$4 sm:$0xff]   ;;  %v6911_v27 = vld [vmem:[#allocation5 + $0x248] ss:$16 sps:$4 sm:$0xff]  }
  0xb1   :  { %1077 = vmatprep.subr.bf16.mxu1 %v6820_v29  ;;  %v6856_v55 = vld [vmem:[#allocation5 + $0x344] ss:$16 sps:$4 sm:$0xff]   ;;  %v6864_v60 = vld [vmem:[#allocation5 + $0x120] ss:$16 sps:$4 sm:$0xff]   ;;  %v6916_v28 = vld [vmem:[#allocation5 + $0x2c] ss:$16 sps:$4 sm:$0xff]  }
  0xb2   :  { %v6860_v58 = vld [vmem:[#allocation5 + $0x124] ss:$16 sps:$4 sm:$0xff]   ;;  %v6865_v61 = vld [vmem:[#allocation5 + $0x320] ss:$16 sps:$4 sm:$0xff]   ;;  %v6919_v29 = vld [vmem:[#allocation5 + $0x22c] ss:$16 sps:$4 sm:$0xff]  }
  0xb3   :  { %1035 = vmatpush1.bf16.msra.mxu0 %v6822_v30  ;;  %v6862_v59 = vld [vmem:[#allocation5 + $0x324] ss:$16 sps:$4 sm:$0xff]   ;;  %v6870_v0 = vld [vmem:[#allocation5 + $0x100] ss:$16 sps:$4 sm:$0xff]   ;;  %v6914_v30 = vld [vmem:[#allocation5 + $0x28] ss:$16 sps:$4 sm:$0xff]  }
  0xb4   :  { %1078 = vmatpush1.bf16.msra.mxu1 %v6823_v31  ;;  %1036 = vmatprep.subr.bf16.mxu0 %v6824_v32  ;;  %v6866_v62 = vld [vmem:[#allocation5 + $0x104] ss:$16 sps:$4 sm:$0xff]   ;;  %v6871_v1 = vld [vmem:[#allocation5 + $0x300] ss:$16 sps:$4 sm:$0xff]   ;;  %v6917_v31 = vld [vmem:[#allocation5 + $0x228] ss:$16 sps:$4 sm:$0xff]  }
  0xb5   :  { %1079 = vmatprep.subr.bf16.mxu1 %v6826_v33  ;;  %v6868_v63 = vld [vmem:[#allocation5 + $0x304] ss:$16 sps:$4 sm:$0xff]   ;;  %v8231_v4 = vld [vmem:[#allocation2] ss:$16 sps:$4 sm:$0xff]   ;;  %v6922_v32 = vld [vmem:[#allocation5 + $0xc] ss:$16 sps:$4 sm:$0xff]  }
  0xb6   :  { %v6925_v33 = vld [vmem:[#allocation5 + $0x20c] ss:$16 sps:$4 sm:$0xff]   ;;  %s5877_s11 = sshll.u32 %s8099_s10, 4  ;;  %s5878_s11 = int_to_ptr.vmem [resolvable:$true] %s5877_s11 }
  0xb7   :  { %1037 = vmatpush2.bf16.msra.mxu0 %v6828_v34  ;;  %v6920_v34 = vld [vmem:[#allocation5 + $0x8] ss:$16 sps:$4 sm:$0xff]   ;;  %s8038_s23 = scalar_lea.vmem %s5878_s11, 256  ;;  %p8043_p5 = scmp.lt.s32.totalorder %s5878_s11, %s5878_s11 }
  0xb8   :  { %1080 = vmatpush2.bf16.msra.mxu1 %v6829_v35  ;;  %1038 = vmatprep.subr.bf16.mxu0 %v6830_v36  ;;  %v6923_v35 = vld [vmem:[#allocation5 + $0x208] ss:$16 sps:$4 sm:$0xff]   ;;  %v6928_v36 = vld [vmem:[#allocation5 + $0x1ec] ss:$16 sps:$4 sm:$0xff]   ;;  %p8039_p4 = scmp.ne.s32.totalorder %s5878_s11, %s8038_s23  ;;  %p8044_p6 = scmp.lt.s32.totalorder %s8038_s23, %s8038_s23 }
  0xb9   :  { %1081 = vmatprep.subr.bf16.mxu1 %v6832_v37  ;;  %v6931_v37 = vld [vmem:[#allocation5 + $0x3ec] ss:$16 sps:$4 sm:$0xff]  }
  0xba   :  { %p8045_p7 = por %p8044_p6, %p8043_p5 }
  0xbb   :  { %1039 = vmatpush2.bf16.msra.mxu0 %v6834_v38  ;;  %v6926_v38 = vld [vmem:[#allocation5 + $0x1e8] ss:$16 sps:$4 sm:$0xff]  }
  0xbc   :  { %1082 = vmatpush2.bf16.msra.mxu1 %v6835_v39  ;;  %1040 = vmatprep.subr.bf16.mxu0 %v6836_v40  ;;  %v6929_v39 = vld [vmem:[#allocation5 + $0x3e8] ss:$16 sps:$4 sm:$0xff]   ;;  %v6934_v40 = vld [vmem:[#allocation5 + $0x1cc] ss:$16 sps:$4 sm:$0xff]   ;;  %p8046_p8 = pnand %p8045_p7, %p8039_p4 }
  0xbd   :  { %1083 = vmatprep.subr.bf16.mxu1 %v6838_v41  ;;  %v6937_v41 = vld [vmem:[#allocation5 + $0x3cc] ss:$16 sps:$4 sm:$0xff]  }
  0xbf   :  { %1041 = vmatpush2.bf16.msra.mxu0 %v6840_v42  ;;  %v6932_v42 = vld [vmem:[#allocation5 + $0x1c8] ss:$16 sps:$4 sm:$0xff]  }
  0xc0   :  { %1084 = vmatpush2.bf16.msra.mxu1 %v6841_v43  ;;  %1042 = vmatprep.subr.bf16.mxu0 %v6842_v44  ;;  %v6935_v43 = vld [vmem:[#allocation5 + $0x3c8] ss:$16 sps:$4 sm:$0xff]   ;;  %v6940_v44 = vld [vmem:[#allocation5 + $0x1ac] ss:$16 sps:$4 sm:$0xff]  }
  0xc1   :  { %1085 = vmatprep.subr.bf16.mxu1 %v6844_v45  ;;  %v6943_v45 = vld [vmem:[#allocation5 + $0x3ac] ss:$16 sps:$4 sm:$0xff]  }
  0xc3   :  { %1043 = vmatpush2.bf16.msra.mxu0 %v6846_v46  ;;  %v6938_v46 = vld [vmem:[#allocation5 + $0x1a8] ss:$16 sps:$4 sm:$0xff]  }
  0xc4   :  { %1086 = vmatpush2.bf16.msra.mxu1 %v6847_v47  ;;  %1044 = vmatprep.subr.bf16.mxu0 %v6848_v48  ;;  %v6941_v47 = vld [vmem:[#allocation5 + $0x3a8] ss:$16 sps:$4 sm:$0xff]   ;;  %v6946_v48 = vld [vmem:[#allocation5 + $0x18c] ss:$16 sps:$4 sm:$0xff]  }
  0xc5   :  { %1087 = vmatprep.subr.bf16.mxu1 %v6850_v50  ;;  %v6944_v50 = vld [vmem:[#allocation5 + $0x188] ss:$16 sps:$4 sm:$0xff]  }
  0xc7   :  { %1045 = vmatpush2.bf16.msra.mxu0 %v6852_v52  ;;  %v6952_v52 = vld [vmem:[#allocation5 + $0x16c] ss:$16 sps:$4 sm:$0xff]  }
  0xc8   :  { %1088 = vmatpush2.bf16.msra.mxu1 %v6853_v53  ;;  %1046 = vmatprep.subr.bf16.mxu0 %v6854_v54  ;;  %v6955_v53 = vld [vmem:[#allocation5 + $0x36c] ss:$16 sps:$4 sm:$0xff]   ;;  %v6950_v54 = vld [vmem:[#allocation5 + $0x168] ss:$16 sps:$4 sm:$0xff]  }
  0xc9   :  { %1089 = vmatprep.subr.bf16.mxu1 %v6856_v55  ;;  %v6953_v55 = vld [vmem:[#allocation5 + $0x368] ss:$16 sps:$4 sm:$0xff]  }
  0xcb   :  { %1047 = vmatpush2.bf16.msra.mxu0 %v6858_v56  ;;  %v6958_v56 = vld [vmem:[#allocation5 + $0x14c] ss:$16 sps:$4 sm:$0xff]  }
  0xcc   :  { %1090 = vmatpush2.bf16.msra.mxu1 %v6859_v57  ;;  %1048 = vmatprep.subr.bf16.mxu0 %v6860_v58  ;;  %v6961_v57 = vld [vmem:[#allocation5 + $0x34c] ss:$16 sps:$4 sm:$0xff]   ;;  %v6956_v58 = vld [vmem:[#allocation5 + $0x148] ss:$16 sps:$4 sm:$0xff]  }
  0xcd   :  { %1091 = vmatprep.subr.bf16.mxu1 %v6862_v59  ;;  %v6959_v59 = vld [vmem:[#allocation5 + $0x348] ss:$16 sps:$4 sm:$0xff]  }
  0xcf   :  { %1049 = vmatpush2.bf16.msra.mxu0 %v6864_v60  ;;  %v6964_v60 = vld [vmem:[#allocation5 + $0x12c] ss:$16 sps:$4 sm:$0xff]  }
  0xd0   :  { %1092 = vmatpush2.bf16.msra.mxu1 %v6865_v61  ;;  %1050 = vmatprep.subr.bf16.mxu0 %v6866_v62  ;;  %v6967_v61 = vld [vmem:[#allocation5 + $0x32c] ss:$16 sps:$4 sm:$0xff]   ;;  %v6962_v62 = vld [vmem:[#allocation5 + $0x128] ss:$16 sps:$4 sm:$0xff]  }
  0xd1   :  { %1093 = vmatprep.subr.bf16.mxu1 %v6868_v63  ;;  %v6965_v63 = vld [vmem:[#allocation5 + $0x328] ss:$16 sps:$4 sm:$0xff]  }
  0xd3   :  { %1051 = vmatpush2.bf16.msra.mxu0 %v6870_v0  ;;  %v6970_v0 = vld [vmem:[#allocation5 + $0x10c] ss:$16 sps:$4 sm:$0xff]  }
  0xd4   :  { %1094 = vmatpush2.bf16.msra.mxu1 %v6871_v1  ;;  %1106 = vmatprep.subr.bf16.mxu0 %v6880_v2  ;;  %v6973_v1 = vld [vmem:[#allocation5 + $0x30c] ss:$16 sps:$4 sm:$0xff]   ;;  %v6968_v2 = vld [vmem:[#allocation5 + $0x108] ss:$16 sps:$4 sm:$0xff]  }
  0xd5   :  { %1149 = vmatprep.subr.bf16.mxu1 %v6883_v3  ;;  %v6971_v3 = vld [vmem:[#allocation5 + $0x308] ss:$16 sps:$4 sm:$0xff]  }
  0xd6   :  { %1053 = vmatmul.mubr.bf16.vlgmr.msra.gmra.mxu0 %v8231_v4 }
  0xd7   :  { %1096 = vmatmul.mubr.bf16.vlgmr.msra.gmra.mxu1 %v8233_v5  ;;  %1107 = vmatpush1.bf16.msra.mxu0 %v6878_v6  ;;  %v6976_v6 = vld [vmem:[#allocation7 + $0xe4] ss:$16 sps:$4 sm:$0xff]  }
  0xd8   :  { %1150 = vmatpush1.bf16.msra.mxu1 %v6881_v7  ;;  %1108 = vmatprep.subr.bf16.mxu0 %v6886_v8  ;;  %v6974_v7 = vld [vmem:[#allocation7 + $0xe0] ss:$16 sps:$4 sm:$0xff]   ;;  %v6979_v8 = vld [vmem:[#allocation7 + $0xc4] ss:$16 sps:$4 sm:$0xff]  }
  0xd9   :  { %1151 = vmatprep.subr.bf16.mxu1 %v6889_v9  ;;  %1138 = vmatprep.mubr.bf16.mxu0 %v6874_v49  ;;  %v6949_v49 = vld [vmem:[#allocation5 + $0x38c] ss:$16 sps:$4 sm:$0xff]   ;;  %v6977_v9 = vld [vmem:[#allocation7 + $0xc0] ss:$16 sps:$4 sm:$0xff]  }
  0xda   :  { %1181 = vmatprep.mubr.bf16.mxu1 %v6877_v51  ;;  %v6947_v51 = vld [vmem:[#allocation5 + $0x388] ss:$16 sps:$4 sm:$0xff]  }
  0xdb   :  { %1109 = vmatpush1.bf16.msra.mxu0 %v6884_v10  ;;  %v6982_v10 = vld [vmem:[#allocation7 + $0xa4] ss:$16 sps:$4 sm:$0xff]  }
  0xdc   :  { %1152 = vmatpush1.bf16.msra.mxu1 %v6887_v11  ;;  %1110 = vmatprep.subr.bf16.mxu0 %v6892_v12  ;;  %v6980_v11 = vld [vmem:[#allocation7 + $0xa0] ss:$16 sps:$4 sm:$0xff]   ;;  %v6985_v12 = vld [vmem:[#allocation7 + $0x84] ss:$16 sps:$4 sm:$0xff]  }
  0xdd   :  { %1153 = vmatprep.subr.bf16.mxu1 %v6895_v13  ;;  %v6983_v13 = vld [vmem:[#allocation7 + $0x80] ss:$16 sps:$4 sm:$0xff]  }
  0xdf   :  { %1111 = vmatpush1.bf16.msra.mxu0 %v6890_v14  ;;  %v6988_v14 = vld [vmem:[#allocation7 + $0x64] ss:$16 sps:$4 sm:$0xff]  }
  0xe0   :  { %1154 = vmatpush1.bf16.msra.mxu1 %v6893_v15  ;;  %1112 = vmatprep.subr.bf16.mxu0 %v6898_v16  ;;  %v6986_v15 = vld [vmem:[#allocation7 + $0x60] ss:$16 sps:$4 sm:$0xff]   ;;  %v7024_v16 = vld [vmem:[#allocation7 + $0x2e4] ss:$16 sps:$4 sm:$0xff]  }
  0xe1   :  { %1155 = vmatprep.subr.bf16.mxu1 %v6901_v17  ;;  %v6991_v17 = vld [vmem:[#allocation7 + $0x44] ss:$16 sps:$4 sm:$0xff]  }
  0xe3   :  { %1113 = vmatpush1.bf16.msra.mxu0 %v6896_v18  ;;  %v7028_v18 = vld [vmem:[#allocation7 + $0x2c0] ss:$16 sps:$4 sm:$0xff]  }
  0xe4   :  { %1156 = vmatpush1.bf16.msra.mxu1 %v6899_v19  ;;  %1114 = vmatprep.subr.bf16.mxu0 %v6904_v20  ;;  %v7030_v19 = vld [vmem:[#allocation7 + $0x2c4] ss:$16 sps:$4 sm:$0xff]  }
  0xe5   :  { %1157 = vmatprep.subr.bf16.mxu1 %v6907_v21  ;;  %v6994_v20 = vld [vmem:[#allocation7 + $0x24] ss:$16 sps:$4 sm:$0xff]   ;;  %v6992_v21 = vld [vmem:[#allocation7 + $0x20] ss:$16 sps:$4 sm:$0xff]  }
  0xe7   :  { %1115 = vmatpush1.bf16.msra.mxu0 %v6902_v22  ;;  %v7034_v22 = vld [vmem:[#allocation7 + $0x2a0] ss:$16 sps:$4 sm:$0xff]  }
  0xe8   :  { %1158 = vmatpush1.bf16.msra.mxu1 %v6905_v23  ;;  %1116 = vmatprep.subr.bf16.mxu0 %v6910_v24  ;;  %v7036_v23 = vld [vmem:[#allocation7 + $0x2a4] ss:$16 sps:$4 sm:$0xff]  }
  0xe9   :  { %1159 = vmatprep.subr.bf16.mxu1 %v6913_v25  ;;  %v6997_v24 = vld [vmem:[#allocation7 + $0x4] ss:$16 sps:$4 sm:$0xff]   ;;  %v6995_v25 = vld [vmem:[#allocation7] ss:$16 sps:$4 sm:$0xff]  }
  0xeb   :  { %1117 = vmatpush1.bf16.msra.mxu0 %v6908_v26  ;;  %v7040_v26 = vld [vmem:[#allocation7 + $0x280] ss:$16 sps:$4 sm:$0xff]  }
  0xec   :  { %1160 = vmatpush1.bf16.msra.mxu1 %v6911_v27  ;;  %1118 = vmatprep.subr.bf16.mxu0 %v6916_v28  ;;  %v7042_v27 = vld [vmem:[#allocation7 + $0x284] ss:$16 sps:$4 sm:$0xff]  }
  0xed   :  { %1161 = vmatprep.subr.bf16.mxu1 %v6919_v29  ;;  %v7000_v28 = vld [vmem:[#allocation7 + $0x1e4] ss:$16 sps:$4 sm:$0xff]   ;;  %v6998_v29 = vld [vmem:[#allocation7 + $0x1e0] ss:$16 sps:$4 sm:$0xff]  }
  0xef   :  { %1119 = vmatpush1.bf16.msra.mxu0 %v6914_v30  ;;  %v7046_v30 = vld [vmem:[#allocation7 + $0x260] ss:$16 sps:$4 sm:$0xff]  }
  0xf0   :  { %1162 = vmatpush1.bf16.msra.mxu1 %v6917_v31  ;;  %1120 = vmatprep.subr.bf16.mxu0 %v6922_v32  ;;  %v7048_v31 = vld [vmem:[#allocation7 + $0x264] ss:$16 sps:$4 sm:$0xff]  }
  0xf1   :  { %1163 = vmatprep.subr.bf16.mxu1 %v6925_v33  ;;  %v7003_v32 = vld [vmem:[#allocation7 + $0x1c4] ss:$16 sps:$4 sm:$0xff]   ;;  %v7001_v33 = vld [vmem:[#allocation7 + $0x1c0] ss:$16 sps:$4 sm:$0xff]  }
  0xf3   :  { %1121 = vmatpush1.bf16.msra.mxu0 %v6920_v34  ;;  %v7052_v34 = vld [vmem:[#allocation7 + $0x240] ss:$16 sps:$4 sm:$0xff]  }
  0xf4   :  { %1164 = vmatpush1.bf16.msra.mxu1 %v6923_v35  ;;  %1122 = vmatprep.subr.bf16.mxu0 %v6928_v36  ;;  %v7054_v35 = vld [vmem:[#allocation7 + $0x244] ss:$16 sps:$4 sm:$0xff]  }
  0xf5   :  { %1165 = vmatprep.subr.bf16.mxu1 %v6931_v37  ;;  %v7006_v36 = vld [vmem:[#allocation7 + $0x1a4] ss:$16 sps:$4 sm:$0xff]   ;;  %v7004_v37 = vld [vmem:[#allocation7 + $0x1a0] ss:$16 sps:$4 sm:$0xff]  }
  0xf7   :  { %1123 = vmatpush2.bf16.msra.mxu0 %v6926_v38  ;;  %v7058_v38 = vld [vmem:[#allocation7 + $0x220] ss:$16 sps:$4 sm:$0xff]  }
  0xf8   :  { %1166 = vmatpush2.bf16.msra.mxu1 %v6929_v39  ;;  %1124 = vmatprep.subr.bf16.mxu0 %v6934_v40  ;;  %v7060_v39 = vld [vmem:[#allocation7 + $0x224] ss:$16 sps:$4 sm:$0xff]  }
  0xf9   :  { %1167 = vmatprep.subr.bf16.mxu1 %v6937_v41  ;;  %v7009_v40 = vld [vmem:[#allocation7 + $0x184] ss:$16 sps:$4 sm:$0xff]   ;;  %v7007_v41 = vld [vmem:[#allocation7 + $0x180] ss:$16 sps:$4 sm:$0xff]  }
  0xfb   :  { %1125 = vmatpush2.bf16.msra.mxu0 %v6932_v42  ;;  %v7064_v42 = vld [vmem:[#allocation7 + $0x200] ss:$16 sps:$4 sm:$0xff]  }
  0xfc   :  { %1168 = vmatpush2.bf16.msra.mxu1 %v6935_v43  ;;  %1126 = vmatprep.subr.bf16.mxu0 %v6940_v44  ;;  %v7066_v43 = vld [vmem:[#allocation7 + $0x204] ss:$16 sps:$4 sm:$0xff]  }
  0xfd   :  { %1169 = vmatprep.subr.bf16.mxu1 %v6943_v45  ;;  %v7012_v44 = vld [vmem:[#allocation7 + $0x164] ss:$16 sps:$4 sm:$0xff]   ;;  %v7010_v45 = vld [vmem:[#allocation7 + $0x160] ss:$16 sps:$4 sm:$0xff]  }
  0xff   :  { %1127 = vmatpush2.bf16.msra.mxu0 %v6938_v46  ;;  %v7070_v46 = vld [vmem:[#allocation7 + $0x3e0] ss:$16 sps:$4 sm:$0xff]  }
 0x100   :  { %1170 = vmatpush2.bf16.msra.mxu1 %v6941_v47  ;;  %1128 = vmatprep.subr.bf16.mxu0 %v6946_v48  ;;  %v7072_v47 = vld [vmem:[#allocation7 + $0x3e4] ss:$16 sps:$4 sm:$0xff]  }
 0x101   :  { %1171 = vmatprep.subr.bf16.mxu1 %v6949_v49  ;;  %v7015_v48 = vld [vmem:[#allocation7 + $0x144] ss:$16 sps:$4 sm:$0xff]   ;;  %v7013_v49 = vld [vmem:[#allocation7 + $0x140] ss:$16 sps:$4 sm:$0xff]  }
 0x103   :  { %1129 = vmatpush2.bf16.msra.mxu0 %v6944_v50  ;;  %v7076_v50 = vld [vmem:[#allocation7 + $0x3c0] ss:$16 sps:$4 sm:$0xff]  }
 0x104   :  { %1172 = vmatpush2.bf16.msra.mxu1 %v6947_v51  ;;  %1130 = vmatprep.subr.bf16.mxu0 %v6952_v52  ;;  %v7078_v51 = vld [vmem:[#allocation7 + $0x3c4] ss:$16 sps:$4 sm:$0xff]  }
 0x105   :  { %1173 = vmatprep.subr.bf16.mxu1 %v6955_v53  ;;  %v7018_v52 = vld [vmem:[#allocation7 + $0x124] ss:$16 sps:$4 sm:$0xff]   ;;  %v7016_v53 = vld [vmem:[#allocation7 + $0x120] ss:$16 sps:$4 sm:$0xff]  }
 0x107   :  { %1131 = vmatpush2.bf16.msra.mxu0 %v6950_v54  ;;  %v7082_v54 = vld [vmem:[#allocation7 + $0x3a0] ss:$16 sps:$4 sm:$0xff]  }
 0x108   :  { %1174 = vmatpush2.bf16.msra.mxu1 %v6953_v55  ;;  %1132 = vmatprep.subr.bf16.mxu0 %v6958_v56  ;;  %v7084_v55 = vld [vmem:[#allocation7 + $0x3a4] ss:$16 sps:$4 sm:$0xff]  }
 0x109   :  { %1175 = vmatprep.subr.bf16.mxu1 %v6961_v57  ;;  %v7021_v56 = vld [vmem:[#allocation7 + $0x104] ss:$16 sps:$4 sm:$0xff]   ;;  %v7019_v57 = vld [vmem:[#allocation7 + $0x100] ss:$16 sps:$4 sm:$0xff]  }
 0x10b   :  { %1133 = vmatpush2.bf16.msra.mxu0 %v6956_v58  ;;  %v7088_v58 = vld [vmem:[#allocation7 + $0x380] ss:$16 sps:$4 sm:$0xff]  }
 0x10c   :  { %1176 = vmatpush2.bf16.msra.mxu1 %v6959_v59  ;;  %1134 = vmatprep.subr.bf16.mxu0 %v6964_v60  ;;  %v7090_v59 = vld [vmem:[#allocation7 + $0x384] ss:$16 sps:$4 sm:$0xff]   ;;  %v7027_v60 = vld [vmem:[#allocation7 + $0xec] ss:$16 sps:$4 sm:$0xff]  }
 0x10d   :  { %1177 = vmatprep.subr.bf16.mxu1 %v6967_v61  ;;  %v7094_v61 = vld [vmem:[#allocation7 + $0x360] ss:$16 sps:$4 sm:$0xff]  }
 0x10f   :  { %1135 = vmatpush2.bf16.msra.mxu0 %v6962_v62  ;;  %v7096_v62 = vld [vmem:[#allocation7 + $0x364] ss:$16 sps:$4 sm:$0xff]  }
 0x110   :  { %1178 = vmatpush2.bf16.msra.mxu1 %v6965_v63  ;;  %1136 = vmatprep.subr.bf16.mxu0 %v6970_v0  ;;  %v7102_v63 = vld [vmem:[#allocation7 + $0x344] ss:$16 sps:$4 sm:$0xff]   ;;  %v7100_v0 = vld [vmem:[#allocation7 + $0x340] ss:$16 sps:$4 sm:$0xff]  }
 0x111   :  { %1179 = vmatprep.subr.bf16.mxu1 %v6973_v1  ;;  %v7108_v1 = vld [vmem:[#allocation7 + $0x324] ss:$16 sps:$4 sm:$0xff]  }
 0x113   :  { %1137 = vmatpush2.bf16.msra.mxu0 %v6968_v2  ;;  %v7106_v2 = vld [vmem:[#allocation7 + $0x320] ss:$16 sps:$4 sm:$0xff]  }
 0x114   :  { %1180 = vmatpush2.bf16.msra.mxu1 %v6971_v3  ;;  %1995 = vmatprep.subr.bf16.mxu0 %v6976_v6  ;;  %v7114_v3 = vld [vmem:[#allocation7 + $0x304] ss:$16 sps:$4 sm:$0xff]   ;;  %v7112_v6 = vld [vmem:[#allocation7 + $0x300] ss:$16 sps:$4 sm:$0xff]  }
 0x115   :  { %2038 = vmatprep.subr.bf16.mxu1 %v7024_v16 }
 0x116   :  { %1139 = vmatmul.mubr.bf16.vlgmr.msra.gmra.mxu0 %v8231_v4  ;;  %v7022_v4 = vld [vmem:[#allocation7 + $0x2e0] ss:$16 sps:$4 sm:$0xff]  }
 0x117   :  { %1182 = vmatmul.mubr.bf16.vlgmr.msra.gmra.mxu1 %v8233_v5  ;;  %1996 = vmatpush1.bf16.msra.mxu0 %v6974_v7  ;;  %v6989_v5 = vld [vmem:[#allocation7 + $0x40] ss:$16 sps:$4 sm:$0xff]   ;;  %v7120_v7 = vld [vmem:[#allocation7 + $0x2ec] ss:$16 sps:$4 sm:$0xff]  }
 0x118   :  { %1997 = vmatprep.subr.bf16.mxu0 %v6979_v8  ;;  %2039 = vmatpush1.bf16.msra.mxu1 %v7022_v4  ;;  %v340_v8 = vlaneseq }
 0x119   :  { %2040 = vmatprep.subr.bf16.mxu1 %v7030_v19 }
 0x11b   :  { %1998 = vmatpush1.bf16.msra.mxu0 %v6977_v9  ;;  %v8239_v9 = vshrl.u32 %v340_v8, 7 }
 0x11c   :  { %1999 = vmatprep.subr.bf16.mxu0 %v6982_v10  ;;  %2041 = vmatpush1.bf16.msra.mxu1 %v7028_v18  ;;  %v8241_v10 = vld [vmem:[#allocation20] ss:$8 sm:$0xf] }
 0x11d   :  { %2042 = vmatprep.subr.bf16.mxu1 %v7036_v23 }
 0x11f   :  { %2000 = vmatpush1.bf16.msra.mxu0 %v6980_v11  ;;  %v8244_v11 = vsub.s32 1, %v8239_v9 }
 0x120   :  { %2001 = vmatprep.subr.bf16.mxu0 %v6985_v12  ;;  %2043 = vmatpush1.bf16.msra.mxu1 %v7034_v22  ;;  %v8247_v12 = vsub.s32 0, %v8239_v9 }
 0x121   :  { %2044 = vmatprep.subr.bf16.mxu1 %v7042_v27 }
 0x123   :  { %2002 = vmatpush1.bf16.msra.mxu0 %v6983_v13  ;;  %v347_v13 = vrot.slane %v8241_v10, %v8244_v11 }
 0x124   :  { %2003 = vmatprep.subr.bf16.mxu0 %v6988_v14  ;;  %2045 = vmatpush1.bf16.msra.mxu1 %v7040_v26  ;;  %v343_v14 = vrot.slane %v8241_v10, %v8247_v12 }
 0x125   :  { %2046 = vmatprep.subr.bf16.mxu1 %v7048_v31 }
 0x127   :  { %2004 = vmatpush1.bf16.msra.mxu0 %v6986_v15 }
 0x128   :  { %2005 = vmatprep.subr.bf16.mxu0 %v6991_v17  ;;  %2047 = vmatpush1.bf16.msra.mxu1 %v7046_v30 }
 0x129   :  { %2048 = vmatprep.subr.bf16.mxu1 %v7054_v35 }
 0x12b   :  { %2006 = vmatpush1.bf16.msra.mxu0 %v6989_v5 }
 0x12c   :  { %2007 = vmatprep.subr.bf16.mxu0 %v6994_v20  ;;  %2049 = vmatpush1.bf16.msra.mxu1 %v7052_v34  ;;  %v7033_v34 = vld [vmem:[#allocation7 + $0xcc] ss:$16 sps:$4 sm:$0xff]  }
 0x12d   :  { %2050 = vmatprep.subr.bf16.mxu1 %v7060_v39  ;;  %v7037_v39 = vld [vmem:[#allocation7 + $0xa8] ss:$16 sps:$4 sm:$0xff]  }
 0x12f   :  { %2008 = vmatpush1.bf16.msra.mxu0 %v6992_v21 }
 0x130   :  { %2009 = vmatprep.subr.bf16.mxu0 %v6997_v24  ;;  %2051 = vmatpush1.bf16.msra.mxu1 %v7058_v38  ;;  %v7039_v38 = vld [vmem:[#allocation7 + $0xac] ss:$16 sps:$4 sm:$0xff]  }
 0x131   :  { %2052 = vmatprep.subr.bf16.mxu1 %v7066_v43  ;;  %v7049_v43 = vld [vmem:[#allocation7 + $0x68] ss:$16 sps:$4 sm:$0xff]  }
 0x133   :  { %2010 = vmatpush1.bf16.msra.mxu0 %v6995_v25 }
 0x134   :  { %2011 = vmatprep.subr.bf16.mxu0 %v7000_v28  ;;  %2053 = vmatpush1.bf16.msra.mxu1 %v7064_v42  ;;  %v7051_v42 = vld [vmem:[#allocation7 + $0x6c] ss:$16 sps:$4 sm:$0xff]  }
 0x135   :  { %2054 = vmatprep.subr.bf16.mxu1 %v7072_v47  ;;  %v7061_v47 = vld [vmem:[#allocation7 + $0x28] ss:$16 sps:$4 sm:$0xff]  }
 0x137   :  { %2012 = vmatpush2.bf16.msra.mxu0 %v6998_v29 }
 0x138   :  { %2013 = vmatprep.subr.bf16.mxu0 %v7003_v32  ;;  %2055 = vmatpush2.bf16.msra.mxu1 %v7070_v46  ;;  %v7025_v32 = vld [vmem:[#allocation7 + $0xe8] ss:$16 sps:$4 sm:$0xff]   ;;  %v7063_v46 = vld [vmem:[#allocation7 + $0x2c] ss:$16 sps:$4 sm:$0xff]  }
 0x139   :  { %2056 = vmatprep.subr.bf16.mxu1 %v7078_v51  ;;  %v7073_v51 = vld [vmem:[#allocation7 + $0x1e8] ss:$16 sps:$4 sm:$0xff]  }
 0x13b   :  { %2014 = vmatpush2.bf16.msra.mxu0 %v7001_v33 }
 0x13c   :  { %2015 = vmatprep.subr.bf16.mxu0 %v7006_v36  ;;  %2057 = vmatpush2.bf16.msra.mxu1 %v7076_v50  ;;  %v7075_v50 = vld [vmem:[#allocation7 + $0x1ec] ss:$16 sps:$4 sm:$0xff]  }
 0x13d   :  { %2058 = vmatprep.subr.bf16.mxu1 %v7084_v55  ;;  %v7085_v55 = vld [vmem:[#allocation7 + $0x1a8] ss:$16 sps:$4 sm:$0xff]  }
 0x13f   :  { %2016 = vmatpush2.bf16.msra.mxu0 %v7004_v37  ;;  %v7031_v37 = vld [vmem:[#allocation7 + $0xc8] ss:$16 sps:$4 sm:$0xff]  }
 0x140   :  { %2017 = vmatprep.subr.bf16.mxu0 %v7009_v40  ;;  %2059 = vmatpush2.bf16.msra.mxu1 %v7082_v54  ;;  %v7045_v40 = vld [vmem:[#allocation7 + $0x8c] ss:$16 sps:$4 sm:$0xff]  }
 0x141   :  { %2060 = vmatprep.subr.bf16.mxu1 %v7090_v59  ;;  %v7087_v54 = vld [vmem:[#allocation7 + $0x1ac] ss:$16 sps:$4 sm:$0xff]   ;;  %v8257_v59 = vsub.s32 2, %v8239_v9 }
 0x143   :  { %2018 = vmatpush2.bf16.msra.mxu0 %v7007_v41  ;;  %v7043_v41 = vld [vmem:[#allocation7 + $0x88] ss:$16 sps:$4 sm:$0xff]  }
 0x144   :  { %2019 = vmatprep.subr.bf16.mxu0 %v7012_v44  ;;  %2061 = vmatpush2.bf16.msra.mxu1 %v7088_v58  ;;  %v7057_v44 = vld [vmem:[#allocation7 + $0x4c] ss:$16 sps:$4 sm:$0xff]  }
 0x145   :  { %2062 = vmatprep.subr.bf16.mxu1 %v7096_v62  ;;  %v7099_v58 = vld [vmem:[#allocation7 + $0x16c] ss:$16 sps:$4 sm:$0xff]  }
 0x146   :  { %v7105_v62 = vld [vmem:[#allocation7 + $0x14c] ss:$16 sps:$4 sm:$0xff]  }
 0x147   :  { %2020 = vmatpush2.bf16.msra.mxu0 %v7010_v45  ;;  %v7055_v45 = vld [vmem:[#allocation7 + $0x48] ss:$16 sps:$4 sm:$0xff]  }
 0x148   :  { %2021 = vmatprep.subr.bf16.mxu0 %v7015_v48  ;;  %2063 = vmatpush2.bf16.msra.mxu1 %v7094_v61  ;;  %v7069_v48 = vld [vmem:[#allocation7 + $0xc] ss:$16 sps:$4 sm:$0xff]   ;;  %v7097_v61 = vld [vmem:[#allocation7 + $0x168] ss:$16 sps:$4 sm:$0xff]  }
 0x149   :  { %2064 = vmatprep.subr.bf16.mxu1 %v7102_v63  ;;  %v351_v63 = vrot.slane %v8241_v10, %v8257_v59 }
 0x14b   :  { %2022 = vmatpush2.bf16.msra.mxu0 %v7013_v49  ;;  %v7067_v49 = vld [vmem:[#allocation7 + $0x8] ss:$16 sps:$4 sm:$0xff]  }
 0x14c   :  { %2023 = vmatprep.subr.bf16.mxu0 %v7018_v52  ;;  %2065 = vmatpush2.bf16.msra.mxu1 %v7100_v0  ;;  %v7081_v52 = vld [vmem:[#allocation7 + $0x1cc] ss:$16 sps:$4 sm:$0xff]  }
 0x14d   :  { %2066 = vmatprep.subr.bf16.mxu1 %v7108_v1  ;;  %v7103_v1 = vld [vmem:[#allocation7 + $0x148] ss:$16 sps:$4 sm:$0xff]  }
 0x14f   :  { %2024 = vmatpush2.bf16.msra.mxu0 %v7016_v53  ;;  %v7079_v53 = vld [vmem:[#allocation7 + $0x1c8] ss:$16 sps:$4 sm:$0xff]  }
 0x150   :  { %2025 = vmatprep.subr.bf16.mxu0 %v7021_v56  ;;  %2067 = vmatpush2.bf16.msra.mxu1 %v7106_v2  ;;  %v7093_v56 = vld [vmem:[#allocation7 + $0x18c] ss:$16 sps:$4 sm:$0xff]  }
 0x151   :  { %2068 = vmatprep.subr.bf16.mxu1 %v7114_v3 }
 0x153   :  { %2026 = vmatpush2.bf16.msra.mxu0 %v7019_v57  ;;  %v7091_v57 = vld [vmem:[#allocation7 + $0x188] ss:$16 sps:$4 sm:$0xff]  }
 0x154   :  { %2081 = vmatprep.subr.bf16.mxu0 %v7027_v60  ;;  %2069 = vmatpush2.bf16.msra.mxu1 %v7112_v6  ;;  %v8260_v60 = vsub.s32 3, %v8239_v9  ;;  %v7111_v6 = vld [vmem:[#allocation7 + $0x12c] ss:$16 sps:$4 sm:$0xff]  }
 0x155   :  { %2124 = vmatprep.subr.bf16.mxu1 %v7120_v7 }
 0x156   :  { %v355_v0 = vrot.slane %v8241_v10, %v8260_v60 }
 0x196   :  { %v1054_v15 = vpop.f32.mrf.mxu0 }
 0x197   :  { %v1097_v16 = vpop.f32.mrf.mxu1  ;;  %v1055_v18 = vadd.f32 %v1054_v15, %v343_v14 }
 0x198   :  { %v1056_v17 = vpop.f32.mrf.mxu0 }
 0x199   :  { %v1099_v4 = vpop.f32.mrf.mxu1  ;;  %v1057_v5 = vadd.f32 %v1056_v17, %v347_v13  ;;  %v1098_v26 = vadd.f32 %v1097_v16, %v1055_v18 }
 0x19a   :  { %v1058_v19 = vpop.f32.mrf.mxu0 }
 0x19b   :  { %v1101_v20 = vpop.f32.mrf.mxu1  ;;  %v1059_v21 = vadd.f32 %v1058_v19, %v343_v14  ;;  %v1100_v22 = vadd.f32 %v1099_v4, %v1057_v5  ;;  %v1192_v33 = vmax.f32 %v1098_v26, 0.0  ;;  %v7109_v14 = vld [vmem:[#allocation7 + $0x128] ss:$16 sps:$4 sm:$0xff]   ;;  %v7117_v5 = vld [vmem:[#allocation7 + $0x10c] ss:$16 sps:$4 sm:$0xff]  }
 0x19c   :  { %v1060_v23 = vpop.f32.mrf.mxu0 }
 0x19d   :  { %v1102_v24 = vadd.f32 %v1101_v20, %v1059_v21  ;;  %v1061_v25 = vadd.f32 %v1060_v23, %v347_v13  ;;  %v1103_v27 = vpop.f32.mrf.mxu1  ;;  %v1193_v29 = vmax.f32 %v1100_v22, 0.0  ;;  %v7115_v21 = vld [vmem:[#allocation7 + $0x108] ss:$16 sps:$4 sm:$0xff]  }
 0x19f   :  { %v1104_v28 = vadd.f32 %v1103_v27, %v1061_v25  ;;  %v1196_v30 = vmax.f32 %v1102_v24, 0.0 }
 0x1a1   :  { %v1197_v31 = vmax.f32 %v1104_v28, 0.0  ;;  %v8253_v36 = vpack.c.bf16 %v1196_v30, %v1192_v33  ;;  %v7118_v28 = vld [vmem:[#allocation7 + $0x2e8] ss:$16 sps:$4 sm:$0xff]   ;;  %v7126_v33 = vld [vmem:[#allocation7 + $0x2ac] ss:$16 sps:$4 sm:$0xff]  }
 0x1a3   :  { %v1201_v35 = vpack.c.bf16 %v1197_v31, %v1193_v29  ;;  %v7123_v29 = vld [vmem:[#allocation7 + $0x2cc] ss:$16 sps:$4 sm:$0xff]  }
 0x1a5   :  { %2027 = vmatprep.mubr.bf16.mxu0 %v1201_v35 }
 0x1a6   :  { %2028 = vmatmul.mubr.bf16.vlgmr.msra.gmra.mxu0 %v8253_v36 }
 0x1a7   :  { %2082 = vmatpush1.bf16.msra.mxu0 %v7025_v32  ;;  %2113 = vmatprep.mubr.bf16.mxu0 %v1201_v35  ;;  %v7121_v32 = vld [vmem:[#allocation7 + $0x2c8] ss:$16 sps:$4 sm:$0xff]   ;;  %v7129_v35 = vld [vmem:[#allocation7 + $0x28c] ss:$16 sps:$4 sm:$0xff]  }
 0x1a8   :  { %2083 = vmatprep.subr.bf16.mxu0 %v7033_v34  ;;  %v7124_v34 = vld [vmem:[#allocation7 + $0x2a8] ss:$16 sps:$4 sm:$0xff]  }
 0x1ab   :  { %2084 = vmatpush1.bf16.msra.mxu0 %v7031_v37  ;;  %v7166_v37 = vld [vmem:[#allocation8 + $0xe0] ss:$16 sps:$4 sm:$0xff]  }
 0x1ac   :  { %2085 = vmatprep.subr.bf16.mxu0 %v7039_v38  ;;  %v7168_v38 = vld [vmem:[#allocation8 + $0xe4] ss:$16 sps:$4 sm:$0xff]  }
 0x1af   :  { %2086 = vmatpush1.bf16.msra.mxu0 %v7037_v39  ;;  %v7171_v39 = vld [vmem:[#allocation8 + $0xc4] ss:$16 sps:$4 sm:$0xff]  }
 0x1b0   :  { %2087 = vmatprep.subr.bf16.mxu0 %v7045_v40  ;;  %v7127_v40 = vld [vmem:[#allocation7 + $0x288] ss:$16 sps:$4 sm:$0xff]  }
 0x1b3   :  { %2088 = vmatpush1.bf16.msra.mxu0 %v7043_v41  ;;  %v7132_v41 = vld [vmem:[#allocation7 + $0x26c] ss:$16 sps:$4 sm:$0xff]  }
 0x1b4   :  { %2089 = vmatprep.subr.bf16.mxu0 %v7051_v42  ;;  %v7174_v42 = vld [vmem:[#allocation8 + $0xa4] ss:$16 sps:$4 sm:$0xff]  }
 0x1b7   :  { %2090 = vmatpush1.bf16.msra.mxu0 %v7049_v43  ;;  %v7130_v43 = vld [vmem:[#allocation7 + $0x268] ss:$16 sps:$4 sm:$0xff]  }
 0x1b8   :  { %2091 = vmatprep.subr.bf16.mxu0 %v7057_v44  ;;  %v7135_v44 = vld [vmem:[#allocation7 + $0x24c] ss:$16 sps:$4 sm:$0xff]  }
 0x1bb   :  { %2092 = vmatpush1.bf16.msra.mxu0 %v7055_v45  ;;  %v7172_v45 = vld [vmem:[#allocation8 + $0xa0] ss:$16 sps:$4 sm:$0xff]  }
 0x1bc   :  { %2093 = vmatprep.subr.bf16.mxu0 %v7063_v46  ;;  %v7177_v46 = vld [vmem:[#allocation8 + $0x84] ss:$16 sps:$4 sm:$0xff]  }
 0x1bf   :  { %2094 = vmatpush1.bf16.msra.mxu0 %v7061_v47  ;;  %v7133_v47 = vld [vmem:[#allocation7 + $0x248] ss:$16 sps:$4 sm:$0xff]  }
 0x1c0   :  { %2095 = vmatprep.subr.bf16.mxu0 %v7069_v48  ;;  %v7138_v48 = vld [vmem:[#allocation7 + $0x22c] ss:$16 sps:$4 sm:$0xff]  }
 0x1c3   :  { %2096 = vmatpush1.bf16.msra.mxu0 %v7067_v49  ;;  %v7175_v49 = vld [vmem:[#allocation8 + $0x80] ss:$16 sps:$4 sm:$0xff]  }
 0x1c4   :  { %2097 = vmatprep.subr.bf16.mxu0 %v7075_v50  ;;  %v7180_v50 = vld [vmem:[#allocation8 + $0x64] ss:$16 sps:$4 sm:$0xff]  }
 0x1c7   :  { %2098 = vmatpush2.bf16.msra.mxu0 %v7073_v51  ;;  %v7136_v51 = vld [vmem:[#allocation7 + $0x228] ss:$16 sps:$4 sm:$0xff]  }
 0x1c8   :  { %2099 = vmatprep.subr.bf16.mxu0 %v7081_v52  ;;  %v7141_v52 = vld [vmem:[#allocation7 + $0x20c] ss:$16 sps:$4 sm:$0xff]  }
 0x1cb   :  { %2100 = vmatpush2.bf16.msra.mxu0 %v7079_v53  ;;  %v7178_v53 = vld [vmem:[#allocation8 + $0x60] ss:$16 sps:$4 sm:$0xff]  }
 0x1cc   :  { %2101 = vmatprep.subr.bf16.mxu0 %v7087_v54  ;;  %v7183_v54 = vld [vmem:[#allocation8 + $0x44] ss:$16 sps:$4 sm:$0xff]  }
 0x1cf   :  { %2102 = vmatpush2.bf16.msra.mxu0 %v7085_v55  ;;  %v7139_v55 = vld [vmem:[#allocation7 + $0x208] ss:$16 sps:$4 sm:$0xff]  }
 0x1d0   :  { %2103 = vmatprep.subr.bf16.mxu0 %v7093_v56  ;;  %v7144_v56 = vld [vmem:[#allocation7 + $0x3ec] ss:$16 sps:$4 sm:$0xff]  }
 0x1d3   :  { %2104 = vmatpush2.bf16.msra.mxu0 %v7091_v57  ;;  %v7181_v57 = vld [vmem:[#allocation8 + $0x40] ss:$16 sps:$4 sm:$0xff]  }
 0x1d4   :  { %2105 = vmatprep.subr.bf16.mxu0 %v7099_v58  ;;  %v7186_v58 = vld [vmem:[#allocation8 + $0x24] ss:$16 sps:$4 sm:$0xff]  }
 0x1d6   :  { %v1140_v2 = vpop.f32.mrf.mxu0 }
 0x1d7   :  { %v1183_v3 = vpop.f32.mrf.mxu1  ;;  %v1141_v7 = vadd.f32 %v1140_v2, %v351_v63  ;;  %2106 = vmatpush2.bf16.msra.mxu0 %v7097_v61  ;;  %v7142_v61 = vld [vmem:[#allocation7 + $0x3e8] ss:$16 sps:$4 sm:$0xff]   ;;  %v7150_v2 = vld [vmem:[#allocation7 + $0x3ac] ss:$16 sps:$4 sm:$0xff]  }
 0x1d8   :  { %v1142_v8 = vpop.f32.mrf.mxu0  ;;  %2107 = vmatprep.subr.bf16.mxu0 %v7105_v62  ;;  %v7147_v62 = vld [vmem:[#allocation7 + $0x3cc] ss:$16 sps:$4 sm:$0xff]  }
 0x1d9   :  { %v1185_v13 = vpop.f32.mrf.mxu1  ;;  %v1143_v9 = vadd.f32 %v1142_v8, %v355_v0  ;;  %v1184_v17 = vadd.f32 %v1183_v3, %v1141_v7  ;;  %v7187_v3 = vld [vmem:[#allocation8] ss:$16 sps:$4 sm:$0xff]   ;;  %v7148_v7 = vld [vmem:[#allocation7 + $0x3a8] ss:$16 sps:$4 sm:$0xff]   ;;  %v7153_v8 = vld [vmem:[#allocation7 + $0x38c] ss:$16 sps:$4 sm:$0xff]  }
 0x1da   :  { %v1144_v15 = vpop.f32.mrf.mxu0 }
 0x1db   :  { %v1187_v16 = vpop.f32.mrf.mxu1  ;;  %v1145_v4 = vadd.f32 %v1144_v15, %v351_v63  ;;  %2108 = vmatpush2.bf16.msra.mxu0 %v7103_v1  ;;  %v1186_v10 = vadd.f32 %v1185_v13, %v1143_v9  ;;  %v1194_v23 = vmax.f32 %v1184_v17, 0.0  ;;  %v7184_v63 = vld [vmem:[#allocation8 + $0x20] ss:$16 sps:$4 sm:$0xff]   ;;  %v7145_v1 = vld [vmem:[#allocation7 + $0x3c8] ss:$16 sps:$4 sm:$0xff]  }
 0x1dc   :  { %v1146_v18 = vpop.f32.mrf.mxu0  ;;  %2109 = vmatprep.subr.bf16.mxu0 %v7111_v6  ;;  %v7192_v6 = vld [vmem:[#allocation8 + $0x1e4] ss:$16 sps:$4 sm:$0xff]   ;;  %v7190_v13 = vld [vmem:[#allocation8 + $0x1e0] ss:$16 sps:$4 sm:$0xff]   ;;  %v7156_v15 = vld [vmem:[#allocation7 + $0x36c] ss:$16 sps:$4 sm:$0xff]  }
 0x1dd   :  { %v1188_v19 = vadd.f32 %v1187_v16, %v1145_v4  ;;  %v1147_v20 = vadd.f32 %v1146_v18, %v355_v0  ;;  %v1189_v22 = vpop.f32.mrf.mxu1  ;;  %v1195_v26 = vmax.f32 %v1186_v10, 0.0  ;;  %v7189_v0 = vld [vmem:[#allocation8 + $0x4] ss:$16 sps:$4 sm:$0xff]   ;;  %v7193_v16 = vld [vmem:[#allocation8 + $0x1c0] ss:$16 sps:$4 sm:$0xff]  }
 0x1de   :  { %v7195_v9 = vld [vmem:[#allocation8 + $0x1c4] ss:$16 sps:$4 sm:$0xff]   ;;  %v7154_v4 = vld [vmem:[#allocation7 + $0x368] ss:$16 sps:$4 sm:$0xff]   ;;  %v7196_v18 = vld [vmem:[#allocation8 + $0x1a0] ss:$16 sps:$4 sm:$0xff]  }
 0x1df   :  { %v1198_v24 = vmax.f32 %v1188_v19, 0.0  ;;  %v1190_v25 = vadd.f32 %v1189_v22, %v1147_v20  ;;  %2110 = vmatpush2.bf16.msra.mxu0 %v7109_v14  ;;  %v7151_v14 = vld [vmem:[#allocation7 + $0x388] ss:$16 sps:$4 sm:$0xff]   ;;  %v7198_v17 = vld [vmem:[#allocation8 + $0x1a4] ss:$16 sps:$4 sm:$0xff]  }
 0x1e0   :  { %2111 = vmatprep.subr.bf16.mxu0 %v7117_v5  ;;  %v7159_v5 = vld [vmem:[#allocation7 + $0x34c] ss:$16 sps:$4 sm:$0xff]   ;;  %v7201_v10 = vld [vmem:[#allocation8 + $0x184] ss:$16 sps:$4 sm:$0xff]   ;;  %v7157_v19 = vld [vmem:[#allocation7 + $0x348] ss:$16 sps:$4 sm:$0xff]  }
 0x1e1   :  { %v1199_v27 = vmax.f32 %v1190_v25, 0.0  ;;  %v8266_v31 = vpack.c.bf16 %v1198_v24, %v1194_v23  ;;  %v7162_v20 = vld [vmem:[#allocation7 + $0x32c] ss:$16 sps:$4 sm:$0xff]   ;;  %v7204_v22 = vld [vmem:[#allocation8 + $0x164] ss:$16 sps:$4 sm:$0xff]  }
 0x1e2   :  { %v7160_v23 = vld [vmem:[#allocation7 + $0x328] ss:$16 sps:$4 sm:$0xff]   ;;  %v7165_v24 = vld [vmem:[#allocation7 + $0x30c] ss:$16 sps:$4 sm:$0xff]   ;;  %v7202_v25 = vld [vmem:[#allocation8 + $0x160] ss:$16 sps:$4 sm:$0xff]  }
 0x1e3   :  { %v1203_v30 = vpack.c.bf16 %v1199_v27, %v1195_v26  ;;  %2112 = vmatpush2.bf16.msra.mxu0 %v7115_v21  ;;  %v7199_v21 = vld [vmem:[#allocation8 + $0x180] ss:$16 sps:$4 sm:$0xff]   ;;  %v7163_v26 = vld [vmem:[#allocation7 + $0x308] ss:$16 sps:$4 sm:$0xff]   ;;  %v7207_v27 = vld [vmem:[#allocation8 + $0x144] ss:$16 sps:$4 sm:$0xff]  }
 0x1e4   :  { %2970 = vmatprep.subr.bf16.mxu0 %v7168_v38  ;;  %v7220_v38 = vld [vmem:[#allocation8 + $0x2c0] ss:$16 sps:$4 sm:$0xff]  }
 0x1e5   :  { %2070 = vmatprep.mubr.bf16.mxu1 %v1203_v30 }
 0x1e6   :  { %2114 = vmatmul.mubr.bf16.vlgmr.msra.gmra.mxu0 %v8253_v36  ;;  %2071 = vmatmul.mubr.bf16.vlgmr.msra.gmra.mxu1 %v8266_v31  ;;  %v7169_v36 = vld [vmem:[#allocation8 + $0xc0] ss:$16 sps:$4 sm:$0xff]  }
 0x1e7   :  { %2125 = vmatpush1.bf16.msra.mxu1 %v7118_v28  ;;  %2156 = vmatprep.mubr.bf16.mxu1 %v1203_v30  ;;  %v7205_v28 = vld [vmem:[#allocation8 + $0x140] ss:$16 sps:$4 sm:$0xff]  }
 0x1e8   :  { %2126 = vmatprep.subr.bf16.mxu1 %v7123_v29  ;;  %2971 = vmatpush1.bf16.msra.mxu0 %v7166_v37  ;;  %v7210_v29 = vld [vmem:[#allocation8 + $0x124] ss:$16 sps:$4 sm:$0xff]   ;;  %v7208_v30 = vld [vmem:[#allocation8 + $0x120] ss:$16 sps:$4 sm:$0xff]   ;;  %v7219_v37 = vld [vmem:[#allocation8 + $0xec] ss:$16 sps:$4 sm:$0xff]  }
 0x1e9   :  { %2972 = vmatprep.subr.bf16.mxu0 %v7171_v39  ;;  %v7226_v39 = vld [vmem:[#allocation8 + $0x2a0] ss:$16 sps:$4 sm:$0xff]  }
 0x1eb   :  { %2127 = vmatpush1.bf16.msra.mxu1 %v7121_v32  ;;  %v7213_v32 = vld [vmem:[#allocation8 + $0x104] ss:$16 sps:$4 sm:$0xff]  }
 0x1ec   :  { %2128 = vmatprep.subr.bf16.mxu1 %v7126_v33  ;;  %2973 = vmatpush1.bf16.msra.mxu0 %v7169_v36  ;;  %v7211_v33 = vld [vmem:[#allocation8 + $0x100] ss:$16 sps:$4 sm:$0xff]   ;;  %v7234_v36 = vld [vmem:[#allocation8 + $0x284] ss:$16 sps:$4 sm:$0xff]  }
 0x1ed   :  { %2974 = vmatprep.subr.bf16.mxu0 %v7174_v42  ;;  %v7238_v42 = vld [vmem:[#allocation8 + $0x260] ss:$16 sps:$4 sm:$0xff]  }
 0x1ef   :  { %2129 = vmatpush1.bf16.msra.mxu1 %v7124_v34  ;;  %v7214_v34 = vld [vmem:[#allocation8 + $0x2e0] ss:$16 sps:$4 sm:$0xff]  }
 0x1f0   :  { %2130 = vmatprep.subr.bf16.mxu1 %v7129_v35  ;;  %2975 = vmatpush1.bf16.msra.mxu0 %v7172_v45  ;;  %v7216_v35 = vld [vmem:[#allocation8 + $0x2e4] ss:$16 sps:$4 sm:$0xff]  }
 0x1f1   :  { %2976 = vmatprep.subr.bf16.mxu0 %v7177_v46  ;;  %v7246_v45 = vld [vmem:[#allocation8 + $0x244] ss:$16 sps:$4 sm:$0xff]   ;;  %v7250_v46 = vld [vmem:[#allocation8 + $0x220] ss:$16 sps:$4 sm:$0xff]  }
 0x1f3   :  { %2131 = vmatpush1.bf16.msra.mxu1 %v7127_v40  ;;  %v7228_v40 = vld [vmem:[#allocation8 + $0x2a4] ss:$16 sps:$4 sm:$0xff]  }
 0x1f4   :  { %2132 = vmatprep.subr.bf16.mxu1 %v7132_v41  ;;  %2977 = vmatpush1.bf16.msra.mxu0 %v7175_v49  ;;  %v7232_v41 = vld [vmem:[#allocation8 + $0x280] ss:$16 sps:$4 sm:$0xff]   ;;  %v7258_v49 = vld [vmem:[#allocation8 + $0x204] ss:$16 sps:$4 sm:$0xff]  }
 0x1f5   :  { %2978 = vmatprep.subr.bf16.mxu0 %v7180_v50  ;;  %v7262_v50 = vld [vmem:[#allocation8 + $0x3e0] ss:$16 sps:$4 sm:$0xff]  }
 0x1f7   :  { %2133 = vmatpush1.bf16.msra.mxu1 %v7130_v43  ;;  %v7240_v43 = vld [vmem:[#allocation8 + $0x264] ss:$16 sps:$4 sm:$0xff]  }
 0x1f8   :  { %2134 = vmatprep.subr.bf16.mxu1 %v7135_v44  ;;  %2979 = vmatpush1.bf16.msra.mxu0 %v7178_v53  ;;  %v7244_v44 = vld [vmem:[#allocation8 + $0x240] ss:$16 sps:$4 sm:$0xff]   ;;  %v7270_v53 = vld [vmem:[#allocation8 + $0x3c4] ss:$16 sps:$4 sm:$0xff]  }
 0x1f9   :  { %2980 = vmatprep.subr.bf16.mxu0 %v7183_v54  ;;  %v7274_v54 = vld [vmem:[#allocation8 + $0x3a0] ss:$16 sps:$4 sm:$0xff]  }
 0x1fb   :  { %2135 = vmatpush1.bf16.msra.mxu1 %v7133_v47  ;;  %v7252_v47 = vld [vmem:[#allocation8 + $0x224] ss:$16 sps:$4 sm:$0xff]  }
 0x1fc   :  { %2136 = vmatprep.subr.bf16.mxu1 %v7138_v48  ;;  %2981 = vmatpush1.bf16.msra.mxu0 %v7181_v57  ;;  %v7256_v48 = vld [vmem:[#allocation8 + $0x200] ss:$16 sps:$4 sm:$0xff]   ;;  %v7282_v57 = vld [vmem:[#allocation8 + $0x384] ss:$16 sps:$4 sm:$0xff]  }
 0x1fd   :  { %2982 = vmatprep.subr.bf16.mxu0 %v7186_v58  ;;  %v7286_v58 = vld [vmem:[#allocation8 + $0x360] ss:$16 sps:$4 sm:$0xff]  }
 0x1ff   :  { %2137 = vmatpush1.bf16.msra.mxu1 %v7136_v51  ;;  %v7264_v51 = vld [vmem:[#allocation8 + $0x3e4] ss:$16 sps:$4 sm:$0xff]  }
 0x200   :  { %2138 = vmatprep.subr.bf16.mxu1 %v7141_v52  ;;  %2983 = vmatpush1.bf16.msra.mxu0 %v7184_v63  ;;  %v7268_v52 = vld [vmem:[#allocation8 + $0x3c0] ss:$16 sps:$4 sm:$0xff]  }
 0x201   :  { %2984 = vmatprep.subr.bf16.mxu0 %v7189_v0  ;;  %v7292_v63 = vld [vmem:[#allocation8 + $0x340] ss:$16 sps:$4 sm:$0xff]   ;;  %v7300_v0 = vld [vmem:[#allocation8 + $0x324] ss:$16 sps:$4 sm:$0xff]  }
 0x203   :  { %2139 = vmatpush1.bf16.msra.mxu1 %v7139_v55  ;;  %v7276_v55 = vld [vmem:[#allocation8 + $0x3a4] ss:$16 sps:$4 sm:$0xff]  }
 0x204   :  { %2140 = vmatprep.subr.bf16.mxu1 %v7144_v56  ;;  %2985 = vmatpush1.bf16.msra.mxu0 %v7187_v3  ;;  %v7280_v56 = vld [vmem:[#allocation8 + $0x380] ss:$16 sps:$4 sm:$0xff]  }
 0x205   :  { %2986 = vmatprep.subr.bf16.mxu0 %v7192_v6  ;;  %v7304_v3 = vld [vmem:[#allocation8 + $0x300] ss:$16 sps:$4 sm:$0xff]   ;;  %v7312_v6 = vld [vmem:[#allocation8 + $0x2ec] ss:$16 sps:$4 sm:$0xff]  }
 0x207   :  { %2141 = vmatpush2.bf16.msra.mxu1 %v7142_v61  ;;  %v7288_v61 = vld [vmem:[#allocation8 + $0x364] ss:$16 sps:$4 sm:$0xff]  }
 0x208   :  { %2142 = vmatprep.subr.bf16.mxu1 %v7147_v62  ;;  %2987 = vmatpush2.bf16.msra.mxu0 %v7190_v13  ;;  %v7294_v62 = vld [vmem:[#allocation8 + $0x344] ss:$16 sps:$4 sm:$0xff]   ;;  %v8271_v13 = vld [vmem:[#allocation20 + $0x1] ss:$8 sm:$0xf] }
 0x209   :  { %2988 = vmatprep.subr.bf16.mxu0 %v7195_v9 }
 0x20b   :  { %2143 = vmatpush2.bf16.msra.mxu1 %v7145_v1  ;;  %v7298_v1 = vld [vmem:[#allocation8 + $0x320] ss:$16 sps:$4 sm:$0xff]  }
 0x20c   :  { %2144 = vmatprep.subr.bf16.mxu1 %v7150_v2  ;;  %2989 = vmatpush2.bf16.msra.mxu0 %v7193_v16  ;;  %v7306_v2 = vld [vmem:[#allocation8 + $0x304] ss:$16 sps:$4 sm:$0xff]  }
 0x20d   :  { %2990 = vmatprep.subr.bf16.mxu0 %v7198_v17 }
 0x20f   :  { %2145 = vmatpush2.bf16.msra.mxu1 %v7148_v7 }
 0x210   :  { %2146 = vmatprep.subr.bf16.mxu1 %v7153_v8  ;;  %2991 = vmatpush2.bf16.msra.mxu0 %v7196_v18 }
 0x211   :  { %2992 = vmatprep.subr.bf16.mxu0 %v7201_v10 }
 0x213   :  { %2147 = vmatpush2.bf16.msra.mxu1 %v7151_v14  ;;  %v1342_v14 = vrot.slane %v8271_v13, %v8244_v11 }
 0x214   :  { %2148 = vmatprep.subr.bf16.mxu1 %v7156_v15  ;;  %2993 = vmatpush2.bf16.msra.mxu0 %v7199_v21  ;;  %v1338_v15 = vrot.slane %v8271_v13, %v8247_v12 }
 0x215   :  { %2994 = vmatprep.subr.bf16.mxu0 %v7204_v22 }
 0x217   :  { %2149 = vmatpush2.bf16.msra.mxu1 %v7154_v4 }
 0x218   :  { %2150 = vmatprep.subr.bf16.mxu1 %v7159_v5  ;;  %2995 = vmatpush2.bf16.msra.mxu0 %v7202_v25 }
 0x219   :  { %2996 = vmatprep.subr.bf16.mxu0 %v7207_v27 }
 0x21b   :  { %2151 = vmatpush2.bf16.msra.mxu1 %v7157_v19 }
 0x21c   :  { %2152 = vmatprep.subr.bf16.mxu1 %v7162_v20  ;;  %2997 = vmatpush2.bf16.msra.mxu0 %v7205_v28 }
 0x21d   :  { %2998 = vmatprep.subr.bf16.mxu0 %v7210_v29 }
 0x21f   :  { %2153 = vmatpush2.bf16.msra.mxu1 %v7160_v23 }
 0x220   :  { %2154 = vmatprep.subr.bf16.mxu1 %v7165_v24  ;;  %2999 = vmatpush2.bf16.msra.mxu0 %v7208_v30 }
 0x221   :  { %3000 = vmatprep.subr.bf16.mxu0 %v7213_v32  ;;  %v7217_v32 = vld [vmem:[#allocation8 + $0xe8] ss:$16 sps:$4 sm:$0xff]  }
 0x223   :  { %2155 = vmatpush2.bf16.msra.mxu1 %v7163_v26 }
 0x224   :  { %3001 = vmatpush2.bf16.msra.mxu0 %v7211_v33  ;;  %3013 = vmatprep.subr.bf16.mxu1 %v7216_v35  ;;  %v7223_v35 = vld [vmem:[#allocation8 + $0xc8] ss:$16 sps:$4 sm:$0xff]  }
 0x225   :  { %3056 = vmatprep.subr.bf16.mxu0 %v7219_v37  ;;  %v7231_v37 = vld [vmem:[#allocation8 + $0xac] ss:$16 sps:$4 sm:$0xff]  }
 0x226   :  { %2157 = vmatmul.mubr.bf16.vlgmr.msra.gmra.mxu1 %v8266_v31  ;;  %v7222_v31 = vld [vmem:[#allocation8 + $0x2c4] ss:$16 sps:$4 sm:$0xff]  }
 0x227   :  { %3014 = vmatpush1.bf16.msra.mxu1 %v7214_v34  ;;  %v7225_v34 = vld [vmem:[#allocation8 + $0xcc] ss:$16 sps:$4 sm:$0xff]  }
 0x228   :  { %3015 = vmatprep.subr.bf16.mxu1 %v7222_v31  ;;  %v7237_v31 = vld [vmem:[#allocation8 + $0x8c] ss:$16 sps:$4 sm:$0xff]  }
 0x22b   :  { %3016 = vmatpush1.bf16.msra.mxu1 %v7220_v38  ;;  %v7229_v38 = vld [vmem:[#allocation8 + $0xa8] ss:$16 sps:$4 sm:$0xff]  }
 0x22c   :  { %3017 = vmatprep.subr.bf16.mxu1 %v7228_v40  ;;  %v7243_v40 = vld [vmem:[#allocation8 + $0x6c] ss:$16 sps:$4 sm:$0xff]  }
 0x22f   :  { %3018 = vmatpush1.bf16.msra.mxu1 %v7226_v39  ;;  %v7235_v39 = vld [vmem:[#allocation8 + $0x88] ss:$16 sps:$4 sm:$0xff]  }
 0x230   :  { %3019 = vmatprep.subr.bf16.mxu1 %v7234_v36  ;;  %v7249_v36 = vld [vmem:[#allocation8 + $0x4c] ss:$16 sps:$4 sm:$0xff]  }
 0x233   :  { %3020 = vmatpush1.bf16.msra.mxu1 %v7232_v41  ;;  %v7241_v41 = vld [vmem:[#allocation8 + $0x68] ss:$16 sps:$4 sm:$0xff]  }
 0x234   :  { %3021 = vmatprep.subr.bf16.mxu1 %v7240_v43  ;;  %v7255_v43 = vld [vmem:[#allocation8 + $0x2c] ss:$16 sps:$4 sm:$0xff]  }
 0x237   :  { %3022 = vmatpush1.bf16.msra.mxu1 %v7238_v42  ;;  %v7247_v42 = vld [vmem:[#allocation8 + $0x48] ss:$16 sps:$4 sm:$0xff]  }
 0x238   :  { %3023 = vmatprep.subr.bf16.mxu1 %v7246_v45  ;;  %v7261_v45 = vld [vmem:[#allocation8 + $0xc] ss:$16 sps:$4 sm:$0xff]  }
 0x23b   :  { %3024 = vmatpush1.bf16.msra.mxu1 %v7244_v44  ;;  %v7253_v44 = vld [vmem:[#allocation8 + $0x28] ss:$16 sps:$4 sm:$0xff]  }
 0x23c   :  { %3025 = vmatprep.subr.bf16.mxu1 %v7252_v47  ;;  %v7267_v47 = vld [vmem:[#allocation8 + $0x1ec] ss:$16 sps:$4 sm:$0xff]  }
 0x23f   :  { %3026 = vmatpush1.bf16.msra.mxu1 %v7250_v46  ;;  %v7259_v46 = vld [vmem:[#allocation8 + $0x8] ss:$16 sps:$4 sm:$0xff]  }
 0x240   :  { %3027 = vmatprep.subr.bf16.mxu1 %v7258_v49  ;;  %v7273_v49 = vld [vmem:[#allocation8 + $0x1cc] ss:$16 sps:$4 sm:$0xff]  }
 0x243   :  { %3028 = vmatpush1.bf16.msra.mxu1 %v7256_v48  ;;  %v7265_v48 = vld [vmem:[#allocation8 + $0x1e8] ss:$16 sps:$4 sm:$0xff]  }
 0x244   :  { %3029 = vmatprep.subr.bf16.mxu1 %v7264_v51  ;;  %v7279_v51 = vld [vmem:[#allocation8 + $0x1ac] ss:$16 sps:$4 sm:$0xff]  }
 0x247   :  { %3030 = vmatpush2.bf16.msra.mxu1 %v7262_v50  ;;  %v7271_v50 = vld [vmem:[#allocation8 + $0x1c8] ss:$16 sps:$4 sm:$0xff]  }
 0x248   :  { %3031 = vmatprep.subr.bf16.mxu1 %v7270_v53  ;;  %v7285_v53 = vld [vmem:[#allocation8 + $0x18c] ss:$16 sps:$4 sm:$0xff]  }
 0x24b   :  { %3032 = vmatpush2.bf16.msra.mxu1 %v7268_v52  ;;  %v7277_v52 = vld [vmem:[#allocation8 + $0x1a8] ss:$16 sps:$4 sm:$0xff]  }
 0x24c   :  { %3033 = vmatprep.subr.bf16.mxu1 %v7276_v55  ;;  %v7283_v55 = vld [vmem:[#allocation8 + $0x188] ss:$16 sps:$4 sm:$0xff]  }
 0x24f   :  { %3034 = vmatpush2.bf16.msra.mxu1 %v7274_v54 }
 0x250   :  { %3035 = vmatprep.subr.bf16.mxu1 %v7282_v57 }
 0x253   :  { %3036 = vmatpush2.bf16.msra.mxu1 %v7280_v56  ;;  %v7291_v56 = vld [vmem:[#allocation8 + $0x16c] ss:$16 sps:$4 sm:$0xff]  }
 0x254   :  { %3037 = vmatprep.subr.bf16.mxu1 %v7288_v61  ;;  %v7297_v61 = vld [vmem:[#allocation8 + $0x14c] ss:$16 sps:$4 sm:$0xff]  }
 0x257   :  { %3038 = vmatpush2.bf16.msra.mxu1 %v7286_v58  ;;  %v7289_v58 = vld [vmem:[#allocation8 + $0x168] ss:$16 sps:$4 sm:$0xff]  }
 0x258   :  { %3039 = vmatprep.subr.bf16.mxu1 %v7294_v62 }
 0x25b   :  { %3040 = vmatpush2.bf16.msra.mxu1 %v7292_v63  ;;  %v1350_v63 = vrot.slane %v8271_v13, %v8260_v60 }
 0x25c   :  { %3041 = vmatprep.subr.bf16.mxu1 %v7300_v0  ;;  %v7295_v0 = vld [vmem:[#allocation8 + $0x148] ss:$16 sps:$4 sm:$0xff]  }
 0x25f   :  { %3042 = vmatpush2.bf16.msra.mxu1 %v7298_v1  ;;  %v1346_v1 = vrot.slane %v8271_v13, %v8257_v59  ;;  %v7307_v13 = vld [vmem:[#allocation8 + $0x108] ss:$16 sps:$4 sm:$0xff]  }
 0x260   :  { %3043 = vmatprep.subr.bf16.mxu1 %v7306_v2 }
 0x263   :  { %3044 = vmatpush2.bf16.msra.mxu1 %v7304_v3  ;;  %v7303_v3 = vld [vmem:[#allocation8 + $0x12c] ss:$16 sps:$4 sm:$0xff]  }
 0x264   :  { %3099 = vmatprep.subr.bf16.mxu1 %v7312_v6 }
 0x266   :  { %v2029_v7 = vpop.f32.mrf.mxu0 }
 0x267   :  { %v2030_v10 = vadd.f32 %v2029_v7, %v1338_v15 }
 0x268   :  { %v2031_v8 = vpop.f32.mrf.mxu0 }
 0x269   :  { %v2032_v5 = vadd.f32 %v2031_v8, %v1342_v14 }
 0x26a   :  { %v2033_v9 = vpop.f32.mrf.mxu0 }
 0x26b   :  { %v2034_v18 = vadd.f32 %v2033_v9, %v1338_v15 }
 0x26c   :  { %v2035_v17 = vpop.f32.mrf.mxu0 }
 0x26d   :  { %v2036_v20 = vadd.f32 %v2035_v17, %v1342_v14  ;;  %v7301_v14 = vld [vmem:[#allocation8 + $0x128] ss:$16 sps:$4 sm:$0xff]   ;;  %v7309_v17 = vld [vmem:[#allocation8 + $0x10c] ss:$16 sps:$4 sm:$0xff]  }
 0x2a6   :  { %v2072_v16 = vpop.f32.mrf.mxu1  ;;  %v2115_v54 = vpop.f32.mrf.mxu0 }
 0x2a7   :  { %v2073_v23 = vadd.f32 %v2072_v16, %v2030_v10  ;;  %v2116_v15 = vadd.f32 %v2115_v54, %v1346_v1  ;;  %v7373_v54 = vld [vmem:[#allocation10 + $0x40] ss:$16 sps:$4 sm:$0xff]  }
 0x2a8   :  { %v2074_v4 = vpop.f32.mrf.mxu1  ;;  %v2117_v57 = vpop.f32.mrf.mxu0 }
 0x2a9   :  { %v2075_v21 = vadd.f32 %v2074_v4, %v2032_v5  ;;  %v2167_v29 = vmax.f32 %v2073_v23, 0.0  ;;  %v2118_v8 = vadd.f32 %v2117_v57, %v1350_v63  ;;  %v7339_v57 = vld [vmem:[#allocation8 + $0x3cc] ss:$16 sps:$4 sm:$0xff]  }
 0x2aa   :  { %v2076_v19 = vpop.f32.mrf.mxu1  ;;  %v2119_v62 = vpop.f32.mrf.mxu0 }
 0x2ab   :  { %v2077_v22 = vadd.f32 %v2076_v19, %v2034_v18  ;;  %v2168_v27 = vmax.f32 %v2075_v21, 0.0  ;;  %v2120_v9 = vadd.f32 %v2119_v62, %v1346_v1  ;;  %v7337_v62 = vld [vmem:[#allocation8 + $0x3c8] ss:$16 sps:$4 sm:$0xff]   ;;  %v7384_v1 = vld [vmem:[#allocation10 + $0x1e4] ss:$16 sps:$4 sm:$0xff]  }
 0x2ac   :  { %v2078_v24 = vpop.f32.mrf.mxu1  ;;  %v2121_v6 = vpop.f32.mrf.mxu0 }
 0x2ad   :  { %v2079_v25 = vadd.f32 %v2078_v24, %v2036_v20  ;;  %v2171_v26 = vmax.f32 %v2077_v22, 0.0  ;;  %v2122_v4 = vadd.f32 %v2121_v6, %v1350_v63  ;;  %v7342_v63 = vld [vmem:[#allocation8 + $0x3ac] ss:$16 sps:$4 sm:$0xff]   ;;  %v7382_v6 = vld [vmem:[#allocation10 + $0x1e0] ss:$16 sps:$4 sm:$0xff]  }
 0x2af   :  { %v2172_v28 = vmax.f32 %v2079_v25, 0.0  ;;  %v8277_v33 = vpack.c.bf16 %v2171_v26, %v2167_v29  ;;  %v7310_v26 = vld [vmem:[#allocation8 + $0x2e8] ss:$16 sps:$4 sm:$0xff]  }
 0x2b0   :  { %v7313_v29 = vld [vmem:[#allocation8 + $0x2c8] ss:$16 sps:$4 sm:$0xff]  }
 0x2b1   :  { %v2176_v30 = vpack.c.bf16 %v2172_v28, %v2168_v27  ;;  %v7315_v28 = vld [vmem:[#allocation8 + $0x2cc] ss:$16 sps:$4 sm:$0xff]  }
 0x2b3   :  { %3002 = vmatprep.mubr.bf16.mxu0 %v2176_v30 }
 0x2b4   :  { %3003 = vmatmul.mubr.bf16.vlgmr.msra.gmra.mxu0 %v8277_v33 }
 0x2b5   :  { %3057 = vmatpush1.bf16.msra.mxu0 %v7217_v32  ;;  %3088 = vmatprep.mubr.bf16.mxu0 %v2176_v30  ;;  %v7318_v30 = vld [vmem:[#allocation8 + $0x2ac] ss:$16 sps:$4 sm:$0xff]   ;;  %v7316_v32 = vld [vmem:[#allocation8 + $0x2a8] ss:$16 sps:$4 sm:$0xff]  }
 0x2b6   :  { %3058 = vmatprep.subr.bf16.mxu0 %v7225_v34  ;;  %v7321_v34 = vld [vmem:[#allocation8 + $0x28c] ss:$16 sps:$4 sm:$0xff]  }
 0x2b9   :  { %3059 = vmatpush1.bf16.msra.mxu0 %v7223_v35  ;;  %v7358_v35 = vld [vmem:[#allocation10 + $0xe0] ss:$16 sps:$4 sm:$0xff]  }
 0x2ba   :  { %3060 = vmatprep.subr.bf16.mxu0 %v7231_v37  ;;  %v7360_v37 = vld [vmem:[#allocation10 + $0xe4] ss:$16 sps:$4 sm:$0xff]  }
 0x2bd   :  { %3061 = vmatpush1.bf16.msra.mxu0 %v7229_v38  ;;  %v7363_v38 = vld [vmem:[#allocation10 + $0xc4] ss:$16 sps:$4 sm:$0xff]  }
 0x2be   :  { %3062 = vmatprep.subr.bf16.mxu0 %v7237_v31  ;;  %v7319_v31 = vld [vmem:[#allocation8 + $0x288] ss:$16 sps:$4 sm:$0xff]  }
 0x2c1   :  { %3063 = vmatpush1.bf16.msra.mxu0 %v7235_v39  ;;  %v7324_v39 = vld [vmem:[#allocation8 + $0x26c] ss:$16 sps:$4 sm:$0xff]  }
 0x2c2   :  { %3064 = vmatprep.subr.bf16.mxu0 %v7243_v40  ;;  %v7361_v40 = vld [vmem:[#allocation10 + $0xc0] ss:$16 sps:$4 sm:$0xff]  }
 0x2c5   :  { %3065 = vmatpush1.bf16.msra.mxu0 %v7241_v41  ;;  %v7322_v41 = vld [vmem:[#allocation8 + $0x268] ss:$16 sps:$4 sm:$0xff]  }
 0x2c6   :  { %3066 = vmatprep.subr.bf16.mxu0 %v7249_v36  ;;  %v7327_v36 = vld [vmem:[#allocation8 + $0x24c] ss:$16 sps:$4 sm:$0xff]  }
 0x2c9   :  { %3067 = vmatpush1.bf16.msra.mxu0 %v7247_v42  ;;  %v7364_v42 = vld [vmem:[#allocation10 + $0xa0] ss:$16 sps:$4 sm:$0xff]  }
 0x2ca   :  { %3068 = vmatprep.subr.bf16.mxu0 %v7255_v43  ;;  %v7369_v43 = vld [vmem:[#allocation10 + $0x84] ss:$16 sps:$4 sm:$0xff]  }
 0x2cd   :  { %3069 = vmatpush1.bf16.msra.mxu0 %v7253_v44  ;;  %v7325_v44 = vld [vmem:[#allocation8 + $0x248] ss:$16 sps:$4 sm:$0xff]  }
 0x2ce   :  { %3070 = vmatprep.subr.bf16.mxu0 %v7261_v45  ;;  %v7330_v45 = vld [vmem:[#allocation8 + $0x22c] ss:$16 sps:$4 sm:$0xff]  }
 0x2d1   :  { %3071 = vmatpush1.bf16.msra.mxu0 %v7259_v46  ;;  %v7367_v46 = vld [vmem:[#allocation10 + $0x80] ss:$16 sps:$4 sm:$0xff]  }
 0x2d2   :  { %3072 = vmatprep.subr.bf16.mxu0 %v7267_v47  ;;  %v7372_v47 = vld [vmem:[#allocation10 + $0x64] ss:$16 sps:$4 sm:$0xff]  }
 0x2d5   :  { %3073 = vmatpush2.bf16.msra.mxu0 %v7265_v48  ;;  %v7328_v48 = vld [vmem:[#allocation8 + $0x228] ss:$16 sps:$4 sm:$0xff]  }
 0x2d6   :  { %3074 = vmatprep.subr.bf16.mxu0 %v7273_v49  ;;  %v7333_v49 = vld [vmem:[#allocation8 + $0x20c] ss:$16 sps:$4 sm:$0xff]  }
 0x2d9   :  { %3075 = vmatpush2.bf16.msra.mxu0 %v7271_v50  ;;  %v7370_v50 = vld [vmem:[#allocation10 + $0x60] ss:$16 sps:$4 sm:$0xff]  }
 0x2da   :  { %3076 = vmatprep.subr.bf16.mxu0 %v7279_v51  ;;  %v7375_v51 = vld [vmem:[#allocation10 + $0x44] ss:$16 sps:$4 sm:$0xff]  }
 0x2dd   :  { %3077 = vmatpush2.bf16.msra.mxu0 %v7277_v52  ;;  %v7331_v52 = vld [vmem:[#allocation8 + $0x208] ss:$16 sps:$4 sm:$0xff]  }
 0x2de   :  { %3078 = vmatprep.subr.bf16.mxu0 %v7285_v53  ;;  %v7336_v53 = vld [vmem:[#allocation8 + $0x3ec] ss:$16 sps:$4 sm:$0xff]  }
 0x2e1   :  { %3079 = vmatpush2.bf16.msra.mxu0 %v7283_v55  ;;  %v7378_v55 = vld [vmem:[#allocation10 + $0x24] ss:$16 sps:$4 sm:$0xff]  }
 0x2e2   :  { %3080 = vmatprep.subr.bf16.mxu0 %v7291_v56  ;;  %v7334_v56 = vld [vmem:[#allocation8 + $0x3e8] ss:$16 sps:$4 sm:$0xff]  }
 0x2e5   :  { %3081 = vmatpush2.bf16.msra.mxu0 %v7289_v58  ;;  %v7376_v58 = vld [vmem:[#allocation10 + $0x20] ss:$16 sps:$4 sm:$0xff]  }
 0x2e6   :  { %v2158_v2 = vpop.f32.mrf.mxu1  ;;  %3082 = vmatprep.subr.bf16.mxu0 %v7297_v61  ;;  %v7381_v61 = vld [vmem:[#allocation10 + $0x4] ss:$16 sps:$4 sm:$0xff]  }
 0x2e7   :  { %v2159_v10 = vadd.f32 %v2158_v2, %v2116_v15  ;;  %v7340_v2 = vld [vmem:[#allocation8 + $0x3a8] ss:$16 sps:$4 sm:$0xff]   ;;  %v7390_v15 = vld [vmem:[#allocation10 + $0x1a4] ss:$16 sps:$4 sm:$0xff]  }
 0x2e8   :  { %v2160_v7 = vpop.f32.mrf.mxu1 }
 0x2e9   :  { %3083 = vmatpush2.bf16.msra.mxu0 %v7295_v0  ;;  %v2161_v5 = vadd.f32 %v2160_v7, %v2118_v8  ;;  %v2169_v24 = vmax.f32 %v2159_v10, 0.0  ;;  %v7379_v0 = vld [vmem:[#allocation10] ss:$16 sps:$4 sm:$0xff]   ;;  %v7387_v7 = vld [vmem:[#allocation10 + $0x1c4] ss:$16 sps:$4 sm:$0xff]  }
 0x2ea   :  { %v2162_v16 = vpop.f32.mrf.mxu1  ;;  %3084 = vmatprep.subr.bf16.mxu0 %v7303_v3  ;;  %v7345_v3 = vld [vmem:[#allocation8 + $0x38c] ss:$16 sps:$4 sm:$0xff]   ;;  %v7343_v8 = vld [vmem:[#allocation8 + $0x388] ss:$16 sps:$4 sm:$0xff]  }
 0x2eb   :  { %v2163_v18 = vadd.f32 %v2162_v16, %v2120_v9  ;;  %v2170_v22 = vmax.f32 %v2161_v5, 0.0  ;;  %v7348_v9 = vld [vmem:[#allocation8 + $0x36c] ss:$16 sps:$4 sm:$0xff]   ;;  %v7346_v16 = vld [vmem:[#allocation8 + $0x368] ss:$16 sps:$4 sm:$0xff]  }
 0x2ec   :  { %v2164_v19 = vpop.f32.mrf.mxu1  ;;  %v7393_v5 = vld [vmem:[#allocation10 + $0x184] ss:$16 sps:$4 sm:$0xff]   ;;  %v7354_v10 = vld [vmem:[#allocation8 + $0x32c] ss:$16 sps:$4 sm:$0xff]  }
 0x2ed   :  { %v2165_v20 = vadd.f32 %v2164_v19, %v2122_v4  ;;  %3085 = vmatpush2.bf16.msra.mxu0 %v7301_v14  ;;  %v2173_v21 = vmax.f32 %v2163_v18, 0.0  ;;  %v7385_v14 = vld [vmem:[#allocation10 + $0x1c0] ss:$16 sps:$4 sm:$0xff]   ;;  %v7349_v18 = vld [vmem:[#allocation8 + $0x348] ss:$16 sps:$4 sm:$0xff]  }
 0x2ee   :  { %3086 = vmatprep.subr.bf16.mxu0 %v7309_v17  ;;  %v7351_v17 = vld [vmem:[#allocation8 + $0x34c] ss:$16 sps:$4 sm:$0xff]   ;;  %v7388_v4 = vld [vmem:[#allocation10 + $0x1a0] ss:$16 sps:$4 sm:$0xff]  }
 0x2ef   :  { %v2174_v23 = vmax.f32 %v2165_v20, 0.0  ;;  %v8284_v27 = vpack.c.bf16 %v2173_v21, %v2169_v24  ;;  %v7391_v19 = vld [vmem:[#allocation10 + $0x180] ss:$16 sps:$4 sm:$0xff]   ;;  %v7396_v20 = vld [vmem:[#allocation10 + $0x164] ss:$16 sps:$4 sm:$0xff]  }
 0x2f0   :  { %v7357_v21 = vld [vmem:[#allocation8 + $0x30c] ss:$16 sps:$4 sm:$0xff]   ;;  %v7399_v24 = vld [vmem:[#allocation10 + $0x144] ss:$16 sps:$4 sm:$0xff]  }
 0x2f1   :  { %v2178_v25 = vpack.c.bf16 %v2174_v23, %v2170_v22  ;;  %3087 = vmatpush2.bf16.msra.mxu0 %v7307_v13  ;;  %v7352_v13 = vld [vmem:[#allocation8 + $0x328] ss:$16 sps:$4 sm:$0xff]   ;;  %v7394_v22 = vld [vmem:[#allocation10 + $0x160] ss:$16 sps:$4 sm:$0xff]  }
 0x2f2   :  { %3945 = vmatprep.subr.bf16.mxu0 %v7360_v37  ;;  %v7355_v23 = vld [vmem:[#allocation8 + $0x308] ss:$16 sps:$4 sm:$0xff]   ;;  %v7412_v37 = vld [vmem:[#allocation10 + $0x2c0] ss:$16 sps:$4 sm:$0xff]  }
 0x2f3   :  { %3045 = vmatprep.mubr.bf16.mxu1 %v2178_v25 }
 0x2f4   :  { %3046 = vmatmul.mubr.bf16.vlgmr.msra.gmra.mxu1 %v8284_v27  ;;  %3089 = vmatmul.mubr.bf16.vlgmr.msra.gmra.mxu0 %v8277_v33  ;;  %v7366_v33 = vld [vmem:[#allocation10 + $0xa4] ss:$16 sps:$4 sm:$0xff]  }
 0x2f5   :  { %3100 = vmatpush1.bf16.msra.mxu1 %v7310_v26  ;;  %3131 = vmatprep.mubr.bf16.mxu1 %v2178_v25  ;;  %v7397_v25 = vld [vmem:[#allocation10 + $0x140] ss:$16 sps:$4 sm:$0xff]   ;;  %v7402_v26 = vld [vmem:[#allocation10 + $0x124] ss:$16 sps:$4 sm:$0xff]  }
 0x2f6   :  { %3101 = vmatprep.subr.bf16.mxu1 %v7315_v28  ;;  %3946 = vmatpush1.bf16.msra.mxu0 %v7358_v35  ;;  %v7400_v28 = vld [vmem:[#allocation10 + $0x120] ss:$16 sps:$4 sm:$0xff]   ;;  %v7411_v35 = vld [vmem:[#allocation10 + $0xec] ss:$16 sps:$4 sm:$0xff]  }
 0x2f7   :  { %3947 = vmatprep.subr.bf16.mxu0 %v7363_v38  ;;  %v7418_v38 = vld [vmem:[#allocation10 + $0x2a0] ss:$16 sps:$4 sm:$0xff]  }
 0x2f9   :  { %3102 = vmatpush1.bf16.msra.mxu1 %v7313_v29  ;;  %v7405_v29 = vld [vmem:[#allocation10 + $0x104] ss:$16 sps:$4 sm:$0xff]  }
 0x2fa   :  { %3103 = vmatprep.subr.bf16.mxu1 %v7318_v30  ;;  %3948 = vmatpush1.bf16.msra.mxu0 %v7361_v40  ;;  %v7403_v30 = vld [vmem:[#allocation10 + $0x100] ss:$16 sps:$4 sm:$0xff]   ;;  %v7426_v40 = vld [vmem:[#allocation10 + $0x284] ss:$16 sps:$4 sm:$0xff]  }
 0x2fb   :  { %3949 = vmatprep.subr.bf16.mxu0 %v7366_v33  ;;  %v7430_v33 = vld [vmem:[#allocation10 + $0x260] ss:$16 sps:$4 sm:$0xff]  }
 0x2fd   :  { %3104 = vmatpush1.bf16.msra.mxu1 %v7316_v32  ;;  %v7406_v32 = vld [vmem:[#allocation10 + $0x2e0] ss:$16 sps:$4 sm:$0xff]  }
 0x2fe   :  { %3105 = vmatprep.subr.bf16.mxu1 %v7321_v34  ;;  %3950 = vmatpush1.bf16.msra.mxu0 %v7364_v42  ;;  %v7408_v34 = vld [vmem:[#allocation10 + $0x2e4] ss:$16 sps:$4 sm:$0xff]  }
 0x2ff   :  { %3951 = vmatprep.subr.bf16.mxu0 %v7369_v43  ;;  %v7438_v42 = vld [vmem:[#allocation10 + $0x244] ss:$16 sps:$4 sm:$0xff]   ;;  %v7442_v43 = vld [vmem:[#allocation10 + $0x220] ss:$16 sps:$4 sm:$0xff]  }
 0x301   :  { %3106 = vmatpush1.bf16.msra.mxu1 %v7319_v31  ;;  %v7420_v31 = vld [vmem:[#allocation10 + $0x2a4] ss:$16 sps:$4 sm:$0xff]  }
 0x302   :  { %3107 = vmatprep.subr.bf16.mxu1 %v7324_v39  ;;  %3952 = vmatpush1.bf16.msra.mxu0 %v7367_v46  ;;  %v7424_v39 = vld [vmem:[#allocation10 + $0x280] ss:$16 sps:$4 sm:$0xff]   ;;  %v7450_v46 = vld [vmem:[#allocation10 + $0x204] ss:$16 sps:$4 sm:$0xff]  }
 0x303   :  { %3953 = vmatprep.subr.bf16.mxu0 %v7372_v47  ;;  %v7454_v47 = vld [vmem:[#allocation10 + $0x3e0] ss:$16 sps:$4 sm:$0xff]  }
 0x305   :  { %3108 = vmatpush1.bf16.msra.mxu1 %v7322_v41  ;;  %v7432_v41 = vld [vmem:[#allocation10 + $0x264] ss:$16 sps:$4 sm:$0xff]  }
 0x306   :  { %3109 = vmatprep.subr.bf16.mxu1 %v7327_v36  ;;  %3954 = vmatpush1.bf16.msra.mxu0 %v7370_v50  ;;  %v7436_v36 = vld [vmem:[#allocation10 + $0x240] ss:$16 sps:$4 sm:$0xff]   ;;  %v7462_v50 = vld [vmem:[#allocation10 + $0x3c4] ss:$16 sps:$4 sm:$0xff]  }
 0x307   :  { %3955 = vmatprep.subr.bf16.mxu0 %v7375_v51  ;;  %v7466_v51 = vld [vmem:[#allocation10 + $0x3a0] ss:$16 sps:$4 sm:$0xff]  }
 0x309   :  { %3110 = vmatpush1.bf16.msra.mxu1 %v7325_v44  ;;  %v7444_v44 = vld [vmem:[#allocation10 + $0x224] ss:$16 sps:$4 sm:$0xff]  }
 0x30a   :  { %3111 = vmatprep.subr.bf16.mxu1 %v7330_v45  ;;  %3956 = vmatpush1.bf16.msra.mxu0 %v7373_v54  ;;  %v7448_v45 = vld [vmem:[#allocation10 + $0x200] ss:$16 sps:$4 sm:$0xff]   ;;  %v7474_v54 = vld [vmem:[#allocation10 + $0x384] ss:$16 sps:$4 sm:$0xff]  }
 0x30b   :  { %3957 = vmatprep.subr.bf16.mxu0 %v7378_v55  ;;  %v7478_v55 = vld [vmem:[#allocation10 + $0x360] ss:$16 sps:$4 sm:$0xff]  }
 0x30d   :  { %3112 = vmatpush1.bf16.msra.mxu1 %v7328_v48  ;;  %v7456_v48 = vld [vmem:[#allocation10 + $0x3e4] ss:$16 sps:$4 sm:$0xff]  }
 0x30e   :  { %3113 = vmatprep.subr.bf16.mxu1 %v7333_v49  ;;  %3958 = vmatpush1.bf16.msra.mxu0 %v7376_v58  ;;  %v7460_v49 = vld [vmem:[#allocation10 + $0x3c0] ss:$16 sps:$4 sm:$0xff]  }
 0x30f   :  { %3959 = vmatprep.subr.bf16.mxu0 %v7381_v61  ;;  %v7484_v58 = vld [vmem:[#allocation10 + $0x340] ss:$16 sps:$4 sm:$0xff]   ;;  %v7492_v61 = vld [vmem:[#allocation10 + $0x324] ss:$16 sps:$4 sm:$0xff]  }
 0x311   :  { %3114 = vmatpush1.bf16.msra.mxu1 %v7331_v52  ;;  %v7468_v52 = vld [vmem:[#allocation10 + $0x3a4] ss:$16 sps:$4 sm:$0xff]  }
 0x312   :  { %3115 = vmatprep.subr.bf16.mxu1 %v7336_v53  ;;  %3960 = vmatpush1.bf16.msra.mxu0 %v7379_v0  ;;  %v7472_v53 = vld [vmem:[#allocation10 + $0x380] ss:$16 sps:$4 sm:$0xff]  }
 0x313   :  { %3961 = vmatprep.subr.bf16.mxu0 %v7384_v1  ;;  %v7496_v0 = vld [vmem:[#allocation10 + $0x300] ss:$16 sps:$4 sm:$0xff]   ;;  %v7504_v1 = vld [vmem:[#allocation10 + $0x2ec] ss:$16 sps:$4 sm:$0xff]  }
 0x315   :  { %3116 = vmatpush2.bf16.msra.mxu1 %v7334_v56  ;;  %v7480_v56 = vld [vmem:[#allocation10 + $0x364] ss:$16 sps:$4 sm:$0xff]  }
 0x316   :  { %3117 = vmatprep.subr.bf16.mxu1 %v7339_v57  ;;  %3962 = vmatpush2.bf16.msra.mxu0 %v7382_v6  ;;  %v7486_v57 = vld [vmem:[#allocation10 + $0x344] ss:$16 sps:$4 sm:$0xff]   ;;  %v8289_v6 = vld [vmem:[#allocation20 + $0x2] ss:$8 sm:$0xf] }
 0x317   :  { %3963 = vmatprep.subr.bf16.mxu0 %v7387_v7 }
 0x319   :  { %3118 = vmatpush2.bf16.msra.mxu1 %v7337_v62  ;;  %v7490_v62 = vld [vmem:[#allocation10 + $0x320] ss:$16 sps:$4 sm:$0xff]  }
 0x31a   :  { %3119 = vmatprep.subr.bf16.mxu1 %v7342_v63  ;;  %3964 = vmatpush2.bf16.msra.mxu0 %v7385_v14  ;;  %v7498_v63 = vld [vmem:[#allocation10 + $0x304] ss:$16 sps:$4 sm:$0xff]  }
 0x31b   :  { %3965 = vmatprep.subr.bf16.mxu0 %v7390_v15 }
 0x31d   :  { %3120 = vmatpush2.bf16.msra.mxu1 %v7340_v2 }
 0x31e   :  { %3121 = vmatprep.subr.bf16.mxu1 %v7345_v3  ;;  %3966 = vmatpush2.bf16.msra.mxu0 %v7388_v4 }
 0x31f   :  { %3967 = vmatprep.subr.bf16.mxu0 %v7393_v5 }
 0x321   :  { %3122 = vmatpush2.bf16.msra.mxu1 %v7343_v8  ;;  %v2317_v8 = vrot.slane %v8289_v6, %v8244_v11 }
 0x322   :  { %3123 = vmatprep.subr.bf16.mxu1 %v7348_v9  ;;  %3968 = vmatpush2.bf16.msra.mxu0 %v7391_v19  ;;  %v2313_v9 = vrot.slane %v8289_v6, %v8247_v12 }
 0x323   :  { %3969 = vmatprep.subr.bf16.mxu0 %v7396_v20 }
 0x325   :  { %3124 = vmatpush2.bf16.msra.mxu1 %v7346_v16 }
 0x326   :  { %3125 = vmatprep.subr.bf16.mxu1 %v7351_v17  ;;  %3970 = vmatpush2.bf16.msra.mxu0 %v7394_v22 }
 0x327   :  { %3971 = vmatprep.subr.bf16.mxu0 %v7399_v24 }
 0x329   :  { %3126 = vmatpush2.bf16.msra.mxu1 %v7349_v18 }
 0x32a   :  { %3127 = vmatprep.subr.bf16.mxu1 %v7354_v10  ;;  %3972 = vmatpush2.bf16.msra.mxu0 %v7397_v25 }
 0x32b   :  { %3973 = vmatprep.subr.bf16.mxu0 %v7402_v26 }
 0x32d   :  { %3128 = vmatpush2.bf16.msra.mxu1 %v7352_v13 }
 0x32e   :  { %3129 = vmatprep.subr.bf16.mxu1 %v7357_v21  ;;  %3974 = vmatpush2.bf16.msra.mxu0 %v7400_v28 }
 0x32f   :  { %3975 = vmatprep.subr.bf16.mxu0 %v7405_v29  ;;  %v7409_v29 = vld [vmem:[#allocation10 + $0xe8] ss:$16 sps:$4 sm:$0xff]  }
 0x331   :  { %3130 = vmatpush2.bf16.msra.mxu1 %v7355_v23 }
 0x332   :  { %3976 = vmatpush2.bf16.msra.mxu0 %v7403_v30  ;;  %3988 = vmatprep.subr.bf16.mxu1 %v7408_v34  ;;  %v7415_v34 = vld [vmem:[#allocation10 + $0xc8] ss:$16 sps:$4 sm:$0xff]  }
 0x333   :  { %4031 = vmatprep.subr.bf16.mxu0 %v7411_v35  ;;  %v7423_v35 = vld [vmem:[#allocation10 + $0xac] ss:$16 sps:$4 sm:$0xff]  }
 0x334   :  { %3132 = vmatmul.mubr.bf16.vlgmr.msra.gmra.mxu1 %v8284_v27  ;;  %v7414_v27 = vld [vmem:[#allocation10 + $0x2c4] ss:$16 sps:$4 sm:$0xff]  }
 0x335   :  { %3989 = vmatpush1.bf16.msra.mxu1 %v7406_v32  ;;  %v7417_v32 = vld [vmem:[#allocation10 + $0xcc] ss:$16 sps:$4 sm:$0xff]  }
 0x336   :  { %3990 = vmatprep.subr.bf16.mxu1 %v7414_v27  ;;  %v7429_v27 = vld [vmem:[#allocation10 + $0x8c] ss:$16 sps:$4 sm:$0xff]  }
 0x339   :  { %3991 = vmatpush1.bf16.msra.mxu1 %v7412_v37  ;;  %v7421_v37 = vld [vmem:[#allocation10 + $0xa8] ss:$16 sps:$4 sm:$0xff]  }
 0x33a   :  { %3992 = vmatprep.subr.bf16.mxu1 %v7420_v31  ;;  %v7435_v31 = vld [vmem:[#allocation10 + $0x6c] ss:$16 sps:$4 sm:$0xff]  }
 0x33d   :  { %3993 = vmatpush1.bf16.msra.mxu1 %v7418_v38  ;;  %v7427_v38 = vld [vmem:[#allocation10 + $0x88] ss:$16 sps:$4 sm:$0xff]  }
 0x33e   :  { %3994 = vmatprep.subr.bf16.mxu1 %v7426_v40  ;;  %v7441_v40 = vld [vmem:[#allocation10 + $0x4c] ss:$16 sps:$4 sm:$0xff]  }
 0x341   :  { %3995 = vmatpush1.bf16.msra.mxu1 %v7424_v39  ;;  %v7433_v39 = vld [vmem:[#allocation10 + $0x68] ss:$16 sps:$4 sm:$0xff]  }
 0x342   :  { %3996 = vmatprep.subr.bf16.mxu1 %v7432_v41  ;;  %v7447_v41 = vld [vmem:[#allocation10 + $0x2c] ss:$16 sps:$4 sm:$0xff]  }
 0x345   :  { %3997 = vmatpush1.bf16.msra.mxu1 %v7430_v33  ;;  %v7439_v33 = vld [vmem:[#allocation10 + $0x48] ss:$16 sps:$4 sm:$0xff]  }
 0x346   :  { %3998 = vmatprep.subr.bf16.mxu1 %v7438_v42  ;;  %v7453_v42 = vld [vmem:[#allocation10 + $0xc] ss:$16 sps:$4 sm:$0xff]  }
 0x349   :  { %3999 = vmatpush1.bf16.msra.mxu1 %v7436_v36  ;;  %v7445_v36 = vld [vmem:[#allocation10 + $0x28] ss:$16 sps:$4 sm:$0xff]  }
 0x34a   :  { %4000 = vmatprep.subr.bf16.mxu1 %v7444_v44  ;;  %v7459_v44 = vld [vmem:[#allocation10 + $0x1ec] ss:$16 sps:$4 sm:$0xff]  }
 0x34d   :  { %4001 = vmatpush1.bf16.msra.mxu1 %v7442_v43  ;;  %v7451_v43 = vld [vmem:[#allocation10 + $0x8] ss:$16 sps:$4 sm:$0xff]  }
 0x34e   :  { %4002 = vmatprep.subr.bf16.mxu1 %v7450_v46  ;;  %v7465_v46 = vld [vmem:[#allocation10 + $0x1cc] ss:$16 sps:$4 sm:$0xff]  }
 0x351   :  { %4003 = vmatpush1.bf16.msra.mxu1 %v7448_v45  ;;  %v7457_v45 = vld [vmem:[#allocation10 + $0x1e8] ss:$16 sps:$4 sm:$0xff]  }
 0x352   :  { %4004 = vmatprep.subr.bf16.mxu1 %v7456_v48  ;;  %v7471_v48 = vld [vmem:[#allocation10 + $0x1ac] ss:$16 sps:$4 sm:$0xff]  }
 0x355   :  { %4005 = vmatpush2.bf16.msra.mxu1 %v7454_v47  ;;  %v7463_v47 = vld [vmem:[#allocation10 + $0x1c8] ss:$16 sps:$4 sm:$0xff]  }
 0x356   :  { %4006 = vmatprep.subr.bf16.mxu1 %v7462_v50  ;;  %v7477_v50 = vld [vmem:[#allocation10 + $0x18c] ss:$16 sps:$4 sm:$0xff]  }
 0x359   :  { %4007 = vmatpush2.bf16.msra.mxu1 %v7460_v49  ;;  %v7469_v49 = vld [vmem:[#allocation10 + $0x1a8] ss:$16 sps:$4 sm:$0xff]  }
 0x35a   :  { %4008 = vmatprep.subr.bf16.mxu1 %v7468_v52  ;;  %v7475_v52 = vld [vmem:[#allocation10 + $0x188] ss:$16 sps:$4 sm:$0xff]  }
 0x35d   :  { %4009 = vmatpush2.bf16.msra.mxu1 %v7466_v51 }
 0x35e   :  { %4010 = vmatprep.subr.bf16.mxu1 %v7474_v54 }
 0x361   :  { %4011 = vmatpush2.bf16.msra.mxu1 %v7472_v53  ;;  %v7483_v53 = vld [vmem:[#allocation10 + $0x16c] ss:$16 sps:$4 sm:$0xff]  }
 0x362   :  { %4012 = vmatprep.subr.bf16.mxu1 %v7480_v56  ;;  %v7489_v56 = vld [vmem:[#allocation10 + $0x14c] ss:$16 sps:$4 sm:$0xff]  }
 0x365   :  { %4013 = vmatpush2.bf16.msra.mxu1 %v7478_v55  ;;  %v7481_v55 = vld [vmem:[#allocation10 + $0x168] ss:$16 sps:$4 sm:$0xff]  }
 0x366   :  { %4014 = vmatprep.subr.bf16.mxu1 %v7486_v57 }
 0x369   :  { %4015 = vmatpush2.bf16.msra.mxu1 %v7484_v58  ;;  %v2325_v58 = vrot.slane %v8289_v6, %v8260_v60 }
 0x36a   :  { %4016 = vmatprep.subr.bf16.mxu1 %v7492_v61  ;;  %v7487_v61 = vld [vmem:[#allocation10 + $0x148] ss:$16 sps:$4 sm:$0xff]  }
 0x36d   :  { %4017 = vmatpush2.bf16.msra.mxu1 %v7490_v62  ;;  %v2321_v62 = vrot.slane %v8289_v6, %v8257_v59  ;;  %v7499_v6 = vld [vmem:[#allocation10 + $0x108] ss:$16 sps:$4 sm:$0xff]  }
 0x36e   :  { %4018 = vmatprep.subr.bf16.mxu1 %v7498_v63 }
 0x371   :  { %4019 = vmatpush2.bf16.msra.mxu1 %v7496_v0  ;;  %v7495_v0 = vld [vmem:[#allocation10 + $0x12c] ss:$16 sps:$4 sm:$0xff]  }
 0x372   :  { %4074 = vmatprep.subr.bf16.mxu1 %v7504_v1 }
 0x374   :  { %v3004_v2 = vpop.f32.mrf.mxu0 }
 0x375   :  { %v3005_v5 = vadd.f32 %v3004_v2, %v2313_v9 }
 0x376   :  { %v3006_v3 = vpop.f32.mrf.mxu0 }
 0x377   :  { %v3007_v17 = vadd.f32 %v3006_v3, %v2317_v8 }
 0x378   :  { %v3008_v7 = vpop.f32.mrf.mxu0 }
 0x379   :  { %v3009_v4 = vadd.f32 %v3008_v7, %v2313_v9 }
 0x37a   :  { %v3010_v15 = vpop.f32.mrf.mxu0 }
 0x37b   :  { %v3011_v10 = vadd.f32 %v3010_v15, %v2317_v8  ;;  %v7493_v8 = vld [vmem:[#allocation10 + $0x128] ss:$16 sps:$4 sm:$0xff]   ;;  %v7501_v15 = vld [vmem:[#allocation10 + $0x10c] ss:$16 sps:$4 sm:$0xff]  }
 0x3b4   :  { %v3047_v14 = vpop.f32.mrf.mxu1  ;;  %v3090_v51 = vpop.f32.mrf.mxu0 }
 0x3b5   :  { %v3048_v13 = vadd.f32 %v3047_v14, %v3005_v5  ;;  %v3091_v9 = vadd.f32 %v3090_v51, %v2321_v62  ;;  %v7565_v51 = vld [vmem:[#allocation11 + $0x30] ss:$12 sps:$4 sm:$0xff]  }
 0x3b6   :  { %v3049_v16 = vpop.f32.mrf.mxu1  ;;  %v3092_v54 = vpop.f32.mrf.mxu0 }
 0x3b7   :  { %v3050_v19 = vadd.f32 %v3049_v16, %v3007_v17  ;;  %v3142_v26 = vmax.f32 %v3048_v13, 0.0  ;;  %v3093_v3 = vadd.f32 %v3092_v54, %v2325_v58  ;;  %v7531_v54 = vld [vmem:[#allocation10 + $0x3cc] ss:$16 sps:$4 sm:$0xff]  }
 0x3b8   :  { %v3051_v18 = vpop.f32.mrf.mxu1  ;;  %v3094_v57 = vpop.f32.mrf.mxu0 }
 0x3b9   :  { %v3052_v20 = vadd.f32 %v3051_v18, %v3009_v4  ;;  %v3143_v24 = vmax.f32 %v3050_v19, 0.0  ;;  %v3095_v7 = vadd.f32 %v3094_v57, %v2321_v62  ;;  %v7529_v57 = vld [vmem:[#allocation10 + $0x3c8] ss:$16 sps:$4 sm:$0xff]  }
 0x3ba   :  { %v3053_v21 = vpop.f32.mrf.mxu1  ;;  %v3096_v1 = vpop.f32.mrf.mxu0  ;;  %v7576_v62 = vld [vmem:[#allocation11 + $0x16c] ss:$12 sps:$4 sm:$0xff]  }
 0x3bb   :  { %v3054_v22 = vadd.f32 %v3053_v21, %v3011_v10  ;;  %v3146_v23 = vmax.f32 %v3052_v20, 0.0  ;;  %v3097_v16 = vadd.f32 %v3096_v1, %v2325_v58  ;;  %v7534_v58 = vld [vmem:[#allocation10 + $0x3ac] ss:$16 sps:$4 sm:$0xff]   ;;  %v7574_v1 = vld [vmem:[#allocation11 + $0x168] ss:$12 sps:$4 sm:$0xff]  }
 0x3bd   :  { %v3147_v25 = vmax.f32 %v3054_v22, 0.0  ;;  %v8295_v30 = vpack.c.bf16 %v3146_v23, %v3142_v26  ;;  %v7502_v23 = vld [vmem:[#allocation10 + $0x2e8] ss:$16 sps:$4 sm:$0xff]  }
 0x3be   :  { %v7505_v26 = vld [vmem:[#allocation10 + $0x2c8] ss:$16 sps:$4 sm:$0xff]  }
 0x3bf   :  { %v3151_v28 = vpack.c.bf16 %v3147_v25, %v3143_v24  ;;  %v7507_v25 = vld [vmem:[#allocation10 + $0x2cc] ss:$16 sps:$4 sm:$0xff]  }
 0x3c1   :  { %3977 = vmatprep.mubr.bf16.mxu0 %v3151_v28 }
 0x3c2   :  { %3978 = vmatmul.mubr.bf16.vlgmr.msra.gmra.mxu0 %v8295_v30 }
 0x3c3   :  { %4032 = vmatpush1.bf16.msra.mxu0 %v7409_v29  ;;  %4063 = vmatprep.mubr.bf16.mxu0 %v3151_v28  ;;  %v7510_v28 = vld [vmem:[#allocation10 + $0x2ac] ss:$16 sps:$4 sm:$0xff]   ;;  %v7508_v29 = vld [vmem:[#allocation10 + $0x2a8] ss:$16 sps:$4 sm:$0xff]  }
 0x3c4   :  { %4033 = vmatprep.subr.bf16.mxu0 %v7417_v32  ;;  %v7513_v32 = vld [vmem:[#allocation10 + $0x28c] ss:$16 sps:$4 sm:$0xff]  }
 0x3c7   :  { %4034 = vmatpush1.bf16.msra.mxu0 %v7415_v34  ;;  %v7550_v34 = vld [vmem:[#allocation11 + $0xa8] ss:$12 sps:$4 sm:$0xff]  }
 0x3c8   :  { %4035 = vmatprep.subr.bf16.mxu0 %v7423_v35  ;;  %v7552_v35 = vld [vmem:[#allocation11 + $0xac] ss:$12 sps:$4 sm:$0xff]  }
 0x3cb   :  { %4036 = vmatpush1.bf16.msra.mxu0 %v7421_v37  ;;  %v7555_v37 = vld [vmem:[#allocation11 + $0x94] ss:$12 sps:$4 sm:$0xff]  }
 0x3cc   :  { %4037 = vmatprep.subr.bf16.mxu0 %v7429_v27  ;;  %v7511_v27 = vld [vmem:[#allocation10 + $0x288] ss:$16 sps:$4 sm:$0xff]  }
 0x3cf   :  { %4038 = vmatpush1.bf16.msra.mxu0 %v7427_v38  ;;  %v7516_v38 = vld [vmem:[#allocation10 + $0x26c] ss:$16 sps:$4 sm:$0xff]  }
 0x3d0   :  { %4039 = vmatprep.subr.bf16.mxu0 %v7435_v31  ;;  %v7553_v31 = vld [vmem:[#allocation11 + $0x90] ss:$12 sps:$4 sm:$0xff]  }
 0x3d3   :  { %4040 = vmatpush1.bf16.msra.mxu0 %v7433_v39  ;;  %v7514_v39 = vld [vmem:[#allocation10 + $0x268] ss:$16 sps:$4 sm:$0xff]  }
 0x3d4   :  { %4041 = vmatprep.subr.bf16.mxu0 %v7441_v40  ;;  %v7519_v40 = vld [vmem:[#allocation10 + $0x24c] ss:$16 sps:$4 sm:$0xff]  }
 0x3d7   :  { %4042 = vmatpush1.bf16.msra.mxu0 %v7439_v33  ;;  %v7556_v33 = vld [vmem:[#allocation11 + $0x78] ss:$12 sps:$4 sm:$0xff]  }
 0x3d8   :  { %4043 = vmatprep.subr.bf16.mxu0 %v7447_v41  ;;  %v7561_v41 = vld [vmem:[#allocation11 + $0x64] ss:$12 sps:$4 sm:$0xff]  }
 0x3db   :  { %4044 = vmatpush1.bf16.msra.mxu0 %v7445_v36  ;;  %v7517_v36 = vld [vmem:[#allocation10 + $0x248] ss:$16 sps:$4 sm:$0xff]  }
 0x3dc   :  { %4045 = vmatprep.subr.bf16.mxu0 %v7453_v42  ;;  %v7522_v42 = vld [vmem:[#allocation10 + $0x22c] ss:$16 sps:$4 sm:$0xff]  }
 0x3df   :  { %4046 = vmatpush1.bf16.msra.mxu0 %v7451_v43  ;;  %v7559_v43 = vld [vmem:[#allocation11 + $0x60] ss:$12 sps:$4 sm:$0xff]  }
 0x3e0   :  { %4047 = vmatprep.subr.bf16.mxu0 %v7459_v44  ;;  %v7564_v44 = vld [vmem:[#allocation11 + $0x4c] ss:$12 sps:$4 sm:$0xff]  }
 0x3e3   :  { %4048 = vmatpush2.bf16.msra.mxu0 %v7457_v45  ;;  %v7520_v45 = vld [vmem:[#allocation10 + $0x228] ss:$16 sps:$4 sm:$0xff]  }
 0x3e4   :  { %4049 = vmatprep.subr.bf16.mxu0 %v7465_v46  ;;  %v7525_v46 = vld [vmem:[#allocation10 + $0x20c] ss:$16 sps:$4 sm:$0xff]  }
 0x3e7   :  { %4050 = vmatpush2.bf16.msra.mxu0 %v7463_v47  ;;  %v7562_v47 = vld [vmem:[#allocation11 + $0x48] ss:$12 sps:$4 sm:$0xff]  }
 0x3e8   :  { %4051 = vmatprep.subr.bf16.mxu0 %v7471_v48  ;;  %v7567_v48 = vld [vmem:[#allocation11 + $0x34] ss:$12 sps:$4 sm:$0xff]  }
 0x3eb   :  { %4052 = vmatpush2.bf16.msra.mxu0 %v7469_v49  ;;  %v7523_v49 = vld [vmem:[#allocation10 + $0x208] ss:$16 sps:$4 sm:$0xff]  }
 0x3ec   :  { %4053 = vmatprep.subr.bf16.mxu0 %v7477_v50  ;;  %v7528_v50 = vld [vmem:[#allocation10 + $0x3ec] ss:$16 sps:$4 sm:$0xff]  }
 0x3ef   :  { %4054 = vmatpush2.bf16.msra.mxu0 %v7475_v52  ;;  %v7570_v52 = vld [vmem:[#allocation11 + $0x1c] ss:$12 sps:$4 sm:$0xff]  }
 0x3f0   :  { %4055 = vmatprep.subr.bf16.mxu0 %v7483_v53  ;;  %v7526_v53 = vld [vmem:[#allocation10 + $0x3e8] ss:$16 sps:$4 sm:$0xff]  }
 0x3f3   :  { %4056 = vmatpush2.bf16.msra.mxu0 %v7481_v55  ;;  %v7568_v55 = vld [vmem:[#allocation11 + $0x18] ss:$12 sps:$4 sm:$0xff]  }
 0x3f4   :  { %v3133_v63 = vpop.f32.mrf.mxu1  ;;  %4057 = vmatprep.subr.bf16.mxu0 %v7489_v56  ;;  %v7573_v56 = vld [vmem:[#allocation11 + $0x4] ss:$12 sps:$4 sm:$0xff]  }
 0x3f5   :  { %v3134_v5 = vadd.f32 %v3133_v63, %v3091_v9  ;;  %v7532_v63 = vld [vmem:[#allocation10 + $0x3a8] ss:$16 sps:$4 sm:$0xff]  }
 0x3f6   :  { %v3135_v2 = vpop.f32.mrf.mxu1  ;;  %v7582_v9 = vld [vmem:[#allocation11 + $0x13c] ss:$12 sps:$4 sm:$0xff]  }
 0x3f7   :  { %4058 = vmatpush2.bf16.msra.mxu0 %v7487_v61  ;;  %v3136_v17 = vadd.f32 %v3135_v2, %v3093_v3  ;;  %v3144_v21 = vmax.f32 %v3134_v5, 0.0  ;;  %v7571_v61 = vld [vmem:[#allocation11] ss:$12 sps:$4 sm:$0xff]   ;;  %v7535_v3 = vld [vmem:[#allocation10 + $0x388] ss:$16 sps:$4 sm:$0xff]  }
 0x3f8   :  { %v3137_v14 = vpop.f32.mrf.mxu1  ;;  %4059 = vmatprep.subr.bf16.mxu0 %v7495_v0  ;;  %v7537_v0 = vld [vmem:[#allocation10 + $0x38c] ss:$16 sps:$4 sm:$0xff]   ;;  %v7579_v2 = vld [vmem:[#allocation11 + $0x154] ss:$12 sps:$4 sm:$0xff]  }
 0x3f9   :  { %v3138_v4 = vadd.f32 %v3137_v14, %v3095_v7  ;;  %v3145_v20 = vmax.f32 %v3136_v17, 0.0  ;;  %v7540_v7 = vld [vmem:[#allocation10 + $0x36c] ss:$16 sps:$4 sm:$0xff]   ;;  %v7538_v14 = vld [vmem:[#allocation10 + $0x368] ss:$16 sps:$4 sm:$0xff]  }
 0x3fa   :  { %v3139_v18 = vpop.f32.mrf.mxu1  ;;  %v7585_v17 = vld [vmem:[#allocation11 + $0x124] ss:$12 sps:$4 sm:$0xff]   ;;  %v7546_v5 = vld [vmem:[#allocation10 + $0x32c] ss:$16 sps:$4 sm:$0xff]  }
 0x3fb   :  { %v3140_v10 = vadd.f32 %v3139_v18, %v3097_v16  ;;  %4060 = vmatpush2.bf16.msra.mxu0 %v7493_v8  ;;  %v3148_v19 = vmax.f32 %v3138_v4, 0.0  ;;  %v7577_v8 = vld [vmem:[#allocation11 + $0x150] ss:$12 sps:$4 sm:$0xff]   ;;  %v7580_v16 = vld [vmem:[#allocation11 + $0x138] ss:$12 sps:$4 sm:$0xff]  }
 0x3fc   :  { %4061 = vmatprep.subr.bf16.mxu0 %v7501_v15  ;;  %v7543_v15 = vld [vmem:[#allocation10 + $0x34c] ss:$16 sps:$4 sm:$0xff]   ;;  %v7541_v4 = vld [vmem:[#allocation10 + $0x348] ss:$16 sps:$4 sm:$0xff]  }
 0x3fd   :  { %v3149_v13 = vmax.f32 %v3140_v10, 0.0  ;;  %v8302_v24 = vpack.c.bf16 %v3148_v19, %v3144_v21  ;;  %v7583_v18 = vld [vmem:[#allocation11 + $0x120] ss:$12 sps:$4 sm:$0xff]  }
 0x3fe   :  { %v7588_v10 = vld [vmem:[#allocation11 + $0x10c] ss:$12 sps:$4 sm:$0xff]   ;;  %v7591_v21 = vld [vmem:[#allocation11 + $0xf4] ss:$12 sps:$4 sm:$0xff]  }
 0x3ff   :  { %v3153_v22 = vpack.c.bf16 %v3149_v13, %v3145_v20  ;;  %4062 = vmatpush2.bf16.msra.mxu0 %v7499_v6  ;;  %v7544_v6 = vld [vmem:[#allocation10 + $0x328] ss:$16 sps:$4 sm:$0xff]   ;;  %v7549_v19 = vld [vmem:[#allocation10 + $0x30c] ss:$16 sps:$4 sm:$0xff]  }
 0x400   :  { %4787 = vmatprep.subr.bf16.mxu0 %v7552_v35  ;;  %v7586_v20 = vld [vmem:[#allocation11 + $0x108] ss:$12 sps:$4 sm:$0xff]   ;;  %v7603_v35 = vld [vmem:[#allocation11 + $0x210] ss:$12 sps:$4 sm:$0xff]  }
 0x401   :  { %4020 = vmatprep.mubr.bf16.mxu1 %v3153_v22  ;;  %v7547_v13 = vld [vmem:[#allocation10 + $0x308] ss:$16 sps:$4 sm:$0xff]  }
 0x402   :  { %4021 = vmatmul.mubr.bf16.vlgmr.msra.gmra.mxu1 %v8302_v24  ;;  %4064 = vmatmul.mubr.bf16.vlgmr.msra.gmra.mxu0 %v8295_v30  ;;  %v7558_v30 = vld [vmem:[#allocation11 + $0x7c] ss:$12 sps:$4 sm:$0xff]  }
 0x403   :  { %4075 = vmatpush1.bf16.msra.mxu1 %v7502_v23  ;;  %4106 = vmatprep.mubr.bf16.mxu1 %v3153_v22  ;;  %v7589_v22 = vld [vmem:[#allocation11 + $0xf0] ss:$12 sps:$4 sm:$0xff]  }
 0x404   :  { %4076 = vmatprep.subr.bf16.mxu1 %v7507_v25  ;;  %4788 = vmatpush1.bf16.msra.mxu0 %v7550_v34  ;;  %v7594_v23 = vld [vmem:[#allocation11 + $0xdc] ss:$12 sps:$4 sm:$0xff]   ;;  %v7592_v25 = vld [vmem:[#allocation11 + $0xd8] ss:$12 sps:$4 sm:$0xff]  }
 0x405   :  { %4789 = vmatprep.subr.bf16.mxu0 %v7555_v37  ;;  %v7601_v34 = vld [vmem:[#allocation11 + $0x170] ss:$12 sps:$4 sm:$0xff]   ;;  %v7608_v37 = vld [vmem:[#allocation11 + $0x1f8] ss:$12 sps:$4 sm:$0xff]  }
 0x407   :  { %4077 = vmatpush1.bf16.msra.mxu1 %v7505_v26  ;;  %v7597_v26 = vld [vmem:[#allocation11 + $0xc4] ss:$12 sps:$4 sm:$0xff]  }
 0x408   :  { %4078 = vmatprep.subr.bf16.mxu1 %v7510_v28  ;;  %4790 = vmatpush1.bf16.msra.mxu0 %v7553_v31  ;;  %v7595_v28 = vld [vmem:[#allocation11 + $0xc0] ss:$12 sps:$4 sm:$0xff]   ;;  %v7615_v31 = vld [vmem:[#allocation11 + $0x1e4] ss:$12 sps:$4 sm:$0xff]  }
 0x409   :  { %4791 = vmatprep.subr.bf16.mxu0 %v7558_v30  ;;  %v7618_v30 = vld [vmem:[#allocation11 + $0x1c8] ss:$12 sps:$4 sm:$0xff]  }
 0x40b   :  { %4079 = vmatpush1.bf16.msra.mxu1 %v7508_v29  ;;  %v7598_v29 = vld [vmem:[#allocation11 + $0x228] ss:$12 sps:$4 sm:$0xff]  }
 0x40c   :  { %4080 = vmatprep.subr.bf16.mxu1 %v7513_v32  ;;  %4792 = vmatpush1.bf16.msra.mxu0 %v7556_v33  ;;  %v7600_v32 = vld [vmem:[#allocation11 + $0x22c] ss:$12 sps:$4 sm:$0xff]   ;;  %v7625_v33 = vld [vmem:[#allocation11 + $0x1b4] ss:$12 sps:$4 sm:$0xff]  }
 0x40d   :  { %4793 = vmatprep.subr.bf16.mxu0 %v7561_v41  ;;  %v7628_v41 = vld [vmem:[#allocation11 + $0x198] ss:$12 sps:$4 sm:$0xff]  }
 0x40f   :  { %4081 = vmatpush1.bf16.msra.mxu1 %v7511_v27  ;;  %v7610_v27 = vld [vmem:[#allocation11 + $0x1fc] ss:$12 sps:$4 sm:$0xff]  }
 0x410   :  { %4082 = vmatprep.subr.bf16.mxu1 %v7516_v38  ;;  %4794 = vmatpush1.bf16.msra.mxu0 %v7559_v43  ;;  %v7613_v38 = vld [vmem:[#allocation11 + $0x1e0] ss:$12 sps:$4 sm:$0xff]   ;;  %v7635_v43 = vld [vmem:[#allocation11 + $0x184] ss:$12 sps:$4 sm:$0xff]  }
 0x411   :  { %4795 = vmatprep.subr.bf16.mxu0 %v7564_v44  ;;  %v7638_v44 = vld [vmem:[#allocation11 + $0x2e8] ss:$12 sps:$4 sm:$0xff]  }
 0x413   :  { %4083 = vmatpush1.bf16.msra.mxu1 %v7514_v39  ;;  %v7620_v39 = vld [vmem:[#allocation11 + $0x1cc] ss:$12 sps:$4 sm:$0xff]  }
 0x414   :  { %4084 = vmatprep.subr.bf16.mxu1 %v7519_v40  ;;  %4796 = vmatpush1.bf16.msra.mxu0 %v7562_v47  ;;  %v7623_v40 = vld [vmem:[#allocation11 + $0x1b0] ss:$12 sps:$4 sm:$0xff]   ;;  %v7643_v47 = vld [vmem:[#allocation11 + $0x2d4] ss:$12 sps:$4 sm:$0xff]  }
 0x415   :  { %4797 = vmatprep.subr.bf16.mxu0 %v7567_v48  ;;  %v7646_v48 = vld [vmem:[#allocation11 + $0x2bc] ss:$12 sps:$4 sm:$0xff]  }
 0x417   :  { %4085 = vmatpush1.bf16.msra.mxu1 %v7517_v36  ;;  %v7630_v36 = vld [vmem:[#allocation11 + $0x19c] ss:$12 sps:$4 sm:$0xff]  }
 0x418   :  { %4086 = vmatprep.subr.bf16.mxu1 %v7522_v42  ;;  %4798 = vmatpush1.bf16.msra.mxu0 %v7565_v51  ;;  %v7633_v42 = vld [vmem:[#allocation11 + $0x180] ss:$12 sps:$4 sm:$0xff]  }
 0x419   :  { %4799 = vmatprep.subr.bf16.mxu0 %v7570_v52  ;;  %v7647_v51 = vld [vmem:[#allocation11 + $0x2a0] ss:$12 sps:$4 sm:$0xff]  }
 0x41a   :  { %v7652_v52 = vld [vmem:[#allocation11 + $0x28c] ss:$12 sps:$4 sm:$0xff]  }
 0x41b   :  { %4087 = vmatpush1.bf16.msra.mxu1 %v7520_v45  ;;  %v7640_v45 = vld [vmem:[#allocation11 + $0x2ec] ss:$12 sps:$4 sm:$0xff]  }
 0x41c   :  { %4088 = vmatprep.subr.bf16.mxu1 %v7525_v46  ;;  %4800 = vmatpush1.bf16.msra.mxu0 %v7568_v55  ;;  %v7641_v46 = vld [vmem:[#allocation11 + $0x2d0] ss:$12 sps:$4 sm:$0xff]  }
 0x41d   :  { %4801 = vmatprep.subr.bf16.mxu0 %v7573_v56  ;;  %v7653_v55 = vld [vmem:[#allocation11 + $0x270] ss:$12 sps:$4 sm:$0xff]  }
 0x41e   :  { %v7658_v56 = vld [vmem:[#allocation11 + $0x25c] ss:$12 sps:$4 sm:$0xff]  }
 0x41f   :  { %4089 = vmatpush1.bf16.msra.mxu1 %v7523_v49  ;;  %v7644_v49 = vld [vmem:[#allocation11 + $0x2b8] ss:$12 sps:$4 sm:$0xff]  }
 0x420   :  { %4090 = vmatprep.subr.bf16.mxu1 %v7528_v50  ;;  %4802 = vmatpush1.bf16.msra.mxu0 %v7571_v61  ;;  %v7649_v50 = vld [vmem:[#allocation11 + $0x2a4] ss:$12 sps:$4 sm:$0xff]   ;;  %v7659_v61 = vld [vmem:[#allocation11 + $0x240] ss:$12 sps:$4 sm:$0xff]  }
 0x421   :  { %4803 = vmatprep.subr.bf16.mxu0 %v7576_v62  ;;  %v7662_v62 = vld [vmem:[#allocation11 + $0x2f0] ss:$12 sps:$4 sm:$0xff]  }
 0x423   :  { %4091 = vmatpush2.bf16.msra.mxu1 %v7526_v53  ;;  %v7650_v53 = vld [vmem:[#allocation11 + $0x288] ss:$12 sps:$4 sm:$0xff]  }
 0x424   :  { %4092 = vmatprep.subr.bf16.mxu1 %v7531_v54  ;;  %4804 = vmatpush2.bf16.msra.mxu0 %v7574_v1  ;;  %v7655_v54 = vld [vmem:[#allocation11 + $0x274] ss:$12 sps:$4 sm:$0xff]  }
 0x425   :  { %4805 = vmatprep.subr.bf16.mxu0 %v7579_v2  ;;  %v3155_v1 = vld [vmem:[#allocation20 + $0x3] ss:$8 sm:$0xf] }
 0x427   :  { %4093 = vmatpush2.bf16.msra.mxu1 %v7529_v57  ;;  %v7656_v57 = vld [vmem:[#allocation11 + $0x258] ss:$12 sps:$4 sm:$0xff]  }
 0x428   :  { %4094 = vmatprep.subr.bf16.mxu1 %v7534_v58  ;;  %4806 = vmatpush2.bf16.msra.mxu0 %v7577_v8  ;;  %v7661_v58 = vld [vmem:[#allocation11 + $0x244] ss:$12 sps:$4 sm:$0xff]  }
 0x429   :  { %4807 = vmatprep.subr.bf16.mxu0 %v7582_v9 }
 0x42b   :  { %4095 = vmatpush2.bf16.msra.mxu1 %v7532_v63 }
 0x42c   :  { %4096 = vmatprep.subr.bf16.mxu1 %v7537_v0  ;;  %4808 = vmatpush2.bf16.msra.mxu0 %v7580_v16 }
 0x42d   :  { %4809 = vmatprep.subr.bf16.mxu0 %v7585_v17 }
 0x42f   :  { %4097 = vmatpush2.bf16.msra.mxu1 %v7535_v3  ;;  %v3292_v3 = vrot.slane %v3155_v1, %v8244_v11 }
 0x430   :  { %4098 = vmatprep.subr.bf16.mxu1 %v7540_v7  ;;  %4810 = vmatpush2.bf16.msra.mxu0 %v7583_v18  ;;  %v3288_v7 = vrot.slane %v3155_v1, %v8247_v12 }
 0x431   :  { %4811 = vmatprep.subr.bf16.mxu0 %v7588_v10 }
 0x433   :  { %4099 = vmatpush2.bf16.msra.mxu1 %v7538_v14 }
 0x434   :  { %4100 = vmatprep.subr.bf16.mxu1 %v7543_v15  ;;  %4812 = vmatpush2.bf16.msra.mxu0 %v7586_v20 }
 0x435   :  { %4813 = vmatprep.subr.bf16.mxu0 %v7591_v21 }
 0x437   :  { %4101 = vmatpush2.bf16.msra.mxu1 %v7541_v4 }
 0x438   :  { %4102 = vmatprep.subr.bf16.mxu1 %v7546_v5  ;;  %4814 = vmatpush2.bf16.msra.mxu0 %v7589_v22 }
 0x439   :  { %4815 = vmatprep.subr.bf16.mxu0 %v7594_v23 }
 0x43b   :  { %4103 = vmatpush2.bf16.msra.mxu1 %v7544_v6 }
 0x43c   :  { %4104 = vmatprep.subr.bf16.mxu1 %v7549_v19  ;;  %4816 = vmatpush2.bf16.msra.mxu0 %v7592_v25 }
 0x43d   :  { %4817 = vmatprep.subr.bf16.mxu0 %v7597_v26  ;;  %v7602_v26 = vld [vmem:[#allocation11 + $0xb0] ss:$12 sps:$4 sm:$0xff]  }
 0x43f   :  { %4105 = vmatpush2.bf16.msra.mxu1 %v7547_v13 }
 0x440   :  { %4818 = vmatpush2.bf16.msra.mxu0 %v7595_v28  ;;  %4830 = vmatprep.subr.bf16.mxu1 %v7600_v32  ;;  %v7607_v32 = vld [vmem:[#allocation11 + $0x98] ss:$12 sps:$4 sm:$0xff]  }
 0x441   :  { %6597 = vmatprep.subr.bf16.mxu0 %v7601_v34  ;;  %v7611_v34 = vld [vmem:[#allocation11 + $0x140] ss:$12 sps:$4 sm:$0xff]  }
 0x442   :  { %4107 = vmatmul.mubr.bf16.vlgmr.msra.gmra.mxu1 %v8302_v24  ;;  %v7605_v24 = vld [vmem:[#allocation11 + $0x214] ss:$12 sps:$4 sm:$0xff]  }
 0x443   :  { %4831 = vmatpush1.bf16.msra.mxu1 %v7598_v29  ;;  %v7606_v29 = vld [vmem:[#allocation11 + $0x158] ss:$12 sps:$4 sm:$0xff]  }
 0x444   :  { %4832 = vmatprep.subr.bf16.mxu1 %v7605_v24  ;;  %v7616_v24 = vld [vmem:[#allocation11 + $0x128] ss:$12 sps:$4 sm:$0xff]  }
 0x447   :  { %4833 = vmatpush1.bf16.msra.mxu1 %v7603_v35  ;;  %v7612_v35 = vld [vmem:[#allocation11 + $0x80] ss:$12 sps:$4 sm:$0xff]  }
 0x448   :  { %4834 = vmatprep.subr.bf16.mxu1 %v7610_v27  ;;  %v7621_v27 = vld [vmem:[#allocation11 + $0x110] ss:$12 sps:$4 sm:$0xff]  }
 0x44b   :  { %4835 = vmatpush1.bf16.msra.mxu1 %v7608_v37  ;;  %v7617_v37 = vld [vmem:[#allocation11 + $0x68] ss:$12 sps:$4 sm:$0xff]  }
 0x44c   :  { %4836 = vmatprep.subr.bf16.mxu1 %v7615_v31  ;;  %v7626_v31 = vld [vmem:[#allocation11 + $0xf8] ss:$12 sps:$4 sm:$0xff]  }
 0x44f   :  { %4837 = vmatpush1.bf16.msra.mxu1 %v7613_v38  ;;  %v7622_v38 = vld [vmem:[#allocation11 + $0x50] ss:$12 sps:$4 sm:$0xff]  }
 0x450   :  { %4838 = vmatprep.subr.bf16.mxu1 %v7620_v39  ;;  %v7631_v39 = vld [vmem:[#allocation11 + $0xe0] ss:$12 sps:$4 sm:$0xff]  }
 0x453   :  { %4839 = vmatpush1.bf16.msra.mxu1 %v7618_v30  ;;  %v7627_v30 = vld [vmem:[#allocation11 + $0x38] ss:$12 sps:$4 sm:$0xff]  }
 0x454   :  { %4840 = vmatprep.subr.bf16.mxu1 %v7625_v33  ;;  %v7636_v33 = vld [vmem:[#allocation11 + $0xc8] ss:$12 sps:$4 sm:$0xff]  }
 0x457   :  { %4841 = vmatpush1.bf16.msra.mxu1 %v7623_v40  ;;  %v7632_v40 = vld [vmem:[#allocation11 + $0x20] ss:$12 sps:$4 sm:$0xff]  }
 0x458   :  { %4842 = vmatprep.subr.bf16.mxu1 %v7630_v36 }
 0x45b   :  { %4843 = vmatpush1.bf16.msra.mxu1 %v7628_v41  ;;  %v7637_v41 = vld [vmem:[#allocation11 + $0x8] ss:$12 sps:$4 sm:$0xff]  }
 0x45c   :  { %4844 = vmatprep.subr.bf16.mxu1 %v7635_v43 }
 0x45f   :  { %4845 = vmatpush1.bf16.msra.mxu1 %v7633_v42 }
 0x460   :  { %4846 = vmatprep.subr.bf16.mxu1 %v7640_v45  ;;  %v3296_v45 = vrot.slane %v3155_v1, %v8257_v59 }
 0x463   :  { %4847 = vmatpush2.bf16.msra.mxu1 %v7638_v44  ;;  %v3300_v44 = vrot.slane %v3155_v1, %v8260_v60 }
 0x464   :  { %4848 = vmatprep.subr.bf16.mxu1 %v7643_v47 }
 0x467   :  { %4849 = vmatpush2.bf16.msra.mxu1 %v7641_v46 }
 0x468   :  { %4850 = vmatprep.subr.bf16.mxu1 %v7646_v48 }
 0x46b   :  { %4851 = vmatpush2.bf16.msra.mxu1 %v7644_v49 }
 0x46c   :  { %4852 = vmatprep.subr.bf16.mxu1 %v7649_v50 }
 0x46f   :  { %4853 = vmatpush2.bf16.msra.mxu1 %v7647_v51 }
 0x470   :  { %4854 = vmatprep.subr.bf16.mxu1 %v7652_v52 }
 0x473   :  { %4855 = vmatpush2.bf16.msra.mxu1 %v7650_v53 }
 0x474   :  { %4856 = vmatprep.subr.bf16.mxu1 %v7655_v54 }
 0x477   :  { %4857 = vmatpush2.bf16.msra.mxu1 %v7653_v55 }
 0x478   :  { %4858 = vmatprep.subr.bf16.mxu1 %v7658_v56 }
 0x47b   :  { %4859 = vmatpush2.bf16.msra.mxu1 %v7656_v57 }
 0x47c   :  { %4860 = vmatprep.subr.bf16.mxu1 %v7661_v58 }
 0x47f   :  { %4861 = vmatpush2.bf16.msra.mxu1 %v7659_v61 }
 0x480   :  { %6619 = vmatprep.subr.bf16.mxu1 %v7662_v62 }
 0x482   :  { %v3979_v63 = vpop.f32.mrf.mxu0 }
 0x483   :  { %v3980_v17 = vadd.f32 %v3979_v63, %v3288_v7 }
 0x484   :  { %v3981_v0 = vpop.f32.mrf.mxu0 }
 0x485   :  { %v3982_v15 = vadd.f32 %v3981_v0, %v3292_v3 }
 0x486   :  { %v3983_v2 = vpop.f32.mrf.mxu0 }
 0x487   :  { %v3984_v16 = vadd.f32 %v3983_v2, %v3288_v7  ;;  %v7663_v2 = vld [vmem:[#allocation11 + $0x230] ss:$12 sps:$4 sm:$0xff]   ;;  %v7665_v7 = vld [vmem:[#allocation11 + $0x218] ss:$12 sps:$4 sm:$0xff]  }
 0x488   :  { %v3985_v9 = vpop.f32.mrf.mxu0 }
 0x489   :  { %v3986_v5 = vadd.f32 %v3985_v9, %v3292_v3  ;;  %v7664_v3 = vld [vmem:[#allocation11 + $0x2d8] ss:$12 sps:$4 sm:$0xff]   ;;  %v7667_v9 = vld [vmem:[#allocation11 + $0x200] ss:$12 sps:$4 sm:$0xff]  }
 0x4c2   :  { %v4022_v8 = vpop.f32.mrf.mxu1  ;;  %v4065_v36 = vpop.f32.mrf.mxu0 }
 0x4c3   :  { %v4023_v6 = vadd.f32 %v4022_v8, %v3980_v17  ;;  %v4066_v51 = vadd.f32 %v4065_v36, %v3296_v45  ;;  %v7666_v8 = vld [vmem:[#allocation11 + $0x2c0] ss:$12 sps:$4 sm:$0xff]  }
 0x4c4   :  { %v4024_v14 = vpop.f32.mrf.mxu1  ;;  %v4067_v42 = vpop.f32.mrf.mxu0  ;;  %v7683_v17 = vld [vmem:[#allocation13 + $0x64] ss:$8 sps:$4 sm:$0xff]  }
 0x4c5   :  { %v4025_v18 = vadd.f32 %v4024_v14, %v3982_v15  ;;  %v4117_v23 = vmax.f32 %v4023_v6, 0.0  ;;  %v4068_v49 = vadd.f32 %v4067_v42, %v3300_v44  ;;  %v7668_v14 = vld [vmem:[#allocation11 + $0x2a8] ss:$12 sps:$4 sm:$0xff]   ;;  %v7678_v15 = vld [vmem:[#allocation13 + $0x70] ss:$8 sps:$4 sm:$0xff]  }
 0x4c6   :  { %v4026_v4 = vpop.f32.mrf.mxu1  ;;  %v4069_v43 = vpop.f32.mrf.mxu0  ;;  %v7671_v6 = vld [vmem:[#allocation11 + $0x1d0] ss:$12 sps:$4 sm:$0xff]   ;;  %v7713_v36 = vld [vmem:[#allocation13 + $0xc4] ss:$8 sps:$4 sm:$0xff]   ;;  %v7711_v42 = vld [vmem:[#allocation13 + $0xc0] ss:$8 sps:$4 sm:$0xff]  }
 0x4c7   :  { %v4027_v10 = vadd.f32 %v4026_v4, %v3984_v16  ;;  %v4118_v21 = vmax.f32 %v4025_v18, 0.0  ;;  %v4070_v50 = vadd.f32 %v4069_v43, %v3296_v45  ;;  %v7680_v16 = vld [vmem:[#allocation13 + $0x74] ss:$8 sps:$4 sm:$0xff]   ;;  %v7681_v18 = vld [vmem:[#allocation13 + $0x60] ss:$8 sps:$4 sm:$0xff]  }
 0x4c8   :  { %v4028_v19 = vpop.f32.mrf.mxu1  ;;  %v4071_v47 = vpop.f32.mrf.mxu0  ;;  %v7669_v4 = vld [vmem:[#allocation11 + $0x1e8] ss:$12 sps:$4 sm:$0xff]   ;;  %v7719_v45 = vld [vmem:[#allocation13 + $0xa4] ss:$8 sps:$4 sm:$0xff]  }
 0x4c9   :  { %v4029_v20 = vadd.f32 %v4028_v19, %v3986_v5  ;;  %v4121_v13 = vmax.f32 %v4027_v10, 0.0  ;;  %v4072_v53 = vadd.f32 %v4071_v47, %v3300_v44  ;;  %v7670_v5 = vld [vmem:[#allocation11 + $0x290] ss:$12 sps:$4 sm:$0xff]   ;;  %v7672_v19 = vld [vmem:[#allocation11 + $0x278] ss:$12 sps:$4 sm:$0xff]  }
 0x4ca   :  { %v7686_v10 = vld [vmem:[#allocation13 + $0x54] ss:$8 sps:$4 sm:$0xff]   ;;  %v7714_v44 = vld [vmem:[#allocation13 + $0xb0] ss:$8 sps:$4 sm:$0xff]  }
 0x4cb   :  { %v4122_v22 = vmax.f32 %v4029_v20, 0.0  ;;  %v4125_v28 = vpack.c.bf16 %v4121_v13, %v4117_v23  ;;  %v7684_v20 = vld [vmem:[#allocation13 + $0x50] ss:$8 sps:$4 sm:$0xff]   ;;  %v7689_v13 = vld [vmem:[#allocation13 + $0x44] ss:$8 sps:$4 sm:$0xff]  }
 0x4cc   :  { %v7687_v23 = vld [vmem:[#allocation13 + $0x40] ss:$8 sps:$4 sm:$0xff]   ;;  %v7716_v43 = vld [vmem:[#allocation13 + $0xb4] ss:$8 sps:$4 sm:$0xff]  }
 0x4cd   :  { %v4126_v25 = vpack.c.bf16 %v4122_v22, %v4118_v21  ;;  %v7673_v21 = vld [vmem:[#allocation11 + $0x1b8] ss:$12 sps:$4 sm:$0xff]   ;;  %v7674_v22 = vld [vmem:[#allocation11 + $0x260] ss:$12 sps:$4 sm:$0xff]   ;;  %v7722_v47 = vld [vmem:[#allocation13 + $0x94] ss:$8 sps:$4 sm:$0xff]  }
 0x4cf   :  { %4819 = vmatprep.mubr.bf16.mxu0 %v4126_v25 }
 0x4d0   :  { %4820 = vmatmul.mubr.bf16.vlgmr.msra.gmra.mxu0 %v4125_v28 }
 0x4d1   :  { %6598 = vmatpush3.bf16.msra.mxu0 %v7602_v26  ;;  %4905 = vmatprep.mubr.bf16.mxu0 %v4126_v25  ;;  %v7692_v25 = vld [vmem:[#allocation13 + $0x34] ss:$8 sps:$4 sm:$0xff]   ;;  %v7675_v26 = vld [vmem:[#allocation11 + $0x1a0] ss:$12 sps:$4 sm:$0xff]  }
 0x4d2   :  { %6599 = vmatprep.subr.bf16.mxu0 %v7606_v29  ;;  %v7690_v29 = vld [vmem:[#allocation13 + $0x30] ss:$8 sps:$4 sm:$0xff]  }
 0x4d5   :  { %6600 = vmatpush3.bf16.msra.mxu0 %v7607_v32  ;;  %v7677_v32 = vld [vmem:[#allocation11 + $0x188] ss:$12 sps:$4 sm:$0xff]  }
 0x4d6   :  { %6601 = vmatprep.subr.bf16.mxu0 %v7611_v34  ;;  %v7695_v34 = vld [vmem:[#allocation13 + $0x24] ss:$8 sps:$4 sm:$0xff]  }
 0x4d9   :  { %6602 = vmatpush3.bf16.msra.mxu0 %v7612_v35  ;;  %v7693_v35 = vld [vmem:[#allocation13 + $0x20] ss:$8 sps:$4 sm:$0xff]  }
 0x4da   :  { %6603 = vmatprep.subr.bf16.mxu0 %v7616_v24  ;;  %v7698_v24 = vld [vmem:[#allocation13 + $0x14] ss:$8 sps:$4 sm:$0xff]  }
 0x4dd   :  { %6604 = vmatpush3.bf16.msra.mxu0 %v7617_v37  ;;  %v7696_v37 = vld [vmem:[#allocation13 + $0x10] ss:$8 sps:$4 sm:$0xff]  }
 0x4de   :  { %6605 = vmatprep.subr.bf16.mxu0 %v7621_v27  ;;  %v7699_v27 = vld [vmem:[#allocation13] ss:$8 sps:$4 sm:$0xff]  }
 0x4e1   :  { %6606 = vmatpush3.bf16.msra.mxu0 %v7622_v38  ;;  %v7701_v38 = vld [vmem:[#allocation13 + $0x4] ss:$8 sps:$4 sm:$0xff]  }
 0x4e2   :  { %6607 = vmatprep.subr.bf16.mxu0 %v7626_v31  ;;  %v7704_v31 = vld [vmem:[#allocation13 + $0xf4] ss:$8 sps:$4 sm:$0xff]  }
 0x4e5   :  { %6608 = vmatpush3.bf16.msra.mxu0 %v7627_v30  ;;  %v7702_v30 = vld [vmem:[#allocation13 + $0xf0] ss:$8 sps:$4 sm:$0xff]  }
 0x4e6   :  { %6609 = vmatprep.subr.bf16.mxu0 %v7631_v39  ;;  %v7707_v39 = vld [vmem:[#allocation13 + $0xe4] ss:$8 sps:$4 sm:$0xff]  }
 0x4e9   :  { %6610 = vmatpush3.bf16.msra.mxu0 %v7632_v40  ;;  %v7705_v40 = vld [vmem:[#allocation13 + $0xe0] ss:$8 sps:$4 sm:$0xff]  }
 0x4ea   :  { %6611 = vmatprep.subr.bf16.mxu0 %v7636_v33  ;;  %v7710_v33 = vld [vmem:[#allocation13 + $0xd4] ss:$8 sps:$4 sm:$0xff]  }
 0x4ed   :  { %6612 = vmatpush3.bf16.msra.mxu0 %v7637_v41  ;;  %v7708_v41 = vld [vmem:[#allocation13 + $0xd0] ss:$8 sps:$4 sm:$0xff]  }
 0x4ee   :  { %5265 = vmatprep.subr.bf16.mxu0 %v7680_v16 }
 0x4f0   :  { %4906 = vmatmul.mubr.bf16.vlgmr.msra.gmra.mxu0 %v4125_v28  ;;  %v7676_v28 = vld [vmem:[#allocation11 + $0x248] ss:$12 sps:$4 sm:$0xff]  }
 0x4f1   :  { %5266 = vmatpush1.bf16.msra.mxu0 %v7678_v15 }
 0x4f2   :  { %5267 = vmatprep.subr.bf16.mxu0 %v7683_v17 }
 0x4f5   :  { %5268 = vmatpush1.bf16.msra.mxu0 %v7681_v18 }
 0x4f6   :  { %5269 = vmatprep.subr.bf16.mxu0 %v7686_v10 }
 0x4f9   :  { %5270 = vmatpush1.bf16.msra.mxu0 %v7684_v20 }
 0x4fa   :  { %5271 = vmatprep.subr.bf16.mxu0 %v7689_v13 }
 0x4fd   :  { %5272 = vmatpush1.bf16.msra.mxu0 %v7687_v23 }
 0x4fe   :  { %5273 = vmatprep.subr.bf16.mxu0 %v7692_v25 }
 0x501   :  { %5274 = vmatpush1.bf16.msra.mxu0 %v7690_v29 }
 0x502   :  { %v4108_v46 = vpop.f32.mrf.mxu1  ;;  %5275 = vmatprep.subr.bf16.mxu0 %v7695_v34 }
 0x503   :  { %v4109_v56 = vadd.f32 %v4108_v46, %v4066_v51  ;;  %v7717_v46 = vld [vmem:[#allocation13 + $0xa0] ss:$8 sps:$4 sm:$0xff]   ;;  %v7728_v51 = vld [vmem:[#allocation13 + $0x174] ss:$8 sps:$4 sm:$0xff]  }
 0x504   :  { %v4110_v48 = vpop.f32.mrf.mxu1 }
 0x505   :  { %v4111_v54 = vadd.f32 %v4110_v48, %v4068_v49  ;;  %v4119_v0 = vmax.f32 %v4109_v56, 0.0  ;;  %5276 = vmatpush1.bf16.msra.mxu0 %v7693_v35  ;;  %v7720_v48 = vld [vmem:[#allocation13 + $0x90] ss:$8 sps:$4 sm:$0xff]   ;;  %v7725_v49 = vld [vmem:[#allocation13 + $0x84] ss:$8 sps:$4 sm:$0xff]  }
 0x506   :  { %v4112_v52 = vpop.f32.mrf.mxu1  ;;  %5277 = vmatprep.subr.bf16.mxu0 %v7698_v24  ;;  %v7732_v56 = vld [vmem:[#allocation13 + $0x150] ss:$8 sps:$4 sm:$0xff]  }
 0x507   :  { %v4113_v55 = vadd.f32 %v4112_v52, %v4070_v50  ;;  %v4120_v62 = vmax.f32 %v4111_v54, 0.0  ;;  %v7723_v50 = vld [vmem:[#allocation13 + $0x80] ss:$8 sps:$4 sm:$0xff]   ;;  %v7726_v52 = vld [vmem:[#allocation13 + $0x170] ss:$8 sps:$4 sm:$0xff]  }
 0x508   :  { %v4114_v57 = vpop.f32.mrf.mxu1  ;;  %v7729_v54 = vld [vmem:[#allocation13 + $0x160] ss:$8 sps:$4 sm:$0xff]  }
 0x509   :  { %v4115_v58 = vadd.f32 %v4114_v57, %v4072_v53  ;;  %v4123_v61 = vmax.f32 %v4113_v55, 0.0  ;;  %5278 = vmatpush1.bf16.msra.mxu0 %v7696_v37  ;;  %v7731_v53 = vld [vmem:[#allocation13 + $0x164] ss:$8 sps:$4 sm:$0xff]   ;;  %v7734_v55 = vld [vmem:[#allocation13 + $0x154] ss:$8 sps:$4 sm:$0xff]  }
 0x50a   :  { %5279 = vmatprep.subr.bf16.mxu0 %v7701_v38  ;;  %v7737_v57 = vld [vmem:[#allocation13 + $0x144] ss:$8 sps:$4 sm:$0xff]  }
 0x50b   :  { %v4124_v63 = vmax.f32 %v4115_v58, 0.0  ;;  %v4127_v1 = vpack.c.bf16 %v4123_v61, %v4119_v0  ;;  %v7735_v58 = vld [vmem:[#allocation13 + $0x140] ss:$8 sps:$4 sm:$0xff]   ;;  %v7740_v61 = vld [vmem:[#allocation13 + $0x134] ss:$8 sps:$4 sm:$0xff]  }
 0x50c   :  { %v7741_v0 = vld [vmem:[#allocation13 + $0x120] ss:$8 sps:$4 sm:$0xff]  }
 0x50d   :  { %v4128_v60 = vpack.c.bf16 %v4124_v63, %v4120_v62  ;;  %5280 = vmatpush1.bf16.msra.mxu0 %v7699_v27  ;;  %v7738_v62 = vld [vmem:[#allocation13 + $0x130] ss:$8 sps:$4 sm:$0xff]   ;;  %v7743_v63 = vld [vmem:[#allocation13 + $0x124] ss:$8 sps:$4 sm:$0xff]  }
 0x50e   :  { %5281 = vmatprep.subr.bf16.mxu0 %v7704_v31 }
 0x50f   :  { %4862 = vmatprep.mubr.bf16.mxu1 %v4128_v60 }
 0x510   :  { %4863 = vmatmul.mubr.bf16.vlgmr.msra.gmra.mxu1 %v4127_v1 }
 0x511   :  { %6620 = vmatpush3.bf16.msra.mxu1 %v7663_v2  ;;  %4946 = vmatprep.mubr.bf16.mxu1 %v4128_v60  ;;  %v7746_v60 = vld [vmem:[#allocation13 + $0x114] ss:$8 sps:$4 sm:$0xff]   ;;  %v7744_v2 = vld [vmem:[#allocation13 + $0x110] ss:$8 sps:$4 sm:$0xff]  }
 0x512   :  { %6621 = vmatprep.subr.bf16.mxu1 %v7664_v3  ;;  %5282 = vmatpush2.bf16.msra.mxu0 %v7702_v30  ;;  %v7747_v3 = vld [vmem:[#allocation13 + $0x100] ss:$8 sps:$4 sm:$0xff]  }
 0x513   :  { %5283 = vmatprep.subr.bf16.mxu0 %v7707_v39 }
 0x515   :  { %6622 = vmatpush3.bf16.msra.mxu1 %v7665_v7  ;;  %v8096_v7 = vmov 0  }
 0x516   :  { %6623 = vmatprep.subr.bf16.mxu1 %v7666_v8  ;;  %5284 = vmatpush2.bf16.msra.mxu0 %v7705_v40 }
 0x517   :  { %5285 = vmatprep.subr.bf16.mxu0 %v7710_v33 }
 0x519   :  { %6624 = vmatpush3.bf16.msra.mxu1 %v7667_v9 }
 0x51a   :  { %6625 = vmatprep.subr.bf16.mxu1 %v7668_v14  ;;  %5286 = vmatpush2.bf16.msra.mxu0 %v7708_v41  ;;  %v4130_v14 = vld [vmem:[#allocation20 + $0x4] ss:$8 sm:$0x7] }
 0x51b   :  { %5287 = vmatprep.subr.bf16.mxu0 %v7713_v36  ;;  %v4267_v16 = vrot.slane %v4130_v14, %v8244_v11  ;;  %v4263_v17 = vrot.slane %v4130_v14, %v8247_v12  ;;  %v4271_v39 = vrot.slane %v4130_v14, %v8257_v59  ;;  %v7753_v59 = vld [vmem:[#allocation14 + $0x30] sm:$0xff]   ;;  %v7768_v14 = vld [vmem:[#allocation16 + $0x28] sm:$0xff]  }
 0x51d   :  { %6626 = vmatpush3.bf16.msra.mxu1 %v7669_v4 }
 0x51e   :  { %6627 = vmatprep.subr.bf16.mxu1 %v7670_v5  ;;  %5288 = vmatpush2.bf16.msra.mxu0 %v7711_v42 }
 0x51f   :  { %5289 = vmatprep.subr.bf16.mxu0 %v7716_v43 }
 0x521   :  { %6628 = vmatpush3.bf16.msra.mxu1 %v7671_v6 }
 0x522   :  { %6629 = vmatprep.subr.bf16.mxu1 %v7672_v19  ;;  %5290 = vmatpush2.bf16.msra.mxu0 %v7714_v44 }
 0x523   :  { %5291 = vmatprep.subr.bf16.mxu0 %v7719_v45 }
 0x525   :  { %6630 = vmatpush3.bf16.msra.mxu1 %v7673_v21 }
 0x526   :  { %6631 = vmatprep.subr.bf16.mxu1 %v7674_v22  ;;  %5292 = vmatpush2.bf16.msra.mxu0 %v7717_v46 }
 0x527   :  { %5293 = vmatprep.subr.bf16.mxu0 %v7722_v47 }
 0x529   :  { %6632 = vmatpush3.bf16.msra.mxu1 %v7675_v26 }
 0x52a   :  { %6633 = vmatprep.subr.bf16.mxu1 %v7676_v28  ;;  %5294 = vmatpush2.bf16.msra.mxu0 %v7720_v48 }
 0x52b   :  { %5295 = vmatprep.subr.bf16.mxu0 %v7725_v49 }
 0x52d   :  { %6634 = vmatpush3.bf16.msra.mxu1 %v7677_v32 }
 0x52e   :  { %5296 = vmatpush2.bf16.msra.mxu0 %v7723_v50  ;;  %5308 = vmatprep.subr.bf16.mxu1 %v7728_v51 }
 0x530   :  { %4947 = vmatmul.mubr.bf16.vlgmr.msra.gmra.mxu1 %v4127_v1  ;;  %v7749_v1 = vld [vmem:[#allocation13 + $0x104] ss:$8 sps:$4 sm:$0xff]  }
 0x531   :  { %5309 = vmatpush1.bf16.msra.mxu1 %v7726_v52  ;;  %5340 = vmatprep.mubr.bf16.mxu1 %v8096_v7  ;;  %v7750_v52 = vld [vmem:[#allocation14 + $0x78] sm:$0xff]  }
 0x532   :  { %5310 = vmatprep.subr.bf16.mxu1 %v7731_v53  ;;  %v7751_v53 = vld [vmem:[#allocation14 + $0x38] sm:$0xff]  }
 0x533   :  { %v7766_v7 = vld [vmem:[#allocation16 + $0x38] sm:$0xff]  }
 0x535   :  { %5311 = vmatpush1.bf16.msra.mxu1 %v7729_v54  ;;  %v7752_v54 = vld [vmem:[#allocation14 + $0x70] sm:$0xff]  }
 0x536   :  { %5312 = vmatprep.subr.bf16.mxu1 %v7734_v55  ;;  %v7754_v55 = vld [vmem:[#allocation14 + $0x68] sm:$0xff]  }
 0x539   :  { %5313 = vmatpush1.bf16.msra.mxu1 %v7732_v56  ;;  %v7755_v56 = vld [vmem:[#allocation14 + $0x28] sm:$0xff]  }
 0x53a   :  { %5314 = vmatprep.subr.bf16.mxu1 %v7737_v57  ;;  %v7756_v57 = vld [vmem:[#allocation14 + $0x60] sm:$0xff]  }
 0x53d   :  { %5315 = vmatpush1.bf16.msra.mxu1 %v7735_v58  ;;  %v7757_v58 = vld [vmem:[#allocation14 + $0x20] sm:$0xff]  }
 0x53e   :  { %5316 = vmatprep.subr.bf16.mxu1 %v7740_v61  ;;  %v7758_v61 = vld [vmem:[#allocation14 + $0x58] sm:$0xff]  }
 0x541   :  { %5317 = vmatpush1.bf16.msra.mxu1 %v7738_v62  ;;  %v7759_v62 = vld [vmem:[#allocation14 + $0x18] sm:$0xff]  }
 0x542   :  { %5318 = vmatprep.subr.bf16.mxu1 %v7743_v63  ;;  %v7760_v63 = vld [vmem:[#allocation14 + $0x50] sm:$0xff]  }
 0x545   :  { %5319 = vmatpush1.bf16.msra.mxu1 %v7741_v0  ;;  %v7761_v0 = vld [vmem:[#allocation14 + $0x10] sm:$0xff]  }
 0x546   :  { %5320 = vmatprep.subr.bf16.mxu1 %v7746_v60  ;;  %v7762_v60 = vld [vmem:[#allocation14 + $0x48] sm:$0xff]  }
 0x549   :  { %5321 = vmatpush1.bf16.msra.mxu1 %v7744_v2  ;;  %v7763_v2 = vld [vmem:[#allocation14 + $0x8] sm:$0xff]  }
 0x54a   :  { %5322 = vmatprep.subr.bf16.mxu1 %v7749_v1  ;;  %v7764_v1 = vld [vmem:[#allocation14 + $0x40] sm:$0xff]  }
 0x54d   :  { %5323 = vmatpush1.bf16.msra.mxu1 %v7747_v3  ;;  %v7765_v3 = vld [vmem:[#allocation14] sm:$0xff]  }
 0x54e   :  { %6641 = vmatprep.subr.bf16.mxu1 %v7750_v52 }
 0x590   :  { %v4821_v8 = vpop.f32.mrf.mxu0 }
 0x591   :  { %v4822_v19 = vadd.f32 %v4821_v8, %v4263_v17  ;;  %v8097_v8 = vmov 0.0  }
 0x592   :  { %v4823_v9 = vpop.f32.mrf.mxu0  ;;  %6690 = vmatprep.subr.bf16.mxu0 %v8097_v8 }
 0x593   :  { %v4824_v10 = vadd.f32 %v4823_v9, %v4267_v16  ;;  %v7767_v9 = vld [vmem:[#allocation16 + $0x30] sm:$0xff]  }
 0x594   :  { %v4825_v15 = vpop.f32.mrf.mxu0 }
 0x595   :  { %v4826_v6 = vadd.f32 %v4825_v15, %v4263_v17  ;;  %v7769_v15 = vld [vmem:[#allocation16 + $0x20] sm:$0xff]  }
 0x596   :  { %v4827_v5 = vpop.f32.mrf.mxu0 }
 0x597   :  { %v4828_v13 = vadd.f32 %v4827_v5, %v4267_v16 }
 0x5b0   :  { %v6613_v37 = vpop.f32.mrf.mxu0 }
 0x5b2   :  { %v6614_v27 = vpop.f32.mrf.mxu0 }
 0x5b3   :  { %v6615_v40 = vadd.f32 %v6614_v27, %v6613_v37 }
 0x5b4   :  { %v6616_v38 = vpop.f32.mrf.mxu0 }
 0x5b5   :  { %v4908_v43 = vadd.f32 %v6615_v40, %v4271_v39  ;;  %v7774_v40 = vld [vmem:[#allocation17 + $0x38] sm:$0xff]  }
 0x5b6   :  { %v6617_v31 = vpop.f32.mrf.mxu0 }
 0x5b7   :  { %v6618_v41 = vadd.f32 %v6617_v31, %v6616_v38  ;;  %v7771_v31 = vld [vmem:[#allocation16 + $0x10] sm:$0xff]  }
 0x5b9   :  { %v4911_v45 = vadd.f32 %v6618_v41, %v4271_v39  ;;  %v7773_v39 = vld [vmem:[#allocation16] sm:$0xff]   ;;  %v7776_v41 = vld [vmem:[#allocation17 + $0x28] sm:$0xff]  }
 0x5d0   :  { %v4864_v4 = vpop.f32.mrf.mxu1 }
 0x5d1   :  { %v4865_v23 = vadd.f32 %v4864_v4, %v4822_v19  ;;  %v4965_v4 = vld [vmem:[#allocation20 + $0x5] ss:$8 sm:$0x3] }
 0x5d2   :  { %v4866_v18 = vpop.f32.mrf.mxu1 }
 0x5d3   :  { %v4867_v21 = vadd.f32 %v4866_v18, %v4824_v10  ;;  %v4955_v34 = vmax.f32 %v4865_v23, 0.0  ;;  %v5022_v18 = vrot.slane %v4965_v4, %v8244_v11  ;;  %v5018_v10 = vrot.slane %v4965_v4, %v8247_v12  ;;  %v7770_v12 = vld [vmem:[#allocation16 + $0x18] sm:$0xff]  }
 0x5d4   :  { %v4868_v20 = vpop.f32.mrf.mxu1 }
 0x5d5   :  { %v4869_v22 = vadd.f32 %v4868_v20, %v4826_v6  ;;  %v4956_v29 = vmax.f32 %v4867_v21, 0.0 }
 0x5d6   :  { %v4870_v25 = vpop.f32.mrf.mxu1 }
 0x5d7   :  { %v4871_v26 = vadd.f32 %v4870_v25, %v4828_v13  ;;  %v4958_v28 = vmax.f32 %v4869_v22, 0.0 }
 0x5d9   :  { %v4959_v32 = vmax.f32 %v4871_v26, 0.0  ;;  %v4961_v24 = vpack.c.bf16 %v4958_v28, %v4955_v34 }
 0x5db   :  { %v4962_v35 = vpack.c.bf16 %v4959_v32, %v4956_v29 }
 0x5dd   :  { %5297 = vmatprep.mubr.bf16.mxu0 %v4962_v35 }
 0x5de   :  { %5298 = vmatmul.mubr.bf16.vlgmr.msra.gmra.mxu0 %v4961_v24 }
 0x5df   :  { %6691 = vmatpush3.bf16.msra.mxu0 %v7766_v7  ;;  %6706 = vmatprep.mubr.msk.bf16.mxu0 %vm8098_vm0, %v8097_v8 }
 0x5e0   :  { %6692 = vmatprep.subr.bf16.mxu0 %v8097_v8 }
 0x5e3   :  { %6693 = vmatpush3.bf16.msra.mxu0 %v7767_v9 }
 0x5e4   :  { %6694 = vmatprep.subr.bf16.mxu0 %v8097_v8 }
 0x5e7   :  { %6695 = vmatpush3.bf16.msra.mxu0 %v7768_v14 }
 0x5e8   :  { %6696 = vmatprep.subr.bf16.mxu0 %v8097_v8 }
 0x5eb   :  { %6697 = vmatpush3.bf16.msra.mxu0 %v7769_v15 }
 0x5ec   :  { %6698 = vmatprep.subr.bf16.mxu0 %v8097_v8 }
 0x5ef   :  { %6699 = vmatpush3.bf16.msra.mxu0 %v7770_v12 }
 0x5f0   :  { %v6635_v30 = vpop.f32.mrf.mxu1  ;;  %6700 = vmatprep.subr.bf16.mxu0 %v8097_v8 }
 0x5f2   :  { %v6636_v33 = vpop.f32.mrf.mxu1 }
 0x5f3   :  { %v6637_v36 = vadd.f32 %v6636_v33, %v6635_v30  ;;  %6701 = vmatpush3.bf16.msra.mxu0 %v7771_v31  ;;  %v7772_v30 = vld [vmem:[#allocation16 + $0x8] sm:$0xff]   ;;  %v7775_v33 = vld [vmem:[#allocation17 + $0x30] sm:$0xff]  }
 0x5f4   :  { %v6638_v42 = vpop.f32.mrf.mxu1  ;;  %6702 = vmatprep.subr.bf16.mxu0 %v8097_v8 }
 0x5f5   :  { %v4949_v46 = vadd.f32 %v6637_v36, %v4908_v43  ;;  %v7777_v36 = vld [vmem:[#allocation17 + $0x20] sm:$0xff]  }
 0x5f6   :  { %v6639_v44 = vpop.f32.mrf.mxu1 }
 0x5f7   :  { %v6640_v47 = vadd.f32 %v6639_v44, %v6638_v42  ;;  %v4957_v49 = vmax.f32 %v4949_v46, 0.0  ;;  %6703 = vmatpush3.bf16.msra.mxu0 %v7772_v30  ;;  %v7778_v42 = vld [vmem:[#allocation17 + $0x18] sm:$0xff]   ;;  %v5357_v46 = vld [vmem:[#allocation20 + $0x6] ss:$0 sm:$0xff] }
 0x5f8   :  { %6704 = vmatprep.subr.bf16.mxu0 %v8097_v8 }
 0x5f9   :  { %v4952_v48 = vadd.f32 %v6640_v47, %v4911_v45 }
 0x5fb   :  { %v4960_v50 = vmax.f32 %v4952_v48, 0.0  ;;  %6705 = vmatpush3.bf16.msra.mxu0 %v7773_v39 }
 0x5fc   :  { %6730 = vmatprep.subr.bf16.mxu0 %v8097_v8 }
 0x5fd   :  { %v4963_v51 = vpack.c.bf16 %v4960_v50, %v4957_v49 }
 0x5ff   :  { %5341 = vmatmul.mubr.bf16.vlgmr.msra.gmra.mxu1 %v4963_v51 }
 0x600   :  { %6642 = vmatpush3.bf16.msra.mxu1 %v7751_v53 }
 0x601   :  { %6643 = vmatprep.subr.bf16.mxu1 %v7752_v54 }
 0x604   :  { %6644 = vmatpush3.bf16.msra.mxu1 %v7753_v59  ;;  %v7779_v59 = vld [vmem:[#allocation17 + $0x10] sm:$0xff]  }
 0x605   :  { %6645 = vmatprep.subr.bf16.mxu1 %v7754_v55  ;;  %v7780_v55 = vld [vmem:[#allocation17 + $0x8] sm:$0xff]  }
 0x608   :  { %6646 = vmatpush3.bf16.msra.mxu1 %v7755_v56  ;;  %v7781_v56 = vld [vmem:[#allocation17] sm:$0xff]  }
 0x609   :  { %6647 = vmatprep.subr.bf16.mxu1 %v7756_v57  ;;  %v7782_v57 = vld [vmem:[#allocation19 + $0x38] sm:$0xff]  }
 0x60c   :  { %6648 = vmatpush3.bf16.msra.mxu1 %v7757_v58  ;;  %v7783_v58 = vld [vmem:[#allocation19 + $0x30] sm:$0xff]  }
 0x60d   :  { %6649 = vmatprep.subr.bf16.mxu1 %v7758_v61  ;;  %v7784_v61 = vld [vmem:[#allocation19 + $0x28] sm:$0xff]  }
 0x610   :  { %6650 = vmatpush3.bf16.msra.mxu1 %v7759_v62  ;;  %v7785_v62 = vld [vmem:[#allocation19 + $0x20] sm:$0xff]  }
 0x611   :  { %6651 = vmatprep.subr.bf16.mxu1 %v7760_v63  ;;  %v7786_v63 = vld [vmem:[#allocation19 + $0x18] sm:$0xff]  }
 0x614   :  { %6652 = vmatpush3.bf16.msra.mxu1 %v7761_v0  ;;  %v5530_v0 = vld [vmem:[#allocation20 + $0x7] ss:$0 sm:$0xff] }
 0x615   :  { %6653 = vmatprep.subr.bf16.mxu1 %v7762_v60 }
 0x618   :  { %6654 = vmatpush3.bf16.msra.mxu1 %v7763_v2 }
 0x619   :  { %6655 = vmatprep.subr.bf16.mxu1 %v7764_v1 }
 0x61c   :  { %6656 = vmatpush3.bf16.msra.mxu1 %v7765_v3 }
 0x61d   :  { %6710 = vmatprep.subr.bf16.mxu1 %v8097_v8 }
 0x69e   :  { %v5299_v16 = vpop.f32.mrf.mxu0 }
 0x69f   :  { %v5300_v22 = vadd.f32 %v5299_v16, %v5018_v10 }
 0x6a0   :  { %v5301_v17 = vpop.f32.mrf.mxu0 }
 0x6a1   :  { %v5302_v13 = vadd.f32 %v5301_v17, %v5022_v18 }
 0x6a2   :  { %v5303_v5 = vpop.f32.mrf.mxu0 }
 0x6a3   :  { %v5304_v21 = vadd.f32 %v5303_v5, %v5018_v10  ;;  %v7787_v5 = vld [vmem:[#allocation19 + $0x10] sm:$0xff]   ;;  %v7789_v10 = vld [vmem:[#allocation19] sm:$0xff]  }
 0x6a4   :  { %v5305_v19 = vpop.f32.mrf.mxu0 }
 0x6a5   :  { %v5306_v25 = vadd.f32 %v5305_v19, %v5022_v18  ;;  %v7788_v18 = vld [vmem:[#allocation19 + $0x8] sm:$0xff]  }
 0x6bf   :  { %v5342_v6 = vpop.f32.mrf.mxu1 }
 0x6c0   :  { %v5343_v29 = vadd.f32 %v5342_v6, %v5300_v22  ;;  %v5641_v6 = vld [vmem:[#allocation20 + $0x20] ss:$0 sm:$0xff] }
 0x6c1   :  { %v5344_v20 = vpop.f32.mrf.mxu1 }
 0x6c2   :  { %v5345_v26 = vadd.f32 %v5344_v20, %v5302_v13  ;;  %v5351_v27 = vmax.f32 %v5343_v29, 0.0 }
 0x6c3   :  { %v5346_v23 = vpop.f32.mrf.mxu1 }
 0x6c4   :  { %v5347_v28 = vadd.f32 %v5346_v23, %v5304_v21  ;;  %v5352_v24 = vmax.f32 %v5345_v26, 0.0 }
 0x6c5   :  { %v5348_v32 = vpop.f32.mrf.mxu1 }
 0x6c6   :  { %v5349_v34 = vadd.f32 %v5348_v32, %v5306_v25  ;;  %v5353_v35 = vmax.f32 %v5347_v28, 0.0 }
 0x6c8   :  { %v5354_v37 = vmax.f32 %v5349_v34, 0.0  ;;  %v5355_v38 = vpack.c.bf16 %v5353_v35, %v5351_v27  ;;  %v5752_v34 = vld [vmem:[#allocation20 + $0x21] ss:$0 sm:$0xff] }
 0x6ca   :  { %v5356_v11 = vpack.c.bf16 %v5354_v37, %v5352_v24 }
 0x6cc   :  { %5518 = vmatprep.mubr.bf16.mxu1 %v5356_v11 }
 0x6cd   :  { %5519 = vmatmul.mubr.bf16.vlgmr.msra.gmra.mxu1 %v5355_v38 }
 0x6ce   :  { %6726 = vmatprep.mubr.msk.bf16.mxu1 %vm8098_vm0, %v8097_v8  ;;  %6711 = vmatpush3.bf16.msra.mxu1 %v7774_v40 }
 0x6cf   :  { %6712 = vmatprep.subr.bf16.mxu1 %v8097_v8 }
 0x6d2   :  { %6713 = vmatpush3.bf16.msra.mxu1 %v7775_v33 }
 0x6d3   :  { %6714 = vmatprep.subr.bf16.mxu1 %v8097_v8 }
 0x6d6   :  { %6715 = vmatpush3.bf16.msra.mxu1 %v7776_v41 }
 0x6d7   :  { %6716 = vmatprep.subr.bf16.mxu1 %v8097_v8 }
 0x6da   :  { %6717 = vmatpush3.bf16.msra.mxu1 %v7777_v36 }
 0x6db   :  { %6718 = vmatprep.subr.bf16.mxu1 %v8097_v8 }
 0x6de   :  { %6719 = vmatpush3.bf16.msra.mxu1 %v7778_v42 }
 0x6df   :  { %6720 = vmatprep.subr.bf16.mxu1 %v8097_v8 }
 0x6e2   :  { %6721 = vmatpush3.bf16.msra.mxu1 %v7779_v59 }
 0x6e3   :  { %6722 = vmatprep.subr.bf16.mxu1 %v8097_v8 }
 0x6e6   :  { %6723 = vmatpush3.bf16.msra.mxu1 %v7780_v55 }
 0x6e7   :  { %6724 = vmatprep.subr.bf16.mxu1 %v8097_v8 }
 0x6ea   :  { %6725 = vmatpush3.bf16.msra.mxu1 %v7781_v56 }
 0x78d   :  { %v6657_v43 = vpop.f32.mrf.mxu1 }
 0x78f   :  { %v6658_v44 = vpop.f32.mrf.mxu1 }
 0x790   :  { %v6659_v45 = vadd.f32 %v6658_v44, %v6657_v43 }
 0x791   :  { %v6660_v47 = vpop.f32.mrf.mxu1 }
 0x792   :  { %v5521_v49 = vadd.f32 %v6659_v45, %v5357_v46 }
 0x793   :  { %v6661_v48 = vpop.f32.mrf.mxu1 }
 0x794   :  { %v6662_v50 = vadd.f32 %v6661_v48, %v6660_v47  ;;  %v5527_v52 = vmax.f32 %v5521_v49, 0.0 }
 0x796   :  { %v5524_v51 = vadd.f32 %v6662_v50, %v5357_v46 }
 0x798   :  { %v5528_v53 = vmax.f32 %v5524_v51, 0.0 }
 0x79a   :  { %v5529_v54 = vpack.c.bf16 %v5528_v53, %v5527_v52 }
 0x79c   :  { %6707 = vmatmul.mubr.bf16.vlgmr.msra.gmra.mxu0 %v5529_v54 }
 0x79d   :  { %6746 = vmatprep.mubr.msk.bf16.mxu0 %vm8098_vm0, %v8097_v8  ;;  %6731 = vmatpush3.bf16.msra.mxu0 %v7782_v57 }
 0x79e   :  { %6732 = vmatprep.subr.bf16.mxu0 %v8097_v8 }
 0x7a1   :  { %6733 = vmatpush3.bf16.msra.mxu0 %v7783_v58 }
 0x7a2   :  { %6734 = vmatprep.subr.bf16.mxu0 %v8097_v8 }
 0x7a5   :  { %6735 = vmatpush3.bf16.msra.mxu0 %v7784_v61 }
 0x7a6   :  { %6736 = vmatprep.subr.bf16.mxu0 %v8097_v8 }
 0x7a9   :  { %6737 = vmatpush3.bf16.msra.mxu0 %v7785_v62 }
 0x7aa   :  { %6738 = vmatprep.subr.bf16.mxu0 %v8097_v8 }
 0x7ad   :  { %6739 = vmatpush3.bf16.msra.mxu0 %v7786_v63 }
 0x7ae   :  { %6740 = vmatprep.subr.bf16.mxu0 %v8097_v8 }
 0x7b1   :  { %6741 = vmatpush3.bf16.msra.mxu0 %v7787_v5 }
 0x7b2   :  { %6742 = vmatprep.subr.bf16.mxu0 %v8097_v8 }
 0x7b5   :  { %6743 = vmatpush3.bf16.msra.mxu0 %v7788_v18 }
 0x7b6   :  { %6744 = vmatprep.subr.bf16.mxu0 %v8097_v8 }
 0x7b9   :  { %6745 = vmatpush3.bf16.msra.mxu0 %v7789_v10 }
 0x85c   :  { %v5629_v60 = vpop.f32.mrf.mxu0 }
 0x85d   :  { %v5630_v2 = vadd.f32 %v5629_v60, %v5530_v0 }
 0x85e   :  { %v6708_v1 = vpop.f32.mrf.mxu0 }
 0x85f   :  { %v5636_v7 = vmax.f32 %v5630_v2, 0.0 }
 0x860   :  { %v5632_v3 = vpop.f32.mrf.mxu0 }
 0x861   :  { %v5633_v9 = vadd.f32 %v5632_v3, %v5530_v0  ;;  %v5638_v16 = vmin.f32 %v5636_v7, 6.0 }
 0x862   :  { %v6709_v14 = vpop.f32.mrf.mxu0 }
 0x863   :  { %v5637_v15 = vmax.f32 %v5633_v9, 0.0 }
 0x865   :  { %v5639_v17 = vmin.f32 %v5637_v15, 6.0 }
 0x867   :  { %v5640_v4 = vpack.c.bf16 %v5639_v17, %v5638_v16 }
 0x869   :  { %6727 = vmatmul.mubr.bf16.vlgmr.msra.gmra.mxu1 %v5640_v4 }
 0x929   :  { %v5740_v19 = vpop.f32.mrf.mxu1 }
 0x92a   :  { %v5741_v20 = vadd.f32 %v5740_v19, %v5641_v6 }
 0x92b   :  { %v6728_v13 = vpop.f32.mrf.mxu1 }
 0x92c   :  { %v5747_v22 = vmax.f32 %v5741_v20, 0.0 }
 0x92d   :  { %v5743_v21 = vpop.f32.mrf.mxu1 }
 0x92e   :  { %v5744_v23 = vadd.f32 %v5743_v21, %v5641_v6  ;;  %v5749_v28 = vmin.f32 %v5747_v22, 6.0 }
 0x92f   :  { %v6729_v25 = vpop.f32.mrf.mxu1 }
 0x930   :  { %v5748_v26 = vmax.f32 %v5744_v23, 0.0 }
 0x932   :  { %v5750_v29 = vmin.f32 %v5748_v26, 6.0 }
 0x934   :  { %v5751_v32 = vpack.c.bf16 %v5750_v29, %v5749_v28 }
 0x936   :  { %6747 = vmatmul.mubr.bf16.vlgmr.msra.gmra.mxu0 %v5751_v32 }
 0x9f6   :  { %v5851_v35 = vpop.f32.mrf.mxu0 }
 0x9f7   :  { %v5852_v24 = vadd.f32 %v5851_v35, %v5752_v34 }
 0x9f8   :  { %v6748_v37 = vpop.f32.mrf.mxu0 }
 0x9f9   :  { %v6595_v8 = vmul.f32 -1.442695, %v5852_v24 }
 0x9fa   :  { %v5854_v27 = vpop.f32.mrf.mxu0 }
 0x9fb   :  { %7790 = vpow2.f32 %v6595_v8  ;;  %v5855_v11 = vadd.f32 %v5854_v27, %v5752_v34 }
 0x9fc   :  { %v6749_v38 = vpop.f32.mrf.mxu0 }
 0x9fd   :  { %v6596_v12 = vmul.f32 -1.442695, %v5855_v11 }
 0x9ff   :  { %7792 = vpow2.f32 %v6596_v12 }
 0xa08   :  { %v7791_v31 = vpop.eup %7790 }
 0xa09   :  { %v5864_v30 = vadd.f32 1.0, %v7791_v31 }
 0xa0b   :  { %7794 = vrcp.f32 %v5864_v30 }
 0xa0c   :  { %v7793_v39 = vpop.eup %7792 }
 0xa0d   :  { %v5865_v40 = vadd.f32 1.0, %v7793_v39 }
 0xa0f   :  { %7796 = vrcp.f32 %v5865_v40 }
 0xa18   :  { %v7795_v33 = vpop.eup %7794 }
 0xa19   :  { %5870 = vst [vmem:[#allocation22] sm:$0xff] %v7795_v33 }
 0xa1c   :  { %v7797_v41 = vpop.eup %7796 }
 0xa1d   :  { %5871 = vst [vmem:[#allocation22 + $0x8] sm:$0xff] %v7797_v41 }
 0xa1e   :  { %8049 = shalt.err (!%p8046_p8)
}
 0xa1f   :  { %5883 = dma.vmem_to_hbm [thread:$0]  %s5878_s11, 256, %s8364_s12, [#allocation4], %s8089_s2, %s8089_s2, %s8090_s13  }
 0xa20   :  { %8072 = dma.done.wait [#allocation4], 256  }
 0xa21   :  { %8073 = vsyncadd [#allocation4], 4294967040 }
 0xa22   :  { %5887 = vsyncpa [#allocation3], 1 }
 0xa23   :  { %5888 = vsyncpa [#allocation6], 1 }
 0xa24   :  { %5889 = vsyncpa [#allocation9], 1 }
 0xa25   :  { %5890 = vsyncpa [#allocation12], 1 }
 0xa26   :  { %5891 = vsyncpa [#allocation15], 1 }
 0xa27   :  { %5892 = vsyncpa [#allocation18], 1 }
 0xa28   :  { %5893 = vsyncpa [#allocation21], 1 }
 0xa29   :  { %5894 = vsyncpa [#allocation4], 1 }

// kernel: tpu_custom_call.1
= control target key start
LH: loop header
LB: loop body
LE: loop exit
PB: predicated region body
PF: predicated region fallthrough
CT: control target
= control target key end

     0   :  { %17 = vsyncpa [#allocation3], 0  ;;  %s8352_s0 = inlined_call_operand.hbm [shape: bf16[16,512], index: 0, kind: input, shape index: {}]   ;;  %s8353_s1 = inlined_call_operand.hbm [shape: bf16[512,512], index: 1, kind: input, shape index: {}]   ;;  %s8354_s2 = inlined_call_operand.hbm [shape: bf16[512,512], index: 2, kind: input, shape index: {}]   ;;  %s8355_s3 = inlined_call_operand.hbm [shape: bf16[512,512], index: 3, kind: input, shape index: {}]   ;;  %s8356_s4 = inlined_call_operand.hbm [shape: bf16[512,512], index: 4, kind: input, shape index: {}]   ;;  %s8357_s5 = inlined_call_operand.hbm [shape: bf16[512,384], index: 5, kind: input, shape index: {}]   ;;  %s8358_s6 = inlined_call_operand.hbm [shape: bf16[384,256], index: 6, kind: input, shape index: {}]   ;;  %s8359_s7 = inlined_call_operand.hbm [shape: bf16[256,128], index: 7, kind: input, shape index: {}]   ;;  %s8360_s8 = inlined_call_operand.hbm [shape: bf16[128,128], index: 8, kind: input, shape index: {}]   ;;  %s8361_s9 = inlined_call_operand.hbm [shape: bf16[128,128], index: 9, kind: input, shape index: {}]   ;;  %s8362_s10 = inlined_call_operand.hbm [shape: bf16[128,128], index: 10, kind: input, shape index: {}]   ;;  %s8363_s11 = inlined_call_operand.hbm [shape: f32[10,512], index: 11, kind: input, shape index: {}]   ;;  %s8364_s12 = inlined_call_operand.hbm [shape: f32[16,128], index: 12, kind: output, shape index: {}]  }
   0x1   :  { %18 = vsyncpa [#allocation6], 0 }
   0x2   :  { %19 = vsyncpa [#allocation9], 0 }
   0x3   :  { %20 = vsyncpa [#allocation12], 0 }
   0x4   :  { %21 = vsyncpa [#allocation15], 0 }
   0x5   :  { %22 = vsyncpa [#allocation18], 0 }
   0x6   :  { %23 = vsyncpa [#allocation21], 0 }
   0x7   :  { %24 = vsyncpa [#allocation4], 0  ;;  %s8074_s21 = smov [#allocation5]   ;;  %s8075_s23 = smov [#allocation8]  }
   0x8   :  { %s42_s22 = sshll.u32 %s8074_s21, 4  ;;  %s66_s24 = sshll.u32 %s8075_s23, 4  ;;  %s43_s22 = int_to_ptr.vmem [resolvable:$true] %s42_s22  ;;  %s67_s24 = int_to_ptr.vmem [resolvable:$true] %s66_s24 }
   0x9   :  { %s7806_s25 = scalar_lea.vmem %s43_s22, 16384  ;;  %p7811_p1 = scmp.lt.s32.totalorder %s43_s22, %s43_s22 }
   0xa   :  { %p7807_p0 = scmp.ne.s32.totalorder %s43_s22, %s7806_s25  ;;  %p7812_p2 = scmp.lt.s32.totalorder %s7806_s25, %s7806_s25 }
   0xc   :  { %p7813_p3 = por %p7812_p2, %p7811_p1 }
   0xe   :  { %p7814_p4 = pnand %p7813_p3, %p7807_p0 }
  0x10   :  { %7817 = shalt.err (!%p7814_p4)
}
  0x11   :  { %s8076_s26 = smov 256   ;;  %s8077_s27 = smov 16  }
  0x12   :  { %48 = dma.hbm_to_vmem [thread:$0]  %s8353_s1, 16384, %s43_s22, [#allocation6], %s8076_s26, %s8076_s26, %s8077_s27  }
  0x13   :  { %s7826_s30 = scalar_lea.vmem %s67_s24, 16384  ;;  %p7831_p6 = scmp.lt.s32.totalorder %s67_s24, %s67_s24 }
  0x14   :  { %p7827_p5 = scmp.ne.s32.totalorder %s67_s24, %s7826_s30  ;;  %p7832_p7 = scmp.lt.s32.totalorder %s7826_s30, %s7826_s30 }
  0x16   :  { %p7833_p8 = por %p7832_p7, %p7831_p6 }
  0x18   :  { %p7834_p9 = pnand %p7833_p8, %p7827_p5 }
  0x1a   :  { %7837 = shalt.err (!%p7834_p9)
}
  0x1b   :  { %72 = dma.hbm_to_vmem [thread:$0]  %s8355_s3, 16384, %s67_s24, [#allocation9], %s8076_s26, %s8076_s26, %s8077_s27  }
  0x1c   :  { %s8078_s15 = smov [#allocation11]  }
  0x1d   :  { %s90_s16 = sshll.u32 %s8078_s15, 4  ;;  %s91_s16 = int_to_ptr.vmem [resolvable:$true] %s90_s16 }
  0x1e   :  { %s7846_s17 = scalar_lea.vmem %s91_s16, 12288  ;;  %p7851_p11 = scmp.lt.s32.totalorder %s91_s16, %s91_s16 }
  0x1f   :  { %p7847_p10 = scmp.ne.s32.totalorder %s91_s16, %s7846_s17  ;;  %p7852_p12 = scmp.lt.s32.totalorder %s7846_s17, %s7846_s17 }
  0x21   :  { %p7853_p13 = por %p7852_p12, %p7851_p11 }
  0x23   :  { %p7854_p0 = pnand %p7853_p13, %p7847_p10 }
  0x25   :  { %7857 = shalt.err (!%p7854_p0)
}
  0x26   :  { %s8079_s1 = smov 192   ;;  %s8080_s18 = smov 12  }
  0x27   :  { %96 = dma.hbm_to_vmem [thread:$0]  %s8357_s5, 12288, %s91_s16, [#allocation12], %s8079_s1, %s8079_s1, %s8080_s18  }
  0x28   :  { %s8081_s21 = smov [#allocation14]  }
  0x29   :  { %s114_s22 = sshll.u32 %s8081_s21, 4  ;;  %s115_s22 = int_to_ptr.vmem [resolvable:$true] %s114_s22 }
  0x2a   :  { %s7866_s3 = scalar_lea.vmem %s115_s22, 2048  ;;  %p7871_p2 = scmp.lt.s32.totalorder %s115_s22, %s115_s22 }
  0x2b   :  { %p7867_p1 = scmp.ne.s32.totalorder %s115_s22, %s7866_s3  ;;  %p7872_p3 = scmp.lt.s32.totalorder %s7866_s3, %s7866_s3 }
  0x2d   :  { %p7873_p4 = por %p7872_p3, %p7871_p2 }
  0x2f   :  { %p7874_p5 = pnand %p7873_p4, %p7867_p1 }
  0x31   :  { %7877 = shalt.err (!%p7874_p5)
}
  0x32   :  { %s8082_s23 = smov 64   ;;  %s8083_s24 = smov 4  }
  0x33   :  { %120 = dma.hbm_to_vmem [thread:$0]  %s8359_s7, 2048, %s115_s22, [#allocation15], %s8082_s23, %s8082_s23, %s8083_s24  }
  0x34   :  { %s8084_s5 = smov [#allocation17]   ;;  %s8085_s30 = smov [#allocation2]  }
  0x35   :  { %s138_s29 = sshll.u32 %s8084_s5, 4  ;;  %s30_s13 = sshll.u32 %s8085_s30, 4  ;;  %s139_s29 = int_to_ptr.vmem [resolvable:$true] %s138_s29  ;;  %s31_s13 = int_to_ptr.vmem [resolvable:$true] %s30_s13 }
  0x36   :  { %s7886_s14 = scalar_lea.vmem %s139_s29, 1024  ;;  %p7891_p7 = scmp.lt.s32.totalorder %s139_s29, %s139_s29 }
  0x37   :  { %p7887_p6 = scmp.ne.s32.totalorder %s139_s29, %s7886_s14  ;;  %p7892_p8 = scmp.lt.s32.totalorder %s7886_s14, %s7886_s14 }
  0x39   :  { %p7893_p9 = por %p7892_p8, %p7891_p7 }
  0x3b   :  { %p7894_p10 = pnand %p7893_p9, %p7887_p6 }
  0x3d   :  { %7897 = shalt.err (!%p7894_p10)
}
  0x3e   :  { %144 = dma.hbm_to_vmem [thread:$0]  %s8361_s9, 1024, %s139_s29, [#allocation18], %s8082_s23, %s8082_s23, %s8083_s24  }
  0x3f   :  { %s7906_s7 = scalar_lea.vmem %s31_s13, 512  ;;  %p7911_p12 = scmp.lt.s32.totalorder %s31_s13, %s31_s13 }
  0x40   :  { %p7907_p11 = scmp.ne.s32.totalorder %s31_s13, %s7906_s7  ;;  %p7912_p13 = scmp.lt.s32.totalorder %s7906_s7, %s7906_s7 }
  0x42   :  { %p7913_p0 = por %p7912_p13, %p7911_p12 }
  0x44   :  { %p7914_p1 = pnand %p7913_p0, %p7907_p11 }
  0x46   :  { %7917 = shalt.err (!%p7914_p1)
}
  0x47   :  { %36 = dma.hbm_to_vmem [thread:$0]  %s8352_s0, 512, %s31_s13, [#allocation3], %s8076_s26, %s8076_s26, %s8077_s27  }
  0x48   :  { %s8086_s18 = smov [#allocation7]   ;;  %s8087_s20 = smov [#allocation10]  }
  0x49   :  { %s54_s19 = sshll.u32 %s8086_s18, 4  ;;  %s78_s21 = sshll.u32 %s8087_s20, 4  ;;  %s55_s19 = int_to_ptr.vmem [resolvable:$true] %s54_s19  ;;  %s79_s21 = int_to_ptr.vmem [resolvable:$true] %s78_s21 }
  0x4a   :  { %s7926_s9 = scalar_lea.vmem %s55_s19, 16384  ;;  %p7931_p3 = scmp.lt.s32.totalorder %s55_s19, %s55_s19 }
  0x4b   :  { %p7927_p2 = scmp.ne.s32.totalorder %s55_s19, %s7926_s9  ;;  %p7932_p4 = scmp.lt.s32.totalorder %s7926_s9, %s7926_s9 }
  0x4d   :  { %p7933_p5 = por %p7932_p4, %p7931_p3 }
  0x4f   :  { %p7934_p6 = pnand %p7933_p5, %p7927_p2 }
  0x51   :  { %7937 = shalt.err (!%p7934_p6)
}
  0x52   :  { %60 = dma.hbm_to_vmem [thread:$0]  %s8354_s2, 16384, %s55_s19, [#allocation6], %s8076_s26, %s8076_s26, %s8077_s27  }
  0x53   :  { %s7946_s0 = scalar_lea.vmem %s79_s21, 16384  ;;  %p7951_p8 = scmp.lt.s32.totalorder %s79_s21, %s79_s21 }
  0x54   :  { %p7947_p7 = scmp.ne.s32.totalorder %s79_s21, %s7946_s0  ;;  %p7952_p9 = scmp.lt.s32.totalorder %s7946_s0, %s7946_s0 }
  0x56   :  { %p7953_p10 = por %p7952_p9, %p7951_p8 }
  0x58   :  { %p7954_p11 = pnand %p7953_p10, %p7947_p7 }
  0x5a   :  { %7957 = shalt.err (!%p7954_p11)
}
  0x5b   :  { %84 = dma.hbm_to_vmem [thread:$0]  %s8356_s4, 16384, %s79_s21, [#allocation9], %s8076_s26, %s8076_s26, %s8077_s27  }
  0x5c   :  { %s8088_s5 = smov [#allocation13]  }
  0x5d   :  { %s102_s29 = sshll.u32 %s8088_s5, 4  ;;  %s103_s29 = int_to_ptr.vmem [resolvable:$true] %s102_s29 }
  0x5e   :  { %s7966_s30 = scalar_lea.vmem %s103_s29, 6144  ;;  %p7971_p13 = scmp.lt.s32.totalorder %s103_s29, %s103_s29 }
  0x5f   :  { %p7967_p12 = scmp.ne.s32.totalorder %s103_s29, %s7966_s30  ;;  %p7972_p0 = scmp.lt.s32.totalorder %s7966_s30, %s7966_s30 }
  0x61   :  { %p7973_p1 = por %p7972_p0, %p7971_p13 }
  0x63   :  { %p7974_p2 = pnand %p7973_p1, %p7967_p12 }
  0x65   :  { %7977 = shalt.err (!%p7974_p2)
}
  0x66   :  { %s8089_s2 = smov 128   ;;  %s8090_s13 = smov 8  }
  0x67   :  { %108 = dma.hbm_to_vmem [thread:$0]  %s8358_s6, 6144, %s103_s29, [#allocation12], %s8089_s2, %s8089_s2, %s8090_s13  }
  0x68   :  { %s8091_s4 = smov [#allocation16]   ;;  %s8092_s27 = smov [#allocation19]  }
  0x69   :  { %s126_s26 = sshll.u32 %s8091_s4, 4  ;;  %s150_s16 = sshll.u32 %s8092_s27, 4  ;;  %s127_s26 = int_to_ptr.vmem [resolvable:$true] %s126_s26  ;;  %s151_s16 = int_to_ptr.vmem [resolvable:$true] %s150_s16 }
  0x6a   :  { %s7986_s7 = scalar_lea.vmem %s127_s26, 1024  ;;  %p7991_p4 = scmp.lt.s32.totalorder %s127_s26, %s127_s26 }
  0x6b   :  { %p7987_p3 = scmp.ne.s32.totalorder %s127_s26, %s7986_s7  ;;  %p7992_p5 = scmp.lt.s32.totalorder %s7986_s7, %s7986_s7 }
  0x6d   :  { %p7993_p6 = por %p7992_p5, %p7991_p4 }
  0x6f   :  { %p7994_p7 = pnand %p7993_p6, %p7987_p3 }
  0x71   :  { %7997 = shalt.err (!%p7994_p7)
}
  0x72   :  { %132 = dma.hbm_to_vmem [thread:$0]  %s8360_s8, 1024, %s127_s26, [#allocation15], %s8082_s23, %s8082_s23, %s8083_s24  }
  0x73   :  { %s8006_s6 = scalar_lea.vmem %s151_s16, 1024  ;;  %p8011_p9 = scmp.lt.s32.totalorder %s151_s16, %s151_s16 }
  0x74   :  { %p8007_p8 = scmp.ne.s32.totalorder %s151_s16, %s8006_s6  ;;  %p8012_p10 = scmp.lt.s32.totalorder %s8006_s6, %s8006_s6 }
  0x76   :  { %p8013_p11 = por %p8012_p10, %p8011_p9 }
  0x78   :  { %p8014_p12 = pnand %p8013_p11, %p8007_p8 }
  0x7a   :  { %8017 = shalt.err (!%p8014_p12)
}
  0x7b   :  { %156 = dma.hbm_to_vmem [thread:$0]  %s8362_s10, 1024, %s151_s16, [#allocation18], %s8082_s23, %s8082_s23, %s8083_s24  }
  0x7c   :  { %s8093_s20 = smov [#allocation20]  }
  0x7d   :  { %s162_s21 = sshll.u32 %s8093_s20, 4  ;;  %s163_s21 = int_to_ptr.vmem [resolvable:$true] %s162_s21 }
  0x7e   :  { %s8026_s9 = scalar_lea.vmem %s163_s21, 1024  ;;  %p8031_p0 = scmp.lt.s32.totalorder %s163_s21, %s163_s21 }
  0x7f   :  { %p8027_p13 = scmp.ne.s32.totalorder %s163_s21, %s8026_s9  ;;  %p8032_p1 = scmp.lt.s32.totalorder %s8026_s9, %s8026_s9 }
  0x81   :  { %p8033_p2 = por %p8032_p1, %p8031_p0 }
  0x83   :  { %p8034_p3 = pnand %p8033_p2, %p8027_p13 }
  0x85   :  { %8037 = shalt.err (!%p8034_p3)
}
  0x86   :  { %s8094_s8 = smov 512   ;;  %s8095_s22 = smov 32  }
  0x87   :  { %168 = dma.hbm_to_vmem [thread:$0]  %s8363_s11, 1024, %s163_s21, [#allocation21], %s8094_s8, %s8094_s8, %s8095_s22  }
  0x88   :  { %8058 = dma.done.wait [#allocation3], 512  }
  0x89   :  { %8059 = vsyncadd [#allocation3], 4294966784 }
  0x8a   :  { %8060 = dma.done.wait [#allocation6], 32768  }
  0x8b   :  { %8061 = vsyncadd [#allocation6], 4294934528 }
  0x8c   :  { %8062 = dma.done.wait [#allocation9], 32768  }
  0x8d   :  { %8063 = vsyncadd [#allocation9], 4294934528 }
  0x8e   :  { %8064 = dma.done.wait [#allocation12], 18432  }
  0x8f   :  { %8065 = vsyncadd [#allocation12], 4294948864 }
  0x90   :  { %8066 = dma.done.wait [#allocation15], 3072  }
  0x91   :  { %8067 = vsyncadd [#allocation15], 4294964224 }
  0x92   :  { %8068 = dma.done.wait [#allocation18], 2048  }
  0x93   :  { %8069 = vsyncadd [#allocation18], 4294965248 }
  0x94   :  { %8070 = dma.done.wait [#allocation21], 1024  }
  0x95   :  { %8071 = vsyncadd [#allocation21], 4294966272  ;;  %v6776_v0 = vld [vmem:[#allocation5 + $0xe4] ss:$16 sps:$4 sm:$0xff]   ;;  %v6780_v2 = vld [vmem:[#allocation5 + $0xe0] ss:$16 sps:$4 sm:$0xff]  }
  0x96   :  { %v6778_v1 = vld [vmem:[#allocation5 + $0x2e4] ss:$16 sps:$4 sm:$0xff]   ;;  %1020 = vmatprep.subr.bf16.mxu0 %v6776_v0  ;;  %v6781_v3 = vld [vmem:[#allocation5 + $0x2e0] ss:$16 sps:$4 sm:$0xff]   ;;  %v6877_v51 = vld [vmem:[#allocation2 + $0xc] ss:$16 sps:$4 sm:$0xff]  }
  0x97   :  { %1063 = vmatprep.subr.bf16.mxu1 %v6778_v1  ;;  %v6782_v4 = vld [vmem:[#allocation5 + $0xc4] ss:$16 sps:$4 sm:$0xff]   ;;  %1021 = vmatpush1.bf16.msra.mxu0 %v6780_v2  ;;  %v6786_v6 = vld [vmem:[#allocation5 + $0xc0] ss:$16 sps:$4 sm:$0xff]   ;;  %v6880_v2 = vld [vmem:[#allocation5 + $0xec] ss:$16 sps:$4 sm:$0xff]  }
  0x98   :  { %1064 = vmatpush1.bf16.msra.mxu1 %v6781_v3  ;;  %v6784_v5 = vld [vmem:[#allocation5 + $0x2c4] ss:$16 sps:$4 sm:$0xff]   ;;  %1022 = vmatprep.subr.bf16.mxu0 %v6782_v4  ;;  %v6787_v7 = vld [vmem:[#allocation5 + $0x2c0] ss:$16 sps:$4 sm:$0xff]   ;;  %v6883_v3 = vld [vmem:[#allocation5 + $0x2ec] ss:$16 sps:$4 sm:$0xff]  }
  0x99   :  { %1065 = vmatprep.subr.bf16.mxu1 %v6784_v5  ;;  %v6788_v8 = vld [vmem:[#allocation5 + $0xa4] ss:$16 sps:$4 sm:$0xff]   ;;  %v6792_v10 = vld [vmem:[#allocation5 + $0xa0] ss:$16 sps:$4 sm:$0xff]   ;;  %1095 = vmatprep.mubr.bf16.mxu1 %v6877_v51  ;;  %v8233_v5 = vld [vmem:[#allocation2 + $0x8] ss:$16 sps:$4 sm:$0xff]  }
  0x9a   :  { %v6790_v9 = vld [vmem:[#allocation5 + $0x2a4] ss:$16 sps:$4 sm:$0xff]   ;;  %v6793_v11 = vld [vmem:[#allocation5 + $0x2a0] ss:$16 sps:$4 sm:$0xff]   ;;  %vm8098_vm0 = vmmov 0   ;;  %s8099_s10 = smov [#allocation22]  }
  0x9b   :  { %1023 = vmatpush1.bf16.msra.mxu0 %v6786_v6  ;;  %v6794_v12 = vld [vmem:[#allocation5 + $0x84] ss:$16 sps:$4 sm:$0xff]   ;;  %v6798_v14 = vld [vmem:[#allocation5 + $0x80] ss:$16 sps:$4 sm:$0xff]   ;;  %v6878_v6 = vld [vmem:[#allocation5 + $0xe8] ss:$16 sps:$4 sm:$0xff]  }
  0x9c   :  { %1066 = vmatpush1.bf16.msra.mxu1 %v6787_v7  ;;  %1024 = vmatprep.subr.bf16.mxu0 %v6788_v8  ;;  %v6796_v13 = vld [vmem:[#allocation5 + $0x284] ss:$16 sps:$4 sm:$0xff]   ;;  %v6799_v15 = vld [vmem:[#allocation5 + $0x280] ss:$16 sps:$4 sm:$0xff]   ;;  %v6881_v7 = vld [vmem:[#allocation5 + $0x2e8] ss:$16 sps:$4 sm:$0xff]  }
  0x9d   :  { %1067 = vmatprep.subr.bf16.mxu1 %v6790_v9  ;;  %v6800_v16 = vld [vmem:[#allocation5 + $0x64] ss:$16 sps:$4 sm:$0xff]   ;;  %v6804_v18 = vld [vmem:[#allocation5 + $0x60] ss:$16 sps:$4 sm:$0xff]   ;;  %v6886_v8 = vld [vmem:[#allocation5 + $0xcc] ss:$16 sps:$4 sm:$0xff]  }
  0x9e   :  { %v6802_v17 = vld [vmem:[#allocation5 + $0x264] ss:$16 sps:$4 sm:$0xff]   ;;  %v6805_v19 = vld [vmem:[#allocation5 + $0x260] ss:$16 sps:$4 sm:$0xff]   ;;  %v6889_v9 = vld [vmem:[#allocation5 + $0x2cc] ss:$16 sps:$4 sm:$0xff]  }
  0x9f   :  { %1025 = vmatpush1.bf16.msra.mxu0 %v6792_v10  ;;  %v6806_v20 = vld [vmem:[#allocation5 + $0x44] ss:$16 sps:$4 sm:$0xff]   ;;  %v6810_v22 = vld [vmem:[#allocation5 + $0x40] ss:$16 sps:$4 sm:$0xff]   ;;  %v6884_v10 = vld [vmem:[#allocation5 + $0xc8] ss:$16 sps:$4 sm:$0xff]  }
  0xa0   :  { %1068 = vmatpush1.bf16.msra.mxu1 %v6793_v11  ;;  %1026 = vmatprep.subr.bf16.mxu0 %v6794_v12  ;;  %v6808_v21 = vld [vmem:[#allocation5 + $0x244] ss:$16 sps:$4 sm:$0xff]   ;;  %v6811_v23 = vld [vmem:[#allocation5 + $0x240] ss:$16 sps:$4 sm:$0xff]   ;;  %v6887_v11 = vld [vmem:[#allocation5 + $0x2c8] ss:$16 sps:$4 sm:$0xff]  }
  0xa1   :  { %1069 = vmatprep.subr.bf16.mxu1 %v6796_v13  ;;  %v6812_v24 = vld [vmem:[#allocation5 + $0x24] ss:$16 sps:$4 sm:$0xff]   ;;  %v6816_v26 = vld [vmem:[#allocation5 + $0x20] ss:$16 sps:$4 sm:$0xff]   ;;  %v6892_v12 = vld [vmem:[#allocation5 + $0xac] ss:$16 sps:$4 sm:$0xff]  }
  0xa2   :  { %v6814_v25 = vld [vmem:[#allocation5 + $0x224] ss:$16 sps:$4 sm:$0xff]   ;;  %v6817_v27 = vld [vmem:[#allocation5 + $0x220] ss:$16 sps:$4 sm:$0xff]   ;;  %v6895_v13 = vld [vmem:[#allocation5 + $0x2ac] ss:$16 sps:$4 sm:$0xff]  }
  0xa3   :  { %1027 = vmatpush1.bf16.msra.mxu0 %v6798_v14  ;;  %v6818_v28 = vld [vmem:[#allocation5 + $0x4] ss:$16 sps:$4 sm:$0xff]   ;;  %v6822_v30 = vld [vmem:[#allocation5] ss:$16 sps:$4 sm:$0xff]   ;;  %v6890_v14 = vld [vmem:[#allocation5 + $0xa8] ss:$16 sps:$4 sm:$0xff]  }
  0xa4   :  { %1070 = vmatpush1.bf16.msra.mxu1 %v6799_v15  ;;  %1028 = vmatprep.subr.bf16.mxu0 %v6800_v16  ;;  %v6820_v29 = vld [vmem:[#allocation5 + $0x204] ss:$16 sps:$4 sm:$0xff]   ;;  %v6823_v31 = vld [vmem:[#allocation5 + $0x200] ss:$16 sps:$4 sm:$0xff]   ;;  %v6893_v15 = vld [vmem:[#allocation5 + $0x2a8] ss:$16 sps:$4 sm:$0xff]  }
  0xa5   :  { %1071 = vmatprep.subr.bf16.mxu1 %v6802_v17  ;;  %v6824_v32 = vld [vmem:[#allocation5 + $0x1e4] ss:$16 sps:$4 sm:$0xff]   ;;  %v6828_v34 = vld [vmem:[#allocation5 + $0x1e0] ss:$16 sps:$4 sm:$0xff]   ;;  %v6898_v16 = vld [vmem:[#allocation5 + $0x8c] ss:$16 sps:$4 sm:$0xff]  }
  0xa6   :  { %v6826_v33 = vld [vmem:[#allocation5 + $0x3e4] ss:$16 sps:$4 sm:$0xff]   ;;  %v6829_v35 = vld [vmem:[#allocation5 + $0x3e0] ss:$16 sps:$4 sm:$0xff]   ;;  %v6901_v17 = vld [vmem:[#allocation5 + $0x28c] ss:$16 sps:$4 sm:$0xff]  }
  0xa7   :  { %1029 = vmatpush1.bf16.msra.mxu0 %v6804_v18  ;;  %v6830_v36 = vld [vmem:[#allocation5 + $0x1c4] ss:$16 sps:$4 sm:$0xff]   ;;  %v6834_v38 = vld [vmem:[#allocation5 + $0x1c0] ss:$16 sps:$4 sm:$0xff]   ;;  %v6896_v18 = vld [vmem:[#allocation5 + $0x88] ss:$16 sps:$4 sm:$0xff]  }
  0xa8   :  { %1072 = vmatpush1.bf16.msra.mxu1 %v6805_v19  ;;  %1030 = vmatprep.subr.bf16.mxu0 %v6806_v20  ;;  %v6832_v37 = vld [vmem:[#allocation5 + $0x3c4] ss:$16 sps:$4 sm:$0xff]   ;;  %v6835_v39 = vld [vmem:[#allocation5 + $0x3c0] ss:$16 sps:$4 sm:$0xff]   ;;  %v6899_v19 = vld [vmem:[#allocation5 + $0x288] ss:$16 sps:$4 sm:$0xff]  }
  0xa9   :  { %1073 = vmatprep.subr.bf16.mxu1 %v6808_v21  ;;  %v6836_v40 = vld [vmem:[#allocation5 + $0x1a4] ss:$16 sps:$4 sm:$0xff]   ;;  %v6840_v42 = vld [vmem:[#allocation5 + $0x1a0] ss:$16 sps:$4 sm:$0xff]   ;;  %v6904_v20 = vld [vmem:[#allocation5 + $0x6c] ss:$16 sps:$4 sm:$0xff]  }
  0xaa   :  { %v6838_v41 = vld [vmem:[#allocation5 + $0x3a4] ss:$16 sps:$4 sm:$0xff]   ;;  %v6841_v43 = vld [vmem:[#allocation5 + $0x3a0] ss:$16 sps:$4 sm:$0xff]   ;;  %v6907_v21 = vld [vmem:[#allocation5 + $0x26c] ss:$16 sps:$4 sm:$0xff]  }
  0xab   :  { %1031 = vmatpush1.bf16.msra.mxu0 %v6810_v22  ;;  %v6842_v44 = vld [vmem:[#allocation5 + $0x184] ss:$16 sps:$4 sm:$0xff]   ;;  %v6846_v46 = vld [vmem:[#allocation5 + $0x180] ss:$16 sps:$4 sm:$0xff]   ;;  %v6902_v22 = vld [vmem:[#allocation5 + $0x68] ss:$16 sps:$4 sm:$0xff]  }
  0xac   :  { %1074 = vmatpush1.bf16.msra.mxu1 %v6811_v23  ;;  %1032 = vmatprep.subr.bf16.mxu0 %v6812_v24  ;;  %v6844_v45 = vld [vmem:[#allocation5 + $0x384] ss:$16 sps:$4 sm:$0xff]   ;;  %v6847_v47 = vld [vmem:[#allocation5 + $0x380] ss:$16 sps:$4 sm:$0xff]   ;;  %v6905_v23 = vld [vmem:[#allocation5 + $0x268] ss:$16 sps:$4 sm:$0xff]  }
  0xad   :  { %1075 = vmatprep.subr.bf16.mxu1 %v6814_v25  ;;  %v6848_v48 = vld [vmem:[#allocation5 + $0x164] ss:$16 sps:$4 sm:$0xff]   ;;  %v6852_v52 = vld [vmem:[#allocation5 + $0x160] ss:$16 sps:$4 sm:$0xff]   ;;  %v6910_v24 = vld [vmem:[#allocation5 + $0x4c] ss:$16 sps:$4 sm:$0xff]  }
  0xae   :  { %v6874_v49 = vld [vmem:[#allocation2 + $0x4] ss:$16 sps:$4 sm:$0xff]   ;;  %v6853_v53 = vld [vmem:[#allocation5 + $0x360] ss:$16 sps:$4 sm:$0xff]   ;;  %v6913_v25 = vld [vmem:[#allocation5 + $0x24c] ss:$16 sps:$4 sm:$0xff]  }
  0xaf   :  { %1033 = vmatpush1.bf16.msra.mxu0 %v6816_v26  ;;  %v6850_v50 = vld [vmem:[#allocation5 + $0x364] ss:$16 sps:$4 sm:$0xff]   ;;  %1052 = vmatprep.mubr.bf16.mxu0 %v6874_v49  ;;  %v6858_v56 = vld [vmem:[#allocation5 + $0x140] ss:$16 sps:$4 sm:$0xff]   ;;  %v6908_v26 = vld [vmem:[#allocation5 + $0x48] ss:$16 sps:$4 sm:$0xff]  }
  0xb0   :  { %1076 = vmatpush1.bf16.msra.mxu1 %v6817_v27  ;;  %1034 = vmatprep.subr.bf16.mxu0 %v6818_v28  ;;  %v6854_v54 = vld [vmem:[#allocation5 + $0x144] ss:$16 sps:$4 sm:$0xff]   ;;  %v6859_v57 = vld [vmem:[#allocation5 + $0x340] ss:$16 sps:$4 sm:$0xff]   ;;  %v6911_v27 = vld [vmem:[#allocation5 + $0x248] ss:$16 sps:$4 sm:$0xff]  }
  0xb1   :  { %1077 = vmatprep.subr.bf16.mxu1 %v6820_v29  ;;  %v6856_v55 = vld [vmem:[#allocation5 + $0x344] ss:$16 sps:$4 sm:$0xff]   ;;  %v6864_v60 = vld [vmem:[#allocation5 + $0x120] ss:$16 sps:$4 sm:$0xff]   ;;  %v6916_v28 = vld [vmem:[#allocation5 + $0x2c] ss:$16 sps:$4 sm:$0xff]  }
  0xb2   :  { %v6860_v58 = vld [vmem:[#allocation5 + $0x124] ss:$16 sps:$4 sm:$0xff]   ;;  %v6865_v61 = vld [vmem:[#allocation5 + $0x320] ss:$16 sps:$4 sm:$0xff]   ;;  %v6919_v29 = vld [vmem:[#allocation5 + $0x22c] ss:$16 sps:$4 sm:$0xff]  }
  0xb3   :  { %1035 = vmatpush1.bf16.msra.mxu0 %v6822_v30  ;;  %v6862_v59 = vld [vmem:[#allocation5 + $0x324] ss:$16 sps:$4 sm:$0xff]   ;;  %v6870_v0 = vld [vmem:[#allocation5 + $0x100] ss:$16 sps:$4 sm:$0xff]   ;;  %v6914_v30 = vld [vmem:[#allocation5 + $0x28] ss:$16 sps:$4 sm:$0xff]  }
  0xb4   :  { %1078 = vmatpush1.bf16.msra.mxu1 %v6823_v31  ;;  %1036 = vmatprep.subr.bf16.mxu0 %v6824_v32  ;;  %v6866_v62 = vld [vmem:[#allocation5 + $0x104] ss:$16 sps:$4 sm:$0xff]   ;;  %v6871_v1 = vld [vmem:[#allocation5 + $0x300] ss:$16 sps:$4 sm:$0xff]   ;;  %v6917_v31 = vld [vmem:[#allocation5 + $0x228] ss:$16 sps:$4 sm:$0xff]  }
  0xb5   :  { %1079 = vmatprep.subr.bf16.mxu1 %v6826_v33  ;;  %v6868_v63 = vld [vmem:[#allocation5 + $0x304] ss:$16 sps:$4 sm:$0xff]   ;;  %v8231_v4 = vld [vmem:[#allocation2] ss:$16 sps:$4 sm:$0xff]   ;;  %v6922_v32 = vld [vmem:[#allocation5 + $0xc] ss:$16 sps:$4 sm:$0xff]  }
  0xb6   :  { %v6925_v33 = vld [vmem:[#allocation5 + $0x20c] ss:$16 sps:$4 sm:$0xff]   ;;  %s5877_s11 = sshll.u32 %s8099_s10, 4  ;;  %s5878_s11 = int_to_ptr.vmem [resolvable:$true] %s5877_s11 }
  0xb7   :  { %1037 = vmatpush2.bf16.msra.mxu0 %v6828_v34  ;;  %v6920_v34 = vld [vmem:[#allocation5 + $0x8] ss:$16 sps:$4 sm:$0xff]   ;;  %s8038_s23 = scalar_lea.vmem %s5878_s11, 256  ;;  %p8043_p5 = scmp.lt.s32.totalorder %s5878_s11, %s5878_s11 }
  0xb8   :  { %1080 = vmatpush2.bf16.msra.mxu1 %v6829_v35  ;;  %1038 = vmatprep.subr.bf16.mxu0 %v6830_v36  ;;  %v6923_v35 = vld [vmem:[#allocation5 + $0x208] ss:$16 sps:$4 sm:$0xff]   ;;  %v6928_v36 = vld [vmem:[#allocation5 + $0x1ec] ss:$16 sps:$4 sm:$0xff]   ;;  %p8039_p4 = scmp.ne.s32.totalorder %s5878_s11, %s8038_s23  ;;  %p8044_p6 = scmp.lt.s32.totalorder %s8038_s23, %s8038_s23 }
  0xb9   :  { %1081 = vmatprep.subr.bf16.mxu1 %v6832_v37  ;;  %v6931_v37 = vld [vmem:[#allocation5 + $0x3ec] ss:$16 sps:$4 sm:$0xff]  }
  0xba   :  { %p8045_p7 = por %p8044_p6, %p8043_p5 }
  0xbb   :  { %1039 = vmatpush2.bf16.msra.mxu0 %v6834_v38  ;;  %v6926_v38 = vld [vmem:[#allocation5 + $0x1e8] ss:$16 sps:$4 sm:$0xff]  }
  0xbc   :  { %1082 = vmatpush2.bf16.msra.mxu1 %v6835_v39  ;;  %1040 = vmatprep.subr.bf16.mxu0 %v6836_v40  ;;  %v6929_v39 = vld [vmem:[#allocation5 + $0x3e8] ss:$16 sps:$4 sm:$0xff]   ;;  %v6934_v40 = vld [vmem:[#allocation5 + $0x1cc] ss:$16 sps:$4 sm:$0xff]   ;;  %p8046_p8 = pnand %p8045_p7, %p8039_p4 }
  0xbd   :  { %1083 = vmatprep.subr.bf16.mxu1 %v6838_v41  ;;  %v6937_v41 = vld [vmem:[#allocation5 + $0x3cc] ss:$16 sps:$4 sm:$0xff]  }
  0xbf   :  { %1041 = vmatpush2.bf16.msra.mxu0 %v6840_v42  ;;  %v6932_v42 = vld [vmem:[#allocation5 + $0x1c8] ss:$16 sps:$4 sm:$0xff]  }
  0xc0   :  { %1084 = vmatpush2.bf16.msra.mxu1 %v6841_v43  ;;  %1042 = vmatprep.subr.bf16.mxu0 %v6842_v44  ;;  %v6935_v43 = vld [vmem:[#allocation5 + $0x3c8] ss:$16 sps:$4 sm:$0xff]   ;;  %v6940_v44 = vld [vmem:[#allocation5 + $0x1ac] ss:$16 sps:$4 sm:$0xff]  }
  0xc1   :  { %1085 = vmatprep.subr.bf16.mxu1 %v6844_v45  ;;  %v6943_v45 = vld [vmem:[#allocation5 + $0x3ac] ss:$16 sps:$4 sm:$0xff]  }
  0xc3   :  { %1043 = vmatpush2.bf16.msra.mxu0 %v6846_v46  ;;  %v6938_v46 = vld [vmem:[#allocation5 + $0x1a8] ss:$16 sps:$4 sm:$0xff]  }
  0xc4   :  { %1086 = vmatpush2.bf16.msra.mxu1 %v6847_v47  ;;  %1044 = vmatprep.subr.bf16.mxu0 %v6848_v48  ;;  %v6941_v47 = vld [vmem:[#allocation5 + $0x3a8] ss:$16 sps:$4 sm:$0xff]   ;;  %v6946_v48 = vld [vmem:[#allocation5 + $0x18c] ss:$16 sps:$4 sm:$0xff]  }
  0xc5   :  { %1087 = vmatprep.subr.bf16.mxu1 %v6850_v50  ;;  %v6944_v50 = vld [vmem:[#allocation5 + $0x188] ss:$16 sps:$4 sm:$0xff]  }
  0xc7   :  { %1045 = vmatpush2.bf16.msra.mxu0 %v6852_v52  ;;  %v6952_v52 = vld [vmem:[#allocation5 + $0x16c] ss:$16 sps:$4 sm:$0xff]  }
  0xc8   :  { %1088 = vmatpush2.bf16.msra.mxu1 %v6853_v53  ;;  %1046 = vmatprep.subr.bf16.mxu0 %v6854_v54  ;;  %v6955_v53 = vld [vmem:[#allocation5 + $0x36c] ss:$16 sps:$4 sm:$0xff]   ;;  %v6950_v54 = vld [vmem:[#allocation5 + $0x168] ss:$16 sps:$4 sm:$0xff]  }
  0xc9   :  { %1089 = vmatprep.subr.bf16.mxu1 %v6856_v55  ;;  %v6953_v55 = vld [vmem:[#allocation5 + $0x368] ss:$16 sps:$4 sm:$0xff]  }
  0xcb   :  { %1047 = vmatpush2.bf16.msra.mxu0 %v6858_v56  ;;  %v6958_v56 = vld [vmem:[#allocation5 + $0x14c] ss:$16 sps:$4 sm:$0xff]  }
  0xcc   :  { %1090 = vmatpush2.bf16.msra.mxu1 %v6859_v57  ;;  %1048 = vmatprep.subr.bf16.mxu0 %v6860_v58  ;;  %v6961_v57 = vld [vmem:[#allocation5 + $0x34c] ss:$16 sps:$4 sm:$0xff]   ;;  %v6956_v58 = vld [vmem:[#allocation5 + $0x148] ss:$16 sps:$4 sm:$0xff]  }
  0xcd   :  { %1091 = vmatprep.subr.bf16.mxu1 %v6862_v59  ;;  %v6959_v59 = vld [vmem:[#allocation5 + $0x348] ss:$16 sps:$4 sm:$0xff]  }
  0xcf   :  { %1049 = vmatpush2.bf16.msra.mxu0 %v6864_v60  ;;  %v6964_v60 = vld [vmem:[#allocation5 + $0x12c] ss:$16 sps:$4 sm:$0xff]  }
  0xd0   :  { %1092 = vmatpush2.bf16.msra.mxu1 %v6865_v61  ;;  %1050 = vmatprep.subr.bf16.mxu0 %v6866_v62  ;;  %v6967_v61 = vld [vmem:[#allocation5 + $0x32c] ss:$16 sps:$4 sm:$0xff]   ;;  %v6962_v62 = vld [vmem:[#allocation5 + $0x128] ss:$16 sps:$4 sm:$0xff]  }
  0xd1   :  { %1093 = vmatprep.subr.bf16.mxu1 %v6868_v63  ;;  %v6965_v63 = vld [vmem:[#allocation5 + $0x328] ss:$16 sps:$4 sm:$0xff]  }
  0xd3   :  { %1051 = vmatpush2.bf16.msra.mxu0 %v6870_v0  ;;  %v6970_v0 = vld [vmem:[#allocation5 + $0x10c] ss:$16 sps:$4 sm:$0xff]  }
  0xd4   :  { %1094 = vmatpush2.bf16.msra.mxu1 %v6871_v1  ;;  %1106 = vmatprep.subr.bf16.mxu0 %v6880_v2  ;;  %v6973_v1 = vld [vmem:[#allocation5 + $0x30c] ss:$16 sps:$4 sm:$0xff]   ;;  %v6968_v2 = vld [vmem:[#allocation5 + $0x108] ss:$16 sps:$4 sm:$0xff]  }
  0xd5   :  { %1149 = vmatprep.subr.bf16.mxu1 %v6883_v3  ;;  %v6971_v3 = vld [vmem:[#allocation5 + $0x308] ss:$16 sps:$4 sm:$0xff]  }
  0xd6   :  { %1053 = vmatmul.mubr.bf16.vlgmr.msra.gmra.mxu0 %v8231_v4 }
  0xd7   :  { %1096 = vmatmul.mubr.bf16.vlgmr.msra.gmra.mxu1 %v8233_v5  ;;  %1107 = vmatpush1.bf16.msra.mxu0 %v6878_v6  ;;  %v6976_v6 = vld [vmem:[#allocation7 + $0xe4] ss:$16 sps:$4 sm:$0xff]  }
  0xd8   :  { %1150 = vmatpush1.bf16.msra.mxu1 %v6881_v7  ;;  %1108 = vmatprep.subr.bf16.mxu0 %v6886_v8  ;;  %v6974_v7 = vld [vmem:[#allocation7 + $0xe0] ss:$16 sps:$4 sm:$0xff]   ;;  %v6979_v8 = vld [vmem:[#allocation7 + $0xc4] ss:$16 sps:$4 sm:$0xff]  }
  0xd9   :  { %1151 = vmatprep.subr.bf16.mxu1 %v6889_v9  ;;  %1138 = vmatprep.mubr.bf16.mxu0 %v6874_v49  ;;  %v6949_v49 = vld [vmem:[#allocation5 + $0x38c] ss:$16 sps:$4 sm:$0xff]   ;;  %v6977_v9 = vld [vmem:[#allocation7 + $0xc0] ss:$16 sps:$4 sm:$0xff]  }
  0xda   :  { %1181 = vmatprep.mubr.bf16.mxu1 %v6877_v51  ;;  %v6947_v51 = vld [vmem:[#allocation5 + $0x388] ss:$16 sps:$4 sm:$0xff]  }
  0xdb   :  { %1109 = vmatpush1.bf16.msra.mxu0 %v6884_v10  ;;  %v6982_v10 = vld [vmem:[#allocation7 + $0xa4] ss:$16 sps:$4 sm:$0xff]  }
  0xdc   :  { %1152 = vmatpush1.bf16.msra.mxu1 %v6887_v11  ;;  %1110 = vmatprep.subr.bf16.mxu0 %v6892_v12  ;;  %v6980_v11 = vld [vmem:[#allocation7 + $0xa0] ss:$16 sps:$4 sm:$0xff]   ;;  %v6985_v12 = vld [vmem:[#allocation7 + $0x84] ss:$16 sps:$4 sm:$0xff]  }
  0xdd   :  { %1153 = vmatprep.subr.bf16.mxu1 %v6895_v13  ;;  %v6983_v13 = vld [vmem:[#allocation7 + $0x80] ss:$16 sps:$4 sm:$0xff]  }
  0xdf   :  { %1111 = vmatpush1.bf16.msra.mxu0 %v6890_v14  ;;  %v6988_v14 = vld [vmem:[#allocation7 + $0x64] ss:$16 sps:$4 sm:$0xff]  }
  0xe0   :  { %1154 = vmatpush1.bf16.msra.mxu1 %v6893_v15  ;;  %1112 = vmatprep.subr.bf16.mxu0 %v6898_v16  ;;  %v6986_v15 = vld [vmem:[#allocation7 + $0x60] ss:$16 sps:$4 sm:$0xff]   ;;  %v7024_v16 = vld [vmem:[#allocation7 + $0x2e4] ss:$16 sps:$4 sm:$0xff]  }
  0xe1   :  { %1155 = vmatprep.subr.bf16.mxu1 %v6901_v17  ;;  %v6991_v17 = vld [vmem:[#allocation7 + $0x44] ss:$16 sps:$4 sm:$0xff]  }
  0xe3   :  { %1113 = vmatpush1.bf16.msra.mxu0 %v6896_v18  ;;  %v7028_v18 = vld [vmem:[#allocation7 + $0x2c0] ss:$16 sps:$4 sm:$0xff]  }
  0xe4   :  { %1156 = vmatpush1.bf16.msra.mxu1 %v6899_v19  ;;  %1114 = vmatprep.subr.bf16.mxu0 %v6904_v20  ;;  %v7030_v19 = vld [vmem:[#allocation7 + $0x2c4] ss:$16 sps:$4 sm:$0xff]  }
  0xe5   :  { %1157 = vmatprep.subr.bf16.mxu1 %v6907_v21  ;;  %v6994_v20 = vld [vmem:[#allocation7 + $0x24] ss:$16 sps:$4 sm:$0xff]   ;;  %v6992_v21 = vld [vmem:[#allocation7 + $0x20] ss:$16 sps:$4 sm:$0xff]  }
  0xe7   :  { %1115 = vmatpush1.bf16.msra.mxu0 %v6902_v22  ;;  %v7034_v22 = vld [vmem:[#allocation7 + $0x2a0] ss:$16 sps:$4 sm:$0xff]  }
  0xe8   :  { %1158 = vmatpush1.bf16.msra.mxu1 %v6905_v23  ;;  %1116 = vmatprep.subr.bf16.mxu0 %v6910_v24  ;;  %v7036_v23 = vld [vmem:[#allocation7 + $0x2a4] ss:$16 sps:$4 sm:$0xff]  }
  0xe9   :  { %1159 = vmatprep.subr.bf16.mxu1 %v6913_v25  ;;  %v6997_v24 = vld [vmem:[#allocation7 + $0x4] ss:$16 sps:$4 sm:$0xff]   ;;  %v6995_v25 = vld [vmem:[#allocation7] ss:$16 sps:$4 sm:$0xff]  }
  0xeb   :  { %1117 = vmatpush1.bf16.msra.mxu0 %v6908_v26  ;;  %v7040_v26 = vld [vmem:[#allocation7 + $0x280] ss:$16 sps:$4 sm:$0xff]  }
  0xec   :  { %1160 = vmatpush1.bf16.msra.mxu1 %v6911_v27  ;;  %1118 = vmatprep.subr.bf16.mxu0 %v6916_v28  ;;  %v7042_v27 = vld [vmem:[#allocation7 + $0x284] ss:$16 sps:$4 sm:$0xff]  }
  0xed   :  { %1161 = vmatprep.subr.bf16.mxu1 %v6919_v29  ;;  %v7000_v28 = vld [vmem:[#allocation7 + $0x1e4] ss:$16 sps:$4 sm:$0xff]   ;;  %v6998_v29 = vld [vmem:[#allocation7 + $0x1e0] ss:$16 sps:$4 sm:$0xff]  }
  0xef   :  { %1119 = vmatpush1.bf16.msra.mxu0 %v6914_v30  ;;  %v7046_v30 = vld [vmem:[#allocation7 + $0x260] ss:$16 sps:$4 sm:$0xff]  }
  0xf0   :  { %1162 = vmatpush1.bf16.msra.mxu1 %v6917_v31  ;;  %1120 = vmatprep.subr.bf16.mxu0 %v6922_v32  ;;  %v7048_v31 = vld [vmem:[#allocation7 + $0x264] ss:$16 sps:$4 sm:$0xff]  }
  0xf1   :  { %1163 = vmatprep.subr.bf16.mxu1 %v6925_v33  ;;  %v7003_v32 = vld [vmem:[#allocation7 + $0x1c4] ss:$16 sps:$4 sm:$0xff]   ;;  %v7001_v33 = vld [vmem:[#allocation7 + $0x1c0] ss:$16 sps:$4 sm:$0xff]  }
  0xf3   :  { %1121 = vmatpush1.bf16.msra.mxu0 %v6920_v34  ;;  %v7052_v34 = vld [vmem:[#allocation7 + $0x240] ss:$16 sps:$4 sm:$0xff]  }
  0xf4   :  { %1164 = vmatpush1.bf16.msra.mxu1 %v6923_v35  ;;  %1122 = vmatprep.subr.bf16.mxu0 %v6928_v36  ;;  %v7054_v35 = vld [vmem:[#allocation7 + $0x244] ss:$16 sps:$4 sm:$0xff]  }
  0xf5   :  { %1165 = vmatprep.subr.bf16.mxu1 %v6931_v37  ;;  %v7006_v36 = vld [vmem:[#allocation7 + $0x1a4] ss:$16 sps:$4 sm:$0xff]   ;;  %v7004_v37 = vld [vmem:[#allocation7 + $0x1a0] ss:$16 sps:$4 sm:$0xff]  }
  0xf7   :  { %1123 = vmatpush2.bf16.msra.mxu0 %v6926_v38  ;;  %v7058_v38 = vld [vmem:[#allocation7 + $0x220] ss:$16 sps:$4 sm:$0xff]  }
  0xf8   :  { %1166 = vmatpush2.bf16.msra.mxu1 %v6929_v39  ;;  %1124 = vmatprep.subr.bf16.mxu0 %v6934_v40  ;;  %v7060_v39 = vld [vmem:[#allocation7 + $0x224] ss:$16 sps:$4 sm:$0xff]  }
  0xf9   :  { %1167 = vmatprep.subr.bf16.mxu1 %v6937_v41  ;;  %v7009_v40 = vld [vmem:[#allocation7 + $0x184] ss:$16 sps:$4 sm:$0xff]   ;;  %v7007_v41 = vld [vmem:[#allocation7 + $0x180] ss:$16 sps:$4 sm:$0xff]  }
  0xfb   :  { %1125 = vmatpush2.bf16.msra.mxu0 %v6932_v42  ;;  %v7064_v42 = vld [vmem:[#allocation7 + $0x200] ss:$16 sps:$4 sm:$0xff]  }
  0xfc   :  { %1168 = vmatpush2.bf16.msra.mxu1 %v6935_v43  ;;  %1126 = vmatprep.subr.bf16.mxu0 %v6940_v44  ;;  %v7066_v43 = vld [vmem:[#allocation7 + $0x204] ss:$16 sps:$4 sm:$0xff]  }
  0xfd   :  { %1169 = vmatprep.subr.bf16.mxu1 %v6943_v45  ;;  %v7012_v44 = vld [vmem:[#allocation7 + $0x164] ss:$16 sps:$4 sm:$0xff]   ;;  %v7010_v45 = vld [vmem:[#allocation7 + $0x160] ss:$16 sps:$4 sm:$0xff]  }
  0xff   :  { %1127 = vmatpush2.bf16.msra.mxu0 %v6938_v46  ;;  %v7070_v46 = vld [vmem:[#allocation7 + $0x3e0] ss:$16 sps:$4 sm:$0xff]  }
 0x100   :  { %1170 = vmatpush2.bf16.msra.mxu1 %v6941_v47  ;;  %1128 = vmatprep.subr.bf16.mxu0 %v6946_v48  ;;  %v7072_v47 = vld [vmem:[#allocation7 + $0x3e4] ss:$16 sps:$4 sm:$0xff]  }
 0x101   :  { %1171 = vmatprep.subr.bf16.mxu1 %v6949_v49  ;;  %v7015_v48 = vld [vmem:[#allocation7 + $0x144] ss:$16 sps:$4 sm:$0xff]   ;;  %v7013_v49 = vld [vmem:[#allocation7 + $0x140] ss:$16 sps:$4 sm:$0xff]  }
 0x103   :  { %1129 = vmatpush2.bf16.msra.mxu0 %v6944_v50  ;;  %v7076_v50 = vld [vmem:[#allocation7 + $0x3c0] ss:$16 sps:$4 sm:$0xff]  }
 0x104   :  { %1172 = vmatpush2.bf16.msra.mxu1 %v6947_v51  ;;  %1130 = vmatprep.subr.bf16.mxu0 %v6952_v52  ;;  %v7078_v51 = vld [vmem:[#allocation7 + $0x3c4] ss:$16 sps:$4 sm:$0xff]  }
 0x105   :  { %1173 = vmatprep.subr.bf16.mxu1 %v6955_v53  ;;  %v7018_v52 = vld [vmem:[#allocation7 + $0x124] ss:$16 sps:$4 sm:$0xff]   ;;  %v7016_v53 = vld [vmem:[#allocation7 + $0x120] ss:$16 sps:$4 sm:$0xff]  }
 0x107   :  { %1131 = vmatpush2.bf16.msra.mxu0 %v6950_v54  ;;  %v7082_v54 = vld [vmem:[#allocation7 + $0x3a0] ss:$16 sps:$4 sm:$0xff]  }
 0x108   :  { %1174 = vmatpush2.bf16.msra.mxu1 %v6953_v55  ;;  %1132 = vmatprep.subr.bf16.mxu0 %v6958_v56  ;;  %v7084_v55 = vld [vmem:[#allocation7 + $0x3a4] ss:$16 sps:$4 sm:$0xff]  }
 0x109   :  { %1175 = vmatprep.subr.bf16.mxu1 %v6961_v57  ;;  %v7021_v56 = vld [vmem:[#allocation7 + $0x104] ss:$16 sps:$4 sm:$0xff]   ;;  %v7019_v57 = vld [vmem:[#allocation7 + $0x100] ss:$16 sps:$4 sm:$0xff]  }
 0x10b   :  { %1133 = vmatpush2.bf16.msra.mxu0 %v6956_v58  ;;  %v7088_v58 = vld [vmem:[#allocation7 + $0x380] ss:$16 sps:$4 sm:$0xff]  }
 0x10c   :  { %1176 = vmatpush2.bf16.msra.mxu1 %v6959_v59  ;;  %1134 = vmatprep.subr.bf16.mxu0 %v6964_v60  ;;  %v7090_v59 = vld [vmem:[#allocation7 + $0x384] ss:$16 sps:$4 sm:$0xff]   ;;  %v7027_v60 = vld [vmem:[#allocation7 + $0xec] ss:$16 sps:$4 sm:$0xff]  }
 0x10d   :  { %1177 = vmatprep.subr.bf16.mxu1 %v6967_v61  ;;  %v7094_v61 = vld [vmem:[#allocation7 + $0x360] ss:$16 sps:$4 sm:$0xff]  }
 0x10f   :  { %1135 = vmatpush2.bf16.msra.mxu0 %v6962_v62  ;;  %v7096_v62 = vld [vmem:[#allocation7 + $0x364] ss:$16 sps:$4 sm:$0xff]  }
 0x110   :  { %1178 = vmatpush2.bf16.msra.mxu1 %v6965_v63  ;;  %1136 = vmatprep.subr.bf16.mxu0 %v6970_v0  ;;  %v7102_v63 = vld [vmem:[#allocation7 + $0x344] ss:$16 sps:$4 sm:$0xff]   ;;  %v7100_v0 = vld [vmem:[#allocation7 + $0x340] ss:$16 sps:$4 sm:$0xff]  }
 0x111   :  { %1179 = vmatprep.subr.bf16.mxu1 %v6973_v1  ;;  %v7108_v1 = vld [vmem:[#allocation7 + $0x324] ss:$16 sps:$4 sm:$0xff]  }
 0x113   :  { %1137 = vmatpush2.bf16.msra.mxu0 %v6968_v2  ;;  %v7106_v2 = vld [vmem:[#allocation7 + $0x320] ss:$16 sps:$4 sm:$0xff]  }
 0x114   :  { %1180 = vmatpush2.bf16.msra.mxu1 %v6971_v3  ;;  %1995 = vmatprep.subr.bf16.mxu0 %v6976_v6  ;;  %v7114_v3 = vld [vmem:[#allocation7 + $0x304] ss:$16 sps:$4 sm:$0xff]   ;;  %v7112_v6 = vld [vmem:[#allocation7 + $0x300] ss:$16 sps:$4 sm:$0xff]  }
 0x115   :  { %2038 = vmatprep.subr.bf16.mxu1 %v7024_v16 }
 0x116   :  { %1139 = vmatmul.mubr.bf16.vlgmr.msra.gmra.mxu0 %v8231_v4  ;;  %v7022_v4 = vld [vmem:[#allocation7 + $0x2e0] ss:$16 sps:$4 sm:$0xff]  }
 0x117   :  { %1182 = vmatmul.mubr.bf16.vlgmr.msra.gmra.mxu1 %v8233_v5  ;;  %1996 = vmatpush1.bf16.msra.mxu0 %v6974_v7  ;;  %v6989_v5 = vld [vmem:[#allocation7 + $0x40] ss:$16 sps:$4 sm:$0xff]   ;;  %v7120_v7 = vld [vmem:[#allocation7 + $0x2ec] ss:$16 sps:$4 sm:$0xff]  }
 0x118   :  { %1997 = vmatprep.subr.bf16.mxu0 %v6979_v8  ;;  %2039 = vmatpush1.bf16.msra.mxu1 %v7022_v4  ;;  %v340_v8 = vlaneseq }
 0x119   :  { %2040 = vmatprep.subr.bf16.mxu1 %v7030_v19 }
 0x11b   :  { %1998 = vmatpush1.bf16.msra.mxu0 %v6977_v9  ;;  %v8239_v9 = vshrl.u32 %v340_v8, 7 }
 0x11c   :  { %1999 = vmatprep.subr.bf16.mxu0 %v6982_v10  ;;  %2041 = vmatpush1.bf16.msra.mxu1 %v7028_v18  ;;  %v8241_v10 = vld [vmem:[#allocation20] ss:$8 sm:$0xf] }
 0x11d   :  { %2042 = vmatprep.subr.bf16.mxu1 %v7036_v23 }
 0x11f   :  { %2000 = vmatpush1.bf16.msra.mxu0 %v6980_v11  ;;  %v8244_v11 = vsub.s32 1, %v8239_v9 }
 0x120   :  { %2001 = vmatprep.subr.bf16.mxu0 %v6985_v12  ;;  %2043 = vmatpush1.bf16.msra.mxu1 %v7034_v22  ;;  %v8247_v12 = vsub.s32 0, %v8239_v9 }
 0x121   :  { %2044 = vmatprep.subr.bf16.mxu1 %v7042_v27 }
 0x123   :  { %2002 = vmatpush1.bf16.msra.mxu0 %v6983_v13  ;;  %v347_v13 = vrot.slane %v8241_v10, %v8244_v11 }
 0x124   :  { %2003 = vmatprep.subr.bf16.mxu0 %v6988_v14  ;;  %2045 = vmatpush1.bf16.msra.mxu1 %v7040_v26  ;;  %v343_v14 = vrot.slane %v8241_v10, %v8247_v12 }
 0x125   :  { %2046 = vmatprep.subr.bf16.mxu1 %v7048_v31 }
 0x127   :  { %2004 = vmatpush1.bf16.msra.mxu0 %v6986_v15 }
 0x128   :  { %2005 = vmatprep.subr.bf16.mxu0 %v6991_v17  ;;  %2047 = vmatpush1.bf16.msra.mxu1 %v7046_v30 }
 0x129   :  { %2048 = vmatprep.subr.bf16.mxu1 %v7054_v35 }
 0x12b   :  { %2006 = vmatpush1.bf16.msra.mxu0 %v6989_v5 }
 0x12c   :  { %2007 = vmatprep.subr.bf16.mxu0 %v6994_v20  ;;  %2049 = vmatpush1.bf16.msra.mxu1 %v7052_v34  ;;  %v7033_v34 = vld [vmem:[#allocation7 + $0xcc] ss:$16 sps:$4 sm:$0xff]  }
 0x12d   :  { %2050 = vmatprep.subr.bf16.mxu1 %v7060_v39  ;;  %v7037_v39 = vld [vmem:[#allocation7 + $0xa8] ss:$16 sps:$4 sm:$0xff]  }
 0x12f   :  { %2008 = vmatpush1.bf16.msra.mxu0 %v6992_v21 }
 0x130   :  { %2009 = vmatprep.subr.bf16.mxu0 %v6997_v24  ;;  %2051 = vmatpush1.bf16.msra.mxu1 %v7058_v38  ;;  %v7039_v38 = vld [vmem:[#allocation7 + $0xac] ss:$16 sps:$4 sm:$0xff]  }
 0x131   :  { %2052 = vmatprep.subr.bf16.mxu1 %v7066_v43  ;;  %v7049_v43 = vld [vmem:[#allocation7 + $0x68] ss:$16 sps:$4 sm:$0xff]  }
 0x133   :  { %2010 = vmatpush1.bf16.msra.mxu0 %v6995_v25 }
 0x134   :  { %2011 = vmatprep.subr.bf16.mxu0 %v7000_v28  ;;  %2053 = vmatpush1.bf16.msra.mxu1 %v7064_v42  ;;  %v7051_v42 = vld [vmem:[#allocation7 + $0x6c] ss:$16 sps:$4 sm:$0xff]  }
 0x135   :  { %2054 = vmatprep.subr.bf16.mxu1 %v7072_v47  ;;  %v7061_v47 = vld [vmem:[#allocation7 + $0x28] ss:$16 sps:$4 sm:$0xff]  }
 0x137   :  { %2012 = vmatpush2.bf16.msra.mxu0 %v6998_v29 }
 0x138   :  { %2013 = vmatprep.subr.bf16.mxu0 %v7003_v32  ;;  %2055 = vmatpush2.bf16.msra.mxu1 %v7070_v46  ;;  %v7025_v32 = vld [vmem:[#allocation7 + $0xe8] ss:$16 sps:$4 sm:$0xff]   ;;  %v7063_v46 = vld [vmem:[#allocation7 + $0x2c] ss:$16 sps:$4 sm:$0xff]  }
 0x139   :  { %2056 = vmatprep.subr.bf16.mxu1 %v7078_v51  ;;  %v7073_v51 = vld [vmem:[#allocation7 + $0x1e8] ss:$16 sps:$4 sm:$0xff]  }
 0x13b   :  { %2014 = vmatpush2.bf16.msra.mxu0 %v7001_v33 }
 0x13c   :  { %2015 = vmatprep.subr.bf16.mxu0 %v7006_v36  ;;  %2057 = vmatpush2.bf16.msra.mxu1 %v7076_v50  ;;  %v7075_v50 = vld [vmem:[#allocation7 + $0x1ec] ss:$16 sps:$4 sm:$0xff]  }
 0x13d   :  { %2058 = vmatprep.subr.bf16.mxu1 %v7084_v55  ;;  %v7085_v55 = vld [vmem:[#allocation7 + $0x1a8] ss:$16 sps:$4 sm:$0xff]  }
 0x13f   :  { %2016 = vmatpush2.bf16.msra.mxu0 %v7004_v37  ;;  %v7031_v37 = vld [vmem:[#allocation7 + $0xc8] ss:$16 sps:$4 sm:$0xff]  }
 0x140   :  { %2017 = vmatprep.subr.bf16.mxu0 %v7009_v40  ;;  %2059 = vmatpush2.bf16.msra.mxu1 %v7082_v54  ;;  %v7045_v40 = vld [vmem:[#allocation7 + $0x8c] ss:$16 sps:$4 sm:$0xff]  }
 0x141   :  { %2060 = vmatprep.subr.bf16.mxu1 %v7090_v59  ;;  %v7087_v54 = vld [vmem:[#allocation7 + $0x1ac] ss:$16 sps:$4 sm:$0xff]   ;;  %v8257_v59 = vsub.s32 2, %v8239_v9 }
 0x143   :  { %2018 = vmatpush2.bf16.msra.mxu0 %v7007_v41  ;;  %v7043_v41 = vld [vmem:[#allocation7 + $0x88] ss:$16 sps:$4 sm:$0xff]  }
 0x144   :  { %2019 = vmatprep.subr.bf16.mxu0 %v7012_v44  ;;  %2061 = vmatpush2.bf16.msra.mxu1 %v7088_v58  ;;  %v7057_v44 = vld [vmem:[#allocation7 + $0x4c] ss:$16 sps:$4 sm:$0xff]  }
 0x145   :  { %2062 = vmatprep.subr.bf16.mxu1 %v7096_v62  ;;  %v7099_v58 = vld [vmem:[#allocation7 + $0x16c] ss:$16 sps:$4 sm:$0xff]  }
 0x146   :  { %v7105_v62 = vld [vmem:[#allocation7 + $0x14c] ss:$16 sps:$4 sm:$0xff]  }
 0x147   :  { %2020 = vmatpush2.bf16.msra.mxu0 %v7010_v45  ;;  %v7055_v45 = vld [vmem:[#allocation7 + $0x48] ss:$16 sps:$4 sm:$0xff]  }
 0x148   :  { %2021 = vmatprep.subr.bf16.mxu0 %v7015_v48  ;;  %2063 = vmatpush2.bf16.msra.mxu1 %v7094_v61  ;;  %v7069_v48 = vld [vmem:[#allocation7 + $0xc] ss:$16 sps:$4 sm:$0xff]   ;;  %v7097_v61 = vld [vmem:[#allocation7 + $0x168] ss:$16 sps:$4 sm:$0xff]  }
 0x149   :  { %2064 = vmatprep.subr.bf16.mxu1 %v7102_v63  ;;  %v351_v63 = vrot.slane %v8241_v10, %v8257_v59 }
 0x14b   :  { %2022 = vmatpush2.bf16.msra.mxu0 %v7013_v49  ;;  %v7067_v49 = vld [vmem:[#allocation7 + $0x8] ss:$16 sps:$4 sm:$0xff]  }
 0x14c   :  { %2023 = vmatprep.subr.bf16.mxu0 %v7018_v52  ;;  %2065 = vmatpush2.bf16.msra.mxu1 %v7100_v0  ;;  %v7081_v52 = vld [vmem:[#allocation7 + $0x1cc] ss:$16 sps:$4 sm:$0xff]  }
 0x14d   :  { %2066 = vmatprep.subr.bf16.mxu1 %v7108_v1  ;;  %v7103_v1 = vld [vmem:[#allocation7 + $0x148] ss:$16 sps:$4 sm:$0xff]  }
 0x14f   :  { %2024 = vmatpush2.bf16.msra.mxu0 %v7016_v53  ;;  %v7079_v53 = vld [vmem:[#allocation7 + $0x1c8] ss:$16 sps:$4 sm:$0xff]  }
 0x150   :  { %2025 = vmatprep.subr.bf16.mxu0 %v7021_v56  ;;  %2067 = vmatpush2.bf16.msra.mxu1 %v7106_v2  ;;  %v7093_v56 = vld [vmem:[#allocation7 + $0x18c] ss:$16 sps:$4 sm:$0xff]  }
 0x151   :  { %2068 = vmatprep.subr.bf16.mxu1 %v7114_v3 }
 0x153   :  { %2026 = vmatpush2.bf16.msra.mxu0 %v7019_v57  ;;  %v7091_v57 = vld [vmem:[#allocation7 + $0x188] ss:$16 sps:$4 sm:$0xff]  }
 0x154   :  { %2081 = vmatprep.subr.bf16.mxu0 %v7027_v60  ;;  %2069 = vmatpush2.bf16.msra.mxu1 %v7112_v6  ;;  %v8260_v60 = vsub.s32 3, %v8239_v9  ;;  %v7111_v6 = vld [vmem:[#allocation7 + $0x12c] ss:$16 sps:$4 sm:$0xff]  }
 0x155   :  { %2124 = vmatprep.subr.bf16.mxu1 %v7120_v7 }
 0x156   :  { %v355_v0 = vrot.slane %v8241_v10, %v8260_v60 }
 0x196   :  { %v1054_v15 = vpop.f32.mrf.mxu0 }
 0x197   :  { %v1097_v16 = vpop.f32.mrf.mxu1  ;;  %v1055_v18 = vadd.f32 %v1054_v15, %v343_v14 }
 0x198   :  { %v1056_v17 = vpop.f32.mrf.mxu0 }
 0x199   :  { %v1099_v4 = vpop.f32.mrf.mxu1  ;;  %v1057_v5 = vadd.f32 %v1056_v17, %v347_v13  ;;  %v1098_v26 = vadd.f32 %v1097_v16, %v1055_v18 }
 0x19a   :  { %v1058_v19 = vpop.f32.mrf.mxu0 }
 0x19b   :  { %v1101_v20 = vpop.f32.mrf.mxu1  ;;  %v1059_v21 = vadd.f32 %v1058_v19, %v343_v14  ;;  %v1100_v22 = vadd.f32 %v1099_v4, %v1057_v5  ;;  %v1192_v33 = vmax.f32 %v1098_v26, 0.0  ;;  %v7109_v14 = vld [vmem:[#allocation7 + $0x128] ss:$16 sps:$4 sm:$0xff]   ;;  %v7117_v5 = vld [vmem:[#allocation7 + $0x10c] ss:$16 sps:$4 sm:$0xff]  }
 0x19c   :  { %v1060_v23 = vpop.f32.mrf.mxu0 }
 0x19d   :  { %v1102_v24 = vadd.f32 %v1101_v20, %v1059_v21  ;;  %v1061_v25 = vadd.f32 %v1060_v23, %v347_v13  ;;  %v1103_v27 = vpop.f32.mrf.mxu1  ;;  %v1193_v29 = vmax.f32 %v1100_v22, 0.0  ;;  %v7115_v21 = vld [vmem:[#allocation7 + $0x108] ss:$16 sps:$4 sm:$0xff]  }
 0x19f   :  { %v1104_v28 = vadd.f32 %v1103_v27, %v1061_v25  ;;  %v1196_v30 = vmax.f32 %v1102_v24, 0.0 }
 0x1a1   :  { %v1197_v31 = vmax.f32 %v1104_v28, 0.0  ;;  %v8253_v36 = vpack.c.bf16 %v1196_v30, %v1192_v33  ;;  %v7118_v28 = vld [vmem:[#allocation7 + $0x2e8] ss:$16 sps:$4 sm:$0xff]   ;;  %v7126_v33 = vld [vmem:[#allocation7 + $0x2ac] ss:$16 sps:$4 sm:$0xff]  }
 0x1a3   :  { %v1201_v35 = vpack.c.bf16 %v1197_v31, %v1193_v29  ;;  %v7123_v29 = vld [vmem:[#allocation7 + $0x2cc] ss:$16 sps:$4 sm:$0xff]  }
 0x1a5   :  { %2027 = vmatprep.mubr.bf16.mxu0 %v1201_v35 }
 0x1a6   :  { %2028 = vmatmul.mubr.bf16.vlgmr.msra.gmra.mxu0 %v8253_v36 }
 0x1a7   :  { %2082 = vmatpush1.bf16.msra.mxu0 %v7025_v32  ;;  %2113 = vmatprep.mubr.bf16.mxu0 %v1201_v35  ;;  %v7121_v32 = vld [vmem:[#allocation7 + $0x2c8] ss:$16 sps:$4 sm:$0xff]   ;;  %v7129_v35 = vld [vmem:[#allocation7 + $0x28c] ss:$16 sps:$4 sm:$0xff]  }
 0x1a8   :  { %2083 = vmatprep.subr.bf16.mxu0 %v7033_v34  ;;  %v7124_v34 = vld [vmem:[#allocation7 + $0x2a8] ss:$16 sps:$4 sm:$0xff]  }
 0x1ab   :  { %2084 = vmatpush1.bf16.msra.mxu0 %v7031_v37  ;;  %v7166_v37 = vld [vmem:[#allocation8 + $0xe0] ss:$16 sps:$4 sm:$0xff]  }
 0x1ac   :  { %2085 = vmatprep.subr.bf16.mxu0 %v7039_v38  ;;  %v7168_v38 = vld [vmem:[#allocation8 + $0xe4] ss:$16 sps:$4 sm:$0xff]  }
 0x1af   :  { %2086 = vmatpush1.bf16.msra.mxu0 %v7037_v39  ;;  %v7171_v39 = vld [vmem:[#allocation8 + $0xc4] ss:$16 sps:$4 sm:$0xff]  }
 0x1b0   :  { %2087 = vmatprep.subr.bf16.mxu0 %v7045_v40  ;;  %v7127_v40 = vld [vmem:[#allocation7 + $0x288] ss:$16 sps:$4 sm:$0xff]  }
 0x1b3   :  { %2088 = vmatpush1.bf16.msra.mxu0 %v7043_v41  ;;  %v7132_v41 = vld [vmem:[#allocation7 + $0x26c] ss:$16 sps:$4 sm:$0xff]  }
 0x1b4   :  { %2089 = vmatprep.subr.bf16.mxu0 %v7051_v42  ;;  %v7174_v42 = vld [vmem:[#allocation8 + $0xa4] ss:$16 sps:$4 sm:$0xff]  }
 0x1b7   :  { %2090 = vmatpush1.bf16.msra.mxu0 %v7049_v43  ;;  %v7130_v43 = vld [vmem:[#allocation7 + $0x268] ss:$16 sps:$4 sm:$0xff]  }
 0x1b8   :  { %2091 = vmatprep.subr.bf16.mxu0 %v7057_v44  ;;  %v7135_v44 = vld [vmem:[#allocation7 + $0x24c] ss:$16 sps:$4 sm:$0xff]  }
 0x1bb   :  { %2092 = vmatpush1.bf16.msra.mxu0 %v7055_v45  ;;  %v7172_v45 = vld [vmem:[#allocation8 + $0xa0] ss:$16 sps:$4 sm:$0xff]  }
 0x1bc   :  { %2093 = vmatprep.subr.bf16.mxu0 %v7063_v46  ;;  %v7177_v46 = vld [vmem:[#allocation8 + $0x84] ss:$16 sps:$4 sm:$0xff]  }
 0x1bf   :  { %2094 = vmatpush1.bf16.msra.mxu0 %v7061_v47  ;;  %v7133_v47 = vld [vmem:[#allocation7 + $0x248] ss:$16 sps:$4 sm:$0xff]  }
 0x1c0   :  { %2095 = vmatprep.subr.bf16.mxu0 %v7069_v48  ;;  %v7138_v48 = vld [vmem:[#allocation7 + $0x22c] ss:$16 sps:$4 sm:$0xff]  }
 0x1c3   :  { %2096 = vmatpush1.bf16.msra.mxu0 %v7067_v49  ;;  %v7175_v49 = vld [vmem:[#allocation8 + $0x80] ss:$16 sps:$4 sm:$0xff]  }
 0x1c4   :  { %2097 = vmatprep.subr.bf16.mxu0 %v7075_v50  ;;  %v7180_v50 = vld [vmem:[#allocation8 + $0x64] ss:$16 sps:$4 sm:$0xff]  }
 0x1c7   :  { %2098 = vmatpush2.bf16.msra.mxu0 %v7073_v51  ;;  %v7136_v51 = vld [vmem:[#allocation7 + $0x228] ss:$16 sps:$4 sm:$0xff]  }
 0x1c8   :  { %2099 = vmatprep.subr.bf16.mxu0 %v7081_v52  ;;  %v7141_v52 = vld [vmem:[#allocation7 + $0x20c] ss:$16 sps:$4 sm:$0xff]  }
 0x1cb   :  { %2100 = vmatpush2.bf16.msra.mxu0 %v7079_v53  ;;  %v7178_v53 = vld [vmem:[#allocation8 + $0x60] ss:$16 sps:$4 sm:$0xff]  }
 0x1cc   :  { %2101 = vmatprep.subr.bf16.mxu0 %v7087_v54  ;;  %v7183_v54 = vld [vmem:[#allocation8 + $0x44] ss:$16 sps:$4 sm:$0xff]  }
 0x1cf   :  { %2102 = vmatpush2.bf16.msra.mxu0 %v7085_v55  ;;  %v7139_v55 = vld [vmem:[#allocation7 + $0x208] ss:$16 sps:$4 sm:$0xff]  }
 0x1d0   :  { %2103 = vmatprep.subr.bf16.mxu0 %v7093_v56  ;;  %v7144_v56 = vld [vmem:[#allocation7 + $0x3ec] ss:$16 sps:$4 sm:$0xff]  }
 0x1d3   :  { %2104 = vmatpush2.bf16.msra.mxu0 %v7091_v57  ;;  %v7181_v57 = vld [vmem:[#allocation8 + $0x40] ss:$16 sps:$4 sm:$0xff]  }
 0x1d4   :  { %2105 = vmatprep.subr.bf16.mxu0 %v7099_v58  ;;  %v7186_v58 = vld [vmem:[#allocation8 + $0x24] ss:$16 sps:$4 sm:$0xff]  }
 0x1d6   :  { %v1140_v2 = vpop.f32.mrf.mxu0 }
 0x1d7   :  { %v1183_v3 = vpop.f32.mrf.mxu1  ;;  %v1141_v7 = vadd.f32 %v1140_v2, %v351_v63  ;;  %2106 = vmatpush2.bf16.msra.mxu0 %v7097_v61  ;;  %v7142_v61 = vld [vmem:[#allocation7 + $0x3e8] ss:$16 sps:$4 sm:$0xff]   ;;  %v7150_v2 = vld [vmem:[#allocation7 + $0x3ac] ss:$16 sps:$4 sm:$0xff]  }
 0x1d8   :  { %v1142_v8 = vpop.f32.mrf.mxu0  ;;  %2107 = vmatprep.subr.bf16.mxu0 %v7105_v62  ;;  %v7147_v62 = vld [vmem:[#allocation7 + $0x3cc] ss:$16 sps:$4 sm:$0xff]  }
 0x1d9   :  { %v1185_v13 = vpop.f32.mrf.mxu1  ;;  %v1143_v9 = vadd.f32 %v1142_v8, %v355_v0  ;;  %v1184_v17 = vadd.f32 %v1183_v3, %v1141_v7  ;;  %v7187_v3 = vld [vmem:[#allocation8] ss:$16 sps:$4 sm:$0xff]   ;;  %v7148_v7 = vld [vmem:[#allocation7 + $0x3a8] ss:$16 sps:$4 sm:$0xff]   ;;  %v7153_v8 = vld [vmem:[#allocation7 + $0x38c] ss:$16 sps:$4 sm:$0xff]  }
 0x1da   :  { %v1144_v15 = vpop.f32.mrf.mxu0 }
 0x1db   :  { %v1187_v16 = vpop.f32.mrf.mxu1  ;;  %v1145_v4 = vadd.f32 %v1144_v15, %v351_v63  ;;  %2108 = vmatpush2.bf16.msra.mxu0 %v7103_v1  ;;  %v1186_v10 = vadd.f32 %v1185_v13, %v1143_v9  ;;  %v1194_v23 = vmax.f32 %v1184_v17, 0.0  ;;  %v7184_v63 = vld [vmem:[#allocation8 + $0x20] ss:$16 sps:$4 sm:$0xff]   ;;  %v7145_v1 = vld [vmem:[#allocation7 + $0x3c8] ss:$16 sps:$4 sm:$0xff]  }
 0x1dc   :  { %v1146_v18 = vpop.f32.mrf.mxu0  ;;  %2109 = vmatprep.subr.bf16.mxu0 %v7111_v6  ;;  %v7192_v6 = vld [vmem:[#allocation8 + $0x1e4] ss:$16 sps:$4 sm:$0xff]   ;;  %v7190_v13 = vld [vmem:[#allocation8 + $0x1e0] ss:$16 sps:$4 sm:$0xff]   ;;  %v7156_v15 = vld [vmem:[#allocation7 + $0x36c] ss:$16 sps:$4 sm:$0xff]  }
 0x1dd   :  { %v1188_v19 = vadd.f32 %v1187_v16, %v1145_v4  ;;  %v1147_v20 = vadd.f32 %v1146_v18, %v355_v0  ;;  %v1189_v22 = vpop.f32.mrf.mxu1  ;;  %v1195_v26 = vmax.f32 %v1186_v10, 0.0  ;;  %v7189_v0 = vld [vmem:[#allocation8 + $0x4] ss:$16 sps:$4 sm:$0xff]   ;;  %v7193_v16 = vld [vmem:[#allocation8 + $0x1c0] ss:$16 sps:$4 sm:$0xff]  }
 0x1de   :  { %v7195_v9 = vld [vmem:[#allocation8 + $0x1c4] ss:$16 sps:$4 sm:$0xff]   ;;  %v7154_v4 = vld [vmem:[#allocation7 + $0x368] ss:$16 sps:$4 sm:$0xff]   ;;  %v7196_v18 = vld [vmem:[#allocation8 + $0x1a0] ss:$16 sps:$4 sm:$0xff]  }
 0x1df   :  { %v1198_v24 = vmax.f32 %v1188_v19, 0.0  ;;  %v1190_v25 = vadd.f32 %v1189_v22, %v1147_v20  ;;  %2110 = vmatpush2.bf16.msra.mxu0 %v7109_v14  ;;  %v7151_v14 = vld [vmem:[#allocation7 + $0x388] ss:$16 sps:$4 sm:$0xff]   ;;  %v7198_v17 = vld [vmem:[#allocation8 + $0x1a4] ss:$16 sps:$4 sm:$0xff]  }
 0x1e0   :  { %2111 = vmatprep.subr.bf16.mxu0 %v7117_v5  ;;  %v7159_v5 = vld [vmem:[#allocation7 + $0x34c] ss:$16 sps:$4 sm:$0xff]   ;;  %v7201_v10 = vld [vmem:[#allocation8 + $0x184] ss:$16 sps:$4 sm:$0xff]   ;;  %v7157_v19 = vld [vmem:[#allocation7 + $0x348] ss:$16 sps:$4 sm:$0xff]  }
 0x1e1   :  { %v1199_v27 = vmax.f32 %v1190_v25, 0.0  ;;  %v8266_v31 = vpack.c.bf16 %v1198_v24, %v1194_v23  ;;  %v7162_v20 = vld [vmem:[#allocation7 + $0x32c] ss:$16 sps:$4 sm:$0xff]   ;;  %v7204_v22 = vld [vmem:[#allocation8 + $0x164] ss:$16 sps:$4 sm:$0xff]  }
 0x1e2   :  { %v7160_v23 = vld [vmem:[#allocation7 + $0x328] ss:$16 sps:$4 sm:$0xff]   ;;  %v7165_v24 = vld [vmem:[#allocation7 + $0x30c] ss:$16 sps:$4 sm:$0xff]   ;;  %v7202_v25 = vld [vmem:[#allocation8 + $0x160] ss:$16 sps:$4 sm:$0xff]  }
 0x1e3   :  { %v1203_v30 = vpack.c.bf16 %v1199_v27, %v1195_v26  ;;  %2112 = vmatpush2.bf16.msra.mxu0 %v7115_v21  ;;  %v7199_v21 = vld [vmem:[#allocation8 + $0x180] ss:$16 sps:$4 sm:$0xff]   ;;  %v7163_v26 = vld [vmem:[#allocation7 + $0x308] ss:$16 sps:$4 sm:$0xff]   ;;  %v7207_v27 = vld [vmem:[#allocation8 + $0x144] ss:$16 sps:$4 sm:$0xff]  }
 0x1e4   :  { %2970 = vmatprep.subr.bf16.mxu0 %v7168_v38  ;;  %v7220_v38 = vld [vmem:[#allocation8 + $0x2c0] ss:$16 sps:$4 sm:$0xff]  }
 0x1e5   :  { %2070 = vmatprep.mubr.bf16.mxu1 %v1203_v30 }
 0x1e6   :  { %2114 = vmatmul.mubr.bf16.vlgmr.msra.gmra.mxu0 %v8253_v36  ;;  %2071 = vmatmul.mubr.bf16.vlgmr.msra.gmra.mxu1 %v8266_v31  ;;  %v7169_v36 = vld [vmem:[#allocation8 + $0xc0] ss:$16 sps:$4 sm:$0xff]  }
 0x1e7   :  { %2125 = vmatpush1.bf16.msra.mxu1 %v7118_v28  ;;  %2156 = vmatprep.mubr.bf16.mxu1 %v1203_v30  ;;  %v7205_v28 = vld [vmem:[#allocation8 + $0x140] ss:$16 sps:$4 sm:$0xff]  }
 0x1e8   :  { %2126 = vmatprep.subr.bf16.mxu1 %v7123_v29  ;;  %2971 = vmatpush1.bf16.msra.mxu0 %v7166_v37  ;;  %v7210_v29 = vld [vmem:[#allocation8 + $0x124] ss:$16 sps:$4 sm:$0xff]   ;;  %v7208_v30 = vld [vmem:[#allocation8 + $0x120] ss:$16 sps:$4 sm:$0xff]   ;;  %v7219_v37 = vld [vmem:[#allocation8 + $0xec] ss:$16 sps:$4 sm:$0xff]  }
 0x1e9   :  { %2972 = vmatprep.subr.bf16.mxu0 %v7171_v39  ;;  %v7226_v39 = vld [vmem:[#allocation8 + $0x2a0] ss:$16 sps:$4 sm:$0xff]  }
 0x1eb   :  { %2127 = vmatpush1.bf16.msra.mxu1 %v7121_v32  ;;  %v7213_v32 = vld [vmem:[#allocation8 + $0x104] ss:$16 sps:$4 sm:$0xff]  }
 0x1ec   :  { %2128 = vmatprep.subr.bf16.mxu1 %v7126_v33  ;;  %2973 = vmatpush1.bf16.msra.mxu0 %v7169_v36  ;;  %v7211_v33 = vld [vmem:[#allocation8 + $0x100] ss:$16 sps:$4 sm:$0xff]   ;;  %v7234_v36 = vld [vmem:[#allocation8 + $0x284] ss:$16 sps:$4 sm:$0xff]  }
 0x1ed   :  { %2974 = vmatprep.subr.bf16.mxu0 %v7174_v42  ;;  %v7238_v42 = vld [vmem:[#allocation8 + $0x260] ss:$16 sps:$4 sm:$0xff]  }
 0x1ef   :  { %2129 = vmatpush1.bf16.msra.mxu1 %v7124_v34  ;;  %v7214_v34 = vld [vmem:[#allocation8 + $0x2e0] ss:$16 sps:$4 sm:$0xff]  }
 0x1f0   :  { %2130 = vmatprep.subr.bf16.mxu1 %v7129_v35  ;;  %2975 = vmatpush1.bf16.msra.mxu0 %v7172_v45  ;;  %v7216_v35 = vld [vmem:[#allocation8 + $0x2e4] ss:$16 sps:$4 sm:$0xff]  }
 0x1f1   :  { %2976 = vmatprep.subr.bf16.mxu0 %v7177_v46  ;;  %v7246_v45 = vld [vmem:[#allocation8 + $0x244] ss:$16 sps:$4 sm:$0xff]   ;;  %v7250_v46 = vld [vmem:[#allocation8 + $0x220] ss:$16 sps:$4 sm:$0xff]  }
 0x1f3   :  { %2131 = vmatpush1.bf16.msra.mxu1 %v7127_v40  ;;  %v7228_v40 = vld [vmem:[#allocation8 + $0x2a4] ss:$16 sps:$4 sm:$0xff]  }
 0x1f4   :  { %2132 = vmatprep.subr.bf16.mxu1 %v7132_v41  ;;  %2977 = vmatpush1.bf16.msra.mxu0 %v7175_v49  ;;  %v7232_v41 = vld [vmem:[#allocation8 + $0x280] ss:$16 sps:$4 sm:$0xff]   ;;  %v7258_v49 = vld [vmem:[#allocation8 + $0x204] ss:$16 sps:$4 sm:$0xff]  }
 0x1f5   :  { %2978 = vmatprep.subr.bf16.mxu0 %v7180_v50  ;;  %v7262_v50 = vld [vmem:[#allocation8 + $0x3e0] ss:$16 sps:$4 sm:$0xff]  }
 0x1f7   :  { %2133 = vmatpush1.bf16.msra.mxu1 %v7130_v43  ;;  %v7240_v43 = vld [vmem:[#allocation8 + $0x264] ss:$16 sps:$4 sm:$0xff]  }
 0x1f8   :  { %2134 = vmatprep.subr.bf16.mxu1 %v7135_v44  ;;  %2979 = vmatpush1.bf16.msra.mxu0 %v7178_v53  ;;  %v7244_v44 = vld [vmem:[#allocation8 + $0x240] ss:$16 sps:$4 sm:$0xff]   ;;  %v7270_v53 = vld [vmem:[#allocation8 + $0x3c4] ss:$16 sps:$4 sm:$0xff]  }
 0x1f9   :  { %2980 = vmatprep.subr.bf16.mxu0 %v7183_v54  ;;  %v7274_v54 = vld [vmem:[#allocation8 + $0x3a0] ss:$16 sps:$4 sm:$0xff]  }
 0x1fb   :  { %2135 = vmatpush1.bf16.msra.mxu1 %v7133_v47  ;;  %v7252_v47 = vld [vmem:[#allocation8 + $0x224] ss:$16 sps:$4 sm:$0xff]  }
 0x1fc   :  { %2136 = vmatprep.subr.bf16.mxu1 %v7138_v48  ;;  %2981 = vmatpush1.bf16.msra.mxu0 %v7181_v57  ;;  %v7256_v48 = vld [vmem:[#allocation8 + $0x200] ss:$16 sps:$4 sm:$0xff]   ;;  %v7282_v57 = vld [vmem:[#allocation8 + $0x384] ss:$16 sps:$4 sm:$0xff]  }
 0x1fd   :  { %2982 = vmatprep.subr.bf16.mxu0 %v7186_v58  ;;  %v7286_v58 = vld [vmem:[#allocation8 + $0x360] ss:$16 sps:$4 sm:$0xff]  }
 0x1ff   :  { %2137 = vmatpush1.bf16.msra.mxu1 %v7136_v51  ;;  %v7264_v51 = vld [vmem:[#allocation8 + $0x3e4] ss:$16 sps:$4 sm:$0xff]  }
 0x200   :  { %2138 = vmatprep.subr.bf16.mxu1 %v7141_v52  ;;  %2983 = vmatpush1.bf16.msra.mxu0 %v7184_v63  ;;  %v7268_v52 = vld [vmem:[#allocation8 + $0x3c0] ss:$16 sps:$4 sm:$0xff]  }
 0x201   :  { %2984 = vmatprep.subr.bf16.mxu0 %v7189_v0  ;;  %v7292_v63 = vld [vmem:[#allocation8 + $0x340] ss:$16 sps:$4 sm:$0xff]   ;;  %v7300_v0 = vld [vmem:[#allocation8 + $0x324] ss:$16 sps:$4 sm:$0xff]  }
 0x203   :  { %2139 = vmatpush1.bf16.msra.mxu1 %v7139_v55  ;;  %v7276_v55 = vld [vmem:[#allocation8 + $0x3a4] ss:$16 sps:$4 sm:$0xff]  }
 0x204   :  { %2140 = vmatprep.subr.bf16.mxu1 %v7144_v56  ;;  %2985 = vmatpush1.bf16.msra.mxu0 %v7187_v3  ;;  %v7280_v56 = vld [vmem:[#allocation8 + $0x380] ss:$16 sps:$4 sm:$0xff]  }
 0x205   :  { %2986 = vmatprep.subr.bf16.mxu0 %v7192_v6  ;;  %v7304_v3 = vld [vmem:[#allocation8 + $0x300] ss:$16 sps:$4 sm:$0xff]   ;;  %v7312_v6 = vld [vmem:[#allocation8 + $0x2ec] ss:$16 sps:$4 sm:$0xff]  }
 0x207   :  { %2141 = vmatpush2.bf16.msra.mxu1 %v7142_v61  ;;  %v7288_v61 = vld [vmem:[#allocation8 + $0x364] ss:$16 sps:$4 sm:$0xff]  }
 0x208   :  { %2142 = vmatprep.subr.bf16.mxu1 %v7147_v62  ;;  %2987 = vmatpush2.bf16.msra.mxu0 %v7190_v13  ;;  %v7294_v62 = vld [vmem:[#allocation8 + $0x344] ss:$16 sps:$4 sm:$0xff]   ;;  %v8271_v13 = vld [vmem:[#allocation20 + $0x1] ss:$8 sm:$0xf] }
 0x209   :  { %2988 = vmatprep.subr.bf16.mxu0 %v7195_v9 }
 0x20b   :  { %2143 = vmatpush2.bf16.msra.mxu1 %v7145_v1  ;;  %v7298_v1 = vld [vmem:[#allocation8 + $0x320] ss:$16 sps:$4 sm:$0xff]  }
 0x20c   :  { %2144 = vmatprep.subr.bf16.mxu1 %v7150_v2  ;;  %2989 = vmatpush2.bf16.msra.mxu0 %v7193_v16  ;;  %v7306_v2 = vld [vmem:[#allocation8 + $0x304] ss:$16 sps:$4 sm:$0xff]  }
 0x20d   :  { %2990 = vmatprep.subr.bf16.mxu0 %v7198_v17 }
 0x20f   :  { %2145 = vmatpush2.bf16.msra.mxu1 %v7148_v7 }
 0x210   :  { %2146 = vmatprep.subr.bf16.mxu1 %v7153_v8  ;;  %2991 = vmatpush2.bf16.msra.mxu0 %v7196_v18 }
 0x211   :  { %2992 = vmatprep.subr.bf16.mxu0 %v7201_v10 }
 0x213   :  { %2147 = vmatpush2.bf16.msra.mxu1 %v7151_v14  ;;  %v1342_v14 = vrot.slane %v8271_v13, %v8244_v11 }
 0x214   :  { %2148 = vmatprep.subr.bf16.mxu1 %v7156_v15  ;;  %2993 = vmatpush2.bf16.msra.mxu0 %v7199_v21  ;;  %v1338_v15 = vrot.slane %v8271_v13, %v8247_v12 }
 0x215   :  { %2994 = vmatprep.subr.bf16.mxu0 %v7204_v22 }
 0x217   :  { %2149 = vmatpush2.bf16.msra.mxu1 %v7154_v4 }
 0x218   :  { %2150 = vmatprep.subr.bf16.mxu1 %v7159_v5  ;;  %2995 = vmatpush2.bf16.msra.mxu0 %v7202_v25 }
 0x219   :  { %2996 = vmatprep.subr.bf16.mxu0 %v7207_v27 }
 0x21b   :  { %2151 = vmatpush2.bf16.msra.mxu1 %v7157_v19 }
 0x21c   :  { %2152 = vmatprep.subr.bf16.mxu1 %v7162_v20  ;;  %2997 = vmatpush2.bf16.msra.mxu0 %v7205_v28 }
 0x21d   :  { %2998 = vmatprep.subr.bf16.mxu0 %v7210_v29 }
 0x21f   :  { %2153 = vmatpush2.bf16.msra.mxu1 %v7160_v23 }
 0x220   :  { %2154 = vmatprep.subr.bf16.mxu1 %v7165_v24  ;;  %2999 = vmatpush2.bf16.msra.mxu0 %v7208_v30 }
 0x221   :  { %3000 = vmatprep.subr.bf16.mxu0 %v7213_v32  ;;  %v7217_v32 = vld [vmem:[#allocation8 + $0xe8] ss:$16 sps:$4 sm:$0xff]  }
 0x223   :  { %2155 = vmatpush2.bf16.msra.mxu1 %v7163_v26 }
 0x224   :  { %3001 = vmatpush2.bf16.msra.mxu0 %v7211_v33  ;;  %3013 = vmatprep.subr.bf16.mxu1 %v7216_v35  ;;  %v7223_v35 = vld [vmem:[#allocation8 + $0xc8] ss:$16 sps:$4 sm:$0xff]  }
 0x225   :  { %3056 = vmatprep.subr.bf16.mxu0 %v7219_v37  ;;  %v7231_v37 = vld [vmem:[#allocation8 + $0xac] ss:$16 sps:$4 sm:$0xff]  }
 0x226   :  { %2157 = vmatmul.mubr.bf16.vlgmr.msra.gmra.mxu1 %v8266_v31  ;;  %v7222_v31 = vld [vmem:[#allocation8 + $0x2c4] ss:$16 sps:$4 sm:$0xff]  }
 0x227   :  { %3014 = vmatpush1.bf16.msra.mxu1 %v7214_v34  ;;  %v7225_v34 = vld [vmem:[#allocation8 + $0xcc] ss:$16 sps:$4 sm:$0xff]  }
 0x228   :  { %3015 = vmatprep.subr.bf16.mxu1 %v7222_v31  ;;  %v7237_v31 = vld [vmem:[#allocation8 + $0x8c] ss:$16 sps:$4 sm:$0xff]  }
 0x22b   :  { %3016 = vmatpush1.bf16.msra.mxu1 %v7220_v38  ;;  %v7229_v38 = vld [vmem:[#allocation8 + $0xa8] ss:$16 sps:$4 sm:$0xff]  }
 0x22c   :  { %3017 = vmatprep.subr.bf16.mxu1 %v7228_v40  ;;  %v7243_v40 = vld [vmem:[#allocation8 + $0x6c] ss:$16 sps:$4 sm:$0xff]  }
 0x22f   :  { %3018 = vmatpush1.bf16.msra.mxu1 %v7226_v39  ;;  %v7235_v39 = vld [vmem:[#allocation8 + $0x88] ss:$16 sps:$4 sm:$0xff]  }
 0x230   :  { %3019 = vmatprep.subr.bf16.mxu1 %v7234_v36  ;;  %v7249_v36 = vld [vmem:[#allocation8 + $0x4c] ss:$16 sps:$4 sm:$0xff]  }
 0x233   :  { %3020 = vmatpush1.bf16.msra.mxu1 %v7232_v41  ;;  %v7241_v41 = vld [vmem:[#allocation8 + $0x68] ss:$16 sps:$4 sm:$0xff]  }
 0x234   :  { %3021 = vmatprep.subr.bf16.mxu1 %v7240_v43  ;;  %v7255_v43 = vld [vmem:[#allocation8 + $0x2c] ss:$16 sps:$4 sm:$0xff]  }
 0x237   :  { %3022 = vmatpush1.bf16.msra.mxu1 %v7238_v42  ;;  %v7247_v42 = vld [vmem:[#allocation8 + $0x48] ss:$16 sps:$4 sm:$0xff]  }
 0x238   :  { %3023 = vmatprep.subr.bf16.mxu1 %v7246_v45  ;;  %v7261_v45 = vld [vmem:[#allocation8 + $0xc] ss:$16 sps:$4 sm:$0xff]  }
 0x23b   :  { %3024 = vmatpush1.bf16.msra.mxu1 %v7244_v44  ;;  %v7253_v44 = vld [vmem:[#allocation8 + $0x28] ss:$16 sps:$4 sm:$0xff]  }
 0x23c   :  { %3025 = vmatprep.subr.bf16.mxu1 %v7252_v47  ;;  %v7267_v47 = vld [vmem:[#allocation8 + $0x1ec] ss:$16 sps:$4 sm:$0xff]  }
 0x23f   :  { %3026 = vmatpush1.bf16.msra.mxu1 %v7250_v46  ;;  %v7259_v46 = vld [vmem:[#allocation8 + $0x8] ss:$16 sps:$4 sm:$0xff]  }
 0x240   :  { %3027 = vmatprep.subr.bf16.mxu1 %v7258_v49  ;;  %v7273_v49 = vld [vmem:[#allocation8 + $0x1cc] ss:$16 sps:$4 sm:$0xff]  }
 0x243   :  { %3028 = vmatpush1.bf16.msra.mxu1 %v7256_v48  ;;  %v7265_v48 = vld [vmem:[#allocation8 + $0x1e8] ss:$16 sps:$4 sm:$0xff]  }
 0x244   :  { %3029 = vmatprep.subr.bf16.mxu1 %v7264_v51  ;;  %v7279_v51 = vld [vmem:[#allocation8 + $0x1ac] ss:$16 sps:$4 sm:$0xff]  }
 0x247   :  { %3030 = vmatpush2.bf16.msra.mxu1 %v7262_v50  ;;  %v7271_v50 = vld [vmem:[#allocation8 + $0x1c8] ss:$16 sps:$4 sm:$0xff]  }
 0x248   :  { %3031 = vmatprep.subr.bf16.mxu1 %v7270_v53  ;;  %v7285_v53 = vld [vmem:[#allocation8 + $0x18c] ss:$16 sps:$4 sm:$0xff]  }
 0x24b   :  { %3032 = vmatpush2.bf16.msra.mxu1 %v7268_v52  ;;  %v7277_v52 = vld [vmem:[#allocation8 + $0x1a8] ss:$16 sps:$4 sm:$0xff]  }
 0x24c   :  { %3033 = vmatprep.subr.bf16.mxu1 %v7276_v55  ;;  %v7283_v55 = vld [vmem:[#allocation8 + $0x188] ss:$16 sps:$4 sm:$0xff]  }
 0x24f   :  { %3034 = vmatpush2.bf16.msra.mxu1 %v7274_v54 }
 0x250   :  { %3035 = vmatprep.subr.bf16.mxu1 %v7282_v57 }
 0x253   :  { %3036 = vmatpush2.bf16.msra.mxu1 %v7280_v56  ;;  %v7291_v56 = vld [vmem:[#allocation8 + $0x16c] ss:$16 sps:$4 sm:$0xff]  }
 0x254   :  { %3037 = vmatprep.subr.bf16.mxu1 %v7288_v61  ;;  %v7297_v61 = vld [vmem:[#allocation8 + $0x14c] ss:$16 sps:$4 sm:$0xff]  }
 0x257   :  { %3038 = vmatpush2.bf16.msra.mxu1 %v7286_v58  ;;  %v7289_v58 = vld [vmem:[#allocation8 + $0x168] ss:$16 sps:$4 sm:$0xff]  }
 0x258   :  { %3039 = vmatprep.subr.bf16.mxu1 %v7294_v62 }
 0x25b   :  { %3040 = vmatpush2.bf16.msra.mxu1 %v7292_v63  ;;  %v1350_v63 = vrot.slane %v8271_v13, %v8260_v60 }
 0x25c   :  { %3041 = vmatprep.subr.bf16.mxu1 %v7300_v0  ;;  %v7295_v0 = vld [vmem:[#allocation8 + $0x148] ss:$16 sps:$4 sm:$0xff]  }
 0x25f   :  { %3042 = vmatpush2.bf16.msra.mxu1 %v7298_v1  ;;  %v1346_v1 = vrot.slane %v8271_v13, %v8257_v59  ;;  %v7307_v13 = vld [vmem:[#allocation8 + $0x108] ss:$16 sps:$4 sm:$0xff]  }
 0x260   :  { %3043 = vmatprep.subr.bf16.mxu1 %v7306_v2 }
 0x263   :  { %3044 = vmatpush2.bf16.msra.mxu1 %v7304_v3  ;;  %v7303_v3 = vld [vmem:[#allocation8 + $0x12c] ss:$16 sps:$4 sm:$0xff]  }
 0x264   :  { %3099 = vmatprep.subr.bf16.mxu1 %v7312_v6 }
 0x266   :  { %v2029_v7 = vpop.f32.mrf.mxu0 }
 0x267   :  { %v2030_v10 = vadd.f32 %v2029_v7, %v1338_v15 }
 0x268   :  { %v2031_v8 = vpop.f32.mrf.mxu0 }
 0x269   :  { %v2032_v5 = vadd.f32 %v2031_v8, %v1342_v14 }
 0x26a   :  { %v2033_v9 = vpop.f32.mrf.mxu0 }
 0x26b   :  { %v2034_v18 = vadd.f32 %v2033_v9, %v1338_v15 }
 0x26c   :  { %v2035_v17 = vpop.f32.mrf.mxu0 }
 0x26d   :  { %v2036_v20 = vadd.f32 %v2035_v17, %v1342_v14  ;;  %v7301_v14 = vld [vmem:[#allocation8 + $0x128] ss:$16 sps:$4 sm:$0xff]   ;;  %v7309_v17 = vld [vmem:[#allocation8 + $0x10c] ss:$16 sps:$4 sm:$0xff]  }
 0x2a6   :  { %v2072_v16 = vpop.f32.mrf.mxu1  ;;  %v2115_v54 = vpop.f32.mrf.mxu0 }
 0x2a7   :  { %v2073_v23 = vadd.f32 %v2072_v16, %v2030_v10  ;;  %v2116_v15 = vadd.f32 %v2115_v54, %v1346_v1  ;;  %v7373_v54 = vld [vmem:[#allocation10 + $0x40] ss:$16 sps:$4 sm:$0xff]  }
 0x2a8   :  { %v2074_v4 = vpop.f32.mrf.mxu1  ;;  %v2117_v57 = vpop.f32.mrf.mxu0 }
 0x2a9   :  { %v2075_v21 = vadd.f32 %v2074_v4, %v2032_v5  ;;  %v2167_v29 = vmax.f32 %v2073_v23, 0.0  ;;  %v2118_v8 = vadd.f32 %v2117_v57, %v1350_v63  ;;  %v7339_v57 = vld [vmem:[#allocation8 + $0x3cc] ss:$16 sps:$4 sm:$0xff]  }
 0x2aa   :  { %v2076_v19 = vpop.f32.mrf.mxu1  ;;  %v2119_v62 = vpop.f32.mrf.mxu0 }
 0x2ab   :  { %v2077_v22 = vadd.f32 %v2076_v19, %v2034_v18  ;;  %v2168_v27 = vmax.f32 %v2075_v21, 0.0  ;;  %v2120_v9 = vadd.f32 %v2119_v62, %v1346_v1  ;;  %v7337_v62 = vld [vmem:[#allocation8 + $0x3c8] ss:$16 sps:$4 sm:$0xff]   ;;  %v7384_v1 = vld [vmem:[#allocation10 + $0x1e4] ss:$16 sps:$4 sm:$0xff]  }
 0x2ac   :  { %v2078_v24 = vpop.f32.mrf.mxu1  ;;  %v2121_v6 = vpop.f32.mrf.mxu0 }
 0x2ad   :  { %v2079_v25 = vadd.f32 %v2078_v24, %v2036_v20  ;;  %v2171_v26 = vmax.f32 %v2077_v22, 0.0  ;;  %v2122_v4 = vadd.f32 %v2121_v6, %v1350_v63  ;;  %v7342_v63 = vld [vmem:[#allocation8 + $0x3ac] ss:$16 sps:$4 sm:$0xff]   ;;  %v7382_v6 = vld [vmem:[#allocation10 + $0x1e0] ss:$16 sps:$4 sm:$0xff]  }
 0x2af   :  { %v2172_v28 = vmax.f32 %v2079_v25, 0.0  ;;  %v8277_v33 = vpack.c.bf16 %v2171_v26, %v2167_v29  ;;  %v7310_v26 = vld [vmem:[#allocation8 + $0x2e8] ss:$16 sps:$4 sm:$0xff]  }
 0x2b0   :  { %v7313_v29 = vld [vmem:[#allocation8 + $0x2c8] ss:$16 sps:$4 sm:$0xff]  }
 0x2b1   :  { %v2176_v30 = vpack.c.bf16 %v2172_v28, %v2168_v27  ;;  %v7315_v28 = vld [vmem:[#allocation8 + $0x2cc] ss:$16 sps:$4 sm:$0xff]  }
 0x2b3   :  { %3002 = vmatprep.mubr.bf16.mxu0 %v2176_v30 }
 0x2b4   :  { %3003 = vmatmul.mubr.bf16.vlgmr.msra.gmra.mxu0 %v8277_v33 }
 0x2b5   :  { %3057 = vmatpush1.bf16.msra.mxu0 %v7217_v32  ;;  %3088 = vmatprep.mubr.bf16.mxu0 %v2176_v30  ;;  %v7318_v30 = vld [vmem:[#allocation8 + $0x2ac] ss:$16 sps:$4 sm:$0xff]   ;;  %v7316_v32 = vld [vmem:[#allocation8 + $0x2a8] ss:$16 sps:$4 sm:$0xff]  }
 0x2b6   :  { %3058 = vmatprep.subr.bf16.mxu0 %v7225_v34  ;;  %v7321_v34 = vld [vmem:[#allocation8 + $0x28c] ss:$16 sps:$4 sm:$0xff]  }
 0x2b9   :  { %3059 = vmatpush1.bf16.msra.mxu0 %v7223_v35  ;;  %v7358_v35 = vld [vmem:[#allocation10 + $0xe0] ss:$16 sps:$4 sm:$0xff]  }
 0x2ba   :  { %3060 = vmatprep.subr.bf16.mxu0 %v7231_v37  ;;  %v7360_v37 = vld [vmem:[#allocation10 + $0xe4] ss:$16 sps:$4 sm:$0xff]  }
 0x2bd   :  { %3061 = vmatpush1.bf16.msra.mxu0 %v7229_v38  ;;  %v7363_v38 = vld [vmem:[#allocation10 + $0xc4] ss:$16 sps:$4 sm:$0xff]  }
 0x2be   :  { %3062 = vmatprep.subr.bf16.mxu0 %v7237_v31  ;;  %v7319_v31 = vld [vmem:[#allocation8 + $0x288] ss:$16 sps:$4 sm:$0xff]  }
 0x2c1   :  { %3063 = vmatpush1.bf16.msra.mxu0 %v7235_v39  ;;  %v7324_v39 = vld [vmem:[#allocation8 + $0x26c] ss:$16 sps:$4 sm:$0xff]  }
 0x2c2   :  { %3064 = vmatprep.subr.bf16.mxu0 %v7243_v40  ;;  %v7361_v40 = vld [vmem:[#allocation10 + $0xc0] ss:$16 sps:$4 sm:$0xff]  }
 0x2c5   :  { %3065 = vmatpush1.bf16.msra.mxu0 %v7241_v41  ;;  %v7322_v41 = vld [vmem:[#allocation8 + $0x268] ss:$16 sps:$4 sm:$0xff]  }
 0x2c6   :  { %3066 = vmatprep.subr.bf16.mxu0 %v7249_v36  ;;  %v7327_v36 = vld [vmem:[#allocation8 + $0x24c] ss:$16 sps:$4 sm:$0xff]  }
 0x2c9   :  { %3067 = vmatpush1.bf16.msra.mxu0 %v7247_v42  ;;  %v7364_v42 = vld [vmem:[#allocation10 + $0xa0] ss:$16 sps:$4 sm:$0xff]  }
 0x2ca   :  { %3068 = vmatprep.subr.bf16.mxu0 %v7255_v43  ;;  %v7369_v43 = vld [vmem:[#allocation10 + $0x84] ss:$16 sps:$4 sm:$0xff]  }
 0x2cd   :  { %3069 = vmatpush1.bf16.msra.mxu0 %v7253_v44  ;;  %v7325_v44 = vld [vmem:[#allocation8 + $0x248] ss:$16 sps:$4 sm:$0xff]  }
 0x2ce   :  { %3070 = vmatprep.subr.bf16.mxu0 %v7261_v45  ;;  %v7330_v45 = vld [vmem:[#allocation8 + $0x22c] ss:$16 sps:$4 sm:$0xff]  }
 0x2d1   :  { %3071 = vmatpush1.bf16.msra.mxu0 %v7259_v46  ;;  %v7367_v46 = vld [vmem:[#allocation10 + $0x80] ss:$16 sps:$4 sm:$0xff]  }
 0x2d2   :  { %3072 = vmatprep.subr.bf16.mxu0 %v7267_v47  ;;  %v7372_v47 = vld [vmem:[#allocation10 + $0x64] ss:$16 sps:$4 sm:$0xff]  }
 0x2d5   :  { %3073 = vmatpush2.bf16.msra.mxu0 %v7265_v48  ;;  %v7328_v48 = vld [vmem:[#allocation8 + $0x228] ss:$16 sps:$4 sm:$0xff]  }
 0x2d6   :  { %3074 = vmatprep.subr.bf16.mxu0 %v7273_v49  ;;  %v7333_v49 = vld [vmem:[#allocation8 + $0x20c] ss:$16 sps:$4 sm:$0xff]  }
 0x2d9   :  { %3075 = vmatpush2.bf16.msra.mxu0 %v7271_v50  ;;  %v7370_v50 = vld [vmem:[#allocation10 + $0x60] ss:$16 sps:$4 sm:$0xff]  }
 0x2da   :  { %3076 = vmatprep.subr.bf16.mxu0 %v7279_v51  ;;  %v7375_v51 = vld [vmem:[#allocation10 + $0x44] ss:$16 sps:$4 sm:$0xff]  }
 0x2dd   :  { %3077 = vmatpush2.bf16.msra.mxu0 %v7277_v52  ;;  %v7331_v52 = vld [vmem:[#allocation8 + $0x208] ss:$16 sps:$4 sm:$0xff]  }
 0x2de   :  { %3078 = vmatprep.subr.bf16.mxu0 %v7285_v53  ;;  %v7336_v53 = vld [vmem:[#allocation8 + $0x3ec] ss:$16 sps:$4 sm:$0xff]  }
 0x2e1   :  { %3079 = vmatpush2.bf16.msra.mxu0 %v7283_v55  ;;  %v7378_v55 = vld [vmem:[#allocation10 + $0x24] ss:$16 sps:$4 sm:$0xff]  }
 0x2e2   :  { %3080 = vmatprep.subr.bf16.mxu0 %v7291_v56  ;;  %v7334_v56 = vld [vmem:[#allocation8 + $0x3e8] ss:$16 sps:$4 sm:$0xff]  }
 0x2e5   :  { %3081 = vmatpush2.bf16.msra.mxu0 %v7289_v58  ;;  %v7376_v58 = vld [vmem:[#allocation10 + $0x20] ss:$16 sps:$4 sm:$0xff]  }
 0x2e6   :  { %v2158_v2 = vpop.f32.mrf.mxu1  ;;  %3082 = vmatprep.subr.bf16.mxu0 %v7297_v61  ;;  %v7381_v61 = vld [vmem:[#allocation10 + $0x4] ss:$16 sps:$4 sm:$0xff]  }
 0x2e7   :  { %v2159_v10 = vadd.f32 %v2158_v2, %v2116_v15  ;;  %v7340_v2 = vld [vmem:[#allocation8 + $0x3a8] ss:$16 sps:$4 sm:$0xff]   ;;  %v7390_v15 = vld [vmem:[#allocation10 + $0x1a4] ss:$16 sps:$4 sm:$0xff]  }
 0x2e8   :  { %v2160_v7 = vpop.f32.mrf.mxu1 }
 0x2e9   :  { %3083 = vmatpush2.bf16.msra.mxu0 %v7295_v0  ;;  %v2161_v5 = vadd.f32 %v2160_v7, %v2118_v8  ;;  %v2169_v24 = vmax.f32 %v2159_v10, 0.0  ;;  %v7379_v0 = vld [vmem:[#allocation10] ss:$16 sps:$4 sm:$0xff]   ;;  %v7387_v7 = vld [vmem:[#allocation10 + $0x1c4] ss:$16 sps:$4 sm:$0xff]  }
 0x2ea   :  { %v2162_v16 = vpop.f32.mrf.mxu1  ;;  %3084 = vmatprep.subr.bf16.mxu0 %v7303_v3  ;;  %v7345_v3 = vld [vmem:[#allocation8 + $0x38c] ss:$16 sps:$4 sm:$0xff]   ;;  %v7343_v8 = vld [vmem:[#allocation8 + $0x388] ss:$16 sps:$4 sm:$0xff]  }
 0x2eb   :  { %v2163_v18 = vadd.f32 %v2162_v16, %v2120_v9  ;;  %v2170_v22 = vmax.f32 %v2161_v5, 0.0  ;;  %v7348_v9 = vld [vmem:[#allocation8 + $0x36c] ss:$16 sps:$4 sm:$0xff]   ;;  %v7346_v16 = vld [vmem:[#allocation8 + $0x368] ss:$16 sps:$4 sm:$0xff]  }
 0x2ec   :  { %v2164_v19 = vpop.f32.mrf.mxu1  ;;  %v7393_v5 = vld [vmem:[#allocation10 + $0x184] ss:$16 sps:$4 sm:$0xff]   ;;  %v7354_v10 = vld [vmem:[#allocation8 + $0x32c] ss:$16 sps:$4 sm:$0xff]  }
 0x2ed   :  { %v2165_v20 = vadd.f32 %v2164_v19, %v2122_v4  ;;  %3085 = vmatpush2.bf16.msra.mxu0 %v7301_v14  ;;  %v2173_v21 = vmax.f32 %v2163_v18, 0.0  ;;  %v7385_v14 = vld [vmem:[#allocation10 + $0x1c0] ss:$16 sps:$4 sm:$0xff]   ;;  %v7349_v18 = vld [vmem:[#allocation8 + $0x348] ss:$16 sps:$4 sm:$0xff]  }
 0x2ee   :  { %3086 = vmatprep.subr.bf16.mxu0 %v7309_v17  ;;  %v7351_v17 = vld [vmem:[#allocation8 + $0x34c] ss:$16 sps:$4 sm:$0xff]   ;;  %v7388_v4 = vld [vmem:[#allocation10 + $0x1a0] ss:$16 sps:$4 sm:$0xff]  }
 0x2ef   :  { %v2174_v23 = vmax.f32 %v2165_v20, 0.0  ;;  %v8284_v27 = vpack.c.bf16 %v2173_v21, %v2169_v24  ;;  %v7391_v19 = vld [vmem:[#allocation10 + $0x180] ss:$16 sps:$4 sm:$0xff]   ;;  %v7396_v20 = vld [vmem:[#allocation10 + $0x164] ss:$16 sps:$4 sm:$0xff]  }
 0x2f0   :  { %v7357_v21 = vld [vmem:[#allocation8 + $0x30c] ss:$16 sps:$4 sm:$0xff]   ;;  %v7399_v24 = vld [vmem:[#allocation10 + $0x144] ss:$16 sps:$4 sm:$0xff]  }
 0x2f1   :  { %v2178_v25 = vpack.c.bf16 %v2174_v23, %v2170_v22  ;;  %3087 = vmatpush2.bf16.msra.mxu0 %v7307_v13  ;;  %v7352_v13 = vld [vmem:[#allocation8 + $0x328] ss:$16 sps:$4 sm:$0xff]   ;;  %v7394_v22 = vld [vmem:[#allocation10 + $0x160] ss:$16 sps:$4 sm:$0xff]  }
 0x2f2   :  { %3945 = vmatprep.subr.bf16.mxu0 %v7360_v37  ;;  %v7355_v23 = vld [vmem:[#allocation8 + $0x308] ss:$16 sps:$4 sm:$0xff]   ;;  %v7412_v37 = vld [vmem:[#allocation10 + $0x2c0] ss:$16 sps:$4 sm:$0xff]  }
 0x2f3   :  { %3045 = vmatprep.mubr.bf16.mxu1 %v2178_v25 }
 0x2f4   :  { %3046 = vmatmul.mubr.bf16.vlgmr.msra.gmra.mxu1 %v8284_v27  ;;  %3089 = vmatmul.mubr.bf16.vlgmr.msra.gmra.mxu0 %v8277_v33  ;;  %v7366_v33 = vld [vmem:[#allocation10 + $0xa4] ss:$16 sps:$4 sm:$0xff]  }
 0x2f5   :  { %3100 = vmatpush1.bf16.msra.mxu1 %v7310_v26  ;;  %3131 = vmatprep.mubr.bf16.mxu1 %v2178_v25  ;;  %v7397_v25 = vld [vmem:[#allocation10 + $0x140] ss:$16 sps:$4 sm:$0xff]   ;;  %v7402_v26 = vld [vmem:[#allocation10 + $0x124] ss:$16 sps:$4 sm:$0xff]  }
 0x2f6   :  { %3101 = vmatprep.subr.bf16.mxu1 %v7315_v28  ;;  %3946 = vmatpush1.bf16.msra.mxu0 %v7358_v35  ;;  %v7400_v28 = vld [vmem:[#allocation10 + $0x120] ss:$16 sps:$4 sm:$0xff]   ;;  %v7411_v35 = vld [vmem:[#allocation10 + $0xec] ss:$16 sps:$4 sm:$0xff]  }
 0x2f7   :  { %3947 = vmatprep.subr.bf16.mxu0 %v7363_v38  ;;  %v7418_v38 = vld [vmem:[#allocation10 + $0x2a0] ss:$16 sps:$4 sm:$0xff]  }
 0x2f9   :  { %3102 = vmatpush1.bf16.msra.mxu1 %v7313_v29  ;;  %v7405_v29 = vld [vmem:[#allocation10 + $0x104] ss:$16 sps:$4 sm:$0xff]  }
 0x2fa   :  { %3103 = vmatprep.subr.bf16.mxu1 %v7318_v30  ;;  %3948 = vmatpush1.bf16.msra.mxu0 %v7361_v40  ;;  %v7403_v30 = vld [vmem:[#allocation10 + $0x100] ss:$16 sps:$4 sm:$0xff]   ;;  %v7426_v40 = vld [vmem:[#allocation10 + $0x284] ss:$16 sps:$4 sm:$0xff]  }
 0x2fb   :  { %3949 = vmatprep.subr.bf16.mxu0 %v7366_v33  ;;  %v7430_v33 = vld [vmem:[#allocation10 + $0x260] ss:$16 sps:$4 sm:$0xff]  }
 0x2fd   :  { %3104 = vmatpush1.bf16.msra.mxu1 %v7316_v32  ;;  %v7406_v32 = vld [vmem:[#allocation10 + $0x2e0] ss:$16 sps:$4 sm:$0xff]  }
 0x2fe   :  { %3105 = vmatprep.subr.bf16.mxu1 %v7321_v34  ;;  %3950 = vmatpush1.bf16.msra.mxu0 %v7364_v42  ;;  %v7408_v34 = vld [vmem:[#allocation10 + $0x2e4] ss:$16 sps:$4 sm:$0xff]  }
 0x2ff   :  { %3951 = vmatprep.subr.bf16.mxu0 %v7369_v43  ;;  %v7438_v42 = vld [vmem:[#allocation10 + $0x244] ss:$16 sps:$4 sm:$0xff]   ;;  %v7442_v43 = vld [vmem:[#allocation10 + $0x220] ss:$16 sps:$4 sm:$0xff]  }
 0x301   :  { %3106 = vmatpush1.bf16.msra.mxu1 %v7319_v31  ;;  %v7420_v31 = vld [vmem:[#allocation10 + $0x2a4] ss:$16 sps:$4 sm:$0xff]  }
 0x302   :  { %3107 = vmatprep.subr.bf16.mxu1 %v7324_v39  ;;  %3952 = vmatpush1.bf16.msra.mxu0 %v7367_v46  ;;  %v7424_v39 = vld [vmem:[#allocation10 + $0x280] ss:$16 sps:$4 sm:$0xff]   ;;  %v7450_v46 = vld [vmem:[#allocation10 + $0x204] ss:$16 sps:$4 sm:$0xff]  }
 0x303   :  { %3953 = vmatprep.subr.bf16.mxu0 %v7372_v47  ;;  %v7454_v47 = vld [vmem:[#allocation10 + $0x3e0] ss:$16 sps:$4 sm:$0xff]  }
 0x305   :  { %3108 = vmatpush1.bf16.msra.mxu1 %v7322_v41  ;;  %v7432_v41 = vld [vmem:[#allocation10 + $0x264] ss:$16 sps:$4 sm:$0xff]  }
 0x306   :  { %3109 = vmatprep.subr.bf16.mxu1 %v7327_v36  ;;  %3954 = vmatpush1.bf16.msra.mxu0 %v7370_v50  ;;  %v7436_v36 = vld [vmem:[#allocation10 + $0x240] ss:$16 sps:$4 sm:$0xff]   ;;  %v7462_v50 = vld [vmem:[#allocation10 + $0x3c4] ss:$16 sps:$4 sm:$0xff]  }
 0x307   :  { %3955 = vmatprep.subr.bf16.mxu0 %v7375_v51  ;;  %v7466_v51 = vld [vmem:[#allocation10 + $0x3a0] ss:$16 sps:$4 sm:$0xff]  }
 0x309   :  { %3110 = vmatpush1.bf16.msra.mxu1 %v7325_v44  ;;  %v7444_v44 = vld [vmem:[#allocation10 + $0x224] ss:$16 sps:$4 sm:$0xff]  }
 0x30a   :  { %3111 = vmatprep.subr.bf16.mxu1 %v7330_v45  ;;  %3956 = vmatpush1.bf16.msra.mxu0 %v7373_v54  ;;  %v7448_v45 = vld [vmem:[#allocation10 + $0x200] ss:$16 sps:$4 sm:$0xff]   ;;  %v7474_v54 = vld [vmem:[#allocation10 + $0x384] ss:$16 sps:$4 sm:$0xff]  }
 0x30b   :  { %3957 = vmatprep.subr.bf16.mxu0 %v7378_v55  ;;  %v7478_v55 = vld [vmem:[#allocation10 + $0x360] ss:$16 sps:$4 sm:$0xff]  }
 0x30d   :  { %3112 = vmatpush1.bf16.msra.mxu1 %v7328_v48  ;;  %v7456_v48 = vld [vmem:[#allocation10 + $0x3e4] ss:$16 sps:$4 sm:$0xff]  }
 0x30e   :  { %3113 = vmatprep.subr.bf16.mxu1 %v7333_v49  ;;  %3958 = vmatpush1.bf16.msra.mxu0 %v7376_v58  ;;  %v7460_v49 = vld [vmem:[#allocation10 + $0x3c0] ss:$16 sps:$4 sm:$0xff]  }
 0x30f   :  { %3959 = vmatprep.subr.bf16.mxu0 %v7381_v61  ;;  %v7484_v58 = vld [vmem:[#allocation10 + $0x340] ss:$16 sps:$4 sm:$0xff]   ;;  %v7492_v61 = vld [vmem:[#allocation10 + $0x324] ss:$16 sps:$4 sm:$0xff]  }
 0x311   :  { %3114 = vmatpush1.bf16.msra.mxu1 %v7331_v52  ;;  %v7468_v52 = vld [vmem:[#allocation10 + $0x3a4] ss:$16 sps:$4 sm:$0xff]  }
 0x312   :  { %3115 = vmatprep.subr.bf16.mxu1 %v7336_v53  ;;  %3960 = vmatpush1.bf16.msra.mxu0 %v7379_v0  ;;  %v7472_v53 = vld [vmem:[#allocation10 + $0x380] ss:$16 sps:$4 sm:$0xff]  }
 0x313   :  { %3961 = vmatprep.subr.bf16.mxu0 %v7384_v1  ;;  %v7496_v0 = vld [vmem:[#allocation10 + $0x300] ss:$16 sps:$4 sm:$0xff]   ;;  %v7504_v1 = vld [vmem:[#allocation10 + $0x2ec] ss:$16 sps:$4 sm:$0xff]  }
 0x315   :  { %3116 = vmatpush2.bf16.msra.mxu1 %v7334_v56  ;;  %v7480_v56 = vld [vmem:[#allocation10 + $0x364] ss:$16 sps:$4 sm:$0xff]  }
 0x316   :  { %3117 = vmatprep.subr.bf16.mxu1 %v7339_v57  ;;  %3962 = vmatpush2.bf16.msra.mxu0 %v7382_v6  ;;  %v7486_v57 = vld [vmem:[#allocation10 + $0x344] ss:$16 sps:$4 sm:$0xff]   ;;  %v8289_v6 = vld [vmem:[#allocation20 + $0x2] ss:$8 sm:$0xf] }
 0x317   :  { %3963 = vmatprep.subr.bf16.mxu0 %v7387_v7 }
 0x319   :  { %3118 = vmatpush2.bf16.msra.mxu1 %v7337_v62  ;;  %v7490_v62 = vld [vmem:[#allocation10 + $0x320] ss:$16 sps:$4 sm:$0xff]  }
 0x31a   :  { %3119 = vmatprep.subr.bf16.mxu1 %v7342_v63  ;;  %3964 = vmatpush2.bf16.msra.mxu0 %v7385_v14  ;;  %v7498_v63 = vld [vmem:[#allocation10 + $0x304] ss:$16 sps:$4 sm:$0xff]  }
 0x31b   :  { %3965 = vmatprep.subr.bf16.mxu0 %v7390_v15 }
 0x31d   :  { %3120 = vmatpush2.bf16.msra.mxu1 %v7340_v2 }
 0x31e   :  { %3121 = vmatprep.subr.bf16.mxu1 %v7345_v3  ;;  %3966 = vmatpush2.bf16.msra.mxu0 %v7388_v4 }
 0x31f   :  { %3967 = vmatprep.subr.bf16.mxu0 %v7393_v5 }
 0x321   :  { %3122 = vmatpush2.bf16.msra.mxu1 %v7343_v8  ;;  %v2317_v8 = vrot.slane %v8289_v6, %v8244_v11 }
 0x322   :  { %3123 = vmatprep.subr.bf16.mxu1 %v7348_v9  ;;  %3968 = vmatpush2.bf16.msra.mxu0 %v7391_v19  ;;  %v2313_v9 = vrot.slane %v8289_v6, %v8247_v12 }
 0x323   :  { %3969 = vmatprep.subr.bf16.mxu0 %v7396_v20 }
 0x325   :  { %3124 = vmatpush2.bf16.msra.mxu1 %v7346_v16 }
 0x326   :  { %3125 = vmatprep.subr.bf16.mxu1 %v7351_v17  ;;  %3970 = vmatpush2.bf16.msra.mxu0 %v7394_v22 }
 0x327   :  { %3971 = vmatprep.subr.bf16.mxu0 %v7399_v24 }
 0x329   :  { %3126 = vmatpush2.bf16.msra.mxu1 %v7349_v18 }
 0x32a   :  { %3127 = vmatprep.subr.bf16.mxu1 %v7354_v10  ;;  %3972 = vmatpush2.bf16.msra.mxu0 %v7397_v25 }
 0x32b   :  { %3973 = vmatprep.subr.bf16.mxu0 %v7402_v26 }
 0x32d   :  { %3128 = vmatpush2.bf16.msra.mxu1 %v7352_v13 }
 0x32e   :  { %3129 = vmatprep.subr.bf16.mxu1 %v7357_v21  ;;  %3974 = vmatpush2.bf16.msra.mxu0 %v7400_v28 }
 0x32f   :  { %3975 = vmatprep.subr.bf16.mxu0 %v7405_v29  ;;  %v7409_v29 = vld [vmem:[#allocation10 + $0xe8] ss:$16 sps:$4 sm:$0xff]  }
 0x331   :  { %3130 = vmatpush2.bf16.msra.mxu1 %v7355_v23 }
 0x332   :  { %3976 = vmatpush2.bf16.msra.mxu0 %v7403_v30  ;;  %3988 = vmatprep.subr.bf16.mxu1 %v7408_v34  ;;  %v7415_v34 = vld [vmem:[#allocation10 + $0xc8] ss:$16 sps:$4 sm:$0xff]  }
 0x333   :  { %4031 = vmatprep.subr.bf16.mxu0 %v7411_v35  ;;  %v7423_v35 = vld [vmem:[#allocation10 + $0xac] ss:$16 sps:$4 sm:$0xff]  }
 0x334   :  { %3132 = vmatmul.mubr.bf16.vlgmr.msra.gmra.mxu1 %v8284_v27  ;;  %v7414_v27 = vld [vmem:[#allocation10 + $0x2c4] ss:$16 sps:$4 sm:$0xff]  }
 0x335   :  { %3989 = vmatpush1.bf16.msra.mxu1 %v7406_v32  ;;  %v7417_v32 = vld [vmem:[#allocation10 + $0xcc] ss:$16 sps:$4 sm:$0xff]  }
 0x336   :  { %3990 = vmatprep.subr.bf16.mxu1 %v7414_v27  ;;  %v7429_v27 = vld [vmem:[#allocation10 + $0x8c] ss:$16 sps:$4 sm:$0xff]  }
 0x339   :  { %3991 = vmatpush1.bf16.msra.mxu1 %v7412_v37  ;;  %v7421_v37 = vld [vmem:[#allocation10 + $0xa8] ss:$16 sps:$4 sm:$0xff]  }
 0x33a   :  { %3992 = vmatprep.subr.bf16.mxu1 %v7420_v31  ;;  %v7435_v31 = vld [vmem:[#allocation10 + $0x6c] ss:$16 sps:$4 sm:$0xff]  }
 0x33d   :  { %3993 = vmatpush1.bf16.msra.mxu1 %v7418_v38  ;;  %v7427_v38 = vld [vmem:[#allocation10 + $0x88] ss:$16 sps:$4 sm:$0xff]  }
 0x33e   :  { %3994 = vmatprep.subr.bf16.mxu1 %v7426_v40  ;;  %v7441_v40 = vld [vmem:[#allocation10 + $0x4c] ss:$16 sps:$4 sm:$0xff]  }
 0x341   :  { %3995 = vmatpush1.bf16.msra.mxu1 %v7424_v39  ;;  %v7433_v39 = vld [vmem:[#allocation10 + $0x68] ss:$16 sps:$4 sm:$0xff]  }
 0x342   :  { %3996 = vmatprep.subr.bf16.mxu1 %v7432_v41  ;;  %v7447_v41 = vld [vmem:[#allocation10 + $0x2c] ss:$16 sps:$4 sm:$0xff]  }
 0x345   :  { %3997 = vmatpush1.bf16.msra.mxu1 %v7430_v33  ;;  %v7439_v33 = vld [vmem:[#allocation10 + $0x48] ss:$16 sps:$4 sm:$0xff]  }
 0x346   :  { %3998 = vmatprep.subr.bf16.mxu1 %v7438_v42  ;;  %v7453_v42 = vld [vmem:[#allocation10 + $0xc] ss:$16 sps:$4 sm:$0xff]  }
 0x349   :  { %3999 = vmatpush1.bf16.msra.mxu1 %v7436_v36  ;;  %v7445_v36 = vld [vmem:[#allocation10 + $0x28] ss:$16 sps:$4 sm:$0xff]  }
 0x34a   :  { %4000 = vmatprep.subr.bf16.mxu1 %v7444_v44  ;;  %v7459_v44 = vld [vmem:[#allocation10 + $0x1ec] ss:$16 sps:$4 sm:$0xff]  }
 0x34d   :  { %4001 = vmatpush1.bf16.msra.mxu1 %v7442_v43  ;;  %v7451_v43 = vld [vmem:[#allocation10 + $0x8] ss:$16 sps:$4 sm:$0xff]  }
 0x34e   :  { %4002 = vmatprep.subr.bf16.mxu1 %v7450_v46  ;;  %v7465_v46 = vld [vmem:[#allocation10 + $0x1cc] ss:$16 sps:$4 sm:$0xff]  }
 0x351   :  { %4003 = vmatpush1.bf16.msra.mxu1 %v7448_v45  ;;  %v7457_v45 = vld [vmem:[#allocation10 + $0x1e8] ss:$16 sps:$4 sm:$0xff]  }
 0x352   :  { %4004 = vmatprep.subr.bf16.mxu1 %v7456_v48  ;;  %v7471_v48 = vld [vmem:[#allocation10 + $0x1ac] ss:$16 sps:$4 sm:$0xff]  }
 0x355   :  { %4005 = vmatpush2.bf16.msra.mxu1 %v7454_v47  ;;  %v7463_v47 = vld [vmem:[#allocation10 + $0x1c8] ss:$16 sps:$4 sm:$0xff]  }
 0x356   :  { %4006 = vmatprep.subr.bf16.mxu1 %v7462_v50  ;;  %v7477_v50 = vld [vmem:[#allocation10 + $0x18c] ss:$16 sps:$4 sm:$0xff]  }
 0x359   :  { %4007 = vmatpush2.bf16.msra.mxu1 %v7460_v49  ;;  %v7469_v49 = vld [vmem:[#allocation10 + $0x1a8] ss:$16 sps:$4 sm:$0xff]  }
 0x35a   :  { %4008 = vmatprep.subr.bf16.mxu1 %v7468_v52  ;;  %v7475_v52 = vld [vmem:[#allocation10 + $0x188] ss:$16 sps:$4 sm:$0xff]  }
 0x35d   :  { %4009 = vmatpush2.bf16.msra.mxu1 %v7466_v51 }
 0x35e   :  { %4010 = vmatprep.subr.bf16.mxu1 %v7474_v54 }
 0x361   :  { %4011 = vmatpush2.bf16.msra.mxu1 %v7472_v53  ;;  %v7483_v53 = vld [vmem:[#allocation10 + $0x16c] ss:$16 sps:$4 sm:$0xff]  }
 0x362   :  { %4012 = vmatprep.subr.bf16.mxu1 %v7480_v56  ;;  %v7489_v56 = vld [vmem:[#allocation10 + $0x14c] ss:$16 sps:$4 sm:$0xff]  }
 0x365   :  { %4013 = vmatpush2.bf16.msra.mxu1 %v7478_v55  ;;  %v7481_v55 = vld [vmem:[#allocation10 + $0x168] ss:$16 sps:$4 sm:$0xff]  }
 0x366   :  { %4014 = vmatprep.subr.bf16.mxu1 %v7486_v57 }
 0x369   :  { %4015 = vmatpush2.bf16.msra.mxu1 %v7484_v58  ;;  %v2325_v58 = vrot.slane %v8289_v6, %v8260_v60 }
 0x36a   :  { %4016 = vmatprep.subr.bf16.mxu1 %v7492_v61  ;;  %v7487_v61 = vld [vmem:[#allocation10 + $0x148] ss:$16 sps:$4 sm:$0xff]  }
 0x36d   :  { %4017 = vmatpush2.bf16.msra.mxu1 %v7490_v62  ;;  %v2321_v62 = vrot.slane %v8289_v6, %v8257_v59  ;;  %v7499_v6 = vld [vmem:[#allocation10 + $0x108] ss:$16 sps:$4 sm:$0xff]  }
 0x36e   :  { %4018 = vmatprep.subr.bf16.mxu1 %v7498_v63 }
 0x371   :  { %4019 = vmatpush2.bf16.msra.mxu1 %v7496_v0  ;;  %v7495_v0 = vld [vmem:[#allocation10 + $0x12c] ss:$16 sps:$4 sm:$0xff]  }
 0x372   :  { %4074 = vmatprep.subr.bf16.mxu1 %v7504_v1 }
 0x374   :  { %v3004_v2 = vpop.f32.mrf.mxu0 }
 0x375   :  { %v3005_v5 = vadd.f32 %v3004_v2, %v2313_v9 }
 0x376   :  { %v3006_v3 = vpop.f32.mrf.mxu0 }
 0x377   :  { %v3007_v17 = vadd.f32 %v3006_v3, %v2317_v8 }
 0x378   :  { %v3008_v7 = vpop.f32.mrf.mxu0 }
 0x379   :  { %v3009_v4 = vadd.f32 %v3008_v7, %v2313_v9 }
 0x37a   :  { %v3010_v15 = vpop.f32.mrf.mxu0 }
 0x37b   :  { %v3011_v10 = vadd.f32 %v3010_v15, %v2317_v8  ;;  %v7493_v8 = vld [vmem:[#allocation10 + $0x128] ss:$16 sps:$4 sm:$0xff]   ;;  %v7501_v15 = vld [vmem:[#allocation10 + $0x10c] ss:$16 sps:$4 sm:$0xff]  }
 0x3b4   :  { %v3047_v14 = vpop.f32.mrf.mxu1  ;;  %v3090_v51 = vpop.f32.mrf.mxu0 }
 0x3b5   :  { %v3048_v13 = vadd.f32 %v3047_v14, %v3005_v5  ;;  %v3091_v9 = vadd.f32 %v3090_v51, %v2321_v62  ;;  %v7565_v51 = vld [vmem:[#allocation11 + $0x30] ss:$12 sps:$4 sm:$0xff]  }
 0x3b6   :  { %v3049_v16 = vpop.f32.mrf.mxu1  ;;  %v3092_v54 = vpop.f32.mrf.mxu0 }
 0x3b7   :  { %v3050_v19 = vadd.f32 %v3049_v16, %v3007_v17  ;;  %v3142_v26 = vmax.f32 %v3048_v13, 0.0  ;;  %v3093_v3 = vadd.f32 %v3092_v54, %v2325_v58  ;;  %v7531_v54 = vld [vmem:[#allocation10 + $0x3cc] ss:$16 sps:$4 sm:$0xff]  }
 0x3b8   :  { %v3051_v18 = vpop.f32.mrf.mxu1  ;;  %v3094_v57 = vpop.f32.mrf.mxu0 }
 0x3b9   :  { %v3052_v20 = vadd.f32 %v3051_v18, %v3009_v4  ;;  %v3143_v24 = vmax.f32 %v3050_v19, 0.0  ;;  %v3095_v7 = vadd.f32 %v3094_v57, %v2321_v62  ;;  %v7529_v57 = vld [vmem:[#allocation10 + $0x3c8] ss:$16 sps:$4 sm:$0xff]  }
 0x3ba   :  { %v3053_v21 = vpop.f32.mrf.mxu1  ;;  %v3096_v1 = vpop.f32.mrf.mxu0  ;;  %v7576_v62 = vld [vmem:[#allocation11 + $0x16c] ss:$12 sps:$4 sm:$0xff]  }
 0x3bb   :  { %v3054_v22 = vadd.f32 %v3053_v21, %v3011_v10  ;;  %v3146_v23 = vmax.f32 %v3052_v20, 0.0  ;;  %v3097_v16 = vadd.f32 %v3096_v1, %v2325_v58  ;;  %v7534_v58 = vld [vmem:[#allocation10 + $0x3ac] ss:$16 sps:$4 sm:$0xff]   ;;  %v7574_v1 = vld [vmem:[#allocation11 + $0x168] ss:$12 sps:$4 sm:$0xff]  }
 0x3bd   :  { %v3147_v25 = vmax.f32 %v3054_v22, 0.0  ;;  %v8295_v30 = vpack.c.bf16 %v3146_v23, %v3142_v26  ;;  %v7502_v23 = vld [vmem:[#allocation10 + $0x2e8] ss:$16 sps:$4 sm:$0xff]  }
 0x3be   :  { %v7505_v26 = vld [vmem:[#allocation10 + $0x2c8] ss:$16 sps:$4 sm:$0xff]  }
 0x3bf   :  { %v3151_v28 = vpack.c.bf16 %v3147_v25, %v3143_v24  ;;  %v7507_v25 = vld [vmem:[#allocation10 + $0x2cc] ss:$16 sps:$4 sm:$0xff]  }
 0x3c1   :  { %3977 = vmatprep.mubr.bf16.mxu0 %v3151_v28 }
 0x3c2   :  { %3978 = vmatmul.mubr.bf16.vlgmr.msra.gmra.mxu0 %v8295_v30 }
 0x3c3   :  { %4032 = vmatpush1.bf16.msra.mxu0 %v7409_v29  ;;  %4063 = vmatprep.mubr.bf16.mxu0 %v3151_v28  ;;  %v7510_v28 = vld [vmem:[#allocation10 + $0x2ac] ss:$16 sps:$4 sm:$0xff]   ;;  %v7508_v29 = vld [vmem:[#allocation10 + $0x2a8] ss:$16 sps:$4 sm:$0xff]  }
 0x3c4   :  { %4033 = vmatprep.subr.bf16.mxu0 %v7417_v32  ;;  %v7513_v32 = vld [vmem:[#allocation10 + $0x28c] ss:$16 sps:$4 sm:$0xff]  }
 0x3c7   :  { %4034 = vmatpush1.bf16.msra.mxu0 %v7415_v34  ;;  %v7550_v34 = vld [vmem:[#allocation11 + $0xa8] ss:$12 sps:$4 sm:$0xff]  }
 0x3c8   :  { %4035 = vmatprep.subr.bf16.mxu0 %v7423_v35  ;;  %v7552_v35 = vld [vmem:[#allocation11 + $0xac] ss:$12 sps:$4 sm:$0xff]  }
 0x3cb   :  { %4036 = vmatpush1.bf16.msra.mxu0 %v7421_v37  ;;  %v7555_v37 = vld [vmem:[#allocation11 + $0x94] ss:$12 sps:$4 sm:$0xff]  }
 0x3cc   :  { %4037 = vmatprep.subr.bf16.mxu0 %v7429_v27  ;;  %v7511_v27 = vld [vmem:[#allocation10 + $0x288] ss:$16 sps:$4 sm:$0xff]  }
 0x3cf   :  { %4038 = vmatpush1.bf16.msra.mxu0 %v7427_v38  ;;  %v7516_v38 = vld [vmem:[#allocation10 + $0x26c] ss:$16 sps:$4 sm:$0xff]  }
 0x3d0   :  { %4039 = vmatprep.subr.bf16.mxu0 %v7435_v31  ;;  %v7553_v31 = vld [vmem:[#allocation11 + $0x90] ss:$12 sps:$4 sm:$0xff]  }
 0x3d3   :  { %4040 = vmatpush1.bf16.msra.mxu0 %v7433_v39  ;;  %v7514_v39 = vld [vmem:[#allocation10 + $0x268] ss:$16 sps:$4 sm:$0xff]  }
 0x3d4   :  { %4041 = vmatprep.subr.bf16.mxu0 %v7441_v40  ;;  %v7519_v40 = vld [vmem:[#allocation10 + $0x24c] ss:$16 sps:$4 sm:$0xff]  }
 0x3d7   :  { %4042 = vmatpush1.bf16.msra.mxu0 %v7439_v33  ;;  %v7556_v33 = vld [vmem:[#allocation11 + $0x78] ss:$12 sps:$4 sm:$0xff]  }
 0x3d8   :  { %4043 = vmatprep.subr.bf16.mxu0 %v7447_v41  ;;  %v7561_v41 = vld [vmem:[#allocation11 + $0x64] ss:$12 sps:$4 sm:$0xff]  }
 0x3db   :  { %4044 = vmatpush1.bf16.msra.mxu0 %v7445_v36  ;;  %v7517_v36 = vld [vmem:[#allocation10 + $0x248] ss:$16 sps:$4 sm:$0xff]  }
 0x3dc   :  { %4045 = vmatprep.subr.bf16.mxu0 %v7453_v42  ;;  %v7522_v42 = vld [vmem:[#allocation10 + $0x22c] ss:$16 sps:$4 sm:$0xff]  }
 0x3df   :  { %4046 = vmatpush1.bf16.msra.mxu0 %v7451_v43  ;;  %v7559_v43 = vld [vmem:[#allocation11 + $0x60] ss:$12 sps:$4 sm:$0xff]  }
 0x3e0   :  { %4047 = vmatprep.subr.bf16.mxu0 %v7459_v44  ;;  %v7564_v44 = vld [vmem:[#allocation11 + $0x4c] ss:$12 sps:$4 sm:$0xff]  }
 0x3e3   :  { %4048 = vmatpush2.bf16.msra.mxu0 %v7457_v45  ;;  %v7520_v45 = vld [vmem:[#allocation10 + $0x228] ss:$16 sps:$4 sm:$0xff]  }
 0x3e4   :  { %4049 = vmatprep.subr.bf16.mxu0 %v7465_v46  ;;  %v7525_v46 = vld [vmem:[#allocation10 + $0x20c] ss:$16 sps:$4 sm:$0xff]  }
 0x3e7   :  { %4050 = vmatpush2.bf16.msra.mxu0 %v7463_v47  ;;  %v7562_v47 = vld [vmem:[#allocation11 + $0x48] ss:$12 sps:$4 sm:$0xff]  }
 0x3e8   :  { %4051 = vmatprep.subr.bf16.mxu0 %v7471_v48  ;;  %v7567_v48 = vld [vmem:[#allocation11 + $0x34] ss:$12 sps:$4 sm:$0xff]  }
 0x3eb   :  { %4052 = vmatpush2.bf16.msra.mxu0 %v7469_v49  ;;  %v7523_v49 = vld [vmem:[#allocation10 + $0x208] ss:$16 sps:$4 sm:$0xff]  }
 0x3ec   :  { %4053 = vmatprep.subr.bf16.mxu0 %v7477_v50  ;;  %v7528_v50 = vld [vmem:[#allocation10 + $0x3ec] ss:$16 sps:$4 sm:$0xff]  }
 0x3ef   :  { %4054 = vmatpush2.bf16.msra.mxu0 %v7475_v52  ;;  %v7570_v52 = vld [vmem:[#allocation11 + $0x1c] ss:$12 sps:$4 sm:$0xff]  }
 0x3f0   :  { %4055 = vmatprep.subr.bf16.mxu0 %v7483_v53  ;;  %v7526_v53 = vld [vmem:[#allocation10 + $0x3e8] ss:$16 sps:$4 sm:$0xff]  }
 0x3f3   :  { %4056 = vmatpush2.bf16.msra.mxu0 %v7481_v55  ;;  %v7568_v55 = vld [vmem:[#allocation11 + $0x18] ss:$12 sps:$4 sm:$0xff]  }
 0x3f4   :  { %v3133_v63 = vpop.f32.mrf.mxu1  ;;  %4057 = vmatprep.subr.bf16.mxu0 %v7489_v56  ;;  %v7573_v56 = vld [vmem:[#allocation11 + $0x4] ss:$12 sps:$4 sm:$0xff]  }
 0x3f5   :  { %v3134_v5 = vadd.f32 %v3133_v63, %v3091_v9  ;;  %v7532_v63 = vld [vmem:[#allocation10 + $0x3a8] ss:$16 sps:$4 sm:$0xff]  }
 0x3f6   :  { %v3135_v2 = vpop.f32.mrf.mxu1  ;;  %v7582_v9 = vld [vmem:[#allocation11 + $0x13c] ss:$12 sps:$4 sm:$0xff]  }
 0x3f7   :  { %4058 = vmatpush2.bf16.msra.mxu0 %v7487_v61  ;;  %v3136_v17 = vadd.f32 %v3135_v2, %v3093_v3  ;;  %v3144_v21 = vmax.f32 %v3134_v5, 0.0  ;;  %v7571_v61 = vld [vmem:[#allocation11] ss:$12 sps:$4 sm:$0xff]   ;;  %v7535_v3 = vld [vmem:[#allocation10 + $0x388] ss:$16 sps:$4 sm:$0xff]  }
 0x3f8   :  { %v3137_v14 = vpop.f32.mrf.mxu1  ;;  %4059 = vmatprep.subr.bf16.mxu0 %v7495_v0  ;;  %v7537_v0 = vld [vmem:[#allocation10 + $0x38c] ss:$16 sps:$4 sm:$0xff]   ;;  %v7579_v2 = vld [vmem:[#allocation11 + $0x154] ss:$12 sps:$4 sm:$0xff]  }
 0x3f9   :  { %v3138_v4 = vadd.f32 %v3137_v14, %v3095_v7  ;;  %v3145_v20 = vmax.f32 %v3136_v17, 0.0  ;;  %v7540_v7 = vld [vmem:[#allocation10 + $0x36c] ss:$16 sps:$4 sm:$0xff]   ;;  %v7538_v14 = vld [vmem:[#allocation10 + $0x368] ss:$16 sps:$4 sm:$0xff]  }
 0x3fa   :  { %v3139_v18 = vpop.f32.mrf.mxu1  ;;  %v7585_v17 = vld [vmem:[#allocation11 + $0x124] ss:$12 sps:$4 sm:$0xff]   ;;  %v7546_v5 = vld [vmem:[#allocation10 + $0x32c] ss:$16 sps:$4 sm:$0xff]  }
 0x3fb   :  { %v3140_v10 = vadd.f32 %v3139_v18, %v3097_v16  ;;  %4060 = vmatpush2.bf16.msra.mxu0 %v7493_v8  ;;  %v3148_v19 = vmax.f32 %v3138_v4, 0.0  ;;  %v7577_v8 = vld [vmem:[#allocation11 + $0x150] ss:$12 sps:$4 sm:$0xff]   ;;  %v7580_v16 = vld [vmem:[#allocation11 + $0x138] ss:$12 sps:$4 sm:$0xff]  }
 0x3fc   :  { %4061 = vmatprep.subr.bf16.mxu0 %v7501_v15  ;;  %v7543_v15 = vld [vmem:[#allocation10 + $0x34c] ss:$16 sps:$4 sm:$0xff]   ;;  %v7541_v4 = vld [vmem:[#allocation10 + $0x348] ss:$16 sps:$4 sm:$0xff]  }
 0x3fd   :  { %v3149_v13 = vmax.f32 %v3140_v10, 0.0  ;;  %v8302_v24 = vpack.c.bf16 %v3148_v19, %v3144_v21  ;;  %v7583_v18 = vld [vmem:[#allocation11 + $0x120] ss:$12 sps:$4 sm:$0xff]  }
 0x3fe   :  { %v7588_v10 = vld [vmem:[#allocation11 + $0x10c] ss:$12 sps:$4 sm:$0xff]   ;;  %v7591_v21 = vld [vmem:[#allocation11 + $0xf4] ss:$12 sps:$4 sm:$0xff]  }
 0x3ff   :  { %v3153_v22 = vpack.c.bf16 %v3149_v13, %v3145_v20  ;;  %4062 = vmatpush2.bf16.msra.mxu0 %v7499_v6  ;;  %v7544_v6 = vld [vmem:[#allocation10 + $0x328] ss:$16 sps:$4 sm:$0xff]   ;;  %v7549_v19 = vld [vmem:[#allocation10 + $0x30c] ss:$16 sps:$4 sm:$0xff]  }
 0x400   :  { %4787 = vmatprep.subr.bf16.mxu0 %v7552_v35  ;;  %v7586_v20 = vld [vmem:[#allocation11 + $0x108] ss:$12 sps:$4 sm:$0xff]   ;;  %v7603_v35 = vld [vmem:[#allocation11 + $0x210] ss:$12 sps:$4 sm:$0xff]  }
 0x401   :  { %4020 = vmatprep.mubr.bf16.mxu1 %v3153_v22  ;;  %v7547_v13 = vld [vmem:[#allocation10 + $0x308] ss:$16 sps:$4 sm:$0xff]  }
 0x402   :  { %4021 = vmatmul.mubr.bf16.vlgmr.msra.gmra.mxu1 %v8302_v24  ;;  %4064 = vmatmul.mubr.bf16.vlgmr.msra.gmra.mxu0 %v8295_v30  ;;  %v7558_v30 = vld [vmem:[#allocation11 + $0x7c] ss:$12 sps:$4 sm:$0xff]  }
 0x403   :  { %4075 = vmatpush1.bf16.msra.mxu1 %v7502_v23  ;;  %4106 = vmatprep.mubr.bf16.mxu1 %v3153_v22  ;;  %v7589_v22 = vld [vmem:[#allocation11 + $0xf0] ss:$12 sps:$4 sm:$0xff]  }
 0x404   :  { %4076 = vmatprep.subr.bf16.mxu1 %v7507_v25  ;;  %4788 = vmatpush1.bf16.msra.mxu0 %v7550_v34  ;;  %v7594_v23 = vld [vmem:[#allocation11 + $0xdc] ss:$12 sps:$4 sm:$0xff]   ;;  %v7592_v25 = vld [vmem:[#allocation11 + $0xd8] ss:$12 sps:$4 sm:$0xff]  }
 0x405   :  { %4789 = vmatprep.subr.bf16.mxu0 %v7555_v37  ;;  %v7601_v34 = vld [vmem:[#allocation11 + $0x170] ss:$12 sps:$4 sm:$0xff]   ;;  %v7608_v37 = vld [vmem:[#allocation11 + $0x1f8] ss:$12 sps:$4 sm:$0xff]  }
 0x407   :  { %4077 = vmatpush1.bf16.msra.mxu1 %v7505_v26  ;;  %v7597_v26 = vld [vmem:[#allocation11 + $0xc4] ss:$12 sps:$4 sm:$0xff]  }
 0x408   :  { %4078 = vmatprep.subr.bf16.mxu1 %v7510_v28  ;;  %4790 = vmatpush1.bf16.msra.mxu0 %v7553_v31  ;;  %v7595_v28 = vld [vmem:[#allocation11 + $0xc0] ss:$12 sps:$4 sm:$0xff]   ;;  %v7615_v31 = vld [vmem:[#allocation11 + $0x1e4] ss:$12 sps:$4 sm:$0xff]  }
 0x409   :  { %4791 = vmatprep.subr.bf16.mxu0 %v7558_v30  ;;  %v7618_v30 = vld [vmem:[#allocation11 + $0x1c8] ss:$12 sps:$4 sm:$0xff]  }
 0x40b   :  { %4079 = vmatpush1.bf16.msra.mxu1 %v7508_v29  ;;  %v7598_v29 = vld [vmem:[#allocation11 + $0x228] ss:$12 sps:$4 sm:$0xff]  }
 0x40c   :  { %4080 = vmatprep.subr.bf16.mxu1 %v7513_v32  ;;  %4792 = vmatpush1.bf16.msra.mxu0 %v7556_v33  ;;  %v7600_v32 = vld [vmem:[#allocation11 + $0x22c] ss:$12 sps:$4 sm:$0xff]   ;;  %v7625_v33 = vld [vmem:[#allocation11 + $0x1b4] ss:$12 sps:$4 sm:$0xff]  }
 0x40d   :  { %4793 = vmatprep.subr.bf16.mxu0 %v7561_v41  ;;  %v7628_v41 = vld [vmem:[#allocation11 + $0x198] ss:$12 sps:$4 sm:$0xff]  }
 0x40f   :  { %4081 = vmatpush1.bf16.msra.mxu1 %v7511_v27  ;;  %v7610_v27 = vld [vmem:[#allocation11 + $0x1fc] ss:$12 sps:$4 sm:$0xff]  }
 0x410   :  { %4082 = vmatprep.subr.bf16.mxu1 %v7516_v38  ;;  %4794 = vmatpush1.bf16.msra.mxu0 %v7559_v43  ;;  %v7613_v38 = vld [vmem:[#allocation11 + $0x1e0] ss:$12 sps:$4 sm:$0xff]   ;;  %v7635_v43 = vld [vmem:[#allocation11 + $0x184] ss:$12 sps:$4 sm:$0xff]  }
 0x411   :  { %4795 = vmatprep.subr.bf16.mxu0 %v7564_v44  ;;  %v7638_v44 = vld [vmem:[#allocation11 + $0x2e8] ss:$12 sps:$4 sm:$0xff]  }
 0x413   :  { %4083 = vmatpush1.bf16.msra.mxu1 %v7514_v39  ;;  %v7620_v39 = vld [vmem:[#allocation11 + $0x1cc] ss:$12 sps:$4 sm:$0xff]  }
 0x414   :  { %4084 = vmatprep.subr.bf16.mxu1 %v7519_v40  ;;  %4796 = vmatpush1.bf16.msra.mxu0 %v7562_v47  ;;  %v7623_v40 = vld [vmem:[#allocation11 + $0x1b0] ss:$12 sps:$4 sm:$0xff]   ;;  %v7643_v47 = vld [vmem:[#allocation11 + $0x2d4] ss:$12 sps:$4 sm:$0xff]  }
 0x415   :  { %4797 = vmatprep.subr.bf16.mxu0 %v7567_v48  ;;  %v7646_v48 = vld [vmem:[#allocation11 + $0x2bc] ss:$12 sps:$4 sm:$0xff]  }
 0x417   :  { %4085 = vmatpush1.bf16.msra.mxu1 %v7517_v36  ;;  %v7630_v36 = vld [vmem:[#allocation11 + $0x19c] ss:$12 sps:$4 sm:$0xff]  }
 0x418   :  { %4086 = vmatprep.subr.bf16.mxu1 %v7522_v42  ;;  %4798 = vmatpush1.bf16.msra.mxu0 %v7565_v51  ;;  %v7633_v42 = vld [vmem:[#allocation11 + $0x180] ss:$12 sps:$4 sm:$0xff]  }
 0x419   :  { %4799 = vmatprep.subr.bf16.mxu0 %v7570_v52  ;;  %v7647_v51 = vld [vmem:[#allocation11 + $0x2a0] ss:$12 sps:$4 sm:$0xff]  }
 0x41a   :  { %v7652_v52 = vld [vmem:[#allocation11 + $0x28c] ss:$12 sps:$4 sm:$0xff]  }
 0x41b   :  { %4087 = vmatpush1.bf16.msra.mxu1 %v7520_v45  ;;  %v7640_v45 = vld [vmem:[#allocation11 + $0x2ec] ss:$12 sps:$4 sm:$0xff]  }
 0x41c   :  { %4088 = vmatprep.subr.bf16.mxu1 %v7525_v46  ;;  %4800 = vmatpush1.bf16.msra.mxu0 %v7568_v55  ;;  %v7641_v46 = vld [vmem:[#allocation11 + $0x2d0] ss:$12 sps:$4 sm:$0xff]  }
 0x41d   :  { %4801 = vmatprep.subr.bf16.mxu0 %v7573_v56  ;;  %v7653_v55 = vld [vmem:[#allocation11 + $0x270] ss:$12 sps:$4 sm:$0xff]  }
 0x41e   :  { %v7658_v56 = vld [vmem:[#allocation11 + $0x25c] ss:$12 sps:$4 sm:$0xff]  }
 0x41f   :  { %4089 = vmatpush1.bf16.msra.mxu1 %v7523_v49  ;;  %v7644_v49 = vld [vmem:[#allocation11 + $0x2b8] ss:$12 sps:$4 sm:$0xff]  }
 0x420   :  { %4090 = vmatprep.subr.bf16.mxu1 %v7528_v50  ;;  %4802 = vmatpush1.bf16.msra.mxu0 %v7571_v61  ;;  %v7649_v50 = vld [vmem:[#allocation11 + $0x2a4] ss:$12 sps:$4 sm:$0xff]   ;;  %v7659_v61 = vld [vmem:[#allocation11 + $0x240] ss:$12 sps:$4 sm:$0xff]  }
 0x421   :  { %4803 = vmatprep.subr.bf16.mxu0 %v7576_v62  ;;  %v7662_v62 = vld [vmem:[#allocation11 + $0x2f0] ss:$12 sps:$4 sm:$0xff]  }
 0x423   :  { %4091 = vmatpush2.bf16.msra.mxu1 %v7526_v53  ;;  %v7650_v53 = vld [vmem:[#allocation11 + $0x288] ss:$12 sps:$4 sm:$0xff]  }
 0x424   :  { %4092 = vmatprep.subr.bf16.mxu1 %v7531_v54  ;;  %4804 = vmatpush2.bf16.msra.mxu0 %v7574_v1  ;;  %v7655_v54 = vld [vmem:[#allocation11 + $0x274] ss:$12 sps:$4 sm:$0xff]  }
 0x425   :  { %4805 = vmatprep.subr.bf16.mxu0 %v7579_v2  ;;  %v3155_v1 = vld [vmem:[#allocation20 + $0x3] ss:$8 sm:$0xf] }
 0x427   :  { %4093 = vmatpush2.bf16.msra.mxu1 %v7529_v57  ;;  %v7656_v57 = vld [vmem:[#allocation11 + $0x258] ss:$12 sps:$4 sm:$0xff]  }
 0x428   :  { %4094 = vmatprep.subr.bf16.mxu1 %v7534_v58  ;;  %4806 = vmatpush2.bf16.msra.mxu0 %v7577_v8  ;;  %v7661_v58 = vld [vmem:[#allocation11 + $0x244] ss:$12 sps:$4 sm:$0xff]  }
 0x429   :  { %4807 = vmatprep.subr.bf16.mxu0 %v7582_v9 }
 0x42b   :  { %4095 = vmatpush2.bf16.msra.mxu1 %v7532_v63 }
 0x42c   :  { %4096 = vmatprep.subr.bf16.mxu1 %v7537_v0  ;;  %4808 = vmatpush2.bf16.msra.mxu0 %v7580_v16 }
 0x42d   :  { %4809 = vmatprep.subr.bf16.mxu0 %v7585_v17 }
 0x42f   :  { %4097 = vmatpush2.bf16.msra.mxu1 %v7535_v3  ;;  %v3292_v3 = vrot.slane %v3155_v1, %v8244_v11 }
 0x430   :  { %4098 = vmatprep.subr.bf16.mxu1 %v7540_v7  ;;  %4810 = vmatpush2.bf16.msra.mxu0 %v7583_v18  ;;  %v3288_v7 = vrot.slane %v3155_v1, %v8247_v12 }
 0x431   :  { %4811 = vmatprep.subr.bf16.mxu0 %v7588_v10 }
 0x433   :  { %4099 = vmatpush2.bf16.msra.mxu1 %v7538_v14 }
 0x434   :  { %4100 = vmatprep.subr.bf16.mxu1 %v7543_v15  ;;  %4812 = vmatpush2.bf16.msra.mxu0 %v7586_v20 }
 0x435   :  { %4813 = vmatprep.subr.bf16.mxu0 %v7591_v21 }
 0x437   :  { %4101 = vmatpush2.bf16.msra.mxu1 %v7541_v4 }
 0x438   :  { %4102 = vmatprep.subr.bf16.mxu1 %v7546_v5  ;;  %4814 = vmatpush2.bf16.msra.mxu0 %v7589_v22 }
 0x439   :  { %4815 = vmatprep.subr.bf16.mxu0 %v7594_v23 }
 0x43b   :  { %4103 = vmatpush2.bf16.msra.mxu1 %v7544_v6 }
 0x43c   :  { %4104 = vmatprep.subr.bf16.mxu1 %v7549_v19  ;;  %4816 = vmatpush2.bf16.msra.mxu0 %v7592_v25 }
 0x43d   :  { %4817 = vmatprep.subr.bf16.mxu0 %v7597_v26  ;;  %v7602_v26 = vld [vmem:[#allocation11 + $0xb0] ss:$12 sps:$4 sm:$0xff]  }
 0x43f   :  { %4105 = vmatpush2.bf16.msra.mxu1 %v7547_v13 }
 0x440   :  { %4818 = vmatpush2.bf16.msra.mxu0 %v7595_v28  ;;  %4830 = vmatprep.subr.bf16.mxu1 %v7600_v32  ;;  %v7607_v32 = vld [vmem:[#allocation11 + $0x98] ss:$12 sps:$4 sm:$0xff]  }
 0x441   :  { %6597 = vmatprep.subr.bf16.mxu0 %v7601_v34  ;;  %v7611_v34 = vld [vmem:[#allocation11 + $0x140] ss:$12 sps:$4 sm:$0xff]  }
 0x442   :  { %4107 = vmatmul.mubr.bf16.vlgmr.msra.gmra.mxu1 %v8302_v24  ;;  %v7605_v24 = vld [vmem:[#allocation11 + $0x214] ss:$12 sps:$4 sm:$0xff]  }
 0x443   :  { %4831 = vmatpush1.bf16.msra.mxu1 %v7598_v29  ;;  %v7606_v29 = vld [vmem:[#allocation11 + $0x158] ss:$12 sps:$4 sm:$0xff]  }
 0x444   :  { %4832 = vmatprep.subr.bf16.mxu1 %v7605_v24  ;;  %v7616_v24 = vld [vmem:[#allocation11 + $0x128] ss:$12 sps:$4 sm:$0xff]  }
 0x447   :  { %4833 = vmatpush1.bf16.msra.mxu1 %v7603_v35  ;;  %v7612_v35 = vld [vmem:[#allocation11 + $0x80] ss:$12 sps:$4 sm:$0xff]  }
 0x448   :  { %4834 = vmatprep.subr.bf16.mxu1 %v7610_v27  ;;  %v7621_v27 = vld [vmem:[#allocation11 + $0x110] ss:$12 sps:$4 sm:$0xff]  }
 0x44b   :  { %4835 = vmatpush1.bf16.msra.mxu1 %v7608_v37  ;;  %v7617_v37 = vld [vmem:[#allocation11 + $0x68] ss:$12 sps:$4 sm:$0xff]  }
 0x44c   :  { %4836 = vmatprep.subr.bf16.mxu1 %v7615_v31  ;;  %v7626_v31 = vld [vmem:[#allocation11 + $0xf8] ss:$12 sps:$4 sm:$0xff]  }
 0x44f   :  { %4837 = vmatpush1.bf16.msra.mxu1 %v7613_v38  ;;  %v7622_v38 = vld [vmem:[#allocation11 + $0x50] ss:$12 sps:$4 sm:$0xff]  }
 0x450   :  { %4838 = vmatprep.subr.bf16.mxu1 %v7620_v39  ;;  %v7631_v39 = vld [vmem:[#allocation11 + $0xe0] ss:$12 sps:$4 sm:$0xff]  }
 0x453   :  { %4839 = vmatpush1.bf16.msra.mxu1 %v7618_v30  ;;  %v7627_v30 = vld [vmem:[#allocation11 + $0x38] ss:$12 sps:$4 sm:$0xff]  }
 0x454   :  { %4840 = vmatprep.subr.bf16.mxu1 %v7625_v33  ;;  %v7636_v33 = vld [vmem:[#allocation11 + $0xc8] ss:$12 sps:$4 sm:$0xff]  }
 0x457   :  { %4841 = vmatpush1.bf16.msra.mxu1 %v7623_v40  ;;  %v7632_v40 = vld [vmem:[#allocation11 + $0x20] ss:$12 sps:$4 sm:$0xff]  }
 0x458   :  { %4842 = vmatprep.subr.bf16.mxu1 %v7630_v36 }
 0x45b   :  { %4843 = vmatpush1.bf16.msra.mxu1 %v7628_v41  ;;  %v7637_v41 = vld [vmem:[#allocation11 + $0x8] ss:$12 sps:$4 sm:$0xff]  }
 0x45c   :  { %4844 = vmatprep.subr.bf16.mxu1 %v7635_v43 }
 0x45f   :  { %4845 = vmatpush1.bf16.msra.mxu1 %v7633_v42 }
 0x460   :  { %4846 = vmatprep.subr.bf16.mxu1 %v7640_v45  ;;  %v3296_v45 = vrot.slane %v3155_v1, %v8257_v59 }
 0x463   :  { %4847 = vmatpush2.bf16.msra.mxu1 %v7638_v44  ;;  %v3300_v44 = vrot.slane %v3155_v1, %v8260_v60 }
 0x464   :  { %4848 = vmatprep.subr.bf16.mxu1 %v7643_v47 }
 0x467   :  { %4849 = vmatpush2.bf16.msra.mxu1 %v7641_v46 }
 0x468   :  { %4850 = vmatprep.subr.bf16.mxu1 %v7646_v48 }
 0x46b   :  { %4851 = vmatpush2.bf16.msra.mxu1 %v7644_v49 }
 0x46c   :  { %4852 = vmatprep.subr.bf16.mxu1 %v7649_v50 }
 0x46f   :  { %4853 = vmatpush2.bf16.msra.mxu1 %v7647_v51 }
 0x470   :  { %4854 = vmatprep.subr.bf16.mxu1 %v7652_v52 }
 0x473   :  { %4855 = vmatpush2.bf16.msra.mxu1 %v7650_v53 }
 0x474   :  { %4856 = vmatprep.subr.bf16.mxu1 %v7655_v54 }
 0x477   :  { %4857 = vmatpush2.bf16.msra.mxu1 %v7653_v55 }
 0x478   :  { %4858 = vmatprep.subr.bf16.mxu1 %v7658_v56 }
 0x47b   :  { %4859 = vmatpush2.bf16.msra.mxu1 %v7656_v57 }
 0x47c   :  { %4860 = vmatprep.subr.bf16.mxu1 %v7661_v58 }
 0x47f   :  { %4861 = vmatpush2.bf16.msra.mxu1 %v7659_v61 }
 0x480   :  { %6619 = vmatprep.subr.bf16.mxu1 %v7662_v62 }
 0x482   :  { %v3979_v63 = vpop.f32.mrf.mxu0 }
 0x483   :  { %v3980_v17 = vadd.f32 %v3979_v63, %v3288_v7 }
 0x484   :  { %v3981_v0 = vpop.f32.mrf.mxu0 }
 0x485   :  { %v3982_v15 = vadd.f32 %v3981_v0, %v3292_v3 }
 0x486   :  { %v3983_v2 = vpop.f32.mrf.mxu0 }
 0x487   :  { %v3984_v16 = vadd.f32 %v3983_v2, %v3288_v7  ;;  %v7663_v2 = vld [vmem:[#allocation11 + $0x230] ss:$12 sps:$4 sm:$0xff]   ;;  %v7665_v7 = vld [vmem:[#allocation11 + $0x218] ss:$12 sps:$4 sm:$0xff]  }
 0x488   :  { %v3985_v9 = vpop.f32.mrf.mxu0 }
 0x489   :  { %v3986_v5 = vadd.f32 %v3985_v9, %v3292_v3  ;;  %v7664_v3 = vld [vmem:[#allocation11 + $0x2d8] ss:$12 sps:$4 sm:$0xff]   ;;  %v7667_v9 = vld [vmem:[#allocation11 + $0x200] ss:$12 sps:$4 sm:$0xff]  }
 0x4c2   :  { %v4022_v8 = vpop.f32.mrf.mxu1  ;;  %v4065_v36 = vpop.f32.mrf.mxu0 }
 0x4c3   :  { %v4023_v6 = vadd.f32 %v4022_v8, %v3980_v17  ;;  %v4066_v51 = vadd.f32 %v4065_v36, %v3296_v45  ;;  %v7666_v8 = vld [vmem:[#allocation11 + $0x2c0] ss:$12 sps:$4 sm:$0xff]  }
 0x4c4   :  { %v4024_v14 = vpop.f32.mrf.mxu1  ;;  %v4067_v42 = vpop.f32.mrf.mxu0  ;;  %v7683_v17 = vld [vmem:[#allocation13 + $0x64] ss:$8 sps:$4 sm:$0xff]  }
 0x4c5   :  { %v4025_v18 = vadd.f32 %v4024_v14, %v3982_v15  ;;  %v4117_v23 = vmax.f32 %v4023_v6, 0.0  ;;  %v4068_v49 = vadd.f32 %v4067_v42, %v3300_v44  ;;  %v7668_v14 = vld [vmem:[#allocation11 + $0x2a8] ss:$12 sps:$4 sm:$0xff]   ;;  %v7678_v15 = vld [vmem:[#allocation13 + $0x70] ss:$8 sps:$4 sm:$0xff]  }
 0x4c6   :  { %v4026_v4 = vpop.f32.mrf.mxu1  ;;  %v4069_v43 = vpop.f32.mrf.mxu0  ;;  %v7671_v6 = vld [vmem:[#allocation11 + $0x1d0] ss:$12 sps:$4 sm:$0xff]   ;;  %v7713_v36 = vld [vmem:[#allocation13 + $0xc4] ss:$8 sps:$4 sm:$0xff]   ;;  %v7711_v42 = vld [vmem:[#allocation13 + $0xc0] ss:$8 sps:$4 sm:$0xff]  }
 0x4c7   :  { %v4027_v10 = vadd.f32 %v4026_v4, %v3984_v16  ;;  %v4118_v21 = vmax.f32 %v4025_v18, 0.0  ;;  %v4070_v50 = vadd.f32 %v4069_v43, %v3296_v45  ;;  %v7680_v16 = vld [vmem:[#allocation13 + $0x74] ss:$8 sps:$4 sm:$0xff]   ;;  %v7681_v18 = vld [vmem:[#allocation13 + $0x60] ss:$8 sps:$4 sm:$0xff]  }
 0x4c8   :  { %v4028_v19 = vpop.f32.mrf.mxu1  ;;  %v4071_v47 = vpop.f32.mrf.mxu0  ;;  %v7669_v4 = vld [vmem:[#allocation11 + $0x1e8] ss:$12 sps:$4 sm:$0xff]   ;;  %v7719_v45 = vld [vmem:[#allocation13 + $0xa4] ss:$8 sps:$4 sm:$0xff]  }
 0x4c9   :  { %v4029_v20 = vadd.f32 %v4028_v19, %v3986_v5  ;;  %v4121_v13 = vmax.f32 %v4027_v10, 0.0  ;;  %v4072_v53 = vadd.f32 %v4071_v47, %v3300_v44  ;;  %v7670_v5 = vld [vmem:[#allocation11 + $0x290] ss:$12 sps:$4 sm:$0xff]   ;;  %v7672_v19 = vld [vmem:[#allocation11 + $0x278] ss:$12 sps:$4 sm:$0xff]  }
 0x4ca   :  { %v7686_v10 = vld [vmem:[#allocation13 + $0x54] ss:$8 sps:$4 sm:$0xff]   ;;  %v7714_v44 = vld [vmem:[#allocation13 + $0xb0] ss:$8 sps:$4 sm:$0xff]  }
 0x4cb   :  { %v4122_v22 = vmax.f32 %v4029_v20, 0.0  ;;  %v4125_v28 = vpack.c.bf16 %v4121_v13, %v4117_v23  ;;  %v7684_v20 = vld [vmem:[#allocation13 + $0x50] ss:$8 sps:$4 sm:$0xff]   ;;  %v7689_v13 = vld [vmem:[#allocation13 + $0x44] ss:$8 sps:$4 sm:$0xff]  }
 0x4cc   :  { %v7687_v23 = vld [vmem:[#allocation13 + $0x40] ss:$8 sps:$4 sm:$0xff]   ;;  %v7716_v43 = vld [vmem:[#allocation13 + $0xb4] ss:$8 sps:$4 sm:$0xff]  }
 0x4cd   :  { %v4126_v25 = vpack.c.bf16 %v4122_v22, %v4118_v21  ;;  %v7673_v21 = vld [vmem:[#allocation11 + $0x1b8] ss:$12 sps:$4 sm:$0xff]   ;;  %v7674_v22 = vld [vmem:[#allocation11 + $0x260] ss:$12 sps:$4 sm:$0xff]   ;;  %v7722_v47 = vld [vmem:[#allocation13 + $0x94] ss:$8 sps:$4 sm:$0xff]  }
 0x4cf   :  { %4819 = vmatprep.mubr.bf16.mxu0 %v4126_v25 }
 0x4d0   :  { %4820 = vmatmul.mubr.bf16.vlgmr.msra.gmra.mxu0 %v4125_v28 }
 0x4d1   :  { %6598 = vmatpush3.bf16.msra.mxu0 %v7602_v26  ;;  %4905 = vmatprep.mubr.bf16.mxu0 %v4126_v25  ;;  %v7692_v25 = vld [vmem:[#allocation13 + $0x34] ss:$8 sps:$4 sm:$0xff]   ;;  %v7675_v26 = vld [vmem:[#allocation11 + $0x1a0] ss:$12 sps:$4 sm:$0xff]  }
 0x4d2   :  { %6599 = vmatprep.subr.bf16.mxu0 %v7606_v29  ;;  %v7690_v29 = vld [vmem:[#allocation13 + $0x30] ss:$8 sps:$4 sm:$0xff]  }
 0x4d5   :  { %6600 = vmatpush3.bf16.msra.mxu0 %v7607_v32  ;;  %v7677_v32 = vld [vmem:[#allocation11 + $0x188] ss:$12 sps:$4 sm:$0xff]  }
 0x4d6   :  { %6601 = vmatprep.subr.bf16.mxu0 %v7611_v34  ;;  %v7695_v34 = vld [vmem:[#allocation13 + $0x24] ss:$8 sps:$4 sm:$0xff]  }
 0x4d9   :  { %6602 = vmatpush3.bf16.msra.mxu0 %v7612_v35  ;;  %v7693_v35 = vld [vmem:[#allocation13 + $0x20] ss:$8 sps:$4 sm:$0xff]  }
 0x4da   :  { %6603 = vmatprep.subr.bf16.mxu0 %v7616_v24  ;;  %v7698_v24 = vld [vmem:[#allocation13 + $0x14] ss:$8 sps:$4 sm:$0xff]  }
 0x4dd   :  { %6604 = vmatpush3.bf16.msra.mxu0 %v7617_v37  ;;  %v7696_v37 = vld [vmem:[#allocation13 + $0x10] ss:$8 sps:$4 sm:$0xff]  }
 0x4de   :  { %6605 = vmatprep.subr.bf16.mxu0 %v7621_v27  ;;  %v7699_v27 = vld [vmem:[#allocation13] ss:$8 sps:$4 sm:$0xff]  }
 0x4e1   :  { %6606 = vmatpush3.bf16.msra.mxu0 %v7622_v38  ;;  %v7701_v38 = vld [vmem:[#allocation13 + $0x4] ss:$8 sps:$4 sm:$0xff]  }
 0x4e2   :  { %6607 = vmatprep.subr.bf16.mxu0 %v7626_v31  ;;  %v7704_v31 = vld [vmem:[#allocation13 + $0xf4] ss:$8 sps:$4 sm:$0xff]  }
 0x4e5   :  { %6608 = vmatpush3.bf16.msra.mxu0 %v7627_v30  ;;  %v7702_v30 = vld [vmem:[#allocation13 + $0xf0] ss:$8 sps:$4 sm:$0xff]  }
 0x4e6   :  { %6609 = vmatprep.subr.bf16.mxu0 %v7631_v39  ;;  %v7707_v39 = vld [vmem:[#allocation13 + $0xe4] ss:$8 sps:$4 sm:$0xff]  }
 0x4e9   :  { %6610 = vmatpush3.bf16.msra.mxu0 %v7632_v40  ;;  %v7705_v40 = vld [vmem:[#allocation13 + $0xe0] ss:$8 sps:$4 sm:$0xff]  }
 0x4ea   :  { %6611 = vmatprep.subr.bf16.mxu0 %v7636_v33  ;;  %v7710_v33 = vld [vmem:[#allocation13 + $0xd4] ss:$8 sps:$4 sm:$0xff]  }
 0x4ed   :  { %6612 = vmatpush3.bf16.msra.mxu0 %v7637_v41  ;;  %v7708_v41 = vld [vmem:[#allocation13 + $0xd0] ss:$8 sps:$4 sm:$0xff]  }
 0x4ee   :  { %5265 = vmatprep.subr.bf16.mxu0 %v7680_v16 }
 0x4f0   :  { %4906 = vmatmul.mubr.bf16.vlgmr.msra.gmra.mxu0 %v4125_v28  ;;  %v7676_v28 = vld [vmem:[#allocation11 + $0x248] ss:$12 sps:$4 sm:$0xff]  }
 0x4f1   :  { %5266 = vmatpush1.bf16.msra.mxu0 %v7678_v15 }
 0x4f2   :  { %5267 = vmatprep.subr.bf16.mxu0 %v7683_v17 }
 0x4f5   :  { %5268 = vmatpush1.bf16.msra.mxu0 %v7681_v18 }
 0x4f6   :  { %5269 = vmatprep.subr.bf16.mxu0 %v7686_v10 }
 0x4f9   :  { %5270 = vmatpush1.bf16.msra.mxu0 %v7684_v20 }
 0x4fa   :  { %5271 = vmatprep.subr.bf16.mxu0 %v7689_v13 }
 0x4fd   :  { %5272 = vmatpush1.bf16.msra.mxu0 %v7687_v23 }
 0x4fe   :  { %5273 = vmatprep.subr.bf16.mxu0 %v7692_v25 }
 0x501   :  { %5274 = vmatpush1.bf16.msra.mxu0 %v7690_v29 }
 0x502   :  { %v4108_v46 = vpop.f32.mrf.mxu1  ;;  %5275 = vmatprep.subr.bf16.mxu0 %v7695_v34 }
 0x503   :  { %v4109_v56 = vadd.f32 %v4108_v46, %v4066_v51  ;;  %v7717_v46 = vld [vmem:[#allocation13 + $0xa0] ss:$8 sps:$4 sm:$0xff]   ;;  %v7728_v51 = vld [vmem:[#allocation13 + $0x174] ss:$8 sps:$4 sm:$0xff]  }
 0x504   :  { %v4110_v48 = vpop.f32.mrf.mxu1 }
 0x505   :  { %v4111_v54 = vadd.f32 %v4110_v48, %v4068_v49  ;;  %v4119_v0 = vmax.f32 %v4109_v56, 0.0  ;;  %5276 = vmatpush1.bf16.msra.mxu0 %v7693_v35  ;;  %v7720_v48 = vld [vmem:[#allocation13 + $0x90] ss:$8 sps:$4 sm:$0xff]   ;;  %v7725_v49 = vld [vmem:[#allocation13 + $0x84] ss:$8 sps:$4 sm:$0xff]  }
 0x506   :  { %v4112_v52 = vpop.f32.mrf.mxu1  ;;  %5277 = vmatprep.subr.bf16.mxu0 %v7698_v24  ;;  %v7732_v56 = vld [vmem:[#allocation13 + $0x150] ss:$8 sps:$4 sm:$0xff]  }
 0x507   :  { %v4113_v55 = vadd.f32 %v4112_v52, %v4070_v50  ;;  %v4120_v62 = vmax.f32 %v4111_v54, 0.0  ;;  %v7723_v50 = vld [vmem:[#allocation13 + $0x80] ss:$8 sps:$4 sm:$0xff]   ;;  %v7726_v52 = vld [vmem:[#allocation13 + $0x170] ss:$8 sps:$4 sm:$0xff]  }
 0x508   :  { %v4114_v57 = vpop.f32.mrf.mxu1  ;;  %v7729_v54 = vld [vmem:[#allocation13 + $0x160] ss:$8 sps:$4 sm:$0xff]  }
 0x509   :  { %v4115_v58 = vadd.f32 %v4114_v57, %v4072_v53  ;;  %v4123_v61 = vmax.f32 %v4113_v55, 0.0  ;;  %5278 = vmatpush1.bf16.msra.mxu0 %v7696_v37  ;;  %v7731_v53 = vld [vmem:[#allocation13 + $0x164] ss:$8 sps:$4 sm:$0xff]   ;;  %v7734_v55 = vld [vmem:[#allocation13 + $0x154] ss:$8 sps:$4 sm:$0xff]  }
 0x50a   :  { %5279 = vmatprep.subr.bf16.mxu0 %v7701_v38  ;;  %v7737_v57 = vld [vmem:[#allocation13 + $0x144] ss:$8 sps:$4 sm:$0xff]  }
 0x50b   :  { %v4124_v63 = vmax.f32 %v4115_v58, 0.0  ;;  %v4127_v1 = vpack.c.bf16 %v4123_v61, %v4119_v0  ;;  %v7735_v58 = vld [vmem:[#allocation13 + $0x140] ss:$8 sps:$4 sm:$0xff]   ;;  %v7740_v61 = vld [vmem:[#allocation13 + $0x134] ss:$8 sps:$4 sm:$0xff]  }
 0x50c   :  { %v7741_v0 = vld [vmem:[#allocation13 + $0x120] ss:$8 sps:$4 sm:$0xff]  }
 0x50d   :  { %v4128_v60 = vpack.c.bf16 %v4124_v63, %v4120_v62  ;;  %5280 = vmatpush1.bf16.msra.mxu0 %v7699_v27  ;;  %v7738_v62 = vld [vmem:[#allocation13 + $0x130] ss:$8 sps:$4 sm:$0xff]   ;;  %v7743_v63 = vld [vmem:[#allocation13 + $0x124] ss:$8 sps:$4 sm:$0xff]  }
 0x50e   :  { %5281 = vmatprep.subr.bf16.mxu0 %v7704_v31 }
 0x50f   :  { %4862 = vmatprep.mubr.bf16.mxu1 %v4128_v60 }
 0x510   :  { %4863 = vmatmul.mubr.bf16.vlgmr.msra.gmra.mxu1 %v4127_v1 }
 0x511   :  { %6620 = vmatpush3.bf16.msra.mxu1 %v7663_v2  ;;  %4946 = vmatprep.mubr.bf16.mxu1 %v4128_v60  ;;  %v7746_v60 = vld [vmem:[#allocation13 + $0x114] ss:$8 sps:$4 sm:$0xff]   ;;  %v7744_v2 = vld [vmem:[#allocation13 + $0x110] ss:$8 sps:$4 sm:$0xff]  }
 0x512   :  { %6621 = vmatprep.subr.bf16.mxu1 %v7664_v3  ;;  %5282 = vmatpush2.bf16.msra.mxu0 %v7702_v30  ;;  %v7747_v3 = vld [vmem:[#allocation13 + $0x100] ss:$8 sps:$4 sm:$0xff]  }
 0x513   :  { %5283 = vmatprep.subr.bf16.mxu0 %v7707_v39 }
 0x515   :  { %6622 = vmatpush3.bf16.msra.mxu1 %v7665_v7  ;;  %v8096_v7 = vmov 0  }
 0x516   :  { %6623 = vmatprep.subr.bf16.mxu1 %v7666_v8  ;;  %5284 = vmatpush2.bf16.msra.mxu0 %v7705_v40 }
 0x517   :  { %5285 = vmatprep.subr.bf16.mxu0 %v7710_v33 }
 0x519   :  { %6624 = vmatpush3.bf16.msra.mxu1 %v7667_v9 }
 0x51a   :  { %6625 = vmatprep.subr.bf16.mxu1 %v7668_v14  ;;  %5286 = vmatpush2.bf16.msra.mxu0 %v7708_v41  ;;  %v4130_v14 = vld [vmem:[#allocation20 + $0x4] ss:$8 sm:$0x7] }
 0x51b   :  { %5287 = vmatprep.subr.bf16.mxu0 %v7713_v36  ;;  %v4267_v16 = vrot.slane %v4130_v14, %v8244_v11  ;;  %v4263_v17 = vrot.slane %v4130_v14, %v8247_v12  ;;  %v4271_v39 = vrot.slane %v4130_v14, %v8257_v59  ;;  %v7753_v59 = vld [vmem:[#allocation14 + $0x30] sm:$0xff]   ;;  %v7768_v14 = vld [vmem:[#allocation16 + $0x28] sm:$0xff]  }
 0x51d   :  { %6626 = vmatpush3.bf16.msra.mxu1 %v7669_v4 }
 0x51e   :  { %6627 = vmatprep.subr.bf16.mxu1 %v7670_v5  ;;  %5288 = vmatpush2.bf16.msra.mxu0 %v7711_v42 }
 0x51f   :  { %5289 = vmatprep.subr.bf16.mxu0 %v7716_v43 }
 0x521   :  { %6628 = vmatpush3.bf16.msra.mxu1 %v7671_v6 }
 0x522   :  { %6629 = vmatprep.subr.bf16.mxu1 %v7672_v19  ;;  %5290 = vmatpush2.bf16.msra.mxu0 %v7714_v44 }
 0x523   :  { %5291 = vmatprep.subr.bf16.mxu0 %v7719_v45 }
 0x525   :  { %6630 = vmatpush3.bf16.msra.mxu1 %v7673_v21 }
 0x526   :  { %6631 = vmatprep.subr.bf16.mxu1 %v7674_v22  ;;  %5292 = vmatpush2.bf16.msra.mxu0 %v7717_v46 }
 0x527   :  { %5293 = vmatprep.subr.bf16.mxu0 %v7722_v47 }
 0x529   :  { %6632 = vmatpush3.bf16.msra.mxu1 %v7675_v26 }
 0x52a   :  { %6633 = vmatprep.subr.bf16.mxu1 %v7676_v28  ;;  %5294 = vmatpush2.bf16.msra.mxu0 %v7720_v48 }
 0x52b   :  { %5295 = vmatprep.subr.bf16.mxu0 %v7725_v49 }
 0x52d   :  { %6634 = vmatpush3.bf16.msra.mxu1 %v7677_v32 }
 0x52e   :  { %5296 = vmatpush2.bf16.msra.mxu0 %v7723_v50  ;;  %5308 = vmatprep.subr.bf16.mxu1 %v7728_v51 }
 0x530   :  { %4947 = vmatmul.mubr.bf16.vlgmr.msra.gmra.mxu1 %v4127_v1  ;;  %v7749_v1 = vld [vmem:[#allocation13 + $0x104] ss:$8 sps:$4 sm:$0xff]  }
 0x531   :  { %5309 = vmatpush1.bf16.msra.mxu1 %v7726_v52  ;;  %5340 = vmatprep.mubr.bf16.mxu1 %v8096_v7  ;;  %v7750_v52 = vld [vmem:[#allocation14 + $0x78] sm:$0xff]  }
 0x532   :  { %5310 = vmatprep.subr.bf16.mxu1 %v7731_v53  ;;  %v7751_v53 = vld [vmem:[#allocation14 + $0x38] sm:$0xff]  }
 0x533   :  { %v7766_v7 = vld [vmem:[#allocation16 + $0x38] sm:$0xff]  }
 0x535   :  { %5311 = vmatpush1.bf16.msra.mxu1 %v7729_v54  ;;  %v7752_v54 = vld [vmem:[#allocation14 + $0x70] sm:$0xff]  }
 0x536   :  { %5312 = vmatprep.subr.bf16.mxu1 %v7734_v55  ;;  %v7754_v55 = vld [vmem:[#allocation14 + $0x68] sm:$0xff]  }
 0x539   :  { %5313 = vmatpush1.bf16.msra.mxu1 %v7732_v56  ;;  %v7755_v56 = vld [vmem:[#allocation14 + $0x28] sm:$0xff]  }
 0x53a   :  { %5314 = vmatprep.subr.bf16.mxu1 %v7737_v57  ;;  %v7756_v57 = vld [vmem:[#allocation14 + $0x60] sm:$0xff]  }
 0x53d   :  { %5315 = vmatpush1.bf16.msra.mxu1 %v7735_v58  ;;  %v7757_v58 = vld [vmem:[#allocation14 + $0x20] sm:$0xff]  }
 0x53e   :  { %5316 = vmatprep.subr.bf16.mxu1 %v7740_v61  ;;  %v7758_v61 = vld [vmem:[#allocation14 + $0x58] sm:$0xff]  }
 0x541   :  { %5317 = vmatpush1.bf16.msra.mxu1 %v7738_v62  ;;  %v7759_v62 = vld [vmem:[#allocation14 + $0x18] sm:$0xff]  }
 0x542   :  { %5318 = vmatprep.subr.bf16.mxu1 %v7743_v63  ;;  %v7760_v63 = vld [vmem:[#allocation14 + $0x50] sm:$0xff]  }
 0x545   :  { %5319 = vmatpush1.bf16.msra.mxu1 %v7741_v0  ;;  %v7761_v0 = vld [vmem:[#allocation14 + $0x10] sm:$0xff]  }
 0x546   :  { %5320 = vmatprep.subr.bf16.mxu1 %v7746_v60  ;;  %v7762_v60 = vld [vmem:[#allocation14 + $0x48] sm:$0xff]  }
 0x549   :  { %5321 = vmatpush1.bf16.msra.mxu1 %v7744_v2  ;;  %v7763_v2 = vld [vmem:[#allocation14 + $0x8] sm:$0xff]  }
 0x54a   :  { %5322 = vmatprep.subr.bf16.mxu1 %v7749_v1  ;;  %v7764_v1 = vld [vmem:[#allocation14 + $0x40] sm:$0xff]  }
 0x54d   :  { %5323 = vmatpush1.bf16.msra.mxu1 %v7747_v3  ;;  %v7765_v3 = vld [vmem:[#allocation14] sm:$0xff]  }
 0x54e   :  { %6641 = vmatprep.subr.bf16.mxu1 %v7750_v52 }
 0x590   :  { %v4821_v8 = vpop.f32.mrf.mxu0 }
 0x591   :  { %v4822_v19 = vadd.f32 %v4821_v8, %v4263_v17  ;;  %v8097_v8 = vmov 0.0  }
 0x592   :  { %v4823_v9 = vpop.f32.mrf.mxu0  ;;  %6690 = vmatprep.subr.bf16.mxu0 %v8097_v8 }
 0x593   :  { %v4824_v10 = vadd.f32 %v4823_v9, %v4267_v16  ;;  %v7767_v9 = vld [vmem:[#allocation16 + $0x30] sm:$0xff]  }
 0x594   :  { %v4825_v15 = vpop.f32.mrf.mxu0 }
 0x595   :  { %v4826_v6 = vadd.f32 %v4825_v15, %v4263_v17  ;;  %v7769_v15 = vld [vmem:[#allocation16 + $0x20] sm:$0xff]  }
 0x596   :  { %v4827_v5 = vpop.f32.mrf.mxu0 }
 0x597   :  { %v4828_v13 = vadd.f32 %v4827_v5, %v4267_v16 }
 0x5b0   :  { %v6613_v37 = vpop.f32.mrf.mxu0 }
 0x5b2   :  { %v6614_v27 = vpop.f32.mrf.mxu0 }
 0x5b3   :  { %v6615_v40 = vadd.f32 %v6614_v27, %v6613_v37 }
 0x5b4   :  { %v6616_v38 = vpop.f32.mrf.mxu0 }
 0x5b5   :  { %v4908_v43 = vadd.f32 %v6615_v40, %v4271_v39  ;;  %v7774_v40 = vld [vmem:[#allocation17 + $0x38] sm:$0xff]  }
 0x5b6   :  { %v6617_v31 = vpop.f32.mrf.mxu0 }
 0x5b7   :  { %v6618_v41 = vadd.f32 %v6617_v31, %v6616_v38  ;;  %v7771_v31 = vld [vmem:[#allocation16 + $0x10] sm:$0xff]  }
 0x5b9   :  { %v4911_v45 = vadd.f32 %v6618_v41, %v4271_v39  ;;  %v7773_v39 = vld [vmem:[#allocation16] sm:$0xff]   ;;  %v7776_v41 = vld [vmem:[#allocation17 + $0x28] sm:$0xff]  }
 0x5d0   :  { %v4864_v4 = vpop.f32.mrf.mxu1 }
 0x5d1   :  { %v4865_v23 = vadd.f32 %v4864_v4, %v4822_v19  ;;  %v4965_v4 = vld [vmem:[#allocation20 + $0x5] ss:$8 sm:$0x3] }
 0x5d2   :  { %v4866_v18 = vpop.f32.mrf.mxu1 }
 0x5d3   :  { %v4867_v21 = vadd.f32 %v4866_v18, %v4824_v10  ;;  %v4955_v34 = vmax.f32 %v4865_v23, 0.0  ;;  %v5022_v18 = vrot.slane %v4965_v4, %v8244_v11  ;;  %v5018_v10 = vrot.slane %v4965_v4, %v8247_v12  ;;  %v7770_v12 = vld [vmem:[#allocation16 + $0x18] sm:$0xff]  }
 0x5d4   :  { %v4868_v20 = vpop.f32.mrf.mxu1 }
 0x5d5   :  { %v4869_v22 = vadd.f32 %v4868_v20, %v4826_v6  ;;  %v4956_v29 = vmax.f32 %v4867_v21, 0.0 }
 0x5d6   :  { %v4870_v25 = vpop.f32.mrf.mxu1 }
 0x5d7   :  { %v4871_v26 = vadd.f32 %v4870_v25, %v4828_v13  ;;  %v4958_v28 = vmax.f32 %v4869_v22, 0.0 }
 0x5d9   :  { %v4959_v32 = vmax.f32 %v4871_v26, 0.0  ;;  %v4961_v24 = vpack.c.bf16 %v4958_v28, %v4955_v34 }
 0x5db   :  { %v4962_v35 = vpack.c.bf16 %v4959_v32, %v4956_v29 }
 0x5dd   :  { %5297 = vmatprep.mubr.bf16.mxu0 %v4962_v35 }
 0x5de   :  { %5298 = vmatmul.mubr.bf16.vlgmr.msra.gmra.mxu0 %v4961_v24 }
 0x5df   :  { %6691 = vmatpush3.bf16.msra.mxu0 %v7766_v7  ;;  %6706 = vmatprep.mubr.msk.bf16.mxu0 %vm8098_vm0, %v8097_v8 }
 0x5e0   :  { %6692 = vmatprep.subr.bf16.mxu0 %v8097_v8 }
 0x5e3   :  { %6693 = vmatpush3.bf16.msra.mxu0 %v7767_v9 }
 0x5e4   :  { %6694 = vmatprep.subr.bf16.mxu0 %v8097_v8 }
 0x5e7   :  { %6695 = vmatpush3.bf16.msra.mxu0 %v7768_v14 }
 0x5e8   :  { %6696 = vmatprep.subr.bf16.mxu0 %v8097_v8 }
 0x5eb   :  { %6697 = vmatpush3.bf16.msra.mxu0 %v7769_v15 }
 0x5ec   :  { %6698 = vmatprep.subr.bf16.mxu0 %v8097_v8 }
 0x5ef   :  { %6699 = vmatpush3.bf16.msra.mxu0 %v7770_v12 }
 0x5f0   :  { %v6635_v30 = vpop.f32.mrf.mxu1  ;;  %6700 = vmatprep.subr.bf16.mxu0 %v8097_v8 }
 0x5f2   :  { %v6636_v33 = vpop.f32.mrf.mxu1 }
 0x5f3   :  { %v6637_v36 = vadd.f32 %v6636_v33, %v6635_v30  ;;  %6701 = vmatpush3.bf16.msra.mxu0 %v7771_v31  ;;  %v7772_v30 = vld [vmem:[#allocation16 + $0x8] sm:$0xff]   ;;  %v7775_v33 = vld [vmem:[#allocation17 + $0x30] sm:$0xff]  }
 0x5f4   :  { %v6638_v42 = vpop.f32.mrf.mxu1  ;;  %6702 = vmatprep.subr.bf16.mxu0 %v8097_v8 }
 0x5f5   :  { %v4949_v46 = vadd.f32 %v6637_v36, %v4908_v43  ;;  %v7777_v36 = vld [vmem:[#allocation17 + $0x20] sm:$0xff]  }
 0x5f6   :  { %v6639_v44 = vpop.f32.mrf.mxu1 }
 0x5f7   :  { %v6640_v47 = vadd.f32 %v6639_v44, %v6638_v42  ;;  %v4957_v49 = vmax.f32 %v4949_v46, 0.0  ;;  %6703 = vmatpush3.bf16.msra.mxu0 %v7772_v30  ;;  %v7778_v42 = vld [vmem:[#allocation17 + $0x18] sm:$0xff]   ;;  %v5357_v46 = vld [vmem:[#allocation20 + $0x6] ss:$0 sm:$0xff] }
 0x5f8   :  { %6704 = vmatprep.subr.bf16.mxu0 %v8097_v8 }
 0x5f9   :  { %v4952_v48 = vadd.f32 %v6640_v47, %v4911_v45 }
 0x5fb   :  { %v4960_v50 = vmax.f32 %v4952_v48, 0.0  ;;  %6705 = vmatpush3.bf16.msra.mxu0 %v7773_v39 }
 0x5fc   :  { %6730 = vmatprep.subr.bf16.mxu0 %v8097_v8 }
 0x5fd   :  { %v4963_v51 = vpack.c.bf16 %v4960_v50, %v4957_v49 }
 0x5ff   :  { %5341 = vmatmul.mubr.bf16.vlgmr.msra.gmra.mxu1 %v4963_v51 }
 0x600   :  { %6642 = vmatpush3.bf16.msra.mxu1 %v7751_v53 }
 0x601   :  { %6643 = vmatprep.subr.bf16.mxu1 %v7752_v54 }
 0x604   :  { %6644 = vmatpush3.bf16.msra.mxu1 %v7753_v59  ;;  %v7779_v59 = vld [vmem:[#allocation17 + $0x10] sm:$0xff]  }
 0x605   :  { %6645 = vmatprep.subr.bf16.mxu1 %v7754_v55  ;;  %v7780_v55 = vld [vmem:[#allocation17 + $0x8] sm:$0xff]  }
 0x608   :  { %6646 = vmatpush3.bf16.msra.mxu1 %v7755_v56  ;;  %v7781_v56 = vld [vmem:[#allocation17] sm:$0xff]  }
 0x609   :  { %6647 = vmatprep.subr.bf16.mxu1 %v7756_v57  ;;  %v7782_v57 = vld [vmem:[#allocation19 + $0x38] sm:$0xff]  }
 0x60c   :  { %6648 = vmatpush3.bf16.msra.mxu1 %v7757_v58  ;;  %v7783_v58 = vld [vmem:[#allocation19 + $0x30] sm:$0xff]  }
 0x60d   :  { %6649 = vmatprep.subr.bf16.mxu1 %v7758_v61  ;;  %v7784_v61 = vld [vmem:[#allocation19 + $0x28] sm:$0xff]  }
 0x610   :  { %6650 = vmatpush3.bf16.msra.mxu1 %v7759_v62  ;;  %v7785_v62 = vld [vmem:[#allocation19 + $0x20] sm:$0xff]  }
 0x611   :  { %6651 = vmatprep.subr.bf16.mxu1 %v7760_v63  ;;  %v7786_v63 = vld [vmem:[#allocation19 + $0x18] sm:$0xff]  }
 0x614   :  { %6652 = vmatpush3.bf16.msra.mxu1 %v7761_v0  ;;  %v5530_v0 = vld [vmem:[#allocation20 + $0x7] ss:$0 sm:$0xff] }
 0x615   :  { %6653 = vmatprep.subr.bf16.mxu1 %v7762_v60 }
 0x618   :  { %6654 = vmatpush3.bf16.msra.mxu1 %v7763_v2 }
 0x619   :  { %6655 = vmatprep.subr.bf16.mxu1 %v7764_v1 }
 0x61c   :  { %6656 = vmatpush3.bf16.msra.mxu1 %v7765_v3 }
 0x61d   :  { %6710 = vmatprep.subr.bf16.mxu1 %v8097_v8 }
 0x69e   :  { %v5299_v16 = vpop.f32.mrf.mxu0 }
 0x69f   :  { %v5300_v22 = vadd.f32 %v5299_v16, %v5018_v10 }
 0x6a0   :  { %v5301_v17 = vpop.f32.mrf.mxu0 }
 0x6a1   :  { %v5302_v13 = vadd.f32 %v5301_v17, %v5022_v18 }
 0x6a2   :  { %v5303_v5 = vpop.f32.mrf.mxu0 }
 0x6a3   :  { %v5304_v21 = vadd.f32 %v5303_v5, %v5018_v10  ;;  %v7787_v5 = vld [vmem:[#allocation19 + $0x10] sm:$0xff]   ;;  %v7789_v10 = vld [vmem:[#allocation19] sm:$0xff]  }
 0x6a4   :  { %v5305_v19 = vpop.f32.mrf.mxu0 }
 0x6a5   :  { %v5306_v25 = vadd.f32 %v5305_v19, %v5022_v18  ;;  %v7788_v18 = vld [vmem:[#allocation19 + $0x8] sm:$0xff]  }
 0x6bf   :  { %v5342_v6 = vpop.f32.mrf.mxu1 }
 0x6c0   :  { %v5343_v29 = vadd.f32 %v5342_v6, %v5300_v22  ;;  %v5641_v6 = vld [vmem:[#allocation20 + $0x20] ss:$0 sm:$0xff] }
 0x6c1   :  { %v5344_v20 = vpop.f32.mrf.mxu1 }
 0x6c2   :  { %v5345_v26 = vadd.f32 %v5344_v20, %v5302_v13  ;;  %v5351_v27 = vmax.f32 %v5343_v29, 0.0 }
 0x6c3   :  { %v5346_v23 = vpop.f32.mrf.mxu1 }
 0x6c4   :  { %v5347_v28 = vadd.f32 %v5346_v23, %v5304_v21  ;;  %v5352_v24 = vmax.f32 %v5345_v26, 0.0 }
 0x6c5   :  { %v5348_v32 = vpop.f32.mrf.mxu1 }
 0x6c6   :  { %v5349_v34 = vadd.f32 %v5348_v32, %v5306_v25  ;;  %v5353_v35 = vmax.f32 %v5347_v28, 0.0 }
 0x6c8   :  { %v5354_v37 = vmax.f32 %v5349_v34, 0.0  ;;  %v5355_v38 = vpack.c.bf16 %v5353_v35, %v5351_v27  ;;  %v5752_v34 = vld [vmem:[#allocation20 + $0x21] ss:$0 sm:$0xff] }
 0x6ca   :  { %v5356_v11 = vpack.c.bf16 %v5354_v37, %v5352_v24 }
 0x6cc   :  { %5518 = vmatprep.mubr.bf16.mxu1 %v5356_v11 }
 0x6cd   :  { %5519 = vmatmul.mubr.bf16.vlgmr.msra.gmra.mxu1 %v5355_v38 }
 0x6ce   :  { %6726 = vmatprep.mubr.msk.bf16.mxu1 %vm8098_vm0, %v8097_v8  ;;  %6711 = vmatpush3.bf16.msra.mxu1 %v7774_v40 }
 0x6cf   :  { %6712 = vmatprep.subr.bf16.mxu1 %v8097_v8 }
 0x6d2   :  { %6713 = vmatpush3.bf16.msra.mxu1 %v7775_v33 }
 0x6d3   :  { %6714 = vmatprep.subr.bf16.mxu1 %v8097_v8 }
 0x6d6   :  { %6715 = vmatpush3.bf16.msra.mxu1 %v7776_v41 }
 0x6d7   :  { %6716 = vmatprep.subr.bf16.mxu1 %v8097_v8 }
 0x6da   :  { %6717 = vmatpush3.bf16.msra.mxu1 %v7777_v36 }
 0x6db   :  { %6718 = vmatprep.subr.bf16.mxu1 %v8097_v8 }
 0x6de   :  { %6719 = vmatpush3.bf16.msra.mxu1 %v7778_v42 }
 0x6df   :  { %6720 = vmatprep.subr.bf16.mxu1 %v8097_v8 }
 0x6e2   :  { %6721 = vmatpush3.bf16.msra.mxu1 %v7779_v59 }
 0x6e3   :  { %6722 = vmatprep.subr.bf16.mxu1 %v8097_v8 }
 0x6e6   :  { %6723 = vmatpush3.bf16.msra.mxu1 %v7780_v55 }
 0x6e7   :  { %6724 = vmatprep.subr.bf16.mxu1 %v8097_v8 }
 0x6ea   :  { %6725 = vmatpush3.bf16.msra.mxu1 %v7781_v56 }
 0x78d   :  { %v6657_v43 = vpop.f32.mrf.mxu1 }
 0x78f   :  { %v6658_v44 = vpop.f32.mrf.mxu1 }
 0x790   :  { %v6659_v45 = vadd.f32 %v6658_v44, %v6657_v43 }
 0x791   :  { %v6660_v47 = vpop.f32.mrf.mxu1 }
 0x792   :  { %v5521_v49 = vadd.f32 %v6659_v45, %v5357_v46 }
 0x793   :  { %v6661_v48 = vpop.f32.mrf.mxu1 }
 0x794   :  { %v6662_v50 = vadd.f32 %v6661_v48, %v6660_v47  ;;  %v5527_v52 = vmax.f32 %v5521_v49, 0.0 }
 0x796   :  { %v5524_v51 = vadd.f32 %v6662_v50, %v5357_v46 }
 0x798   :  { %v5528_v53 = vmax.f32 %v5524_v51, 0.0 }
 0x79a   :  { %v5529_v54 = vpack.c.bf16 %v5528_v53, %v5527_v52 }
 0x79c   :  { %6707 = vmatmul.mubr.bf16.vlgmr.msra.gmra.mxu0 %v5529_v54 }
 0x79d   :  { %6746 = vmatprep.mubr.msk.bf16.mxu0 %vm8098_vm0, %v8097_v8  ;;  %6731 = vmatpush3.bf16.msra.mxu0 %v7782_v57 }
 0x79e   :  { %6732 = vmatprep.subr.bf16.mxu0 %v8097_v8 }
 0x7a1   :  { %6733 = vmatpush3.bf16.msra.mxu0 %v7783_v58 }
 0x7a2   :  { %6734 = vmatprep.subr.bf16.mxu0 %v8097_v8 }
 0x7a5   :  { %6735 = vmatpush3.bf16.msra.mxu0 %v7784_v61 }
 0x7a6   :  { %6736 = vmatprep.subr.bf16.mxu0 %v8097_v8 }
 0x7a9   :  { %6737 = vmatpush3.bf16.msra.mxu0 %v7785_v62 }
 0x7aa   :  { %6738 = vmatprep.subr.bf16.mxu0 %v8097_v8 }
 0x7ad   :  { %6739 = vmatpush3.bf16.msra.mxu0 %v7786_v63 }
 0x7ae   :  { %6740 = vmatprep.subr.bf16.mxu0 %v8097_v8 }
 0x7b1   :  { %6741 = vmatpush3.bf16.msra.mxu0 %v7787_v5 }
 0x7b2   :  { %6742 = vmatprep.subr.bf16.mxu0 %v8097_v8 }
 0x7b5   :  { %6743 = vmatpush3.bf16.msra.mxu0 %v7788_v18 }
 0x7b6   :  { %6744 = vmatprep.subr.bf16.mxu0 %v8097_v8 }
 0x7b9   :  { %6745 = vmatpush3.bf16.msra.mxu0 %v7789_v10 }
 0x85c   :  { %v5629_v60 = vpop.f32.mrf.mxu0 }
 0x85d   :  { %v5630_v2 = vadd.f32 %v5629_v60, %v5530_v0 }
 0x85e   :  { %v6708_v1 = vpop.f32.mrf.mxu0 }
 0x85f   :  { %v5636_v7 = vmax.f32 %v5630_v2, 0.0 }
 0x860   :  { %v5632_v3 = vpop.f32.mrf.mxu0 }
 0x861   :  { %v5633_v9 = vadd.f32 %v5632_v3, %v5530_v0  ;;  %v5638_v16 = vmin.f32 %v5636_v7, 6.0 }
 0x862   :  { %v6709_v14 = vpop.f32.mrf.mxu0 }
 0x863   :  { %v5637_v15 = vmax.f32 %v5633_v9, 0.0 }
 0x865   :  { %v5639_v17 = vmin.f32 %v5637_v15, 6.0 }
 0x867   :  { %v5640_v4 = vpack.c.bf16 %v5639_v17, %v5638_v16 }
 0x869   :  { %6727 = vmatmul.mubr.bf16.vlgmr.msra.gmra.mxu1 %v5640_v4 }
 0x929   :  { %v5740_v19 = vpop.f32.mrf.mxu1 }
 0x92a   :  { %v5741_v20 = vadd.f32 %v5740_v19, %v5641_v6 }
 0x92b   :  { %v6728_v13 = vpop.f32.mrf.mxu1 }
 0x92c   :  { %v5747_v22 = vmax.f32 %v5741_v20, 0.0 }
 0x92d   :  { %v5743_v21 = vpop.f32.mrf.mxu1 }
 0x92e   :  { %v5744_v23 = vadd.f32 %v5743_v21, %v5641_v6  ;;  %v5749_v28 = vmin.f32 %v5747_v22, 6.0 }
 0x92f   :  { %v6729_v25 = vpop.f32.mrf.mxu1 }
 0x930   :  { %v5748_v26 = vmax.f32 %v5744_v23, 0.0 }
 0x932   :  { %v5750_v29 = vmin.f32 %v5748_v26, 6.0 }
 0x934   :  { %v5751_v32 = vpack.c.bf16 %v5750_v29, %v5749_v28 }
 0x936   :  { %6747 = vmatmul.mubr.bf16.vlgmr.msra.gmra.mxu0 %v5751_v32 }
 0x9f6   :  { %v5851_v35 = vpop.f32.mrf.mxu0 }
 0x9f7   :  { %v5852_v24 = vadd.f32 %v5851_v35, %v5752_v34 }
 0x9f8   :  { %v6748_v37 = vpop.f32.mrf.mxu0 }
 0x9f9   :  { %v6595_v8 = vmul.f32 -1.442695, %v5852_v24 }
 0x9fa   :  { %v5854_v27 = vpop.f32.mrf.mxu0 }
 0x9fb   :  { %7790 = vpow2.f32 %v6595_v8  ;;  %v5855_v11 = vadd.f32 %v5854_v27, %v5752_v34 }
 0x9fc   :  { %v6749_v38 = vpop.f32.mrf.mxu0 }
 0x9fd   :  { %v6596_v12 = vmul.f32 -1.442695, %v5855_v11 }
 0x9ff   :  { %7792 = vpow2.f32 %v6596_v12 }
 0xa08   :  { %v7791_v31 = vpop.eup %7790 }
 0xa09   :  { %v5864_v30 = vadd.f32 1.0, %v7791_v31 }
 0xa0b   :  { %7794 = vrcp.f32 %v5864_v30 }
 0xa0c   :  { %v7793_v39 = vpop.eup %7792 }
 0xa0d   :  { %v5865_v40 = vadd.f32 1.0, %v7793_v39 }
 0xa0f   :  { %7796 = vrcp.f32 %v5865_v40 }
 0xa18   :  { %v7795_v33 = vpop.eup %7794 }
 0xa19   :  { %5870 = vst [vmem:[#allocation22] sm:$0xff] %v7795_v33 }
 0xa1c   :  { %v7797_v41 = vpop.eup %7796 }
 0xa1d   :  { %5871 = vst [vmem:[#allocation22 + $0x8] sm:$0xff] %v7797_v41 }
 0xa1e   :  { %8049 = shalt.err (!%p8046_p8)
}
 0xa1f   :  { %5883 = dma.vmem_to_hbm [thread:$0]  %s5878_s11, 256, %s8364_s12, [#allocation4], %s8089_s2, %s8089_s2, %s8090_s13  }
 0xa20   :  { %8072 = dma.done.wait [#allocation4], 256  }
 0xa21   :  { %8073 = vsyncadd [#allocation4], 4294967040 }
 0xa22   :  { %5887 = vsyncpa [#allocation3], 1 }
 0xa23   :  { %5888 = vsyncpa [#allocation6], 1 }
 0xa24   :  { %5889 = vsyncpa [#allocation9], 1 }
 0xa25   :  { %5890 = vsyncpa [#allocation12], 1 }
 0xa26   :  { %5891 = vsyncpa [#allocation15], 1 }
 0xa27   :  { %5892 = vsyncpa [#allocation18], 1 }
 0xa28   :  { %5893 = vsyncpa [#allocation21], 1 }
 0xa29   :  { %5894 = vsyncpa [#allocation4], 1 }

</bundles_post_ra>
